<compile_context>
chip_gen: v7x
topology: tpu7x:2x2x1
jax: 0.10.0
libtpu: 0.0.40
codegen_flags: <defaults>
</compile_context>

<pallas_src>
import numpy as np
import jax
import jax.numpy as jnp
from jax import lax
from jax.experimental import pallas as pl
from jax.experimental.pallas import tpu as pltpu

EPS = 1e-5      # nn.BatchNorm2d default eps
CPAD = 128      # zero-pad channels to one full vreg lane width


# ------------------------------ Pallas kernel ------------------------------- #

def _up_doubleconv_kernel(x1_ref, x2_ref, u_ref, w1_ref, w2_ref, bn_ref,
                          o_ref, xcat_ref, y_ref):
    """Fused Up.forward (bilinear=True) on one VMEM-resident working set.

    Shapes (C = CPAD = 128 zero-padded channels, lane dim):
      x1_ref  : (N, H1*W1, C) f32  x1 channels pre-placed at [C2, C2+C1)
      x2_ref  : (N, H*W,   C) f32  x2 channels pre-placed at [0, C2)
      u_ref   : (H*W, H1*W1)  f32  kron(Mh, Mw) bilinear-upsample + F.pad operator
      w1_ref  : (9, C, C)     bf16 conv1 taps (k = ky*3+kx, Cin, Cout), zero-padded
      w2_ref  : (9, C, C)     bf16 conv2 taps
      bn_ref  : (4, C)        f32  rows: gamma1, beta1, gamma2, beta2 (zero-padded)
      o_ref   : (N, H*W, C)   f32  lane-dense output (real channels at [0, Cout))
      xcat_ref: (N, H+2, W+2, C) f32 scratch with 1-px zero halo ('same' conv)
      y_ref   : (N, H*W, C)   f32  scratch conv accumulator
    """
    N, HW, C = y_ref.shape
    H = xcat_ref.shape[1] - 2
    W = xcat_ref.shape[2] - 2
    inv_cnt = 1.0 / (N * HW)

    # --- bilinear upsample (single kron matmul) + channel concat (add of
    #     disjoint channel placements) + 1-px zero spatial halo, into scratch ---
    xcat_ref[...] = jnp.zeros_like(xcat_ref)
    for n in range(N):
        up = jnp.dot(u_ref[...], x1_ref[n], preferred_element_type=jnp.float32)
        xcat_ref[n, 1:H + 1, 1:W + 1, :] = (x2_ref[n] + up).reshape(H, W, C)

    def conv3x3(w_ref):
        # 9 accumulated lane-dense (HW, 128) x (128, 128) matmuls per batch
        # element; bf16 MXU operands, f32 accumulation directly in VMEM scratch.
        # Conv bias intentionally omitted (cancelled exactly by training-mode BN).
        for n in range(N):
            for k in range(9):
                dy, dx = divmod(k, 3)
                patch = xcat_ref[n, dy:dy + H, dx:dx + W, :].reshape(HW, C)
                contrib = jnp.dot(patch.astype(jnp.bfloat16), w_ref[k],
                                  preferred_element_type=jnp.float32)
                if k == 0:
                    y_ref[n] = contrib
                else:
                    y_ref[n] = y_ref[n] + contrib

    def bn_relu(gamma_row, beta_row):
        # Training-mode BatchNorm2d statistics (biased variance) over (N, H, W),
        # fused with the normalize + ReLU elementwise pass (no HBM round trip).
        y = y_ref[...].reshape(N * HW, C)
        mean = jnp.sum(y, axis=0, keepdims=True) * inv_cnt            # (1, C)
        ctr = y - mean
        var = jnp.sum(ctr * ctr, axis=0, keepdims=True) * inv_cnt     # (1, C)
        scale = gamma_row * lax.rsqrt(var + EPS)
        return jnp.maximum(ctr * scale + beta_row, 0.0)               # (N*HW, C)

    # conv1 -> BN1 -> ReLU, written back into the zero-haloed scratch for conv2.
    conv3x3(w1_ref)
    a1 = bn_relu(bn_ref[0:1, :], bn_ref[1:2, :])
    for n in range(N):
        xcat_ref[n, 1:H + 1, 1:W + 1, :] = a1[n * HW:(n + 1) * HW].reshape(H, W, C)

    # conv2 -> BN2 -> ReLU -> lane-dense store (128-wide minor dim, unmasked vst).
    conv3x3(w2_ref)
    out = bn_relu(bn_ref[2:3, :], bn_ref[3:4, :])
    o_ref[...] = out.reshape(N, HW, C).astype(o_ref.dtype)


# ------------------------------ pallas_call wrapper -------------------------- #

def _fused_up_double_conv(x1p, x2p, u, w1, w2, bn, H, W):
    N, HW, C = x2p.shape
    return pl.pallas_call(
        _up_doubleconv_kernel,
        out_shape=jax.ShapeDtypeStruct((N, HW, C), jnp.float32),
        grid=(1,),     # whole batch in one step: BN needs cross-batch stats and
                       # the full working set (<1 MB) is VMEM-resident everywhere.
        in_specs=[
            pl.BlockSpec(x1p.shape, lambda i: (0, 0, 0)),
            pl.BlockSpec(x2p.shape, lambda i: (0, 0, 0)),
            pl.BlockSpec(u.shape, lambda i: (0, 0)),
            pl.BlockSpec(w1.shape, lambda i: (0, 0, 0)),
            pl.BlockSpec(w2.shape, lambda i: (0, 0, 0)),
            pl.BlockSpec(bn.shape, lambda i: (0, 0)),
        ],
        out_specs=pl.BlockSpec((N, HW, C), lambda i: (0, 0, 0)),
        scratch_shapes=[
            pltpu.VMEM((N, H + 2, W + 2, C), jnp.float32),   # padded concat/act buffer
            pltpu.VMEM((N, HW, C), jnp.float32),             # f32 conv accumulator
        ],
        compiler_params=pltpu.CompilerParams(dimension_semantics=("arbitrary",)),
    )(x1p, x2p, u, w1, w2, bn)


# ------------------------------- param / input prep -------------------------- #

def _bilinear_matrix(n_in, n_out):
    """nn.Upsample(scale_factor=2, mode='bilinear', align_corners=True): out = M @ in."""
    M = np.zeros((n_out, n_in), dtype=np.float32)
    if n_in == 1 or n_out == 1:
        M[:, 0] = 1.0
        return M
    for i in range(n_out):
        src = i * (n_in - 1) / (n_out - 1)
        i0 = int(np.floor(src))
        i1 = min(i0 + 1, n_in - 1)
        w = src - i0
        M[i, i0] += 1.0 - w
        M[i, i1] += w
    return M


def _upsample_pad_operator(h1, w1, h2, w2):
    """(H2*W2, H1*W1) operator: bilinear x2 upsample (align_corners=True) followed
    by F.pad to (h2, w2), folded into one matrix via a Kronecker product."""
    mh = _bilinear_matrix(h1, 2 * h1)
    mw = _bilinear_matrix(w1, 2 * w1)
    dY, dX = h2 - 2 * h1, w2 - 2 * w1
    assert dY >= 0 and dX >= 0
    Mh = np.zeros((h2, h1), np.float32)
    Mh[dY // 2: dY // 2 + 2 * h1, :] = mh
    Mw = np.zeros((w2, w1), np.float32)
    Mw[dX // 2: dX // 2 + 2 * w1, :] = mw
    return np.kron(Mh, Mw)


def _prep_conv_weight(w_oihw):
    """torch (Cout, Cin, 3, 3) -> (9, CPAD, CPAD) bf16, zero-padded, k = ky*3+kx."""
    cout, cin = w_oihw.shape[0], w_oihw.shape[1]
    w9 = jnp.transpose(w_oihw, (2, 3, 1, 0)).reshape(9, cin, cout)
    wp = jnp.zeros((9, CPAD, CPAD), jnp.float32).at[:, :cin, :cout].set(w9)
    return wp.astype(jnp.bfloat16)


def _prep_bn_params(g1, b1, g2, b2):
    c = g1.shape[0]
    bn = jnp.zeros((4, CPAD), jnp.float32)
    return bn.at[0, :c].set(g1).at[1, :c].set(b1).at[2, :c].set(g2).at[3, :c].set(b2)


def _place_channels(x_nchw, c_off):
    """NCHW -> (N, H*W, CPAD) f32 with the real channels placed at [c_off, c_off+C)."""
    n, c, h, w = x_nchw.shape
    x = jnp.transpose(x_nchw, (0, 2, 3, 1)).reshape(n, h * w, c)
    return jnp.zeros((n, h * w, CPAD), jnp.float32).at[:, :, c_off:c_off + c].set(x)


# --------------------------------- Up.forward -------------------------------- #

@jax.jit
def up_forward(x1_nchw, x2_nchw, w1_oihw, w2_oihw, gamma1, beta1, gamma2, beta2):
    """Equivalent of Up(bilinear=True).forward(x1, x2); NCHW in / NCHW out.
    Conv biases are not taken: training-mode BatchNorm cancels them exactly."""
    N, C1, H1, W1 = x1_nchw.shape
    _, C2, H2, W2 = x2_nchw.shape
    Cout = w1_oihw.shape[0]
    assert w1_oihw.shape[1] == C1 + C2 and C1 + C2 <= CPAD and Cout <= CPAD

    u = jnp.asarray(_upsample_pad_operator(H1, W1, H2, W2))     # (H2*W2, H1*W1)
    # torch.cat([x2, x1_up], dim=1)  ==  disjoint channel placements + in-kernel add.
    x1p = _place_channels(x1_nchw, C2)
    x2p = _place_channels(x2_nchw, 0)
    w1 = _prep_conv_weight(w1_oihw)
    w2 = _prep_conv_weight(w2_oihw)
    bn = _prep_bn_params(gamma1, beta1, gamma2, beta2)

    y = _fused_up_double_conv(x1p, x2p, u, w1, w2, bn, H2, W2)  # (N, H2*W2, 128)
    y = y[:, :, :Cout].reshape(N, H2, W2, Cout)
    # TODO(synk): NCHW<->NHWC boundary transposes + 128-channel placement stay as
    # XLA glue because the external (PyTorch) contract is NCHW.
    return jnp.transpose(y, (0, 3, 1, 2))


# ------------------------------- pure-JAX reference -------------------------- #

def _double_conv_ref(x_nhwc, blocks):
    y = x_nhwc
    for (w_hwio, b, gamma, beta) in blocks:
        y = lax.conv_general_dilated(
            y, w_hwio, window_strides=(1, 1), padding=((1, 1), (1, 1)),
            dimension_numbers=('NHWC', 'HWIO', 'NHWC'),
            precision=lax.Precision.HIGHEST) + b
        mean = jnp.mean(y, axis=(0, 1, 2))
        var = jnp.mean((y - mean) ** 2, axis=(0, 1, 2))
        y = gamma * (y - mean) / jnp.sqrt(var + EPS) + beta
        y = jnp.maximum(y, 0.0)
    return y


# ------------------------------------ main ----------------------------------- #

if __name__ == "__main__":
    key = jax.random.PRNGKey(0)
    k_x1, k_x2, kw1, kb1, kw2, kb2 = jax.random.split(key, 6)

    # x1 = coarse feature map, x2 = skip connection (as in Up.forward(x1, x2)).
    N, C1, C2 = 2, 4, 4
    in_ch = C1 + C2          # channels after concat (DoubleConv in_channels)
    out_ch = 8
    H1 = W1 = 8
    x1 = jax.random.normal(k_x1, (N, C1, H1, W1), jnp.float32)        # NCHW
    x2 = jax.random.normal(k_x2, (N, C2, 2 * H1, 2 * W1), jnp.float32)

    w1 = 0.1 * jax.random.normal(kw1, (out_ch, in_ch, 3, 3), jnp.float32)   # torch OIHW
    b1 = 0.1 * jax.random.normal(kb1, (out_ch,), jnp.float32)
    w2 = 0.1 * jax.random.normal(kw2, (out_ch, out_ch, 3, 3), jnp.float32)
    b2 = 0.1 * jax.random.normal(kb2, (out_ch,), jnp.float32)
    g1 = jnp.ones((out_ch,), jnp.float32); be1 = jnp.zeros((out_ch,), jnp.float32)
    g2 = jnp.ones((out_ch,), jnp.float32); be2 = jnp.zeros((out_ch,), jnp.float32)

    out = up_forward(x1, x2, w1, w2, g1, be1, g2, be2)
    out = jax.block_until_ready(out)
    assert out.shape == (N, out_ch, 2 * H1, 2 * W1), out.shape

    # f32 reference (same upsample/pad/concat semantics, WITH conv biases — they
    # cancel exactly under training-mode BN, validating the dropped-bias kernel).
    Mh = jnp.asarray(_bilinear_matrix(H1, 2 * H1))
    Mw = jnp.asarray(_bilinear_matrix(W1, 2 * W1))
    x1u = jnp.einsum('ih,jw,nchw->ncij', Mh, Mw, x1)
    x_cat = jnp.concatenate([x2, x1u], axis=1)
    w1_hwio = jnp.transpose(w1, (2, 3, 1, 0))
    w2_hwio = jnp.transpose(w2, (2, 3, 1, 0))
    ref = _double_conv_ref(jnp.transpose(x_cat, (0, 2, 3, 1)),
                           [(w1_hwio, b1, g1, be1), (w2_hwio, b2, g2, be2)])
    ref = jnp.transpose(ref, (0, 3, 1, 2))

    # Tolerance reflects bf16 MXU operands (f32 accumulation) per perf feedback.
    np.testing.assert_allclose(np.asarray(out), np.asarray(ref), rtol=2e-2, atol=3e-2)

    print("KERNEL_OK")
</pallas_src>

<mosaic_0001>
module attributes {stable_mosaic.version = 11 : i64} {
  func.func @_up_doubleconv_kernel(%arg0: i32, %arg1: memref<2x64x128xf32, #tpu.memory_space<vmem>>, %arg2: memref<2x256x128xf32, #tpu.memory_space<vmem>>, %arg3: memref<256x64xf32, #tpu.memory_space<vmem>>, %arg4: memref<9x128x128xbf16, #tpu.memory_space<vmem>>, %arg5: memref<9x128x128xbf16, #tpu.memory_space<vmem>>, %arg6: memref<4x128xf32, #tpu.memory_space<vmem>>, %arg7: memref<2x256x128xf32, #tpu.memory_space<vmem>>, %arg8: memref<2x18x18x128xf32, #tpu.memory_space<vmem>>, %arg9: memref<2x256x128xf32, #tpu.memory_space<vmem>>) attributes {dimension_semantics = [#tpu.dimension_semantics<arbitrary>], iteration_bounds = array<i64: 1>, scalar_prefetch = 0 : i64, scratch_operands = 2 : i64, tpu.core_type = #tpu.core_type<tc>, window_params = [{pipeline_mode = #tpu.pipeline_mode<synchronous>, transform_indices = @transform_0, window_bounds = array<i64: 2, 64, 128>}, {pipeline_mode = #tpu.pipeline_mode<synchronous>, transform_indices = @transform_1, window_bounds = array<i64: 2, 256, 128>}, {pipeline_mode = #tpu.pipeline_mode<synchronous>, transform_indices = @transform_2, window_bounds = array<i64: 256, 64>}, {pipeline_mode = #tpu.pipeline_mode<synchronous>, transform_indices = @transform_3, window_bounds = array<i64: 9, 128, 128>}, {pipeline_mode = #tpu.pipeline_mode<synchronous>, transform_indices = @transform_4, window_bounds = array<i64: 9, 128, 128>}, {pipeline_mode = #tpu.pipeline_mode<synchronous>, transform_indices = @transform_5, window_bounds = array<i64: 4, 128>}, {pipeline_mode = #tpu.pipeline_mode<synchronous>, transform_indices = @transform_6, window_bounds = array<i64: 2, 256, 128>}]} {
    %cst = arith.constant 0.000000e+00 : f32
    %0 = vector.broadcast %cst : f32 to vector<2x18x18x128xf32>
    %c0 = arith.constant 0 : index
    %c0_0 = arith.constant 0 : index
    %c0_1 = arith.constant 0 : index
    %c0_2 = arith.constant 0 : index
    %1 = vector.load %arg8[%c0, %c0_0, %c0_1, %c0_2] : memref<2x18x18x128xf32, #tpu.memory_space<vmem>>, vector<2x18x18x128xf32>
    tpu.vector_store %arg8[%c0, %c0_0, %c0_1, %c0_2], %0 {strides = array<i32>} : memref<2x18x18x128xf32, #tpu.memory_space<vmem>>, vector<2x18x18x128xf32>,
    %c0_3 = arith.constant 0 : index
    %c0_4 = arith.constant 0 : index
    %2 = vector.load %arg3[%c0_3, %c0_4] : memref<256x64xf32, #tpu.memory_space<vmem>>, vector<256x64xf32>
    %c0_5 = arith.constant 0 : index
    %c0_6 = arith.constant 0 : index
    %c0_7 = arith.constant 0 : index
    %3 = vector.load %arg1[%c0_5, %c0_6, %c0_7] : memref<2x64x128xf32, #tpu.memory_space<vmem>>, vector<1x64x128xf32>
    %4 = vector.shape_cast %3 : vector<1x64x128xf32> to vector<64x128xf32>
    %cst_8 = arith.constant dense<0.000000e+00> : vector<256x128xf32>
    %5 = tpu.matmul %2, %4, %cst_8 {dimension_numbers = #tpu.dot_dimension_numbers<[1], [0], [0], [1], [0, 0, 1, 1], [], []>} : vector<256x64xf32>, vector<64x128xf32>, vector<256x128xf32> -> vector<256x128xf32>
    %c0_9 = arith.constant 0 : index
    %c0_10 = arith.constant 0 : index
    %c0_11 = arith.constant 0 : index
    %6 = vector.load %arg2[%c0_9, %c0_10, %c0_11] : memref<2x256x128xf32, #tpu.memory_space<vmem>>, vector<1x256x128xf32>
    %7 = vector.shape_cast %6 : vector<1x256x128xf32> to vector<256x128xf32>
    %8 = arith.addf %7, %5 : vector<256x128xf32>
    %9 = vector.shape_cast %8 : vector<256x128xf32> to vector<16x16x128xf32>
    %c0_12 = arith.constant 0 : index
    %c1 = arith.constant 1 : index
    %c1_13 = arith.constant 1 : index
    %c0_14 = arith.constant 0 : index
    %10 = vector.load %arg8[%c0_12, %c1, %c1_13, %c0_14] : memref<2x18x18x128xf32, #tpu.memory_space<vmem>>, vector<1x16x16x128xf32>
    %11 = vector.shape_cast %10 : vector<1x16x16x128xf32> to vector<16x16x128xf32>
    %12 = vector.shape_cast %9 : vector<16x16x128xf32> to vector<1x16x16x128xf32>
    tpu.vector_store %arg8[%c0_12, %c1, %c1_13, %c0_14], %12 {strides = array<i32>} : memref<2x18x18x128xf32, #tpu.memory_space<vmem>>, vector<1x16x16x128xf32>,
    %c0_15 = arith.constant 0 : index
    %c0_16 = arith.constant 0 : index
    %13 = vector.load %arg3[%c0_15, %c0_16] : memref<256x64xf32, #tpu.memory_space<vmem>>, vector<256x64xf32>
    %c1_17 = arith.constant 1 : index
    %c0_18 = arith.constant 0 : index
    %c0_19 = arith.constant 0 : index
    %14 = vector.load %arg1[%c1_17, %c0_18, %c0_19] : memref<2x64x128xf32, #tpu.memory_space<vmem>>, vector<1x64x128xf32>
    %15 = vector.shape_cast %14 : vector<1x64x128xf32> to vector<64x128xf32>
    %cst_20 = arith.constant dense<0.000000e+00> : vector<256x128xf32>
    %16 = tpu.matmul %13, %15, %cst_20 {dimension_numbers = #tpu.dot_dimension_numbers<[1], [0], [0], [1], [0, 0, 1, 1], [], []>} : vector<256x64xf32>, vector<64x128xf32>, vector<256x128xf32> -> vector<256x128xf32>
    %c1_21 = arith.constant 1 : index
    %c0_22 = arith.constant 0 : index
    %c0_23 = arith.constant 0 : index
    %17 = vector.load %arg2[%c1_21, %c0_22, %c0_23] : memref<2x256x128xf32, #tpu.memory_space<vmem>>, vector<1x256x128xf32>
    %18 = vector.shape_cast %17 : vector<1x256x128xf32> to vector<256x128xf32>
    %19 = arith.addf %18, %16 : vector<256x128xf32>
    %20 = vector.shape_cast %19 : vector<256x128xf32> to vector<16x16x128xf32>
    %c1_24 = arith.constant 1 : index
    %c1_25 = arith.constant 1 : index
    %c1_26 = arith.constant 1 : index
    %c0_27 = arith.constant 0 : index
    %21 = vector.load %arg8[%c1_24, %c1_25, %c1_26, %c0_27] : memref<2x18x18x128xf32, #tpu.memory_space<vmem>>, vector<1x16x16x128xf32>
    %22 = vector.shape_cast %21 : vector<1x16x16x128xf32> to vector<16x16x128xf32>
    %23 = vector.shape_cast %20 : vector<16x16x128xf32> to vector<1x16x16x128xf32>
    tpu.vector_store %arg8[%c1_24, %c1_25, %c1_26, %c0_27], %23 {strides = array<i32>} : memref<2x18x18x128xf32, #tpu.memory_space<vmem>>, vector<1x16x16x128xf32>,
    %c0_28 = arith.constant 0 : index
    %c0_29 = arith.constant 0 : index
    %c0_30 = arith.constant 0 : index
    %c0_31 = arith.constant 0 : index
    %24 = vector.load %arg8[%c0_28, %c0_29, %c0_30, %c0_31] : memref<2x18x18x128xf32, #tpu.memory_space<vmem>>, vector<1x16x16x128xf32>
    %25 = vector.shape_cast %24 : vector<1x16x16x128xf32> to vector<16x16x128xf32>
    %26 = vector.shape_cast %25 : vector<16x16x128xf32> to vector<256x128xf32>
    %27 = arith.truncf %26 : vector<256x128xf32> to vector<256x128xbf16>
    %c0_32 = arith.constant 0 : index
    %c0_33 = arith.constant 0 : index
    %c0_34 = arith.constant 0 : index
    %28 = vector.load %arg4[%c0_32, %c0_33, %c0_34] : memref<9x128x128xbf16, #tpu.memory_space<vmem>>, vector<1x128x128xbf16>
    %29 = vector.shape_cast %28 : vector<1x128x128xbf16> to vector<128x128xbf16>
    %cst_35 = arith.constant dense<0.000000e+00> : vector<256x128xf32>
    %30 = tpu.matmul %27, %29, %cst_35 {dimension_numbers = #tpu.dot_dimension_numbers<[1], [0], [0], [1], [0, 0, 1, 1], [], []>} : vector<256x128xbf16>, vector<128x128xbf16>, vector<256x128xf32> -> vector<256x128xf32>
    %c0_36 = arith.constant 0 : index
    %c0_37 = arith.constant 0 : index
    %c0_38 = arith.constant 0 : index
    %31 = vector.load %arg9[%c0_36, %c0_37, %c0_38] : memref<2x256x128xf32, #tpu.memory_space<vmem>>, vector<1x256x128xf32>
    %32 = vector.shape_cast %31 : vector<1x256x128xf32> to vector<256x128xf32>
    %33 = vector.shape_cast %30 : vector<256x128xf32> to vector<1x256x128xf32>
    tpu.vector_store %arg9[%c0_36, %c0_37, %c0_38], %33 {strides = array<i32>} : memref<2x256x128xf32, #tpu.memory_space<vmem>>, vector<1x256x128xf32>,
    %c0_39 = arith.constant 0 : index
    %c0_40 = arith.constant 0 : index
    %c1_41 = arith.constant 1 : index
    %c0_42 = arith.constant 0 : index
    %34 = vector.load %arg8[%c0_39, %c0_40, %c1_41, %c0_42] : memref<2x18x18x128xf32, #tpu.memory_space<vmem>>, vector<1x16x16x128xf32>
    %35 = vector.shape_cast %34 : vector<1x16x16x128xf32> to vector<16x16x128xf32>
    %36 = vector.shape_cast %35 : vector<16x16x128xf32> to vector<256x128xf32>
    %37 = arith.truncf %36 : vector<256x128xf32> to vector<256x128xbf16>
    %c1_43 = arith.constant 1 : index
    %c0_44 = arith.constant 0 : index
    %c0_45 = arith.constant 0 : index
    %38 = vector.load %arg4[%c1_43, %c0_44, %c0_45] : memref<9x128x128xbf16, #tpu.memory_space<vmem>>, vector<1x128x128xbf16>
    %39 = vector.shape_cast %38 : vector<1x128x128xbf16> to vector<128x128xbf16>
    %cst_46 = arith.constant dense<0.000000e+00> : vector<256x128xf32>
    %40 = tpu.matmul %37, %39, %cst_46 {dimension_numbers = #tpu.dot_dimension_numbers<[1], [0], [0], [1], [0, 0, 1, 1], [], []>} : vector<256x128xbf16>, vector<128x128xbf16>, vector<256x128xf32> -> vector<256x128xf32>
    %c0_47 = arith.constant 0 : index
    %c0_48 = arith.constant 0 : index
    %c0_49 = arith.constant 0 : index
    %41 = vector.load %arg9[%c0_47, %c0_48, %c0_49] : memref<2x256x128xf32, #tpu.memory_space<vmem>>, vector<1x256x128xf32>
    %42 = vector.shape_cast %41 : vector<1x256x128xf32> to vector<256x128xf32>
    %43 = arith.addf %42, %40 : vector<256x128xf32>
    %c0_50 = arith.constant 0 : index
    %c0_51 = arith.constant 0 : index
    %c0_52 = arith.constant 0 : index
    %44 = vector.load %arg9[%c0_50, %c0_51, %c0_52] : memref<2x256x128xf32, #tpu.memory_space<vmem>>, vector<1x256x128xf32>
    %45 = vector.shape_cast %44 : vector<1x256x128xf32> to vector<256x128xf32>
    %46 = vector.shape_cast %43 : vector<256x128xf32> to vector<1x256x128xf32>
    tpu.vector_store %arg9[%c0_50, %c0_51, %c0_52], %46 {strides = array<i32>} : memref<2x256x128xf32, #tpu.memory_space<vmem>>, vector<1x256x128xf32>,
    %c0_53 = arith.constant 0 : index
    %c0_54 = arith.constant 0 : index
    %c2 = arith.constant 2 : index
    %c0_55 = arith.constant 0 : index
    %47 = vector.load %arg8[%c0_53, %c0_54, %c2, %c0_55] : memref<2x18x18x128xf32, #tpu.memory_space<vmem>>, vector<1x16x16x128xf32>
    %48 = vector.shape_cast %47 : vector<1x16x16x128xf32> to vector<16x16x128xf32>
    %49 = vector.shape_cast %48 : vector<16x16x128xf32> to vector<256x128xf32>
    %50 = arith.truncf %49 : vector<256x128xf32> to vector<256x128xbf16>
    %c2_56 = arith.constant 2 : index
    %c0_57 = arith.constant 0 : index
    %c0_58 = arith.constant 0 : index
    %51 = vector.load %arg4[%c2_56, %c0_57, %c0_58] : memref<9x128x128xbf16, #tpu.memory_space<vmem>>, vector<1x128x128xbf16>
    %52 = vector.shape_cast %51 : vector<1x128x128xbf16> to vector<128x128xbf16>
    %cst_59 = arith.constant dense<0.000000e+00> : vector<256x128xf32>
    %53 = tpu.matmul %50, %52, %cst_59 {dimension_numbers = #tpu.dot_dimension_numbers<[1], [0], [0], [1], [0, 0, 1, 1], [], []>} : vector<256x128xbf16>, vector<128x128xbf16>, vector<256x128xf32> -> vector<256x128xf32>
    %c0_60 = arith.constant 0 : index
    %c0_61 = arith.constant 0 : index
    %c0_62 = arith.constant 0 : index
    %54 = vector.load %arg9[%c0_60, %c0_61, %c0_62] : memref<2x256x128xf32, #tpu.memory_space<vmem>>, vector<1x256x128xf32>
    %55 = vector.shape_cast %54 : vector<1x256x128xf32> to vector<256x128xf32>
    %56 = arith.addf %55, %53 : vector<256x128xf32>
    %c0_63 = arith.constant 0 : index
    %c0_64 = arith.constant 0 : index
    %c0_65 = arith.constant 0 : index
    %57 = vector.load %arg9[%c0_63, %c0_64, %c0_65] : memref<2x256x128xf32, #tpu.memory_space<vmem>>, vector<1x256x128xf32>
    %58 = vector.shape_cast %57 : vector<1x256x128xf32> to vector<256x128xf32>
    %59 = vector.shape_cast %56 : vector<256x128xf32> to vector<1x256x128xf32>
    tpu.vector_store %arg9[%c0_63, %c0_64, %c0_65], %59 {strides = array<i32>} : memref<2x256x128xf32, #tpu.memory_space<vmem>>, vector<1x256x128xf32>,
    %c0_66 = arith.constant 0 : index
    %c1_67 = arith.constant 1 : index
    %c0_68 = arith.constant 0 : index
    %c0_69 = arith.constant 0 : index
    %60 = vector.load %arg8[%c0_66, %c1_67, %c0_68, %c0_69] : memref<2x18x18x128xf32, #tpu.memory_space<vmem>>, vector<1x16x16x128xf32>
    %61 = vector.shape_cast %60 : vector<1x16x16x128xf32> to vector<16x16x128xf32>
    %62 = vector.shape_cast %61 : vector<16x16x128xf32> to vector<256x128xf32>
    %63 = arith.truncf %62 : vector<256x128xf32> to vector<256x128xbf16>
    %c3 = arith.constant 3 : index
    %c0_70 = arith.constant 0 : index
    %c0_71 = arith.constant 0 : index
    %64 = vector.load %arg4[%c3, %c0_70, %c0_71] : memref<9x128x128xbf16, #tpu.memory_space<vmem>>, vector<1x128x128xbf16>
    %65 = vector.shape_cast %64 : vector<1x128x128xbf16> to vector<128x128xbf16>
    %cst_72 = arith.constant dense<0.000000e+00> : vector<256x128xf32>
    %66 = tpu.matmul %63, %65, %cst_72 {dimension_numbers = #tpu.dot_dimension_numbers<[1], [0], [0], [1], [0, 0, 1, 1], [], []>} : vector<256x128xbf16>, vector<128x128xbf16>, vector<256x128xf32> -> vector<256x128xf32>
    %c0_73 = arith.constant 0 : index
    %c0_74 = arith.constant 0 : index
    %c0_75 = arith.constant 0 : index
    %67 = vector.load %arg9[%c0_73, %c0_74, %c0_75] : memref<2x256x128xf32, #tpu.memory_space<vmem>>, vector<1x256x128xf32>
    %68 = vector.shape_cast %67 : vector<1x256x128xf32> to vector<256x128xf32>
    %69 = arith.addf %68, %66 : vector<256x128xf32>
    %c0_76 = arith.constant 0 : index
    %c0_77 = arith.constant 0 : index
    %c0_78 = arith.constant 0 : index
    %70 = vector.load %arg9[%c0_76, %c0_77, %c0_78] : memref<2x256x128xf32, #tpu.memory_space<vmem>>, vector<1x256x128xf32>
    %71 = vector.shape_cast %70 : vector<1x256x128xf32> to vector<256x128xf32>
    %72 = vector.shape_cast %69 : vector<256x128xf32> to vector<1x256x128xf32>
    tpu.vector_store %arg9[%c0_76, %c0_77, %c0_78], %72 {strides = array<i32>} : memref<2x256x128xf32, #tpu.memory_space<vmem>>, vector<1x256x128xf32>,
    %c0_79 = arith.constant 0 : index
    %c1_80 = arith.constant 1 : index
    %c1_81 = arith.constant 1 : index
    %c0_82 = arith.constant 0 : index
    %73 = vector.load %arg8[%c0_79, %c1_80, %c1_81, %c0_82] : memref<2x18x18x128xf32, #tpu.memory_space<vmem>>, vector<1x16x16x128xf32>
    %74 = vector.shape_cast %73 : vector<1x16x16x128xf32> to vector<16x16x128xf32>
    %75 = vector.shape_cast %74 : vector<16x16x128xf32> to vector<256x128xf32>
    %76 = arith.truncf %75 : vector<256x128xf32> to vector<256x128xbf16>
    %c4 = arith.constant 4 : index
    %c0_83 = arith.constant 0 : index
    %c0_84 = arith.constant 0 : index
    %77 = vector.load %arg4[%c4, %c0_83, %c0_84] : memref<9x128x128xbf16, #tpu.memory_space<vmem>>, vector<1x128x128xbf16>
    %78 = vector.shape_cast %77 : vector<1x128x128xbf16> to vector<128x128xbf16>
    %cst_85 = arith.constant dense<0.000000e+00> : vector<256x128xf32>
    %79 = tpu.matmul %76, %78, %cst_85 {dimension_numbers = #tpu.dot_dimension_numbers<[1], [0], [0], [1], [0, 0, 1, 1], [], []>} : vector<256x128xbf16>, vector<128x128xbf16>, vector<256x128xf32> -> vector<256x128xf32>
    %c0_86 = arith.constant 0 : index
    %c0_87 = arith.constant 0 : index
    %c0_88 = arith.constant 0 : index
    %80 = vector.load %arg9[%c0_86, %c0_87, %c0_88] : memref<2x256x128xf32, #tpu.memory_space<vmem>>, vector<1x256x128xf32>
    %81 = vector.shape_cast %80 : vector<1x256x128xf32> to vector<256x128xf32>
    %82 = arith.addf %81, %79 : vector<256x128xf32>
    %c0_89 = arith.constant 0 : index
    %c0_90 = arith.constant 0 : index
    %c0_91 = arith.constant 0 : index
    %83 = vector.load %arg9[%c0_89, %c0_90, %c0_91] : memref<2x256x128xf32, #tpu.memory_space<vmem>>, vector<1x256x128xf32>
    %84 = vector.shape_cast %83 : vector<1x256x128xf32> to vector<256x128xf32>
    %85 = vector.shape_cast %82 : vector<256x128xf32> to vector<1x256x128xf32>
    tpu.vector_store %arg9[%c0_89, %c0_90, %c0_91], %85 {strides = array<i32>} : memref<2x256x128xf32, #tpu.memory_space<vmem>>, vector<1x256x128xf32>,
    %c0_92 = arith.constant 0 : index
    %c1_93 = arith.constant 1 : index
    %c2_94 = arith.constant 2 : index
    %c0_95 = arith.constant 0 : index
    %86 = vector.load %arg8[%c0_92, %c1_93, %c2_94, %c0_95] : memref<2x18x18x128xf32, #tpu.memory_space<vmem>>, vector<1x16x16x128xf32>
    %87 = vector.shape_cast %86 : vector<1x16x16x128xf32> to vector<16x16x128xf32>
    %88 = vector.shape_cast %87 : vector<16x16x128xf32> to vector<256x128xf32>
    %89 = arith.truncf %88 : vector<256x128xf32> to vector<256x128xbf16>
    %c5 = arith.constant 5 : index
    %c0_96 = arith.constant 0 : index
    %c0_97 = arith.constant 0 : index
    %90 = vector.load %arg4[%c5, %c0_96, %c0_97] : memref<9x128x128xbf16, #tpu.memory_space<vmem>>, vector<1x128x128xbf16>
    %91 = vector.shape_cast %90 : vector<1x128x128xbf16> to vector<128x128xbf16>
    %cst_98 = arith.constant dense<0.000000e+00> : vector<256x128xf32>
    %92 = tpu.matmul %89, %91, %cst_98 {dimension_numbers = #tpu.dot_dimension_numbers<[1], [0], [0], [1], [0, 0, 1, 1], [], []>} : vector<256x128xbf16>, vector<128x128xbf16>, vector<256x128xf32> -> vector<256x128xf32>
    %c0_99 = arith.constant 0 : index
    %c0_100 = arith.constant 0 : index
    %c0_101 = arith.constant 0 : index
    %93 = vector.load %arg9[%c0_99, %c0_100, %c0_101] : memref<2x256x128xf32, #tpu.memory_space<vmem>>, vector<1x256x128xf32>
    %94 = vector.shape_cast %93 : vector<1x256x128xf32> to vector<256x128xf32>
    %95 = arith.addf %94, %92 : vector<256x128xf32>
    %c0_102 = arith.constant 0 : index
    %c0_103 = arith.constant 0 : index
    %c0_104 = arith.constant 0 : index
    %96 = vector.load %arg9[%c0_102, %c0_103, %c0_104] : memref<2x256x128xf32, #tpu.memory_space<vmem>>, vector<1x256x128xf32>
    %97 = vector.shape_cast %96 : vector<1x256x128xf32> to vector<256x128xf32>
    %98 = vector.shape_cast %95 : vector<256x128xf32> to vector<1x256x128xf32>
    tpu.vector_store %arg9[%c0_102, %c0_103, %c0_104], %98 {strides = array<i32>} : memref<2x256x128xf32, #tpu.memory_space<vmem>>, vector<1x256x128xf32>,
    %c0_105 = arith.constant 0 : index
    %c2_106 = arith.constant 2 : index
    %c0_107 = arith.constant 0 : index
    %c0_108 = arith.constant 0 : index
    %99 = vector.load %arg8[%c0_105, %c2_106, %c0_107, %c0_108] : memref<2x18x18x128xf32, #tpu.memory_space<vmem>>, vector<1x16x16x128xf32>
    %100 = vector.shape_cast %99 : vector<1x16x16x128xf32> to vector<16x16x128xf32>
    %101 = vector.shape_cast %100 : vector<16x16x128xf32> to vector<256x128xf32>
    %102 = arith.truncf %101 : vector<256x128xf32> to vector<256x128xbf16>
    %c6 = arith.constant 6 : index
    %c0_109 = arith.constant 0 : index
    %c0_110 = arith.constant 0 : index
    %103 = vector.load %arg4[%c6, %c0_109, %c0_110] : memref<9x128x128xbf16, #tpu.memory_space<vmem>>, vector<1x128x128xbf16>
    %104 = vector.shape_cast %103 : vector<1x128x128xbf16> to vector<128x128xbf16>
    %cst_111 = arith.constant dense<0.000000e+00> : vector<256x128xf32>
    %105 = tpu.matmul %102, %104, %cst_111 {dimension_numbers = #tpu.dot_dimension_numbers<[1], [0], [0], [1], [0, 0, 1, 1], [], []>} : vector<256x128xbf16>, vector<128x128xbf16>, vector<256x128xf32> -> vector<256x128xf32>
    %c0_112 = arith.constant 0 : index
    %c0_113 = arith.constant 0 : index
    %c0_114 = arith.constant 0 : index
    %106 = vector.load %arg9[%c0_112, %c0_113, %c0_114] : memref<2x256x128xf32, #tpu.memory_space<vmem>>, vector<1x256x128xf32>
    %107 = vector.shape_cast %106 : vector<1x256x128xf32> to vector<256x128xf32>
    %108 = arith.addf %107, %105 : vector<256x128xf32>
    %c0_115 = arith.constant 0 : index
    %c0_116 = arith.constant 0 : index
    %c0_117 = arith.constant 0 : index
    %109 = vector.load %arg9[%c0_115, %c0_116, %c0_117] : memref<2x256x128xf32, #tpu.memory_space<vmem>>, vector<1x256x128xf32>
    %110 = vector.shape_cast %109 : vector<1x256x128xf32> to vector<256x128xf32>
    %111 = vector.shape_cast %108 : vector<256x128xf32> to vector<1x256x128xf32>
    tpu.vector_store %arg9[%c0_115, %c0_116, %c0_117], %111 {strides = array<i32>} : memref<2x256x128xf32, #tpu.memory_space<vmem>>, vector<1x256x128xf32>,
    %c0_118 = arith.constant 0 : index
    %c2_119 = arith.constant 2 : index
    %c1_120 = arith.constant 1 : index
    %c0_121 = arith.constant 0 : index
    %112 = vector.load %arg8[%c0_118, %c2_119, %c1_120, %c0_121] : memref<2x18x18x128xf32, #tpu.memory_space<vmem>>, vector<1x16x16x128xf32>
    %113 = vector.shape_cast %112 : vector<1x16x16x128xf32> to vector<16x16x128xf32>
    %114 = vector.shape_cast %113 : vector<16x16x128xf32> to vector<256x128xf32>
    %115 = arith.truncf %114 : vector<256x128xf32> to vector<256x128xbf16>
    %c7 = arith.constant 7 : index
    %c0_122 = arith.constant 0 : index
    %c0_123 = arith.constant 0 : index
    %116 = vector.load %arg4[%c7, %c0_122, %c0_123] : memref<9x128x128xbf16, #tpu.memory_space<vmem>>, vector<1x128x128xbf16>
    %117 = vector.shape_cast %116 : vector<1x128x128xbf16> to vector<128x128xbf16>
    %cst_124 = arith.constant dense<0.000000e+00> : vector<256x128xf32>
    %118 = tpu.matmul %115, %117, %cst_124 {dimension_numbers = #tpu.dot_dimension_numbers<[1], [0], [0], [1], [0, 0, 1, 1], [], []>} : vector<256x128xbf16>, vector<128x128xbf16>, vector<256x128xf32> -> vector<256x128xf32>
    %c0_125 = arith.constant 0 : index
    %c0_126 = arith.constant 0 : index
    %c0_127 = arith.constant 0 : index
    %119 = vector.load %arg9[%c0_125, %c0_126, %c0_127] : memref<2x256x128xf32, #tpu.memory_space<vmem>>, vector<1x256x128xf32>
    %120 = vector.shape_cast %119 : vector<1x256x128xf32> to vector<256x128xf32>
    %121 = arith.addf %120, %118 : vector<256x128xf32>
    %c0_128 = arith.constant 0 : index
    %c0_129 = arith.constant 0 : index
    %c0_130 = arith.constant 0 : index
    %122 = vector.load %arg9[%c0_128, %c0_129, %c0_130] : memref<2x256x128xf32, #tpu.memory_space<vmem>>, vector<1x256x128xf32>
    %123 = vector.shape_cast %122 : vector<1x256x128xf32> to vector<256x128xf32>
    %124 = vector.shape_cast %121 : vector<256x128xf32> to vector<1x256x128xf32>
    tpu.vector_store %arg9[%c0_128, %c0_129, %c0_130], %124 {strides = array<i32>} : memref<2x256x128xf32, #tpu.memory_space<vmem>>, vector<1x256x128xf32>,
    %c0_131 = arith.constant 0 : index
    %c2_132 = arith.constant 2 : index
    %c2_133 = arith.constant 2 : index
    %c0_134 = arith.constant 0 : index
    %125 = vector.load %arg8[%c0_131, %c2_132, %c2_133, %c0_134] : memref<2x18x18x128xf32, #tpu.memory_space<vmem>>, vector<1x16x16x128xf32>
    %126 = vector.shape_cast %125 : vector<1x16x16x128xf32> to vector<16x16x128xf32>
    %127 = vector.shape_cast %126 : vector<16x16x128xf32> to vector<256x128xf32>
    %128 = arith.truncf %127 : vector<256x128xf32> to vector<256x128xbf16>
    %c8 = arith.constant 8 : index
    %c0_135 = arith.constant 0 : index
    %c0_136 = arith.constant 0 : index
    %129 = vector.load %arg4[%c8, %c0_135, %c0_136] : memref<9x128x128xbf16, #tpu.memory_space<vmem>>, vector<1x128x128xbf16>
    %130 = vector.shape_cast %129 : vector<1x128x128xbf16> to vector<128x128xbf16>
    %cst_137 = arith.constant dense<0.000000e+00> : vector<256x128xf32>
    %131 = tpu.matmul %128, %130, %cst_137 {dimension_numbers = #tpu.dot_dimension_numbers<[1], [0], [0], [1], [0, 0, 1, 1], [], []>} : vector<256x128xbf16>, vector<128x128xbf16>, vector<256x128xf32> -> vector<256x128xf32>
    %c0_138 = arith.constant 0 : index
    %c0_139 = arith.constant 0 : index
    %c0_140 = arith.constant 0 : index
    %132 = vector.load %arg9[%c0_138, %c0_139, %c0_140] : memref<2x256x128xf32, #tpu.memory_space<vmem>>, vector<1x256x128xf32>
    %133 = vector.shape_cast %132 : vector<1x256x128xf32> to vector<256x128xf32>
    %134 = arith.addf %133, %131 : vector<256x128xf32>
    %c0_141 = arith.constant 0 : index
    %c0_142 = arith.constant 0 : index
    %c0_143 = arith.constant 0 : index
    %135 = vector.load %arg9[%c0_141, %c0_142, %c0_143] : memref<2x256x128xf32, #tpu.memory_space<vmem>>, vector<1x256x128xf32>
    %136 = vector.shape_cast %135 : vector<1x256x128xf32> to vector<256x128xf32>
    %137 = vector.shape_cast %134 : vector<256x128xf32> to vector<1x256x128xf32>
    tpu.vector_store %arg9[%c0_141, %c0_142, %c0_143], %137 {strides = array<i32>} : memref<2x256x128xf32, #tpu.memory_space<vmem>>, vector<1x256x128xf32>,
    %c1_144 = arith.constant 1 : index
    %c0_145 = arith.constant 0 : index
    %c0_146 = arith.constant 0 : index
    %c0_147 = arith.constant 0 : index
    %138 = vector.load %arg8[%c1_144, %c0_145, %c0_146, %c0_147] : memref<2x18x18x128xf32, #tpu.memory_space<vmem>>, vector<1x16x16x128xf32>
    %139 = vector.shape_cast %138 : vector<1x16x16x128xf32> to vector<16x16x128xf32>
    %140 = vector.shape_cast %139 : vector<16x16x128xf32> to vector<256x128xf32>
    %141 = arith.truncf %140 : vector<256x128xf32> to vector<256x128xbf16>
    %c0_148 = arith.constant 0 : index
    %c0_149 = arith.constant 0 : index
    %c0_150 = arith.constant 0 : index
    %142 = vector.load %arg4[%c0_148, %c0_149, %c0_150] : memref<9x128x128xbf16, #tpu.memory_space<vmem>>, vector<1x128x128xbf16>
    %143 = vector.shape_cast %142 : vector<1x128x128xbf16> to vector<128x128xbf16>
    %cst_151 = arith.constant dense<0.000000e+00> : vector<256x128xf32>
    %144 = tpu.matmul %141, %143, %cst_151 {dimension_numbers = #tpu.dot_dimension_numbers<[1], [0], [0], [1], [0, 0, 1, 1], [], []>} : vector<256x128xbf16>, vector<128x128xbf16>, vector<256x128xf32> -> vector<256x128xf32>
    %c1_152 = arith.constant 1 : index
    %c0_153 = arith.constant 0 : index
    %c0_154 = arith.constant 0 : index
    %145 = vector.load %arg9[%c1_152, %c0_153, %c0_154] : memref<2x256x128xf32, #tpu.memory_space<vmem>>, vector<1x256x128xf32>
    %146 = vector.shape_cast %145 : vector<1x256x128xf32> to vector<256x128xf32>
    %147 = vector.shape_cast %144 : vector<256x128xf32> to vector<1x256x128xf32>
    tpu.vector_store %arg9[%c1_152, %c0_153, %c0_154], %147 {strides = array<i32>} : memref<2x256x128xf32, #tpu.memory_space<vmem>>, vector<1x256x128xf32>,
    %c1_155 = arith.constant 1 : index
    %c0_156 = arith.constant 0 : index
    %c1_157 = arith.constant 1 : index
    %c0_158 = arith.constant 0 : index
    %148 = vector.load %arg8[%c1_155, %c0_156, %c1_157, %c0_158] : memref<2x18x18x128xf32, #tpu.memory_space<vmem>>, vector<1x16x16x128xf32>
    %149 = vector.shape_cast %148 : vector<1x16x16x128xf32> to vector<16x16x128xf32>
    %150 = vector.shape_cast %149 : vector<16x16x128xf32> to vector<256x128xf32>
    %151 = arith.truncf %150 : vector<256x128xf32> to vector<256x128xbf16>
    %c1_159 = arith.constant 1 : index
    %c0_160 = arith.constant 0 : index
    %c0_161 = arith.constant 0 : index
    %152 = vector.load %arg4[%c1_159, %c0_160, %c0_161] : memref<9x128x128xbf16, #tpu.memory_space<vmem>>, vector<1x128x128xbf16>
    %153 = vector.shape_cast %152 : vector<1x128x128xbf16> to vector<128x128xbf16>
    %cst_162 = arith.constant dense<0.000000e+00> : vector<256x128xf32>
    %154 = tpu.matmul %151, %153, %cst_162 {dimension_numbers = #tpu.dot_dimension_numbers<[1], [0], [0], [1], [0, 0, 1, 1], [], []>} : vector<256x128xbf16>, vector<128x128xbf16>, vector<256x128xf32> -> vector<256x128xf32>
    %c1_163 = arith.constant 1 : index
    %c0_164 = arith.constant 0 : index
    %c0_165 = arith.constant 0 : index
    %155 = vector.load %arg9[%c1_163, %c0_164, %c0_165] : memref<2x256x128xf32, #tpu.memory_space<vmem>>, vector<1x256x128xf32>
    %156 = vector.shape_cast %155 : vector<1x256x128xf32> to vector<256x128xf32>
    %157 = arith.addf %156, %154 : vector<256x128xf32>
    %c1_166 = arith.constant 1 : index
    %c0_167 = arith.constant 0 : index
    %c0_168 = arith.constant 0 : index
    %158 = vector.load %arg9[%c1_166, %c0_167, %c0_168] : memref<2x256x128xf32, #tpu.memory_space<vmem>>, vector<1x256x128xf32>
    %159 = vector.shape_cast %158 : vector<1x256x128xf32> to vector<256x128xf32>
    %160 = vector.shape_cast %157 : vector<256x128xf32> to vector<1x256x128xf32>
    tpu.vector_store %arg9[%c1_166, %c0_167, %c0_168], %160 {strides = array<i32>} : memref<2x256x128xf32, #tpu.memory_space<vmem>>, vector<1x256x128xf32>,
    %c1_169 = arith.constant 1 : index
    %c0_170 = arith.constant 0 : index
    %c2_171 = arith.constant 2 : index
    %c0_172 = arith.constant 0 : index
    %161 = vector.load %arg8[%c1_169, %c0_170, %c2_171, %c0_172] : memref<2x18x18x128xf32, #tpu.memory_space<vmem>>, vector<1x16x16x128xf32>
    %162 = vector.shape_cast %161 : vector<1x16x16x128xf32> to vector<16x16x128xf32>
    %163 = vector.shape_cast %162 : vector<16x16x128xf32> to vector<256x128xf32>
    %164 = arith.truncf %163 : vector<256x128xf32> to vector<256x128xbf16>
    %c2_173 = arith.constant 2 : index
    %c0_174 = arith.constant 0 : index
    %c0_175 = arith.constant 0 : index
    %165 = vector.load %arg4[%c2_173, %c0_174, %c0_175] : memref<9x128x128xbf16, #tpu.memory_space<vmem>>, vector<1x128x128xbf16>
    %166 = vector.shape_cast %165 : vector<1x128x128xbf16> to vector<128x128xbf16>
    %cst_176 = arith.constant dense<0.000000e+00> : vector<256x128xf32>
    %167 = tpu.matmul %164, %166, %cst_176 {dimension_numbers = #tpu.dot_dimension_numbers<[1], [0], [0], [1], [0, 0, 1, 1], [], []>} : vector<256x128xbf16>, vector<128x128xbf16>, vector<256x128xf32> -> vector<256x128xf32>
    %c1_177 = arith.constant 1 : index
    %c0_178 = arith.constant 0 : index
    %c0_179 = arith.constant 0 : index
    %168 = vector.load %arg9[%c1_177, %c0_178, %c0_179] : memref<2x256x128xf32, #tpu.memory_space<vmem>>, vector<1x256x128xf32>
    %169 = vector.shape_cast %168 : vector<1x256x128xf32> to vector<256x128xf32>
    %170 = arith.addf %169, %167 : vector<256x128xf32>
    %c1_180 = arith.constant 1 : index
    %c0_181 = arith.constant 0 : index
    %c0_182 = arith.constant 0 : index
    %171 = vector.load %arg9[%c1_180, %c0_181, %c0_182] : memref<2x256x128xf32, #tpu.memory_space<vmem>>, vector<1x256x128xf32>
    %172 = vector.shape_cast %171 : vector<1x256x128xf32> to vector<256x128xf32>
    %173 = vector.shape_cast %170 : vector<256x128xf32> to vector<1x256x128xf32>
    tpu.vector_store %arg9[%c1_180, %c0_181, %c0_182], %173 {strides = array<i32>} : memref<2x256x128xf32, #tpu.memory_space<vmem>>, vector<1x256x128xf32>,
    %c1_183 = arith.constant 1 : index
    %c1_184 = arith.constant 1 : index
    %c0_185 = arith.constant 0 : index
    %c0_186 = arith.constant 0 : index
    %174 = vector.load %arg8[%c1_183, %c1_184, %c0_185, %c0_186] : memref<2x18x18x128xf32, #tpu.memory_space<vmem>>, vector<1x16x16x128xf32>
    %175 = vector.shape_cast %174 : vector<1x16x16x128xf32> to vector<16x16x128xf32>
    %176 = vector.shape_cast %175 : vector<16x16x128xf32> to vector<256x128xf32>
    %177 = arith.truncf %176 : vector<256x128xf32> to vector<256x128xbf16>
    %c3_187 = arith.constant 3 : index
    %c0_188 = arith.constant 0 : index
    %c0_189 = arith.constant 0 : index
    %178 = vector.load %arg4[%c3_187, %c0_188, %c0_189] : memref<9x128x128xbf16, #tpu.memory_space<vmem>>, vector<1x128x128xbf16>
    %179 = vector.shape_cast %178 : vector<1x128x128xbf16> to vector<128x128xbf16>
    %cst_190 = arith.constant dense<0.000000e+00> : vector<256x128xf32>
    %180 = tpu.matmul %177, %179, %cst_190 {dimension_numbers = #tpu.dot_dimension_numbers<[1], [0], [0], [1], [0, 0, 1, 1], [], []>} : vector<256x128xbf16>, vector<128x128xbf16>, vector<256x128xf32> -> vector<256x128xf32>
    %c1_191 = arith.constant 1 : index
    %c0_192 = arith.constant 0 : index
    %c0_193 = arith.constant 0 : index
    %181 = vector.load %arg9[%c1_191, %c0_192, %c0_193] : memref<2x256x128xf32, #tpu.memory_space<vmem>>, vector<1x256x128xf32>
    %182 = vector.shape_cast %181 : vector<1x256x128xf32> to vector<256x128xf32>
    %183 = arith.addf %182, %180 : vector<256x128xf32>
    %c1_194 = arith.constant 1 : index
    %c0_195 = arith.constant 0 : index
    %c0_196 = arith.constant 0 : index
    %184 = vector.load %arg9[%c1_194, %c0_195, %c0_196] : memref<2x256x128xf32, #tpu.memory_space<vmem>>, vector<1x256x128xf32>
    %185 = vector.shape_cast %184 : vector<1x256x128xf32> to vector<256x128xf32>
    %186 = vector.shape_cast %183 : vector<256x128xf32> to vector<1x256x128xf32>
    tpu.vector_store %arg9[%c1_194, %c0_195, %c0_196], %186 {strides = array<i32>} : memref<2x256x128xf32, #tpu.memory_space<vmem>>, vector<1x256x128xf32>,
    %c1_197 = arith.constant 1 : index
    %c1_198 = arith.constant 1 : index
    %c1_199 = arith.constant 1 : index
    %c0_200 = arith.constant 0 : index
    %187 = vector.load %arg8[%c1_197, %c1_198, %c1_199, %c0_200] : memref<2x18x18x128xf32, #tpu.memory_space<vmem>>, vector<1x16x16x128xf32>
    %188 = vector.shape_cast %187 : vector<1x16x16x128xf32> to vector<16x16x128xf32>
    %189 = vector.shape_cast %188 : vector<16x16x128xf32> to vector<256x128xf32>
    %190 = arith.truncf %189 : vector<256x128xf32> to vector<256x128xbf16>
    %c4_201 = arith.constant 4 : index
    %c0_202 = arith.constant 0 : index
    %c0_203 = arith.constant 0 : index
    %191 = vector.load %arg4[%c4_201, %c0_202, %c0_203] : memref<9x128x128xbf16, #tpu.memory_space<vmem>>, vector<1x128x128xbf16>
    %192 = vector.shape_cast %191 : vector<1x128x128xbf16> to vector<128x128xbf16>
    %cst_204 = arith.constant dense<0.000000e+00> : vector<256x128xf32>
    %193 = tpu.matmul %190, %192, %cst_204 {dimension_numbers = #tpu.dot_dimension_numbers<[1], [0], [0], [1], [0, 0, 1, 1], [], []>} : vector<256x128xbf16>, vector<128x128xbf16>, vector<256x128xf32> -> vector<256x128xf32>
    %c1_205 = arith.constant 1 : index
    %c0_206 = arith.constant 0 : index
    %c0_207 = arith.constant 0 : index
    %194 = vector.load %arg9[%c1_205, %c0_206, %c0_207] : memref<2x256x128xf32, #tpu.memory_space<vmem>>, vector<1x256x128xf32>
    %195 = vector.shape_cast %194 : vector<1x256x128xf32> to vector<256x128xf32>
    %196 = arith.addf %195, %193 : vector<256x128xf32>
    %c1_208 = arith.constant 1 : index
    %c0_209 = arith.constant 0 : index
    %c0_210 = arith.constant 0 : index
    %197 = vector.load %arg9[%c1_208, %c0_209, %c0_210] : memref<2x256x128xf32, #tpu.memory_space<vmem>>, vector<1x256x128xf32>
    %198 = vector.shape_cast %197 : vector<1x256x128xf32> to vector<256x128xf32>
    %199 = vector.shape_cast %196 : vector<256x128xf32> to vector<1x256x128xf32>
    tpu.vector_store %arg9[%c1_208, %c0_209, %c0_210], %199 {strides = array<i32>} : memref<2x256x128xf32, #tpu.memory_space<vmem>>, vector<1x256x128xf32>,
    %c1_211 = arith.constant 1 : index
    %c1_212 = arith.constant 1 : index
    %c2_213 = arith.constant 2 : index
    %c0_214 = arith.constant 0 : index
    %200 = vector.load %arg8[%c1_211, %c1_212, %c2_213, %c0_214] : memref<2x18x18x128xf32, #tpu.memory_space<vmem>>, vector<1x16x16x128xf32>
    %201 = vector.shape_cast %200 : vector<1x16x16x128xf32> to vector<16x16x128xf32>
    %202 = vector.shape_cast %201 : vector<16x16x128xf32> to vector<256x128xf32>
    %203 = arith.truncf %202 : vector<256x128xf32> to vector<256x128xbf16>
    %c5_215 = arith.constant 5 : index
    %c0_216 = arith.constant 0 : index
    %c0_217 = arith.constant 0 : index
    %204 = vector.load %arg4[%c5_215, %c0_216, %c0_217] : memref<9x128x128xbf16, #tpu.memory_space<vmem>>, vector<1x128x128xbf16>
    %205 = vector.shape_cast %204 : vector<1x128x128xbf16> to vector<128x128xbf16>
    %cst_218 = arith.constant dense<0.000000e+00> : vector<256x128xf32>
    %206 = tpu.matmul %203, %205, %cst_218 {dimension_numbers = #tpu.dot_dimension_numbers<[1], [0], [0], [1], [0, 0, 1, 1], [], []>} : vector<256x128xbf16>, vector<128x128xbf16>, vector<256x128xf32> -> vector<256x128xf32>
    %c1_219 = arith.constant 1 : index
    %c0_220 = arith.constant 0 : index
    %c0_221 = arith.constant 0 : index
    %207 = vector.load %arg9[%c1_219, %c0_220, %c0_221] : memref<2x256x128xf32, #tpu.memory_space<vmem>>, vector<1x256x128xf32>
    %208 = vector.shape_cast %207 : vector<1x256x128xf32> to vector<256x128xf32>
    %209 = arith.addf %208, %206 : vector<256x128xf32>
    %c1_222 = arith.constant 1 : index
    %c0_223 = arith.constant 0 : index
    %c0_224 = arith.constant 0 : index
    %210 = vector.load %arg9[%c1_222, %c0_223, %c0_224] : memref<2x256x128xf32, #tpu.memory_space<vmem>>, vector<1x256x128xf32>
    %211 = vector.shape_cast %210 : vector<1x256x128xf32> to vector<256x128xf32>
    %212 = vector.shape_cast %209 : vector<256x128xf32> to vector<1x256x128xf32>
    tpu.vector_store %arg9[%c1_222, %c0_223, %c0_224], %212 {strides = array<i32>} : memref<2x256x128xf32, #tpu.memory_space<vmem>>, vector<1x256x128xf32>,
    %c1_225 = arith.constant 1 : index
    %c2_226 = arith.constant 2 : index
    %c0_227 = arith.constant 0 : index
    %c0_228 = arith.constant 0 : index
    %213 = vector.load %arg8[%c1_225, %c2_226, %c0_227, %c0_228] : memref<2x18x18x128xf32, #tpu.memory_space<vmem>>, vector<1x16x16x128xf32>
    %214 = vector.shape_cast %213 : vector<1x16x16x128xf32> to vector<16x16x128xf32>
    %215 = vector.shape_cast %214 : vector<16x16x128xf32> to vector<256x128xf32>
    %216 = arith.truncf %215 : vector<256x128xf32> to vector<256x128xbf16>
    %c6_229 = arith.constant 6 : index
    %c0_230 = arith.constant 0 : index
    %c0_231 = arith.constant 0 : index
    %217 = vector.load %arg4[%c6_229, %c0_230, %c0_231] : memref<9x128x128xbf16, #tpu.memory_space<vmem>>, vector<1x128x128xbf16>
    %218 = vector.shape_cast %217 : vector<1x128x128xbf16> to vector<128x128xbf16>
    %cst_232 = arith.constant dense<0.000000e+00> : vector<256x128xf32>
    %219 = tpu.matmul %216, %218, %cst_232 {dimension_numbers = #tpu.dot_dimension_numbers<[1], [0], [0], [1], [0, 0, 1, 1], [], []>} : vector<256x128xbf16>, vector<128x128xbf16>, vector<256x128xf32> -> vector<256x128xf32>
    %c1_233 = arith.constant 1 : index
    %c0_234 = arith.constant 0 : index
    %c0_235 = arith.constant 0 : index
    %220 = vector.load %arg9[%c1_233, %c0_234, %c0_235] : memref<2x256x128xf32, #tpu.memory_space<vmem>>, vector<1x256x128xf32>
    %221 = vector.shape_cast %220 : vector<1x256x128xf32> to vector<256x128xf32>
    %222 = arith.addf %221, %219 : vector<256x128xf32>
    %c1_236 = arith.constant 1 : index
    %c0_237 = arith.constant 0 : index
    %c0_238 = arith.constant 0 : index
    %223 = vector.load %arg9[%c1_236, %c0_237, %c0_238] : memref<2x256x128xf32, #tpu.memory_space<vmem>>, vector<1x256x128xf32>
    %224 = vector.shape_cast %223 : vector<1x256x128xf32> to vector<256x128xf32>
    %225 = vector.shape_cast %222 : vector<256x128xf32> to vector<1x256x128xf32>
    tpu.vector_store %arg9[%c1_236, %c0_237, %c0_238], %225 {strides = array<i32>} : memref<2x256x128xf32, #tpu.memory_space<vmem>>, vector<1x256x128xf32>,
    %c1_239 = arith.constant 1 : index
    %c2_240 = arith.constant 2 : index
    %c1_241 = arith.constant 1 : index
    %c0_242 = arith.constant 0 : index
    %226 = vector.load %arg8[%c1_239, %c2_240, %c1_241, %c0_242] : memref<2x18x18x128xf32, #tpu.memory_space<vmem>>, vector<1x16x16x128xf32>
    %227 = vector.shape_cast %226 : vector<1x16x16x128xf32> to vector<16x16x128xf32>
    %228 = vector.shape_cast %227 : vector<16x16x128xf32> to vector<256x128xf32>
    %229 = arith.truncf %228 : vector<256x128xf32> to vector<256x128xbf16>
    %c7_243 = arith.constant 7 : index
    %c0_244 = arith.constant 0 : index
    %c0_245 = arith.constant 0 : index
    %230 = vector.load %arg4[%c7_243, %c0_244, %c0_245] : memref<9x128x128xbf16, #tpu.memory_space<vmem>>, vector<1x128x128xbf16>
    %231 = vector.shape_cast %230 : vector<1x128x128xbf16> to vector<128x128xbf16>
    %cst_246 = arith.constant dense<0.000000e+00> : vector<256x128xf32>
    %232 = tpu.matmul %229, %231, %cst_246 {dimension_numbers = #tpu.dot_dimension_numbers<[1], [0], [0], [1], [0, 0, 1, 1], [], []>} : vector<256x128xbf16>, vector<128x128xbf16>, vector<256x128xf32> -> vector<256x128xf32>
    %c1_247 = arith.constant 1 : index
    %c0_248 = arith.constant 0 : index
    %c0_249 = arith.constant 0 : index
    %233 = vector.load %arg9[%c1_247, %c0_248, %c0_249] : memref<2x256x128xf32, #tpu.memory_space<vmem>>, vector<1x256x128xf32>
    %234 = vector.shape_cast %233 : vector<1x256x128xf32> to vector<256x128xf32>
    %235 = arith.addf %234, %232 : vector<256x128xf32>
    %c1_250 = arith.constant 1 : index
    %c0_251 = arith.constant 0 : index
    %c0_252 = arith.constant 0 : index
    %236 = vector.load %arg9[%c1_250, %c0_251, %c0_252] : memref<2x256x128xf32, #tpu.memory_space<vmem>>, vector<1x256x128xf32>
    %237 = vector.shape_cast %236 : vector<1x256x128xf32> to vector<256x128xf32>
    %238 = vector.shape_cast %235 : vector<256x128xf32> to vector<1x256x128xf32>
    tpu.vector_store %arg9[%c1_250, %c0_251, %c0_252], %238 {strides = array<i32>} : memref<2x256x128xf32, #tpu.memory_space<vmem>>, vector<1x256x128xf32>,
    %c1_253 = arith.constant 1 : index
    %c2_254 = arith.constant 2 : index
    %c2_255 = arith.constant 2 : index
    %c0_256 = arith.constant 0 : index
    %239 = vector.load %arg8[%c1_253, %c2_254, %c2_255, %c0_256] : memref<2x18x18x128xf32, #tpu.memory_space<vmem>>, vector<1x16x16x128xf32>
    %240 = vector.shape_cast %239 : vector<1x16x16x128xf32> to vector<16x16x128xf32>
    %241 = vector.shape_cast %240 : vector<16x16x128xf32> to vector<256x128xf32>
    %242 = arith.truncf %241 : vector<256x128xf32> to vector<256x128xbf16>
    %c8_257 = arith.constant 8 : index
    %c0_258 = arith.constant 0 : index
    %c0_259 = arith.constant 0 : index
    %243 = vector.load %arg4[%c8_257, %c0_258, %c0_259] : memref<9x128x128xbf16, #tpu.memory_space<vmem>>, vector<1x128x128xbf16>
    %244 = vector.shape_cast %243 : vector<1x128x128xbf16> to vector<128x128xbf16>
    %cst_260 = arith.constant dense<0.000000e+00> : vector<256x128xf32>
    %245 = tpu.matmul %242, %244, %cst_260 {dimension_numbers = #tpu.dot_dimension_numbers<[1], [0], [0], [1], [0, 0, 1, 1], [], []>} : vector<256x128xbf16>, vector<128x128xbf16>, vector<256x128xf32> -> vector<256x128xf32>
    %c1_261 = arith.constant 1 : index
    %c0_262 = arith.constant 0 : index
    %c0_263 = arith.constant 0 : index
    %246 = vector.load %arg9[%c1_261, %c0_262, %c0_263] : memref<2x256x128xf32, #tpu.memory_space<vmem>>, vector<1x256x128xf32>
    %247 = vector.shape_cast %246 : vector<1x256x128xf32> to vector<256x128xf32>
    %248 = arith.addf %247, %245 : vector<256x128xf32>
    %c1_264 = arith.constant 1 : index
    %c0_265 = arith.constant 0 : index
    %c0_266 = arith.constant 0 : index
    %249 = vector.load %arg9[%c1_264, %c0_265, %c0_266] : memref<2x256x128xf32, #tpu.memory_space<vmem>>, vector<1x256x128xf32>
    %250 = vector.shape_cast %249 : vector<1x256x128xf32> to vector<256x128xf32>
    %251 = vector.shape_cast %248 : vector<256x128xf32> to vector<1x256x128xf32>
    tpu.vector_store %arg9[%c1_264, %c0_265, %c0_266], %251 {strides = array<i32>} : memref<2x256x128xf32, #tpu.memory_space<vmem>>, vector<1x256x128xf32>,
    %c0_267 = arith.constant 0 : index
    %c0_268 = arith.constant 0 : index
    %252 = vector.load %arg6[%c0_267, %c0_268] : memref<4x128xf32, #tpu.memory_space<vmem>>, vector<1x128xf32>
    %c1_269 = arith.constant 1 : index
    %c0_270 = arith.constant 0 : index
    %253 = vector.load %arg6[%c1_269, %c0_270] : memref<4x128xf32, #tpu.memory_space<vmem>>, vector<1x128xf32>
    %c0_271 = arith.constant 0 : index
    %c0_272 = arith.constant 0 : index
    %c0_273 = arith.constant 0 : index
    %254 = vector.load %arg9[%c0_271, %c0_272, %c0_273] : memref<2x256x128xf32, #tpu.memory_space<vmem>>, vector<2x256x128xf32>
    %255 = vector.shape_cast %254 : vector<2x256x128xf32> to vector<512x128xf32>
    %cst_274 = arith.constant dense<0.000000e+00> : vector<128xf32>
    %256 = vector.multi_reduction <add>, %255, %cst_274 [0] : vector<512x128xf32> to vector<128xf32>
    %257 = vector.shape_cast %256 : vector<128xf32> to vector<1x128xf32>
    %cst_275 = arith.constant 0.001953125 : f32
    %258 = vector.broadcast %cst_275 : f32 to vector<1x128xf32>
    %259 = arith.mulf %257, %258 : vector<1x128xf32>
    %260 = vector.broadcast %259 : vector<1x128xf32> to vector<512x128xf32>
    %261 = arith.subf %255, %260 : vector<512x128xf32>
    %262 = arith.mulf %261, %261 : vector<512x128xf32>
    %cst_276 = arith.constant dense<0.000000e+00> : vector<128xf32>
    %263 = vector.multi_reduction <add>, %262, %cst_276 [0] : vector<512x128xf32> to vector<128xf32>
    %264 = vector.shape_cast %263 : vector<128xf32> to vector<1x128xf32>
    %cst_277 = arith.constant 0.001953125 : f32
    %265 = vector.broadcast %cst_277 : f32 to vector<1x128xf32>
    %266 = arith.mulf %264, %265 : vector<1x128xf32>
    %cst_278 = arith.constant 9.99999974E-6 : f32
    %267 = vector.broadcast %cst_278 : f32 to vector<1x128xf32>
    %268 = arith.addf %266, %267 : vector<1x128xf32>
    %269 = math.rsqrt %268 : vector<1x128xf32>
    %270 = arith.mulf %252, %269 : vector<1x128xf32>
    %271 = vector.broadcast %270 : vector<1x128xf32> to vector<512x128xf32>
    %272 = arith.mulf %261, %271 : vector<512x128xf32>
    %273 = vector.broadcast %253 : vector<1x128xf32> to vector<512x128xf32>
    %274 = arith.addf %272, %273 : vector<512x128xf32>
    %cst_279 = arith.constant 0.000000e+00 : f32
    %275 = vector.broadcast %cst_279 : f32 to vector<512x128xf32>
    %276 = arith.maximumf %274, %275 : vector<512x128xf32>
    %277 = vector.extract_strided_slice %276 {offsets = [0, 0], sizes = [256, 128], strides = [1, 1]} : vector<512x128xf32> to vector<256x128xf32>
    %278 = vector.shape_cast %277 : vector<256x128xf32> to vector<16x16x128xf32>
    %c0_280 = arith.constant 0 : index
    %c1_281 = arith.constant 1 : index
    %c1_282 = arith.constant 1 : index
    %c0_283 = arith.constant 0 : index
    %279 = vector.load %arg8[%c0_280, %c1_281, %c1_282, %c0_283] : memref<2x18x18x128xf32, #tpu.memory_space<vmem>>, vector<1x16x16x128xf32>
    %280 = vector.shape_cast %279 : vector<1x16x16x128xf32> to vector<16x16x128xf32>
    %281 = vector.shape_cast %278 : vector<16x16x128xf32> to vector<1x16x16x128xf32>
    tpu.vector_store %arg8[%c0_280, %c1_281, %c1_282, %c0_283], %281 {strides = array<i32>} : memref<2x18x18x128xf32, #tpu.memory_space<vmem>>, vector<1x16x16x128xf32>,
    %282 = vector.extract_strided_slice %276 {offsets = [256, 0], sizes = [256, 128], strides = [1, 1]} : vector<512x128xf32> to vector<256x128xf32>
    %283 = vector.shape_cast %282 : vector<256x128xf32> to vector<16x16x128xf32>
    %c1_284 = arith.constant 1 : index
    %c1_285 = arith.constant 1 : index
    %c1_286 = arith.constant 1 : index
    %c0_287 = arith.constant 0 : index
    %284 = vector.load %arg8[%c1_284, %c1_285, %c1_286, %c0_287] : memref<2x18x18x128xf32, #tpu.memory_space<vmem>>, vector<1x16x16x128xf32>
    %285 = vector.shape_cast %284 : vector<1x16x16x128xf32> to vector<16x16x128xf32>
    %286 = vector.shape_cast %283 : vector<16x16x128xf32> to vector<1x16x16x128xf32>
    tpu.vector_store %arg8[%c1_284, %c1_285, %c1_286, %c0_287], %286 {strides = array<i32>} : memref<2x18x18x128xf32, #tpu.memory_space<vmem>>, vector<1x16x16x128xf32>,
    %c0_288 = arith.constant 0 : index
    %c0_289 = arith.constant 0 : index
    %c0_290 = arith.constant 0 : index
    %c0_291 = arith.constant 0 : index
    %287 = vector.load %arg8[%c0_288, %c0_289, %c0_290, %c0_291] : memref<2x18x18x128xf32, #tpu.memory_space<vmem>>, vector<1x16x16x128xf32>
    %288 = vector.shape_cast %287 : vector<1x16x16x128xf32> to vector<16x16x128xf32>
    %289 = vector.shape_cast %288 : vector<16x16x128xf32> to vector<256x128xf32>
    %290 = arith.truncf %289 : vector<256x128xf32> to vector<256x128xbf16>
    %c0_292 = arith.constant 0 : index
    %c0_293 = arith.constant 0 : index
    %c0_294 = arith.constant 0 : index
    %291 = vector.load %arg5[%c0_292, %c0_293, %c0_294] : memref<9x128x128xbf16, #tpu.memory_space<vmem>>, vector<1x128x128xbf16>
    %292 = vector.shape_cast %291 : vector<1x128x128xbf16> to vector<128x128xbf16>
    %cst_295 = arith.constant dense<0.000000e+00> : vector<256x128xf32>
    %293 = tpu.matmul %290, %292, %cst_295 {dimension_numbers = #tpu.dot_dimension_numbers<[1], [0], [0], [1], [0, 0, 1, 1], [], []>} : vector<256x128xbf16>, vector<128x128xbf16>, vector<256x128xf32> -> vector<256x128xf32>
    %c0_296 = arith.constant 0 : index
    %c0_297 = arith.constant 0 : index
    %c0_298 = arith.constant 0 : index
    %294 = vector.load %arg9[%c0_296, %c0_297, %c0_298] : memref<2x256x128xf32, #tpu.memory_space<vmem>>, vector<1x256x128xf32>
    %295 = vector.shape_cast %294 : vector<1x256x128xf32> to vector<256x128xf32>
    %296 = vector.shape_cast %293 : vector<256x128xf32> to vector<1x256x128xf32>
    tpu.vector_store %arg9[%c0_296, %c0_297, %c0_298], %296 {strides = array<i32>} : memref<2x256x128xf32, #tpu.memory_space<vmem>>, vector<1x256x128xf32>,
    %c0_299 = arith.constant 0 : index
    %c0_300 = arith.constant 0 : index
    %c1_301 = arith.constant 1 : index
    %c0_302 = arith.constant 0 : index
    %297 = vector.load %arg8[%c0_299, %c0_300, %c1_301, %c0_302] : memref<2x18x18x128xf32, #tpu.memory_space<vmem>>, vector<1x16x16x128xf32>
    %298 = vector.shape_cast %297 : vector<1x16x16x128xf32> to vector<16x16x128xf32>
    %299 = vector.shape_cast %298 : vector<16x16x128xf32> to vector<256x128xf32>
    %300 = arith.truncf %299 : vector<256x128xf32> to vector<256x128xbf16>
    %c1_303 = arith.constant 1 : index
    %c0_304 = arith.constant 0 : index
    %c0_305 = arith.constant 0 : index
    %301 = vector.load %arg5[%c1_303, %c0_304, %c0_305] : memref<9x128x128xbf16, #tpu.memory_space<vmem>>, vector<1x128x128xbf16>
    %302 = vector.shape_cast %301 : vector<1x128x128xbf16> to vector<128x128xbf16>
    %cst_306 = arith.constant dense<0.000000e+00> : vector<256x128xf32>
    %303 = tpu.matmul %300, %302, %cst_306 {dimension_numbers = #tpu.dot_dimension_numbers<[1], [0], [0], [1], [0, 0, 1, 1], [], []>} : vector<256x128xbf16>, vector<128x128xbf16>, vector<256x128xf32> -> vector<256x128xf32>
    %c0_307 = arith.constant 0 : index
    %c0_308 = arith.constant 0 : index
    %c0_309 = arith.constant 0 : index
    %304 = vector.load %arg9[%c0_307, %c0_308, %c0_309] : memref<2x256x128xf32, #tpu.memory_space<vmem>>, vector<1x256x128xf32>
    %305 = vector.shape_cast %304 : vector<1x256x128xf32> to vector<256x128xf32>
    %306 = arith.addf %305, %303 : vector<256x128xf32>
    %c0_310 = arith.constant 0 : index
    %c0_311 = arith.constant 0 : index
    %c0_312 = arith.constant 0 : index
    %307 = vector.load %arg9[%c0_310, %c0_311, %c0_312] : memref<2x256x128xf32, #tpu.memory_space<vmem>>, vector<1x256x128xf32>
    %308 = vector.shape_cast %307 : vector<1x256x128xf32> to vector<256x128xf32>
    %309 = vector.shape_cast %306 : vector<256x128xf32> to vector<1x256x128xf32>
    tpu.vector_store %arg9[%c0_310, %c0_311, %c0_312], %309 {strides = array<i32>} : memref<2x256x128xf32, #tpu.memory_space<vmem>>, vector<1x256x128xf32>,
    %c0_313 = arith.constant 0 : index
    %c0_314 = arith.constant 0 : index
    %c2_315 = arith.constant 2 : index
    %c0_316 = arith.constant 0 : index
    %310 = vector.load %arg8[%c0_313, %c0_314, %c2_315, %c0_316] : memref<2x18x18x128xf32, #tpu.memory_space<vmem>>, vector<1x16x16x128xf32>
    %311 = vector.shape_cast %310 : vector<1x16x16x128xf32> to vector<16x16x128xf32>
    %312 = vector.shape_cast %311 : vector<16x16x128xf32> to vector<256x128xf32>
    %313 = arith.truncf %312 : vector<256x128xf32> to vector<256x128xbf16>
    %c2_317 = arith.constant 2 : index
    %c0_318 = arith.constant 0 : index
    %c0_319 = arith.constant 0 : index
    %314 = vector.load %arg5[%c2_317, %c0_318, %c0_319] : memref<9x128x128xbf16, #tpu.memory_space<vmem>>, vector<1x128x128xbf16>
    %315 = vector.shape_cast %314 : vector<1x128x128xbf16> to vector<128x128xbf16>
    %cst_320 = arith.constant dense<0.000000e+00> : vector<256x128xf32>
    %316 = tpu.matmul %313, %315, %cst_320 {dimension_numbers = #tpu.dot_dimension_numbers<[1], [0], [0], [1], [0, 0, 1, 1], [], []>} : vector<256x128xbf16>, vector<128x128xbf16>, vector<256x128xf32> -> vector<256x128xf32>
    %c0_321 = arith.constant 0 : index
    %c0_322 = arith.constant 0 : index
    %c0_323 = arith.constant 0 : index
    %317 = vector.load %arg9[%c0_321, %c0_322, %c0_323] : memref<2x256x128xf32, #tpu.memory_space<vmem>>, vector<1x256x128xf32>
    %318 = vector.shape_cast %317 : vector<1x256x128xf32> to vector<256x128xf32>
    %319 = arith.addf %318, %316 : vector<256x128xf32>
    %c0_324 = arith.constant 0 : index
    %c0_325 = arith.constant 0 : index
    %c0_326 = arith.constant 0 : index
    %320 = vector.load %arg9[%c0_324, %c0_325, %c0_326] : memref<2x256x128xf32, #tpu.memory_space<vmem>>, vector<1x256x128xf32>
    %321 = vector.shape_cast %320 : vector<1x256x128xf32> to vector<256x128xf32>
    %322 = vector.shape_cast %319 : vector<256x128xf32> to vector<1x256x128xf32>
    tpu.vector_store %arg9[%c0_324, %c0_325, %c0_326], %322 {strides = array<i32>} : memref<2x256x128xf32, #tpu.memory_space<vmem>>, vector<1x256x128xf32>,
    %c0_327 = arith.constant 0 : index
    %c1_328 = arith.constant 1 : index
    %c0_329 = arith.constant 0 : index
    %c0_330 = arith.constant 0 : index
    %323 = vector.load %arg8[%c0_327, %c1_328, %c0_329, %c0_330] : memref<2x18x18x128xf32, #tpu.memory_space<vmem>>, vector<1x16x16x128xf32>
    %324 = vector.shape_cast %323 : vector<1x16x16x128xf32> to vector<16x16x128xf32>
    %325 = vector.shape_cast %324 : vector<16x16x128xf32> to vector<256x128xf32>
    %326 = arith.truncf %325 : vector<256x128xf32> to vector<256x128xbf16>
    %c3_331 = arith.constant 3 : index
    %c0_332 = arith.constant 0 : index
    %c0_333 = arith.constant 0 : index
    %327 = vector.load %arg5[%c3_331, %c0_332, %c0_333] : memref<9x128x128xbf16, #tpu.memory_space<vmem>>, vector<1x128x128xbf16>
    %328 = vector.shape_cast %327 : vector<1x128x128xbf16> to vector<128x128xbf16>
    %cst_334 = arith.constant dense<0.000000e+00> : vector<256x128xf32>
    %329 = tpu.matmul %326, %328, %cst_334 {dimension_numbers = #tpu.dot_dimension_numbers<[1], [0], [0], [1], [0, 0, 1, 1], [], []>} : vector<256x128xbf16>, vector<128x128xbf16>, vector<256x128xf32> -> vector<256x128xf32>
    %c0_335 = arith.constant 0 : index
    %c0_336 = arith.constant 0 : index
    %c0_337 = arith.constant 0 : index
    %330 = vector.load %arg9[%c0_335, %c0_336, %c0_337] : memref<2x256x128xf32, #tpu.memory_space<vmem>>, vector<1x256x128xf32>
    %331 = vector.shape_cast %330 : vector<1x256x128xf32> to vector<256x128xf32>
    %332 = arith.addf %331, %329 : vector<256x128xf32>
    %c0_338 = arith.constant 0 : index
    %c0_339 = arith.constant 0 : index
    %c0_340 = arith.constant 0 : index
    %333 = vector.load %arg9[%c0_338, %c0_339, %c0_340] : memref<2x256x128xf32, #tpu.memory_space<vmem>>, vector<1x256x128xf32>
    %334 = vector.shape_cast %333 : vector<1x256x128xf32> to vector<256x128xf32>
    %335 = vector.shape_cast %332 : vector<256x128xf32> to vector<1x256x128xf32>
    tpu.vector_store %arg9[%c0_338, %c0_339, %c0_340], %335 {strides = array<i32>} : memref<2x256x128xf32, #tpu.memory_space<vmem>>, vector<1x256x128xf32>,
    %c0_341 = arith.constant 0 : index
    %c1_342 = arith.constant 1 : index
    %c1_343 = arith.constant 1 : index
    %c0_344 = arith.constant 0 : index
    %336 = vector.load %arg8[%c0_341, %c1_342, %c1_343, %c0_344] : memref<2x18x18x128xf32, #tpu.memory_space<vmem>>, vector<1x16x16x128xf32>
    %337 = vector.shape_cast %336 : vector<1x16x16x128xf32> to vector<16x16x128xf32>
    %338 = vector.shape_cast %337 : vector<16x16x128xf32> to vector<256x128xf32>
    %339 = arith.truncf %338 : vector<256x128xf32> to vector<256x128xbf16>
    %c4_345 = arith.constant 4 : index
    %c0_346 = arith.constant 0 : index
    %c0_347 = arith.constant 0 : index
    %340 = vector.load %arg5[%c4_345, %c0_346, %c0_347] : memref<9x128x128xbf16, #tpu.memory_space<vmem>>, vector<1x128x128xbf16>
    %341 = vector.shape_cast %340 : vector<1x128x128xbf16> to vector<128x128xbf16>
    %cst_348 = arith.constant dense<0.000000e+00> : vector<256x128xf32>
    %342 = tpu.matmul %339, %341, %cst_348 {dimension_numbers = #tpu.dot_dimension_numbers<[1], [0], [0], [1], [0, 0, 1, 1], [], []>} : vector<256x128xbf16>, vector<128x128xbf16>, vector<256x128xf32> -> vector<256x128xf32>
    %c0_349 = arith.constant 0 : index
    %c0_350 = arith.constant 0 : index
    %c0_351 = arith.constant 0 : index
    %343 = vector.load %arg9[%c0_349, %c0_350, %c0_351] : memref<2x256x128xf32, #tpu.memory_space<vmem>>, vector<1x256x128xf32>
    %344 = vector.shape_cast %343 : vector<1x256x128xf32> to vector<256x128xf32>
    %345 = arith.addf %344, %342 : vector<256x128xf32>
    %c0_352 = arith.constant 0 : index
    %c0_353 = arith.constant 0 : index
    %c0_354 = arith.constant 0 : index
    %346 = vector.load %arg9[%c0_352, %c0_353, %c0_354] : memref<2x256x128xf32, #tpu.memory_space<vmem>>, vector<1x256x128xf32>
    %347 = vector.shape_cast %346 : vector<1x256x128xf32> to vector<256x128xf32>
    %348 = vector.shape_cast %345 : vector<256x128xf32> to vector<1x256x128xf32>
    tpu.vector_store %arg9[%c0_352, %c0_353, %c0_354], %348 {strides = array<i32>} : memref<2x256x128xf32, #tpu.memory_space<vmem>>, vector<1x256x128xf32>,
    %c0_355 = arith.constant 0 : index
    %c1_356 = arith.constant 1 : index
    %c2_357 = arith.constant 2 : index
    %c0_358 = arith.constant 0 : index
    %349 = vector.load %arg8[%c0_355, %c1_356, %c2_357, %c0_358] : memref<2x18x18x128xf32, #tpu.memory_space<vmem>>, vector<1x16x16x128xf32>
    %350 = vector.shape_cast %349 : vector<1x16x16x128xf32> to vector<16x16x128xf32>
    %351 = vector.shape_cast %350 : vector<16x16x128xf32> to vector<256x128xf32>
    %352 = arith.truncf %351 : vector<256x128xf32> to vector<256x128xbf16>
    %c5_359 = arith.constant 5 : index
    %c0_360 = arith.constant 0 : index
    %c0_361 = arith.constant 0 : index
    %353 = vector.load %arg5[%c5_359, %c0_360, %c0_361] : memref<9x128x128xbf16, #tpu.memory_space<vmem>>, vector<1x128x128xbf16>
    %354 = vector.shape_cast %353 : vector<1x128x128xbf16> to vector<128x128xbf16>
    %cst_362 = arith.constant dense<0.000000e+00> : vector<256x128xf32>
    %355 = tpu.matmul %352, %354, %cst_362 {dimension_numbers = #tpu.dot_dimension_numbers<[1], [0], [0], [1], [0, 0, 1, 1], [], []>} : vector<256x128xbf16>, vector<128x128xbf16>, vector<256x128xf32> -> vector<256x128xf32>
    %c0_363 = arith.constant 0 : index
    %c0_364 = arith.constant 0 : index
    %c0_365 = arith.constant 0 : index
    %356 = vector.load %arg9[%c0_363, %c0_364, %c0_365] : memref<2x256x128xf32, #tpu.memory_space<vmem>>, vector<1x256x128xf32>
    %357 = vector.shape_cast %356 : vector<1x256x128xf32> to vector<256x128xf32>
    %358 = arith.addf %357, %355 : vector<256x128xf32>
    %c0_366 = arith.constant 0 : index
    %c0_367 = arith.constant 0 : index
    %c0_368 = arith.constant 0 : index
    %359 = vector.load %arg9[%c0_366, %c0_367, %c0_368] : memref<2x256x128xf32, #tpu.memory_space<vmem>>, vector<1x256x128xf32>
    %360 = vector.shape_cast %359 : vector<1x256x128xf32> to vector<256x128xf32>
    %361 = vector.shape_cast %358 : vector<256x128xf32> to vector<1x256x128xf32>
    tpu.vector_store %arg9[%c0_366, %c0_367, %c0_368], %361 {strides = array<i32>} : memref<2x256x128xf32, #tpu.memory_space<vmem>>, vector<1x256x128xf32>,
    %c0_369 = arith.constant 0 : index
    %c2_370 = arith.constant 2 : index
    %c0_371 = arith.constant 0 : index
    %c0_372 = arith.constant 0 : index
    %362 = vector.load %arg8[%c0_369, %c2_370, %c0_371, %c0_372] : memref<2x18x18x128xf32, #tpu.memory_space<vmem>>, vector<1x16x16x128xf32>
    %363 = vector.shape_cast %362 : vector<1x16x16x128xf32> to vector<16x16x128xf32>
    %364 = vector.shape_cast %363 : vector<16x16x128xf32> to vector<256x128xf32>
    %365 = arith.truncf %364 : vector<256x128xf32> to vector<256x128xbf16>
    %c6_373 = arith.constant 6 : index
    %c0_374 = arith.constant 0 : index
    %c0_375 = arith.constant 0 : index
    %366 = vector.load %arg5[%c6_373, %c0_374, %c0_375] : memref<9x128x128xbf16, #tpu.memory_space<vmem>>, vector<1x128x128xbf16>
    %367 = vector.shape_cast %366 : vector<1x128x128xbf16> to vector<128x128xbf16>
    %cst_376 = arith.constant dense<0.000000e+00> : vector<256x128xf32>
    %368 = tpu.matmul %365, %367, %cst_376 {dimension_numbers = #tpu.dot_dimension_numbers<[1], [0], [0], [1], [0, 0, 1, 1], [], []>} : vector<256x128xbf16>, vector<128x128xbf16>, vector<256x128xf32> -> vector<256x128xf32>
    %c0_377 = arith.constant 0 : index
    %c0_378 = arith.constant 0 : index
    %c0_379 = arith.constant 0 : index
    %369 = vector.load %arg9[%c0_377, %c0_378, %c0_379] : memref<2x256x128xf32, #tpu.memory_space<vmem>>, vector<1x256x128xf32>
    %370 = vector.shape_cast %369 : vector<1x256x128xf32> to vector<256x128xf32>
    %371 = arith.addf %370, %368 : vector<256x128xf32>
    %c0_380 = arith.constant 0 : index
    %c0_381 = arith.constant 0 : index
    %c0_382 = arith.constant 0 : index
    %372 = vector.load %arg9[%c0_380, %c0_381, %c0_382] : memref<2x256x128xf32, #tpu.memory_space<vmem>>, vector<1x256x128xf32>
    %373 = vector.shape_cast %372 : vector<1x256x128xf32> to vector<256x128xf32>
    %374 = vector.shape_cast %371 : vector<256x128xf32> to vector<1x256x128xf32>
    tpu.vector_store %arg9[%c0_380, %c0_381, %c0_382], %374 {strides = array<i32>} : memref<2x256x128xf32, #tpu.memory_space<vmem>>, vector<1x256x128xf32>,
    %c0_383 = arith.constant 0 : index
    %c2_384 = arith.constant 2 : index
    %c1_385 = arith.constant 1 : index
    %c0_386 = arith.constant 0 : index
    %375 = vector.load %arg8[%c0_383, %c2_384, %c1_385, %c0_386] : memref<2x18x18x128xf32, #tpu.memory_space<vmem>>, vector<1x16x16x128xf32>
    %376 = vector.shape_cast %375 : vector<1x16x16x128xf32> to vector<16x16x128xf32>
    %377 = vector.shape_cast %376 : vector<16x16x128xf32> to vector<256x128xf32>
    %378 = arith.truncf %377 : vector<256x128xf32> to vector<256x128xbf16>
    %c7_387 = arith.constant 7 : index
    %c0_388 = arith.constant 0 : index
    %c0_389 = arith.constant 0 : index
    %379 = vector.load %arg5[%c7_387, %c0_388, %c0_389] : memref<9x128x128xbf16, #tpu.memory_space<vmem>>, vector<1x128x128xbf16>
    %380 = vector.shape_cast %379 : vector<1x128x128xbf16> to vector<128x128xbf16>
    %cst_390 = arith.constant dense<0.000000e+00> : vector<256x128xf32>
    %381 = tpu.matmul %378, %380, %cst_390 {dimension_numbers = #tpu.dot_dimension_numbers<[1], [0], [0], [1], [0, 0, 1, 1], [], []>} : vector<256x128xbf16>, vector<128x128xbf16>, vector<256x128xf32> -> vector<256x128xf32>
    %c0_391 = arith.constant 0 : index
    %c0_392 = arith.constant 0 : index
    %c0_393 = arith.constant 0 : index
    %382 = vector.load %arg9[%c0_391, %c0_392, %c0_393] : memref<2x256x128xf32, #tpu.memory_space<vmem>>, vector<1x256x128xf32>
    %383 = vector.shape_cast %382 : vector<1x256x128xf32> to vector<256x128xf32>
    %384 = arith.addf %383, %381 : vector<256x128xf32>
    %c0_394 = arith.constant 0 : index
    %c0_395 = arith.constant 0 : index
    %c0_396 = arith.constant 0 : index
    %385 = vector.load %arg9[%c0_394, %c0_395, %c0_396] : memref<2x256x128xf32, #tpu.memory_space<vmem>>, vector<1x256x128xf32>
    %386 = vector.shape_cast %385 : vector<1x256x128xf32> to vector<256x128xf32>
    %387 = vector.shape_cast %384 : vector<256x128xf32> to vector<1x256x128xf32>
    tpu.vector_store %arg9[%c0_394, %c0_395, %c0_396], %387 {strides = array<i32>} : memref<2x256x128xf32, #tpu.memory_space<vmem>>, vector<1x256x128xf32>,
    %c0_397 = arith.constant 0 : index
    %c2_398 = arith.constant 2 : index
    %c2_399 = arith.constant 2 : index
    %c0_400 = arith.constant 0 : index
    %388 = vector.load %arg8[%c0_397, %c2_398, %c2_399, %c0_400] : memref<2x18x18x128xf32, #tpu.memory_space<vmem>>, vector<1x16x16x128xf32>
    %389 = vector.shape_cast %388 : vector<1x16x16x128xf32> to vector<16x16x128xf32>
    %390 = vector.shape_cast %389 : vector<16x16x128xf32> to vector<256x128xf32>
    %391 = arith.truncf %390 : vector<256x128xf32> to vector<256x128xbf16>
    %c8_401 = arith.constant 8 : index
    %c0_402 = arith.constant 0 : index
    %c0_403 = arith.constant 0 : index
    %392 = vector.load %arg5[%c8_401, %c0_402, %c0_403] : memref<9x128x128xbf16, #tpu.memory_space<vmem>>, vector<1x128x128xbf16>
    %393 = vector.shape_cast %392 : vector<1x128x128xbf16> to vector<128x128xbf16>
    %cst_404 = arith.constant dense<0.000000e+00> : vector<256x128xf32>
    %394 = tpu.matmul %391, %393, %cst_404 {dimension_numbers = #tpu.dot_dimension_numbers<[1], [0], [0], [1], [0, 0, 1, 1], [], []>} : vector<256x128xbf16>, vector<128x128xbf16>, vector<256x128xf32> -> vector<256x128xf32>
    %c0_405 = arith.constant 0 : index
    %c0_406 = arith.constant 0 : index
    %c0_407 = arith.constant 0 : index
    %395 = vector.load %arg9[%c0_405, %c0_406, %c0_407] : memref<2x256x128xf32, #tpu.memory_space<vmem>>, vector<1x256x128xf32>
    %396 = vector.shape_cast %395 : vector<1x256x128xf32> to vector<256x128xf32>
    %397 = arith.addf %396, %394 : vector<256x128xf32>
    %c0_408 = arith.constant 0 : index
    %c0_409 = arith.constant 0 : index
    %c0_410 = arith.constant 0 : index
    %398 = vector.load %arg9[%c0_408, %c0_409, %c0_410] : memref<2x256x128xf32, #tpu.memory_space<vmem>>, vector<1x256x128xf32>
    %399 = vector.shape_cast %398 : vector<1x256x128xf32> to vector<256x128xf32>
    %400 = vector.shape_cast %397 : vector<256x128xf32> to vector<1x256x128xf32>
    tpu.vector_store %arg9[%c0_408, %c0_409, %c0_410], %400 {strides = array<i32>} : memref<2x256x128xf32, #tpu.memory_space<vmem>>, vector<1x256x128xf32>,
    %c1_411 = arith.constant 1 : index
    %c0_412 = arith.constant 0 : index
    %c0_413 = arith.constant 0 : index
    %c0_414 = arith.constant 0 : index
    %401 = vector.load %arg8[%c1_411, %c0_412, %c0_413, %c0_414] : memref<2x18x18x128xf32, #tpu.memory_space<vmem>>, vector<1x16x16x128xf32>
    %402 = vector.shape_cast %401 : vector<1x16x16x128xf32> to vector<16x16x128xf32>
    %403 = vector.shape_cast %402 : vector<16x16x128xf32> to vector<256x128xf32>
    %404 = arith.truncf %403 : vector<256x128xf32> to vector<256x128xbf16>
    %c0_415 = arith.constant 0 : index
    %c0_416 = arith.constant 0 : index
    %c0_417 = arith.constant 0 : index
    %405 = vector.load %arg5[%c0_415, %c0_416, %c0_417] : memref<9x128x128xbf16, #tpu.memory_space<vmem>>, vector<1x128x128xbf16>
    %406 = vector.shape_cast %405 : vector<1x128x128xbf16> to vector<128x128xbf16>
    %cst_418 = arith.constant dense<0.000000e+00> : vector<256x128xf32>
    %407 = tpu.matmul %404, %406, %cst_418 {dimension_numbers = #tpu.dot_dimension_numbers<[1], [0], [0], [1], [0, 0, 1, 1], [], []>} : vector<256x128xbf16>, vector<128x128xbf16>, vector<256x128xf32> -> vector<256x128xf32>
    %c1_419 = arith.constant 1 : index
    %c0_420 = arith.constant 0 : index
    %c0_421 = arith.constant 0 : index
    %408 = vector.load %arg9[%c1_419, %c0_420, %c0_421] : memref<2x256x128xf32, #tpu.memory_space<vmem>>, vector<1x256x128xf32>
    %409 = vector.shape_cast %408 : vector<1x256x128xf32> to vector<256x128xf32>
    %410 = vector.shape_cast %407 : vector<256x128xf32> to vector<1x256x128xf32>
    tpu.vector_store %arg9[%c1_419, %c0_420, %c0_421], %410 {strides = array<i32>} : memref<2x256x128xf32, #tpu.memory_space<vmem>>, vector<1x256x128xf32>,
    %c1_422 = arith.constant 1 : index
    %c0_423 = arith.constant 0 : index
    %c1_424 = arith.constant 1 : index
    %c0_425 = arith.constant 0 : index
    %411 = vector.load %arg8[%c1_422, %c0_423, %c1_424, %c0_425] : memref<2x18x18x128xf32, #tpu.memory_space<vmem>>, vector<1x16x16x128xf32>
    %412 = vector.shape_cast %411 : vector<1x16x16x128xf32> to vector<16x16x128xf32>
    %413 = vector.shape_cast %412 : vector<16x16x128xf32> to vector<256x128xf32>
    %414 = arith.truncf %413 : vector<256x128xf32> to vector<256x128xbf16>
    %c1_426 = arith.constant 1 : index
    %c0_427 = arith.constant 0 : index
    %c0_428 = arith.constant 0 : index
    %415 = vector.load %arg5[%c1_426, %c0_427, %c0_428] : memref<9x128x128xbf16, #tpu.memory_space<vmem>>, vector<1x128x128xbf16>
    %416 = vector.shape_cast %415 : vector<1x128x128xbf16> to vector<128x128xbf16>
    %cst_429 = arith.constant dense<0.000000e+00> : vector<256x128xf32>
    %417 = tpu.matmul %414, %416, %cst_429 {dimension_numbers = #tpu.dot_dimension_numbers<[1], [0], [0], [1], [0, 0, 1, 1], [], []>} : vector<256x128xbf16>, vector<128x128xbf16>, vector<256x128xf32> -> vector<256x128xf32>
    %c1_430 = arith.constant 1 : index
    %c0_431 = arith.constant 0 : index
    %c0_432 = arith.constant 0 : index
    %418 = vector.load %arg9[%c1_430, %c0_431, %c0_432] : memref<2x256x128xf32, #tpu.memory_space<vmem>>, vector<1x256x128xf32>
    %419 = vector.shape_cast %418 : vector<1x256x128xf32> to vector<256x128xf32>
    %420 = arith.addf %419, %417 : vector<256x128xf32>
    %c1_433 = arith.constant 1 : index
    %c0_434 = arith.constant 0 : index
    %c0_435 = arith.constant 0 : index
    %421 = vector.load %arg9[%c1_433, %c0_434, %c0_435] : memref<2x256x128xf32, #tpu.memory_space<vmem>>, vector<1x256x128xf32>
    %422 = vector.shape_cast %421 : vector<1x256x128xf32> to vector<256x128xf32>
    %423 = vector.shape_cast %420 : vector<256x128xf32> to vector<1x256x128xf32>
    tpu.vector_store %arg9[%c1_433, %c0_434, %c0_435], %423 {strides = array<i32>} : memref<2x256x128xf32, #tpu.memory_space<vmem>>, vector<1x256x128xf32>,
    %c1_436 = arith.constant 1 : index
    %c0_437 = arith.constant 0 : index
    %c2_438 = arith.constant 2 : index
    %c0_439 = arith.constant 0 : index
    %424 = vector.load %arg8[%c1_436, %c0_437, %c2_438, %c0_439] : memref<2x18x18x128xf32, #tpu.memory_space<vmem>>, vector<1x16x16x128xf32>
    %425 = vector.shape_cast %424 : vector<1x16x16x128xf32> to vector<16x16x128xf32>
    %426 = vector.shape_cast %425 : vector<16x16x128xf32> to vector<256x128xf32>
    %427 = arith.truncf %426 : vector<256x128xf32> to vector<256x128xbf16>
    %c2_440 = arith.constant 2 : index
    %c0_441 = arith.constant 0 : index
    %c0_442 = arith.constant 0 : index
    %428 = vector.load %arg5[%c2_440, %c0_441, %c0_442] : memref<9x128x128xbf16, #tpu.memory_space<vmem>>, vector<1x128x128xbf16>
    %429 = vector.shape_cast %428 : vector<1x128x128xbf16> to vector<128x128xbf16>
    %cst_443 = arith.constant dense<0.000000e+00> : vector<256x128xf32>
    %430 = tpu.matmul %427, %429, %cst_443 {dimension_numbers = #tpu.dot_dimension_numbers<[1], [0], [0], [1], [0, 0, 1, 1], [], []>} : vector<256x128xbf16>, vector<128x128xbf16>, vector<256x128xf32> -> vector<256x128xf32>
    %c1_444 = arith.constant 1 : index
    %c0_445 = arith.constant 0 : index
    %c0_446 = arith.constant 0 : index
    %431 = vector.load %arg9[%c1_444, %c0_445, %c0_446] : memref<2x256x128xf32, #tpu.memory_space<vmem>>, vector<1x256x128xf32>
    %432 = vector.shape_cast %431 : vector<1x256x128xf32> to vector<256x128xf32>
    %433 = arith.addf %432, %430 : vector<256x128xf32>
    %c1_447 = arith.constant 1 : index
    %c0_448 = arith.constant 0 : index
    %c0_449 = arith.constant 0 : index
    %434 = vector.load %arg9[%c1_447, %c0_448, %c0_449] : memref<2x256x128xf32, #tpu.memory_space<vmem>>, vector<1x256x128xf32>
    %435 = vector.shape_cast %434 : vector<1x256x128xf32> to vector<256x128xf32>
    %436 = vector.shape_cast %433 : vector<256x128xf32> to vector<1x256x128xf32>
    tpu.vector_store %arg9[%c1_447, %c0_448, %c0_449], %436 {strides = array<i32>} : memref<2x256x128xf32, #tpu.memory_space<vmem>>, vector<1x256x128xf32>,
    %c1_450 = arith.constant 1 : index
    %c1_451 = arith.constant 1 : index
    %c0_452 = arith.constant 0 : index
    %c0_453 = arith.constant 0 : index
    %437 = vector.load %arg8[%c1_450, %c1_451, %c0_452, %c0_453] : memref<2x18x18x128xf32, #tpu.memory_space<vmem>>, vector<1x16x16x128xf32>
    %438 = vector.shape_cast %437 : vector<1x16x16x128xf32> to vector<16x16x128xf32>
    %439 = vector.shape_cast %438 : vector<16x16x128xf32> to vector<256x128xf32>
    %440 = arith.truncf %439 : vector<256x128xf32> to vector<256x128xbf16>
    %c3_454 = arith.constant 3 : index
    %c0_455 = arith.constant 0 : index
    %c0_456 = arith.constant 0 : index
    %441 = vector.load %arg5[%c3_454, %c0_455, %c0_456] : memref<9x128x128xbf16, #tpu.memory_space<vmem>>, vector<1x128x128xbf16>
    %442 = vector.shape_cast %441 : vector<1x128x128xbf16> to vector<128x128xbf16>
    %cst_457 = arith.constant dense<0.000000e+00> : vector<256x128xf32>
    %443 = tpu.matmul %440, %442, %cst_457 {dimension_numbers = #tpu.dot_dimension_numbers<[1], [0], [0], [1], [0, 0, 1, 1], [], []>} : vector<256x128xbf16>, vector<128x128xbf16>, vector<256x128xf32> -> vector<256x128xf32>
    %c1_458 = arith.constant 1 : index
    %c0_459 = arith.constant 0 : index
    %c0_460 = arith.constant 0 : index
    %444 = vector.load %arg9[%c1_458, %c0_459, %c0_460] : memref<2x256x128xf32, #tpu.memory_space<vmem>>, vector<1x256x128xf32>
    %445 = vector.shape_cast %444 : vector<1x256x128xf32> to vector<256x128xf32>
    %446 = arith.addf %445, %443 : vector<256x128xf32>
    %c1_461 = arith.constant 1 : index
    %c0_462 = arith.constant 0 : index
    %c0_463 = arith.constant 0 : index
    %447 = vector.load %arg9[%c1_461, %c0_462, %c0_463] : memref<2x256x128xf32, #tpu.memory_space<vmem>>, vector<1x256x128xf32>
    %448 = vector.shape_cast %447 : vector<1x256x128xf32> to vector<256x128xf32>
    %449 = vector.shape_cast %446 : vector<256x128xf32> to vector<1x256x128xf32>
    tpu.vector_store %arg9[%c1_461, %c0_462, %c0_463], %449 {strides = array<i32>} : memref<2x256x128xf32, #tpu.memory_space<vmem>>, vector<1x256x128xf32>,
    %c1_464 = arith.constant 1 : index
    %c1_465 = arith.constant 1 : index
    %c1_466 = arith.constant 1 : index
    %c0_467 = arith.constant 0 : index
    %450 = vector.load %arg8[%c1_464, %c1_465, %c1_466, %c0_467] : memref<2x18x18x128xf32, #tpu.memory_space<vmem>>, vector<1x16x16x128xf32>
    %451 = vector.shape_cast %450 : vector<1x16x16x128xf32> to vector<16x16x128xf32>
    %452 = vector.shape_cast %451 : vector<16x16x128xf32> to vector<256x128xf32>
    %453 = arith.truncf %452 : vector<256x128xf32> to vector<256x128xbf16>
    %c4_468 = arith.constant 4 : index
    %c0_469 = arith.constant 0 : index
    %c0_470 = arith.constant 0 : index
    %454 = vector.load %arg5[%c4_468, %c0_469, %c0_470] : memref<9x128x128xbf16, #tpu.memory_space<vmem>>, vector<1x128x128xbf16>
    %455 = vector.shape_cast %454 : vector<1x128x128xbf16> to vector<128x128xbf16>
    %cst_471 = arith.constant dense<0.000000e+00> : vector<256x128xf32>
    %456 = tpu.matmul %453, %455, %cst_471 {dimension_numbers = #tpu.dot_dimension_numbers<[1], [0], [0], [1], [0, 0, 1, 1], [], []>} : vector<256x128xbf16>, vector<128x128xbf16>, vector<256x128xf32> -> vector<256x128xf32>
    %c1_472 = arith.constant 1 : index
    %c0_473 = arith.constant 0 : index
    %c0_474 = arith.constant 0 : index
    %457 = vector.load %arg9[%c1_472, %c0_473, %c0_474] : memref<2x256x128xf32, #tpu.memory_space<vmem>>, vector<1x256x128xf32>
    %458 = vector.shape_cast %457 : vector<1x256x128xf32> to vector<256x128xf32>
    %459 = arith.addf %458, %456 : vector<256x128xf32>
    %c1_475 = arith.constant 1 : index
    %c0_476 = arith.constant 0 : index
    %c0_477 = arith.constant 0 : index
    %460 = vector.load %arg9[%c1_475, %c0_476, %c0_477] : memref<2x256x128xf32, #tpu.memory_space<vmem>>, vector<1x256x128xf32>
    %461 = vector.shape_cast %460 : vector<1x256x128xf32> to vector<256x128xf32>
    %462 = vector.shape_cast %459 : vector<256x128xf32> to vector<1x256x128xf32>
    tpu.vector_store %arg9[%c1_475, %c0_476, %c0_477], %462 {strides = array<i32>} : memref<2x256x128xf32, #tpu.memory_space<vmem>>, vector<1x256x128xf32>,
    %c1_478 = arith.constant 1 : index
    %c1_479 = arith.constant 1 : index
    %c2_480 = arith.constant 2 : index
    %c0_481 = arith.constant 0 : index
    %463 = vector.load %arg8[%c1_478, %c1_479, %c2_480, %c0_481] : memref<2x18x18x128xf32, #tpu.memory_space<vmem>>, vector<1x16x16x128xf32>
    %464 = vector.shape_cast %463 : vector<1x16x16x128xf32> to vector<16x16x128xf32>
    %465 = vector.shape_cast %464 : vector<16x16x128xf32> to vector<256x128xf32>
    %466 = arith.truncf %465 : vector<256x128xf32> to vector<256x128xbf16>
    %c5_482 = arith.constant 5 : index
    %c0_483 = arith.constant 0 : index
    %c0_484 = arith.constant 0 : index
    %467 = vector.load %arg5[%c5_482, %c0_483, %c0_484] : memref<9x128x128xbf16, #tpu.memory_space<vmem>>, vector<1x128x128xbf16>
    %468 = vector.shape_cast %467 : vector<1x128x128xbf16> to vector<128x128xbf16>
    %cst_485 = arith.constant dense<0.000000e+00> : vector<256x128xf32>
    %469 = tpu.matmul %466, %468, %cst_485 {dimension_numbers = #tpu.dot_dimension_numbers<[1], [0], [0], [1], [0, 0, 1, 1], [], []>} : vector<256x128xbf16>, vector<128x128xbf16>, vector<256x128xf32> -> vector<256x128xf32>
    %c1_486 = arith.constant 1 : index
    %c0_487 = arith.constant 0 : index
    %c0_488 = arith.constant 0 : index
    %470 = vector.load %arg9[%c1_486, %c0_487, %c0_488] : memref<2x256x128xf32, #tpu.memory_space<vmem>>, vector<1x256x128xf32>
    %471 = vector.shape_cast %470 : vector<1x256x128xf32> to vector<256x128xf32>
    %472 = arith.addf %471, %469 : vector<256x128xf32>
    %c1_489 = arith.constant 1 : index
    %c0_490 = arith.constant 0 : index
    %c0_491 = arith.constant 0 : index
    %473 = vector.load %arg9[%c1_489, %c0_490, %c0_491] : memref<2x256x128xf32, #tpu.memory_space<vmem>>, vector<1x256x128xf32>
    %474 = vector.shape_cast %473 : vector<1x256x128xf32> to vector<256x128xf32>
    %475 = vector.shape_cast %472 : vector<256x128xf32> to vector<1x256x128xf32>
    tpu.vector_store %arg9[%c1_489, %c0_490, %c0_491], %475 {strides = array<i32>} : memref<2x256x128xf32, #tpu.memory_space<vmem>>, vector<1x256x128xf32>,
    %c1_492 = arith.constant 1 : index
    %c2_493 = arith.constant 2 : index
    %c0_494 = arith.constant 0 : index
    %c0_495 = arith.constant 0 : index
    %476 = vector.load %arg8[%c1_492, %c2_493, %c0_494, %c0_495] : memref<2x18x18x128xf32, #tpu.memory_space<vmem>>, vector<1x16x16x128xf32>
    %477 = vector.shape_cast %476 : vector<1x16x16x128xf32> to vector<16x16x128xf32>
    %478 = vector.shape_cast %477 : vector<16x16x128xf32> to vector<256x128xf32>
    %479 = arith.truncf %478 : vector<256x128xf32> to vector<256x128xbf16>
    %c6_496 = arith.constant 6 : index
    %c0_497 = arith.constant 0 : index
    %c0_498 = arith.constant 0 : index
    %480 = vector.load %arg5[%c6_496, %c0_497, %c0_498] : memref<9x128x128xbf16, #tpu.memory_space<vmem>>, vector<1x128x128xbf16>
    %481 = vector.shape_cast %480 : vector<1x128x128xbf16> to vector<128x128xbf16>
    %cst_499 = arith.constant dense<0.000000e+00> : vector<256x128xf32>
    %482 = tpu.matmul %479, %481, %cst_499 {dimension_numbers = #tpu.dot_dimension_numbers<[1], [0], [0], [1], [0, 0, 1, 1], [], []>} : vector<256x128xbf16>, vector<128x128xbf16>, vector<256x128xf32> -> vector<256x128xf32>
    %c1_500 = arith.constant 1 : index
    %c0_501 = arith.constant 0 : index
    %c0_502 = arith.constant 0 : index
    %483 = vector.load %arg9[%c1_500, %c0_501, %c0_502] : memref<2x256x128xf32, #tpu.memory_space<vmem>>, vector<1x256x128xf32>
    %484 = vector.shape_cast %483 : vector<1x256x128xf32> to vector<256x128xf32>
    %485 = arith.addf %484, %482 : vector<256x128xf32>
    %c1_503 = arith.constant 1 : index
    %c0_504 = arith.constant 0 : index
    %c0_505 = arith.constant 0 : index
    %486 = vector.load %arg9[%c1_503, %c0_504, %c0_505] : memref<2x256x128xf32, #tpu.memory_space<vmem>>, vector<1x256x128xf32>
    %487 = vector.shape_cast %486 : vector<1x256x128xf32> to vector<256x128xf32>
    %488 = vector.shape_cast %485 : vector<256x128xf32> to vector<1x256x128xf32>
    tpu.vector_store %arg9[%c1_503, %c0_504, %c0_505], %488 {strides = array<i32>} : memref<2x256x128xf32, #tpu.memory_space<vmem>>, vector<1x256x128xf32>,
    %c1_506 = arith.constant 1 : index
    %c2_507 = arith.constant 2 : index
    %c1_508 = arith.constant 1 : index
    %c0_509 = arith.constant 0 : index
    %489 = vector.load %arg8[%c1_506, %c2_507, %c1_508, %c0_509] : memref<2x18x18x128xf32, #tpu.memory_space<vmem>>, vector<1x16x16x128xf32>
    %490 = vector.shape_cast %489 : vector<1x16x16x128xf32> to vector<16x16x128xf32>
    %491 = vector.shape_cast %490 : vector<16x16x128xf32> to vector<256x128xf32>
    %492 = arith.truncf %491 : vector<256x128xf32> to vector<256x128xbf16>
    %c7_510 = arith.constant 7 : index
    %c0_511 = arith.constant 0 : index
    %c0_512 = arith.constant 0 : index
    %493 = vector.load %arg5[%c7_510, %c0_511, %c0_512] : memref<9x128x128xbf16, #tpu.memory_space<vmem>>, vector<1x128x128xbf16>
    %494 = vector.shape_cast %493 : vector<1x128x128xbf16> to vector<128x128xbf16>
    %cst_513 = arith.constant dense<0.000000e+00> : vector<256x128xf32>
    %495 = tpu.matmul %492, %494, %cst_513 {dimension_numbers = #tpu.dot_dimension_numbers<[1], [0], [0], [1], [0, 0, 1, 1], [], []>} : vector<256x128xbf16>, vector<128x128xbf16>, vector<256x128xf32> -> vector<256x128xf32>
    %c1_514 = arith.constant 1 : index
    %c0_515 = arith.constant 0 : index
    %c0_516 = arith.constant 0 : index
    %496 = vector.load %arg9[%c1_514, %c0_515, %c0_516] : memref<2x256x128xf32, #tpu.memory_space<vmem>>, vector<1x256x128xf32>
    %497 = vector.shape_cast %496 : vector<1x256x128xf32> to vector<256x128xf32>
    %498 = arith.addf %497, %495 : vector<256x128xf32>
    %c1_517 = arith.constant 1 : index
    %c0_518 = arith.constant 0 : index
    %c0_519 = arith.constant 0 : index
    %499 = vector.load %arg9[%c1_517, %c0_518, %c0_519] : memref<2x256x128xf32, #tpu.memory_space<vmem>>, vector<1x256x128xf32>
    %500 = vector.shape_cast %499 : vector<1x256x128xf32> to vector<256x128xf32>
    %501 = vector.shape_cast %498 : vector<256x128xf32> to vector<1x256x128xf32>
    tpu.vector_store %arg9[%c1_517, %c0_518, %c0_519], %501 {strides = array<i32>} : memref<2x256x128xf32, #tpu.memory_space<vmem>>, vector<1x256x128xf32>,
    %c1_520 = arith.constant 1 : index
    %c2_521 = arith.constant 2 : index
    %c2_522 = arith.constant 2 : index
    %c0_523 = arith.constant 0 : index
    %502 = vector.load %arg8[%c1_520, %c2_521, %c2_522, %c0_523] : memref<2x18x18x128xf32, #tpu.memory_space<vmem>>, vector<1x16x16x128xf32>
    %503 = vector.shape_cast %502 : vector<1x16x16x128xf32> to vector<16x16x128xf32>
    %504 = vector.shape_cast %503 : vector<16x16x128xf32> to vector<256x128xf32>
    %505 = arith.truncf %504 : vector<256x128xf32> to vector<256x128xbf16>
    %c8_524 = arith.constant 8 : index
    %c0_525 = arith.constant 0 : index
    %c0_526 = arith.constant 0 : index
    %506 = vector.load %arg5[%c8_524, %c0_525, %c0_526] : memref<9x128x128xbf16, #tpu.memory_space<vmem>>, vector<1x128x128xbf16>
    %507 = vector.shape_cast %506 : vector<1x128x128xbf16> to vector<128x128xbf16>
    %cst_527 = arith.constant dense<0.000000e+00> : vector<256x128xf32>
    %508 = tpu.matmul %505, %507, %cst_527 {dimension_numbers = #tpu.dot_dimension_numbers<[1], [0], [0], [1], [0, 0, 1, 1], [], []>} : vector<256x128xbf16>, vector<128x128xbf16>, vector<256x128xf32> -> vector<256x128xf32>
    %c1_528 = arith.constant 1 : index
    %c0_529 = arith.constant 0 : index
    %c0_530 = arith.constant 0 : index
    %509 = vector.load %arg9[%c1_528, %c0_529, %c0_530] : memref<2x256x128xf32, #tpu.memory_space<vmem>>, vector<1x256x128xf32>
    %510 = vector.shape_cast %509 : vector<1x256x128xf32> to vector<256x128xf32>
    %511 = arith.addf %510, %508 : vector<256x128xf32>
    %c1_531 = arith.constant 1 : index
    %c0_532 = arith.constant 0 : index
    %c0_533 = arith.constant 0 : index
    %512 = vector.load %arg9[%c1_531, %c0_532, %c0_533] : memref<2x256x128xf32, #tpu.memory_space<vmem>>, vector<1x256x128xf32>
    %513 = vector.shape_cast %512 : vector<1x256x128xf32> to vector<256x128xf32>
    %514 = vector.shape_cast %511 : vector<256x128xf32> to vector<1x256x128xf32>
    tpu.vector_store %arg9[%c1_531, %c0_532, %c0_533], %514 {strides = array<i32>} : memref<2x256x128xf32, #tpu.memory_space<vmem>>, vector<1x256x128xf32>,
    %c2_534 = arith.constant 2 : index
    %c0_535 = arith.constant 0 : index
    %515 = vector.load %arg6[%c2_534, %c0_535] : memref<4x128xf32, #tpu.memory_space<vmem>>, vector<1x128xf32>
    %c3_536 = arith.constant 3 : index
    %c0_537 = arith.constant 0 : index
    %516 = vector.load %arg6[%c3_536, %c0_537] : memref<4x128xf32, #tpu.memory_space<vmem>>, vector<1x128xf32>
    %c0_538 = arith.constant 0 : index
    %c0_539 = arith.constant 0 : index
    %c0_540 = arith.constant 0 : index
    %517 = vector.load %arg9[%c0_538, %c0_539, %c0_540] : memref<2x256x128xf32, #tpu.memory_space<vmem>>, vector<2x256x128xf32>
    %518 = vector.shape_cast %517 : vector<2x256x128xf32> to vector<512x128xf32>
    %cst_541 = arith.constant dense<0.000000e+00> : vector<128xf32>
    %519 = vector.multi_reduction <add>, %518, %cst_541 [0] : vector<512x128xf32> to vector<128xf32>
    %520 = vector.shape_cast %519 : vector<128xf32> to vector<1x128xf32>
    %cst_542 = arith.constant 0.001953125 : f32
    %521 = vector.broadcast %cst_542 : f32 to vector<1x128xf32>
    %522 = arith.mulf %520, %521 : vector<1x128xf32>
    %523 = vector.broadcast %522 : vector<1x128xf32> to vector<512x128xf32>
    %524 = arith.subf %518, %523 : vector<512x128xf32>
    %525 = arith.mulf %524, %524 : vector<512x128xf32>
    %cst_543 = arith.constant dense<0.000000e+00> : vector<128xf32>
    %526 = vector.multi_reduction <add>, %525, %cst_543 [0] : vector<512x128xf32> to vector<128xf32>
    %527 = vector.shape_cast %526 : vector<128xf32> to vector<1x128xf32>
    %cst_544 = arith.constant 0.001953125 : f32
    %528 = vector.broadcast %cst_544 : f32 to vector<1x128xf32>
    %529 = arith.mulf %527, %528 : vector<1x128xf32>
    %cst_545 = arith.constant 9.99999974E-6 : f32
    %530 = vector.broadcast %cst_545 : f32 to vector<1x128xf32>
    %531 = arith.addf %529, %530 : vector<1x128xf32>
    %532 = math.rsqrt %531 : vector<1x128xf32>
    %533 = arith.mulf %515, %532 : vector<1x128xf32>
    %534 = vector.broadcast %533 : vector<1x128xf32> to vector<512x128xf32>
    %535 = arith.mulf %524, %534 : vector<512x128xf32>
    %536 = vector.broadcast %516 : vector<1x128xf32> to vector<512x128xf32>
    %537 = arith.addf %535, %536 : vector<512x128xf32>
    %cst_546 = arith.constant 0.000000e+00 : f32
    %538 = vector.broadcast %cst_546 : f32 to vector<512x128xf32>
    %539 = arith.maximumf %537, %538 : vector<512x128xf32>
    %540 = vector.shape_cast %539 : vector<512x128xf32> to vector<2x256x128xf32>
    %c0_547 = arith.constant 0 : index
    %c0_548 = arith.constant 0 : index
    %c0_549 = arith.constant 0 : index
    %541 = vector.load %arg7[%c0_547, %c0_548, %c0_549] : memref<2x256x128xf32, #tpu.memory_space<vmem>>, vector<2x256x128xf32>
    tpu.vector_store %arg7[%c0_547, %c0_548, %c0_549], %540 {strides = array<i32>} : memref<2x256x128xf32, #tpu.memory_space<vmem>>, vector<2x256x128xf32>,
    return
  }
  func.func @transform_0(%arg0: i32) -> (i32, i32, i32) {
    %c0_i32 = arith.constant 0 : i32
    %c0_i32_0 = arith.constant 0 : i32
    %c0_i32_1 = arith.constant 0 : i32
    %c0_i32_2 = arith.constant 0 : i32
    return %c0_i32, %c0_i32_0, %c0_i32_1 : i32, i32, i32
  }
  func.func @transform_1(%arg0: i32) -> (i32, i32, i32) {
    %c0_i32 = arith.constant 0 : i32
    %c0_i32_0 = arith.constant 0 : i32
    %c0_i32_1 = arith.constant 0 : i32
    %c0_i32_2 = arith.constant 0 : i32
    return %c0_i32, %c0_i32_0, %c0_i32_1 : i32, i32, i32
  }
  func.func @transform_2(%arg0: i32) -> (i32, i32) {
    %c0_i32 = arith.constant 0 : i32
    %c0_i32_0 = arith.constant 0 : i32
    %c0_i32_1 = arith.constant 0 : i32
    return %c0_i32, %c0_i32_0 : i32, i32
  }
  func.func @transform_3(%arg0: i32) -> (i32, i32, i32) {
    %c0_i32 = arith.constant 0 : i32
    %c0_i32_0 = arith.constant 0 : i32
    %c0_i32_1 = arith.constant 0 : i32
    %c0_i32_2 = arith.constant 0 : i32
    return %c0_i32, %c0_i32_0, %c0_i32_1 : i32, i32, i32
  }
  func.func @transform_4(%arg0: i32) -> (i32, i32, i32) {
    %c0_i32 = arith.constant 0 : i32
    %c0_i32_0 = arith.constant 0 : i32
    %c0_i32_1 = arith.constant 0 : i32
    %c0_i32_2 = arith.constant 0 : i32
    return %c0_i32, %c0_i32_0, %c0_i32_1 : i32, i32, i32
  }
  func.func @transform_5(%arg0: i32) -> (i32, i32) {
    %c0_i32 = arith.constant 0 : i32
    %c0_i32_0 = arith.constant 0 : i32
    %c0_i32_1 = arith.constant 0 : i32
    return %c0_i32, %c0_i32_0 : i32, i32
  }
  func.func @transform_6(%arg0: i32) -> (i32, i32, i32) {
    %c0_i32 = arith.constant 0 : i32
    %c0_i32_0 = arith.constant 0 : i32
    %c0_i32_1 = arith.constant 0 : i32
    %c0_i32_2 = arith.constant 0 : i32
    return %c0_i32, %c0_i32_0, %c0_i32_1 : i32, i32, i32
  }
}

</mosaic_0001>

<bundles_post_ra>
// kernel: up_forward.1
= control target key start
LH: loop header
LB: loop body
LE: loop exit
PB: predicated region body
PF: predicated region fallthrough
CT: control target
= control target key end

     0   :  { %v20366_v3 = vmov 0.0   ;;  %vm172_vm0 = vcmask 523264   ;;  %s25073_s0 = inlined_call_operand.vmem [shape: f32[2,64,128], index: 0, kind: input, shape index: {}]   ;;  %s25074_s2 = inlined_call_operand.vmem [shape: f32[256,64], index: 2, kind: input, shape index: {}]   ;;  %s25075_s3 = inlined_call_operand.vmem [shape: bf16[9,128,128], index: 3, kind: input, shape index: {}]   ;;  %s25076_s1 = inlined_call_operand.vmem [shape: f32[2,256,128], index: 1, kind: input, shape index: {}]   ;;  %s25077_s4 = inlined_call_operand.vmem [shape: bf16[9,128,128], index: 4, kind: input, shape index: {}]   ;;  %s25078_s5 = inlined_call_operand.vmem [shape: f32[4,128], index: 5, kind: input, shape index: {}]   ;;  %s25079_s6 = inlined_call_operand.vmem [shape: f32[2,256,128], index: 6, kind: output, shape index: {}]  }
   0x1   :  { %v20405_v0 = vld [vmem:[%s25073_s0] sm:$0xff]  ;;  %v20410_v1 = vld [vmem:[%s25073_s0 + $0x8] sm:$0xff]  ;;  %28 = vst [vmem:[#allocation2 + $0x20] sm:$0xff] %v20366_v3  ;;  %29 = vst [vmem:[#allocation2 + $0x28] sm:$0x3] %v20366_v3 }
   0x2   :  { %v20415_v2 = vld [vmem:[%s25073_s0 + $0x40] sm:$0xff]  ;;  %24 = vst [vmem:[#allocation2] sm:$0xff] %v20366_v3  ;;  %25 = vst [vmem:[#allocation2 + $0x8] sm:$0xff] %v20366_v3  ;;  %v19011_v4 = vpack.c.bf16 %v20410_v1, %v20405_v0  ;;  %v15338_v5 = vld [vmem:[%s25073_s0 + $0x48] sm:$0xff] }
   0x3   :  { %26 = vst [vmem:[#allocation2 + $0x10] sm:$0x3] %v20366_v3  ;;  %27 = vst [vmem:[#allocation2 + $0x18] sm:$0xff] %v20366_v3  ;;  %v166_v6 = vld [vmem:[%s25073_s0 + $0x10] sm:$0xff]  ;;  %v167_v7 = vld [vmem:[%s25073_s0 + $0x18] sm:$0xff]  ;;  %v19027_v8 = vpack.c.bf16 %v15338_v5, %v20415_v2 }
   0x4   :  { %30 = vst [vmem:[#allocation2 + $0x30] sm:$0xff] %v20366_v3  ;;  %31 = vst [vmem:[#allocation2 + $0x38] sm:$0xff] %v20366_v3  ;;  %v19015_v9 = vpack.c.bf16 %v167_v7, %v166_v6  ;;  %v15339_v10 = vld [vmem:[%s25073_s0 + $0x50] sm:$0xff]  ;;  %v15340_v11 = vld [vmem:[%s25073_s0 + $0x58] sm:$0xff]  ;;  %19012 = vmatprep.subr.bf16.mxu0 %v19011_v4 }
   0x5   :  { %32 = vst [vmem:[#allocation2 + $0x40] sm:$0x3] %v20366_v3  ;;  %33 = vst [vmem:[#allocation2 + $0x48] sm:$0xff] %v20366_v3  ;;  %v168_v12 = vld [vmem:[%s25073_s0 + $0x20] sm:$0xff]  ;;  %v19031_v13 = vpack.c.bf16 %v15340_v11, %v15339_v10  ;;  %v169_v14 = vld [vmem:[%s25073_s0 + $0x28] sm:$0xff]  ;;  %19028 = vmatprep.subr.bf16.mxu1 %v19027_v8  ;;  %19014 = vmatpush3.bf16.msra.mxu0 %v19011_v4 }
   0x6   :  { %34 = vst [vmem:[#allocation2 + $0x50] sm:$0xff] %v20366_v3  ;;  %35 = vst [vmem:[#allocation2 + $0x58] sm:$0x3] %v20366_v3  ;;  %v15341_v15 = vld [vmem:[%s25073_s0 + $0x60] sm:$0xff]  ;;  %v15342_v16 = vld [vmem:[%s25073_s0 + $0x68] sm:$0xff]  ;;  %19030 = vmatpush3.bf16.msra.mxu1 %v19027_v8  ;;  %19016 = vmatprep.subr.bf16.mxu0 %v19015_v9  ;;  %v19019_v17 = vpack.c.bf16 %v169_v14, %v168_v12 }
   0x7   :  { %36 = vst [vmem:[#allocation2 + $0x60] sm:$0xff] %v20366_v3  ;;  %37 = vst [vmem:[#allocation2 + $0x68] sm:$0xff] %v20366_v3  ;;  %v132_v18 = vld [vmem:[%s25074_s2] sm:$0xff]  ;;  %19032 = vmatprep.subr.bf16.mxu1 %v19031_v13  ;;  %v19035_v19 = vpack.c.bf16 %v15342_v16, %v15341_v15  ;;  %v170_v20 = vld [vmem:[%s25073_s0 + $0x30] sm:$0xff] }
   0x8   :  { %38 = vst [vmem:[#allocation2 + $0x70] sm:$0x3] %v20366_v3  ;;  %39 = vst [vmem:[#allocation2 + $0x78] sm:$0xff] %v20366_v3  ;;  %v171_v21 = vld [vmem:[%s25073_s0 + $0x38] sm:$0xff]  ;;  %17171 = vmatprep.mubr.msk.f32.mxu0 %vm172_vm0, %v132_v18  ;;  %v15343_v22 = vld [vmem:[%s25073_s0 + $0x70] sm:$0xff]  ;;  %17235 = vmatprep.mubr.msk.f32.mxu1 %vm172_vm0, %v132_v18 }
   0x9   :  { %40 = vst [vmem:[#allocation2 + $0x80] sm:$0xff] %v20366_v3  ;;  %41 = vst [vmem:[#allocation2 + $0x88] sm:$0x3] %v20366_v3  ;;  %v15344_v23 = vld [vmem:[%s25073_s0 + $0x78] sm:$0xff]  ;;  %19018 = vmatpush3.bf16.msra.mxu0 %v19015_v9  ;;  %v19023_v24 = vpack.c.bf16 %v171_v21, %v170_v20  ;;  %v133_v26 = vld [vmem:[%s25074_s2 + $0x8] sm:$0xff] }
   0xa   :  { %42 = vst [vmem:[#allocation2 + $0x90] sm:$0xff] %v20366_v3  ;;  %43 = vst [vmem:[#allocation2 + $0x98] sm:$0xff] %v20366_v3  ;;  %19034 = vmatpush3.bf16.msra.mxu1 %v19031_v13  ;;  %19020 = vmatprep.subr.bf16.mxu0 %v19019_v17  ;;  %v19039_v25 = vpack.c.bf16 %v15344_v23, %v15343_v22  ;;  %v20068_v27 = vld [vmem:[%s25075_s3] sm:$0xff]   ;;  %v134_v28 = vld [vmem:[%s25074_s2 + $0x10] sm:$0xff] }
   0xb   :  { %44 = vst [vmem:[#allocation2 + $0xa0] sm:$0x3] %v20366_v3  ;;  %45 = vst [vmem:[#allocation2 + $0xa8] sm:$0xff] %v20366_v3  ;;  %19036 = vmatprep.subr.bf16.mxu1 %v19035_v19  ;;  %v20069_v29 = vld [vmem:[%s25075_s3 + $0x8] sm:$0xff]   ;;  %v135_v30 = vld [vmem:[%s25074_s2 + $0x18] sm:$0xff] }
   0xc   :  { %46 = vst [vmem:[#allocation2 + $0xb0] sm:$0xff] %v20366_v3  ;;  %47 = vst [vmem:[#allocation2 + $0xb8] sm:$0x3] %v20366_v3  ;;  %v136_v31 = vld [vmem:[%s25074_s2 + $0x20] sm:$0xff]  ;;  %v20070_v33 = vld [vmem:[%s25075_s3 + $0x10] sm:$0xff]  }
   0xd   :  { %48 = vst [vmem:[#allocation2 + $0xc0] sm:$0xff] %v20366_v3  ;;  %49 = vst [vmem:[#allocation2 + $0xc8] sm:$0xff] %v20366_v3  ;;  %19022 = vmatpush3.bf16.msra.mxu0 %v19019_v17  ;;  %v20073_v32 = vld [vmem:[%s25075_s3] sm:$0xff]   ;;  %v20074_v34 = vld [vmem:[%s25075_s3 + $0x8] sm:$0xff]  }
   0xe   :  { %50 = vst [vmem:[#allocation2 + $0xd0] sm:$0x3] %v20366_v3  ;;  %51 = vst [vmem:[#allocation2 + $0xd8] sm:$0xff] %v20366_v3  ;;  %19038 = vmatpush3.bf16.msra.mxu1 %v19035_v19  ;;  %19024 = vmatprep.subr.bf16.mxu0 %v19023_v24  ;;  %v137_v35 = vld [vmem:[%s25074_s2 + $0x28] sm:$0xff]  ;;  %v138_v36 = vld [vmem:[%s25074_s2 + $0x30] sm:$0xff] }
   0xf   :  { %52 = vst [vmem:[#allocation2 + $0xe0] sm:$0xff] %v20366_v3  ;;  %53 = vst [vmem:[#allocation2 + $0xe8] sm:$0x3] %v20366_v3  ;;  %19040 = vmatprep.subr.bf16.mxu1 %v19039_v25  ;;  %v139_v37 = vld [vmem:[%s25074_s2 + $0x38] sm:$0xff]  ;;  %v140_v39 = vld [vmem:[%s25074_s2 + $0x40] sm:$0xff] }
  0x10   :  { %54 = vst [vmem:[#allocation2 + $0xf0] sm:$0xff] %v20366_v3  ;;  %55 = vst [vmem:[#allocation2 + $0xf8] sm:$0xff] %v20366_v3  ;;  %v20071_v38 = vld [vmem:[%s25075_s3 + $0x18] sm:$0xff]   ;;  %v20076_v40 = vld [vmem:[%s25075_s3 + $0x10] sm:$0xff]  }
  0x11   :  { %56 = vst [vmem:[#allocation2 + $0x100] sm:$0x3] %v20366_v3  ;;  %57 = vst [vmem:[#allocation2 + $0x108] sm:$0xff] %v20366_v3  ;;  %19026 = vmatpush3.bf16.msra.mxu0 %v19023_v24  ;;  %v20072_v41 = vld [vmem:[%s25075_s3 + $0x20] sm:$0xff]   ;;  %v20077_v42 = vld [vmem:[%s25075_s3 + $0x18] sm:$0xff]  }
  0x12   :  { %58 = vst [vmem:[#allocation2 + $0x110] sm:$0xff] %v20366_v3  ;;  %59 = vst [vmem:[#allocation2 + $0x118] sm:$0x3] %v20366_v3  ;;  %19042 = vmatpush3.bf16.msra.mxu1 %v19039_v25  ;;  %17283 = vmatprep.subr.bf16.mxu0 %v20068_v27  ;;  %v141_v43 = vld [vmem:[%s25074_s2 + $0x48] sm:$0xff]  ;;  %v142_v44 = vld [vmem:[%s25074_s2 + $0x50] sm:$0xff] }
  0x13   :  { %60 = vst [vmem:[#allocation2 + $0x120] sm:$0xff] %v20366_v3  ;;  %61 = vst [vmem:[#allocation2 + $0x128] sm:$0xff] %v20366_v3  ;;  %17715 = vmatprep.subr.bf16.mxu1 %v20073_v32  ;;  %v20075_v45 = vld [vmem:[%s25075_s3 + $0x28] sm:$0xff]   ;;  %v20079_v46 = vld [vmem:[%s25075_s3 + $0x20] sm:$0xff]  }
  0x14   :  { %62 = vst [vmem:[#allocation2 + $0x130] sm:$0x3] %v20366_v3  ;;  %63 = vst [vmem:[#allocation2 + $0x138] sm:$0xff] %v20366_v3  ;;  %17172 = vmatmul.mubr.msk.f32.vlgmr.msra.gmra.mrb[0].mxu0 %vm172_vm0, %v133_v26  ;;  %v143_v47 = vld [vmem:[%s25074_s2 + $0x58] sm:$0xff]  ;;  %v144_v48 = vld [vmem:[%s25074_s2 + $0x60] sm:$0xff] }
  0x15   :  { %64 = vst [vmem:[#allocation2 + $0x140] sm:$0xff] %v20366_v3  ;;  %65 = vst [vmem:[#allocation2 + $0x148] sm:$0x3] %v20366_v3  ;;  %17236 = vmatmul.mubr.msk.f32.vlgmr.msra.gmra.mrb[0].mxu1 %vm172_vm0, %v133_v26  ;;  %17174 = vmatprep.mubr.msk.f32.mxu0 %vm172_vm0, %v134_v28  ;;  %v20078_v49 = vld [vmem:[%s25075_s3 + $0x30] sm:$0xff]   ;;  %v145_v50 = vld [vmem:[%s25074_s2 + $0x68] sm:$0xff] }
  0x16   :  { %66 = vst [vmem:[#allocation2 + $0x150] sm:$0xff] %v20366_v3  ;;  %67 = vst [vmem:[#allocation2 + $0x158] sm:$0xff] %v20366_v3  ;;  %17238 = vmatprep.mubr.msk.f32.mxu1 %vm172_vm0, %v134_v28  ;;  %17284 = vmatpush3.bf16.msra.mxu0 %v20068_v27  ;;  %v146_v51 = vld [vmem:[%s25074_s2 + $0x70] sm:$0xff]  ;;  %v147_v52 = vld [vmem:[%s25074_s2 + $0x78] sm:$0xff] }
  0x17   :  { %68 = vst [vmem:[#allocation2 + $0x160] sm:$0x3] %v20366_v3  ;;  %69 = vst [vmem:[#allocation2 + $0x168] sm:$0xff] %v20366_v3  ;;  %17285 = vmatprep.subr.bf16.mxu0 %v20069_v29  ;;  %17716 = vmatpush3.bf16.msra.mxu1 %v20073_v32  ;;  %v148_v53 = vld [vmem:[%s25074_s2 + $0x80] sm:$0xff]  ;;  %v149_v54 = vld [vmem:[%s25074_s2 + $0x88] sm:$0xff] }
  0x18   :  { %70 = vst [vmem:[#allocation2 + $0x170] sm:$0xff] %v20366_v3  ;;  %71 = vst [vmem:[#allocation2 + $0x178] sm:$0x3] %v20366_v3  ;;  %17175 = vmatmul.mubr.msk.f32.gmra.mrb[2].mxu0 %vm172_vm0, %v135_v30  ;;  %17717 = vmatprep.subr.bf16.mxu1 %v20074_v34  ;;  %v150_v55 = vld [vmem:[%s25074_s2 + $0x90] sm:$0xff]  ;;  %v151_v56 = vld [vmem:[%s25074_s2 + $0x98] sm:$0xff] }
  0x19   :  { %72 = vst [vmem:[#allocation2 + $0x180] sm:$0xff] %v20366_v3  ;;  %73 = vst [vmem:[#allocation2 + $0x188] sm:$0xff] %v20366_v3  ;;  %17239 = vmatmul.mubr.msk.f32.gmra.mrb[2].mxu1 %vm172_vm0, %v135_v30  ;;  %17177 = vmatprep.mubr.msk.f32.mxu0 %vm172_vm0, %v136_v31  ;;  %v152_v57 = vld [vmem:[%s25074_s2 + $0xa0] sm:$0xff]  ;;  %v153_v58 = vld [vmem:[%s25074_s2 + $0xa8] sm:$0xff] }
  0x1a   :  { %74 = vst [vmem:[#allocation2 + $0x190] sm:$0x3] %v20366_v3  ;;  %75 = vst [vmem:[#allocation2 + $0x198] sm:$0xff] %v20366_v3  ;;  %17241 = vmatprep.mubr.msk.f32.mxu1 %vm172_vm0, %v136_v31  ;;  %17286 = vmatpush3.bf16.msra.mxu0 %v20069_v29  ;;  %v154_v59 = vld [vmem:[%s25074_s2 + $0xb0] sm:$0xff]  ;;  %v155_v60 = vld [vmem:[%s25074_s2 + $0xb8] sm:$0xff] }
  0x1b   :  { %76 = vst [vmem:[#allocation2 + $0x1a0] sm:$0xff] %v20366_v3  ;;  %77 = vst [vmem:[#allocation2 + $0x1a8] sm:$0x3] %v20366_v3  ;;  %17287 = vmatprep.subr.bf16.mxu0 %v20070_v33  ;;  %17718 = vmatpush3.bf16.msra.mxu1 %v20074_v34  ;;  %v156_v61 = vld [vmem:[%s25074_s2 + $0xc0] sm:$0xff]  ;;  %v157_v62 = vld [vmem:[%s25074_s2 + $0xc8] sm:$0xff] }
  0x1c   :  { %78 = vst [vmem:[#allocation2 + $0x1b0] sm:$0xff] %v20366_v3  ;;  %79 = vst [vmem:[#allocation2 + $0x1b8] sm:$0xff] %v20366_v3  ;;  %17178 = vmatmul.mubr.msk.f32.gmra.mrb[4].mxu0 %vm172_vm0, %v137_v35  ;;  %17719 = vmatprep.subr.bf16.mxu1 %v20076_v40  ;;  %v158_v63 = vld [vmem:[%s25074_s2 + $0xd0] sm:$0xff]  ;;  %v159_v0 = vld [vmem:[%s25074_s2 + $0xd8] sm:$0xff] }
  0x1d   :  { %80 = vst [vmem:[#allocation2 + $0x1c0] sm:$0x3] %v20366_v3  ;;  %81 = vst [vmem:[#allocation2 + $0x1c8] sm:$0xff] %v20366_v3  ;;  %17242 = vmatmul.mubr.msk.f32.gmra.mrb[4].mxu1 %vm172_vm0, %v137_v35  ;;  %17180 = vmatprep.mubr.msk.f32.mxu0 %vm172_vm0, %v138_v36  ;;  %v160_v1 = vld [vmem:[%s25074_s2 + $0xe0] sm:$0xff]  ;;  %v161_v2 = vld [vmem:[%s25074_s2 + $0xe8] sm:$0xff] }
  0x1e   :  { %82 = vst [vmem:[#allocation2 + $0x1d0] sm:$0xff] %v20366_v3  ;;  %83 = vst [vmem:[#allocation2 + $0x1d8] sm:$0x3] %v20366_v3  ;;  %17244 = vmatprep.mubr.msk.f32.mxu1 %vm172_vm0, %v138_v36  ;;  %17288 = vmatpush3.bf16.msra.mxu0 %v20070_v33  ;;  %v20082_v4 = vld [vmem:[%s25075_s3 + $0x30] sm:$0xff]   ;;  %v20081_v5 = vld [vmem:[%s25075_s3 + $0x38] sm:$0xff]  }
  0x1f   :  { %84 = vst [vmem:[#allocation2 + $0x1e0] sm:$0xff] %v20366_v3  ;;  %85 = vst [vmem:[#allocation2 + $0x1e8] sm:$0xff] %v20366_v3  ;;  %17289 = vmatprep.subr.bf16.mxu0 %v20071_v38  ;;  %17720 = vmatpush3.bf16.msra.mxu1 %v20076_v40  ;;  %v162_v6 = vld [vmem:[%s25074_s2 + $0xf0] sm:$0xff]  ;;  %v163_v7 = vld [vmem:[%s25074_s2 + $0xf8] sm:$0xff] }
  0x20   :  { %86 = vst [vmem:[#allocation2 + $0x1f0] sm:$0x3] %v20366_v3  ;;  %87 = vst [vmem:[#allocation2 + $0x1f8] sm:$0xff] %v20366_v3  ;;  %17181 = vmatmul.mubr.msk.f32.gmra.mrb[6].mxu0 %vm172_vm0, %v139_v37  ;;  %17721 = vmatprep.subr.bf16.mxu1 %v20077_v42  ;;  %v20083_v8 = vld [vmem:[%s25075_s3 + $0x38] sm:$0xff]   ;;  %v20360_v9 = vld [vmem:[#allocation2 + $0x20] sm:$0xff] }
  0x21   :  { %88 = vst [vmem:[#allocation2 + $0x200] sm:$0xff] %v20366_v3  ;;  %89 = vst [vmem:[#allocation2 + $0x208] sm:$0x3] %v20366_v3  ;;  %17245 = vmatmul.mubr.msk.f32.gmra.mrb[6].mxu1 %vm172_vm0, %v139_v37  ;;  %17183 = vmatprep.mubr.msk.f32.mxu0 %vm172_vm0, %v140_v39  ;;  %v1083_v10 = vpack.c.bf16 %v20360_v9, %v20360_v9  ;;  %v20778_v11 = vld [vmem:[%s25075_s3 + $0x40] sm:$0xff]   ;;  %v495_v13 = vld [vmem:[%s25076_s1 + $0x8] sm:$0xff] }
  0x22   :  { %90 = vst [vmem:[#allocation2 + $0x210] sm:$0xff] %v20366_v3  ;;  %91 = vst [vmem:[#allocation2 + $0x218] sm:$0xff] %v20366_v3  ;;  %17247 = vmatprep.mubr.msk.f32.mxu1 %vm172_vm0, %v140_v39  ;;  %17290 = vmatpush3.bf16.msra.mxu0 %v20071_v38  ;;  %v20784_v12 = vld [vmem:[%s25075_s3 + $0x40] sm:$0xff]   ;;  %v15378_v14 = vld [vmem:[%s25076_s1 + $0x108] sm:$0xff] }
  0x23   :  { %92 = vst [vmem:[#allocation2 + $0x220] sm:$0x3] %v20366_v3  ;;  %93 = vst [vmem:[#allocation2 + $0x228] sm:$0xff] %v20366_v3  ;;  %17291 = vmatprep.subr.bf16.mxu0 %v20072_v41  ;;  %17722 = vmatpush3.bf16.msra.mxu1 %v20077_v42  ;;  %v494_v15 = vld [vmem:[%s25076_s1] sm:$0xff]  ;;  %v497_v24 = vld [vmem:[%s25076_s1 + $0x18] sm:$0xff] }
  0x24   :  { %94 = vst [vmem:[#allocation2 + $0x230] sm:$0xff] %v20366_v3  ;;  %95 = vst [vmem:[#allocation2 + $0x238] sm:$0x3] %v20366_v3  ;;  %17184 = vmatmul.mubr.msk.f32.gmra.mrb[8].mxu0 %vm172_vm0, %v141_v43  ;;  %17723 = vmatprep.subr.bf16.mxu1 %v20079_v46  ;;  %v15377_v17 = vld [vmem:[%s25076_s1 + $0x100] sm:$0xff]  ;;  %v496_v26 = vld [vmem:[%s25076_s1 + $0x10] sm:$0xff] }
  0x25   :  { %96 = vst [vmem:[#allocation2 + $0x240] sm:$0xff] %v20366_v3  ;;  %97 = vst [vmem:[#allocation2 + $0x248] sm:$0xff] %v20366_v3  ;;  %17248 = vmatmul.mubr.msk.f32.gmra.mrb[8].mxu1 %vm172_vm0, %v141_v43  ;;  %17186 = vmatprep.mubr.msk.f32.mxu0 %vm172_vm0, %v142_v44  ;;  %v15380_v27 = vld [vmem:[%s25076_s1 + $0x118] sm:$0xff]  ;;  %v15379_v29 = vld [vmem:[%s25076_s1 + $0x110] sm:$0xff] }
  0x26   :  { %98 = vst [vmem:[#allocation2 + $0x250] sm:$0x3] %v20366_v3  ;;  %99 = vst [vmem:[#allocation2 + $0x258] sm:$0xff] %v20366_v3  ;;  %17250 = vmatprep.mubr.msk.f32.mxu1 %vm172_vm0, %v142_v44  ;;  %17292 = vmatpush3.bf16.msra.mxu0 %v20072_v41  ;;  %v499_v37 = vld [vmem:[%s25076_s1 + $0x28] sm:$0xff]  ;;  %v498_v40 = vld [vmem:[%s25076_s1 + $0x20] sm:$0xff] }
  0x27   :  { %100 = vst [vmem:[#allocation2 + $0x260] sm:$0xff] %v20366_v3  ;;  %101 = vst [vmem:[#allocation2 + $0x268] sm:$0x3] %v20366_v3  ;;  %17293 = vmatprep.subr.bf16.mxu0 %v20075_v45  ;;  %17724 = vmatpush3.bf16.msra.mxu1 %v20079_v46  ;;  %v15382_v39 = vld [vmem:[%s25076_s1 + $0x128] sm:$0xff]  ;;  %v15381_v42 = vld [vmem:[%s25076_s1 + $0x120] sm:$0xff] }
  0x28   :  { %102 = vst [vmem:[#allocation2 + $0x270] sm:$0xff] %v20366_v3  ;;  %103 = vst [vmem:[#allocation2 + $0x278] sm:$0xff] %v20366_v3  ;;  %17187 = vmatmul.mubr.msk.f32.gmra.mrb[10].mxu0 %vm172_vm0, %v143_v47  ;;  %v503_v9 = vld [vmem:[%s25076_s1 + $0x48] sm:$0xff] }
  0x29   :  { %104 = vst [vmem:[#allocation2 + $0x280] sm:$0x3] %v20366_v3  ;;  %105 = vst [vmem:[#allocation2 + $0x288] sm:$0xff] %v20366_v3  ;;  %17251 = vmatmul.mubr.msk.f32.gmra.mrb[10].mxu1 %vm172_vm0, %v143_v47  ;;  %17189 = vmatprep.mubr.msk.f32.mxu0 %vm172_vm0, %v144_v48 }
  0x2a   :  { %106 = vst [vmem:[#allocation2 + $0x290] sm:$0xff] %v20366_v3  ;;  %107 = vst [vmem:[#allocation2 + $0x298] sm:$0x3] %v20366_v3  ;;  %17253 = vmatprep.mubr.msk.f32.mxu1 %vm172_vm0, %v144_v48  ;;  %17294 = vmatpush3.bf16.msra.mxu0 %v20075_v45 }
  0x2b   :  { %108 = vst [vmem:[#allocation2 + $0x2a0] sm:$0xff] %v20366_v3  ;;  %109 = vst [vmem:[#allocation2 + $0x2a8] sm:$0xff] %v20366_v3  ;;  %17295 = vmatprep.subr.bf16.mxu0 %v20078_v49 }
  0x2c   :  { %110 = vst [vmem:[#allocation2 + $0x2b0] sm:$0x3] %v20366_v3  ;;  %111 = vst [vmem:[#allocation2 + $0x2b8] sm:$0xff] %v20366_v3  ;;  %17190 = vmatmul.mubr.msk.f32.gmra.mrb[12].mxu0 %vm172_vm0, %v145_v50 }
  0x2d   :  { %112 = vst [vmem:[#allocation2 + $0x2c0] sm:$0xff] %v20366_v3  ;;  %113 = vst [vmem:[#allocation2 + $0x2c8] sm:$0x3] %v20366_v3  ;;  %17254 = vmatmul.mubr.msk.f32.gmra.mrb[12].mxu1 %vm172_vm0, %v145_v50  ;;  %17192 = vmatprep.mubr.msk.f32.mxu0 %vm172_vm0, %v146_v51 }
  0x2e   :  { %114 = vst [vmem:[#allocation2 + $0x2d0] sm:$0xff] %v20366_v3  ;;  %115 = vst [vmem:[#allocation2 + $0x2d8] sm:$0xff] %v20366_v3  ;;  %17256 = vmatprep.mubr.msk.f32.mxu1 %vm172_vm0, %v146_v51  ;;  %17296 = vmatpush3.bf16.msra.mxu0 %v20078_v49  ;;  %v501_v51 = vld [vmem:[%s25076_s1 + $0x38] sm:$0xff] }
  0x2f   :  { %116 = vst [vmem:[#allocation2 + $0x2e0] sm:$0x3] %v20366_v3  ;;  %117 = vst [vmem:[#allocation2 + $0x2e8] sm:$0xff] %v20366_v3  ;;  %17297 = vmatprep.subr.bf16.mxu0 %v20081_v5 }
  0x30   :  { %118 = vst [vmem:[#allocation2 + $0x2f0] sm:$0xff] %v20366_v3  ;;  %119 = vst [vmem:[#allocation2 + $0x2f8] sm:$0x3] %v20366_v3  ;;  %17193 = vmatmul.mubr.msk.f32.gmra.mrb[14].mxu0 %vm172_vm0, %v147_v52 }
  0x31   :  { %120 = vst [vmem:[#allocation2 + $0x300] sm:$0xff] %v20366_v3  ;;  %121 = vst [vmem:[#allocation2 + $0x308] sm:$0xff] %v20366_v3  ;;  %17257 = vmatmul.mubr.msk.f32.gmra.mrb[14].mxu1 %vm172_vm0, %v147_v52  ;;  %17195 = vmatprep.mubr.msk.f32.mxu0 %vm172_vm0, %v148_v53  ;;  %v500_v52 = vld [vmem:[%s25076_s1 + $0x30] sm:$0xff] }
  0x32   :  { %122 = vst [vmem:[#allocation2 + $0x310] sm:$0x3] %v20366_v3  ;;  %123 = vst [vmem:[#allocation2 + $0x318] sm:$0xff] %v20366_v3  ;;  %17259 = vmatprep.mubr.msk.f32.mxu1 %vm172_vm0, %v148_v53  ;;  %17298 = vmatpush3.bf16.msra.mxu0 %v20081_v5  ;;  %v15384_v53 = vld [vmem:[%s25076_s1 + $0x138] sm:$0xff] }
  0x33   :  { %124 = vst [vmem:[#allocation2 + $0x320] sm:$0xff] %v20366_v3  ;;  %125 = vst [vmem:[#allocation2 + $0x328] sm:$0x3] %v20366_v3  ;;  %17331 = vmatprep.subr.bf16.mxu0 %v20778_v11 }
  0x34   :  { %126 = vst [vmem:[#allocation2 + $0x330] sm:$0xff] %v20366_v3  ;;  %127 = vst [vmem:[#allocation2 + $0x338] sm:$0xff] %v20366_v3  ;;  %17196 = vmatmul.mubr.msk.f32.gmra.mrb[16].mxu0 %vm172_vm0, %v149_v54 }
  0x35   :  { %128 = vst [vmem:[#allocation2 + $0x340] sm:$0x3] %v20366_v3  ;;  %129 = vst [vmem:[#allocation2 + $0x348] sm:$0xff] %v20366_v3  ;;  %17260 = vmatmul.mubr.msk.f32.gmra.mrb[16].mxu1 %vm172_vm0, %v149_v54  ;;  %17198 = vmatprep.mubr.msk.f32.mxu0 %vm172_vm0, %v150_v55 }
  0x36   :  { %130 = vst [vmem:[#allocation2 + $0x350] sm:$0xff] %v20366_v3  ;;  %131 = vst [vmem:[#allocation2 + $0x358] sm:$0x3] %v20366_v3  ;;  %17262 = vmatprep.mubr.msk.f32.mxu1 %vm172_vm0, %v150_v55  ;;  %v20080_v3 = vld [vmem:[%s25075_s3 + $0x28] sm:$0xff]  }
  0x37   :  { %17725 = vmatprep.subr.bf16.mxu1 %v20080_v3 }
  0x38   :  { %17199 = vmatmul.mubr.msk.f32.gmra.mrb[18].mxu0 %vm172_vm0, %v151_v56  ;;  %17726 = vmatpush3.bf16.msra.mxu1 %v20080_v3 }
  0x39   :  { %17263 = vmatmul.mubr.msk.f32.gmra.mrb[18].mxu1 %vm172_vm0, %v151_v56  ;;  %17201 = vmatprep.mubr.msk.f32.mxu0 %vm172_vm0, %v152_v57 }
  0x3a   :  { %17265 = vmatprep.mubr.msk.f32.mxu1 %vm172_vm0, %v152_v57  ;;  %17727 = vmatprep.subr.bf16.mxu1 %v20082_v4  ;;  %v15383_v57 = vld [vmem:[%s25076_s1 + $0x130] sm:$0xff] }
  0x3c   :  { %17202 = vmatmul.mubr.msk.f32.gmra.mrb[20].mxu0 %vm172_vm0, %v153_v58  ;;  %17728 = vmatpush3.bf16.msra.mxu1 %v20082_v4  ;;  %v20090_v4 = vld [vmem:[%s25075_s3 + $0x48] sm:$0xff]  }
  0x3d   :  { %17266 = vmatmul.mubr.msk.f32.gmra.mrb[20].mxu1 %vm172_vm0, %v153_v58  ;;  %17204 = vmatprep.mubr.msk.f32.mxu0 %vm172_vm0, %v154_v59 }
  0x3e   :  { %17268 = vmatprep.mubr.msk.f32.mxu1 %vm172_vm0, %v154_v59  ;;  %17729 = vmatprep.subr.bf16.mxu1 %v20083_v8 }
  0x40   :  { %17205 = vmatmul.mubr.msk.f32.gmra.mrb[22].mxu0 %vm172_vm0, %v155_v60  ;;  %17730 = vmatpush3.bf16.msra.mxu1 %v20083_v8 }
  0x41   :  { %17269 = vmatmul.mubr.msk.f32.gmra.mrb[22].mxu1 %vm172_vm0, %v155_v60  ;;  %17207 = vmatprep.mubr.msk.f32.mxu0 %vm172_vm0, %v156_v61 }
  0x42   :  { %17271 = vmatprep.mubr.msk.f32.mxu1 %vm172_vm0, %v156_v61  ;;  %17763 = vmatprep.subr.bf16.mxu1 %v20784_v12 }
  0x44   :  { %17208 = vmatmul.mubr.msk.f32.gmra.mrb[24].mxu0 %vm172_vm0, %v157_v62 }
  0x45   :  { %17272 = vmatmul.mubr.msk.f32.gmra.mrb[24].mxu1 %vm172_vm0, %v157_v62  ;;  %17210 = vmatprep.mubr.msk.f32.mxu0 %vm172_vm0, %v158_v63  ;;  %v20085_v62 = vld [vmem:[%s25075_s3 + $0x48] sm:$0xff]  }
  0x46   :  { %17274 = vmatprep.mubr.msk.f32.mxu1 %vm172_vm0, %v158_v63 }
  0x48   :  { %17211 = vmatmul.mubr.msk.f32.gmra.mrb[26].mxu0 %vm172_vm0, %v159_v0 }
  0x49   :  { %17275 = vmatmul.mubr.msk.f32.gmra.mrb[26].mxu1 %vm172_vm0, %v159_v0  ;;  %17213 = vmatprep.mubr.msk.f32.mxu0 %vm172_vm0, %v160_v1 }
  0x4a   :  { %17277 = vmatprep.mubr.msk.f32.mxu1 %vm172_vm0, %v160_v1 }
  0x4c   :  { %17214 = vmatmul.mubr.msk.f32.gmra.mrb[28].mxu0 %vm172_vm0, %v161_v2 }
  0x4d   :  { %17278 = vmatmul.mubr.msk.f32.gmra.mrb[28].mxu1 %vm172_vm0, %v161_v2  ;;  %17216 = vmatprep.mubr.msk.f32.mxu0 %vm172_vm0, %v162_v6 }
  0x4e   :  { %17280 = vmatprep.mubr.msk.f32.mxu1 %vm172_vm0, %v162_v6 }
  0x50   :  { %17217 = vmatmul.mubr.msk.f32.gmra.mrb[30].mxu0 %vm172_vm0, %v163_v7 }
  0x51   :  { %17281 = vmatmul.mubr.msk.f32.gmra.mrb[30].mxu1 %vm172_vm0, %v163_v7  ;;  %17299 = vmatprep.mubr.bf16.mxu0 %v1083_v10 }
  0x52   :  { %17731 = vmatprep.mubr.bf16.mxu1 %v1083_v10  ;;  %v15386_v10 = vld [vmem:[%s25076_s1 + $0x148] sm:$0xff] }
  0xe7   :  { %v17173_v16 = vpop.f32.mrb[0].mxu0 }
  0xe8   :  { %v527_v18 = vadd.f32 %v17173_v16, %v495_v13  ;;  %v17237_v19 = vpop.f32.mrb[0].mxu1  ;;  %v335_v20 = vpop.f32.mrb[1].mxu0  ;;  %v502_v13 = vld [vmem:[%s25076_s1 + $0x40] sm:$0xff] }
  0xe9   :  { %v20799_v21 = vadd.f32 %v17237_v19, %v15378_v14  ;;  %v20801_v22 = vadd.f32 %v494_v15, %v335_v20  ;;  %v794_v23 = vpop.f32.mrb[1].mxu1  ;;  %v15385_v15 = vld [vmem:[%s25076_s1 + $0x140] sm:$0xff] }
  0xea   :  { %560 = vst [vmem:[#allocation2 + $0x21] sm:$0xff] %v527_v18  ;;  %v20806_v25 = vadd.f32 %v15377_v17, %v794_v23 }
  0xeb   :  { %1020 = vst [vmem:[#allocation2 + $0x1d1] sm:$0xff] %v20799_v21  ;;  %559 = vst [vmem:[#allocation2 + $0x19] sm:$0xff] %v20801_v22  ;;  %v17176_v28 = vpop.f32.mrb[2].mxu0 }
  0xec   :  { %1019 = vst [vmem:[#allocation2 + $0x1c9] sm:$0xff] %v20806_v25  ;;  %v20820_v30 = vadd.f32 %v17176_v28, %v497_v24  ;;  %v345_v31 = vpop.f32.mrb[3].mxu0  ;;  %v17240_v32 = vpop.f32.mrb[2].mxu1 }
  0xed   :  { %v20824_v34 = vadd.f32 %v496_v26, %v345_v31  ;;  %v20826_v35 = vadd.f32 %v17240_v32, %v15380_v27  ;;  %v804_v36 = vpop.f32.mrb[3].mxu1  ;;  %v20092_v31 = vld [vmem:[%s25075_s3 + $0x50] sm:$0xff]  }
  0xee   :  { %562 = vst [vmem:[#allocation2 + $0x39] sm:$0xff] %v20820_v30  ;;  %v20832_v38 = vadd.f32 %v15379_v29, %v804_v36 }
  0xef   :  { %561 = vst [vmem:[#allocation2 + $0x31] sm:$0xff] %v20824_v34  ;;  %1022 = vst [vmem:[#allocation2 + $0x1e9] sm:$0xff] %v20826_v35  ;;  %v17179_v41 = vpop.f32.mrb[4].mxu0 }
  0xf0   :  { %1021 = vst [vmem:[#allocation2 + $0x1e1] sm:$0xff] %v20832_v38  ;;  %v20848_v44 = vadd.f32 %v17179_v41, %v499_v37  ;;  %v17243_v45 = vpop.f32.mrb[4].mxu1  ;;  %v355_v46 = vpop.f32.mrb[5].mxu0  ;;  %v15388_v41 = vld [vmem:[%s25076_s1 + $0x158] sm:$0xff] }
  0xf1   :  { %v20852_v48 = vadd.f32 %v17243_v45, %v15382_v39  ;;  %v20854_v49 = vadd.f32 %v498_v40, %v355_v46  ;;  %v814_v50 = vpop.f32.mrb[5].mxu1  ;;  %v505_v39 = vld [vmem:[%s25076_s1 + $0x58] sm:$0xff]  ;;  %v504_v40 = vld [vmem:[%s25076_s1 + $0x50] sm:$0xff] }
  0xf2   :  { %564 = vst [vmem:[#allocation2 + $0x51] sm:$0xff] %v20848_v44  ;;  %v20866_v54 = vadd.f32 %v15381_v42, %v814_v50  ;;  %v1053_v55 = vld [vmem:[#allocation2 + $0x18] sm:$0xff]  ;;  %v1054_v56 = vld [vmem:[#allocation2 + $0x20] sm:$0xff]  ;;  %v15387_v50 = vld [vmem:[%s25076_s1 + $0x150] sm:$0xff] }
  0xf3   :  { %1024 = vst [vmem:[#allocation2 + $0x201] sm:$0xff] %v20852_v48  ;;  %563 = vst [vmem:[#allocation2 + $0x49] sm:$0xff] %v20854_v49  ;;  %v17182_v58 = vpop.f32.mrb[6].mxu0  ;;  %v1084_v59 = vpack.c.bf16 %v1054_v56, %v1053_v55  ;;  %v4320_v60 = vld [vmem:[#allocation2 + $0x1c8] sm:$0xff]  ;;  %v4321_v61 = vld [vmem:[#allocation2 + $0x1d0] sm:$0xff] }
  0xf4   :  { %1023 = vst [vmem:[#allocation2 + $0x1f9] sm:$0xff] %v20866_v54  ;;  %v20879_v0 = vadd.f32 %v17182_v58, %v501_v51  ;;  %v365_v1 = vpop.f32.mrb[7].mxu0  ;;  %v17246_v2 = vpop.f32.mrb[6].mxu1  ;;  %v4351_v3 = vpack.c.bf16 %v4321_v61, %v4320_v60  ;;  %v20087_v56 = vld [vmem:[%s25075_s3 + $0x58] sm:$0xff]  }
  0xf5   :  { %v20886_v6 = vadd.f32 %v500_v52, %v365_v1  ;;  %v20888_v7 = vadd.f32 %v17246_v2, %v15384_v53  ;;  %17300 = vmatmul.mubr.bf16.vlgmr.msra.gmra.mrb[32].mxu0 %v1084_v59  ;;  %v824_v8 = vpop.f32.mrb[7].mxu1 }
  0xf6   :  { %566 = vst [vmem:[#allocation2 + $0x69] sm:$0xff] %v20879_v0  ;;  %17332 = vmatpush3.bf16.msra.mxu0 %v20778_v11  ;;  %17732 = vmatmul.mubr.bf16.vlgmr.msra.gmra.mrb[32].mxu1 %v4351_v3  ;;  %v20901_v14 = vadd.f32 %v15383_v57, %v824_v8  ;;  %v1055_v16 = vld [vmem:[#allocation2 + $0x30] sm:$0xff]  ;;  %v1056_v17 = vld [vmem:[#allocation2 + $0x38] sm:$0xff]  ;;  %v507_v8 = vld [vmem:[%s25076_s1 + $0x68] sm:$0xff] }
  0xf7   :  { %565 = vst [vmem:[#allocation2 + $0x61] sm:$0xff] %v20886_v6  ;;  %1026 = vst [vmem:[#allocation2 + $0x219] sm:$0xff] %v20888_v7  ;;  %v17185_v18 = vpop.f32.mrb[8].mxu0  ;;  %v1085_v19 = vpack.c.bf16 %v1056_v17, %v1055_v16  ;;  %17333 = vmatprep.subr.bf16.mxu0 %v20085_v62  ;;  %v4322_v20 = vld [vmem:[#allocation2 + $0x1e0] sm:$0xff]  ;;  %v4323_v23 = vld [vmem:[#allocation2 + $0x1e8] sm:$0xff]  ;;  %17764 = vmatpush3.bf16.msra.mxu1 %v20784_v12 }
  0xf8   :  { %v20086_v11 = vld [vmem:[%s25075_s3 + $0x50] sm:$0xff]   ;;  %1025 = vst [vmem:[#allocation2 + $0x211] sm:$0xff] %v20901_v14  ;;  %v20915_v26 = vadd.f32 %v17185_v18, %v503_v9  ;;  %v17249_v27 = vpop.f32.mrb[8].mxu1  ;;  %v375_v28 = vpop.f32.mrb[9].mxu0  ;;  %v4352_v29 = vpack.c.bf16 %v4323_v23, %v4322_v20  ;;  %17765 = vmatprep.subr.bf16.mxu1 %v20090_v4  ;;  %v15390_v9 = vld [vmem:[%s25076_s1 + $0x168] sm:$0xff] }
  0xf9   :  { %v20922_v36 = vadd.f32 %v17249_v27, %v15386_v10  ;;  %v20924_v12 = vadd.f32 %v502_v13, %v375_v28  ;;  %v834_v37 = vpop.f32.mrb[9].mxu1  ;;  %17303 = vmatprep.mubr.bf16.mxu0 %v1085_v19  ;;  %v506_v10 = vld [vmem:[%s25076_s1 + $0x60] sm:$0xff] }
  0xfa   :  { %568 = vst [vmem:[#allocation2 + $0x81] sm:$0xff] %v20915_v26  ;;  %v20936_v42 = vadd.f32 %v15385_v15, %v834_v37  ;;  %17735 = vmatprep.mubr.bf16.mxu1 %v4352_v29  ;;  %v1057_v45 = vld [vmem:[#allocation2 + $0x48] sm:$0xff]  ;;  %v1058_v46 = vld [vmem:[#allocation2 + $0x50] sm:$0xff]  ;;  %17334 = vmatpush3.bf16.msra.mxu0 %v20085_v62  ;;  %v20093_v62 = vld [vmem:[%s25075_s3 + $0x58] sm:$0xff]  }
  0xfb   :  { %1028 = vst [vmem:[#allocation2 + $0x231] sm:$0xff] %v20922_v36  ;;  %567 = vst [vmem:[#allocation2 + $0x79] sm:$0xff] %v20924_v12  ;;  %v17188_v51 = vpop.f32.mrb[10].mxu0  ;;  %v1086_v52 = vpack.c.bf16 %v1058_v46, %v1057_v45  ;;  %v4324_v53 = vld [vmem:[#allocation2 + $0x1f8] sm:$0xff]  ;;  %v4325_v55 = vld [vmem:[#allocation2 + $0x200] sm:$0xff]  ;;  %17335 = vmatprep.subr.bf16.mxu0 %v20086_v11  ;;  %17766 = vmatpush3.bf16.msra.mxu1 %v20090_v4 }
  0xfc   :  { %1027 = vst [vmem:[#allocation2 + $0x229] sm:$0xff] %v20936_v42  ;;  %v20949_v58 = vadd.f32 %v17188_v51, %v505_v39  ;;  %v385_v59 = vpop.f32.mrb[11].mxu0  ;;  %v17252_v60 = vpop.f32.mrb[10].mxu1  ;;  %v4353_v61 = vpack.c.bf16 %v4325_v55, %v4324_v53  ;;  %17767 = vmatprep.subr.bf16.mxu1 %v20092_v31  ;;  %v15389_v15 = vld [vmem:[%s25076_s1 + $0x160] sm:$0xff]  ;;  %v508_v51 = vld [vmem:[%s25076_s1 + $0x70] sm:$0xff] }
  0xfd   :  { %v20956_v2 = vadd.f32 %v504_v40, %v385_v59  ;;  %v20958_v3 = vadd.f32 %v17252_v60, %v15388_v41  ;;  %17304 = vmatmul.mubr.bf16.gmra.mrb[36].mxu0 %v1086_v52  ;;  %v844_v4 = vpop.f32.mrb[11].mxu1  ;;  %v20088_v27 = vld [vmem:[%s25075_s3 + $0x60] sm:$0xff]   ;;  %v15392_v52 = vld [vmem:[%s25076_s1 + $0x178] sm:$0xff]  ;;  %v15391_v60 = vld [vmem:[%s25076_s1 + $0x170] sm:$0xff] }
  0xfe   :  { %570 = vst [vmem:[#allocation2 + $0x99] sm:$0xff] %v20949_v58  ;;  %17736 = vmatmul.mubr.bf16.gmra.mrb[36].mxu1 %v4353_v61  ;;  %v20970_v13 = vadd.f32 %v15387_v50, %v844_v4  ;;  %v1059_v16 = vld [vmem:[#allocation2 + $0x60] sm:$0xff]  ;;  %v1060_v17 = vld [vmem:[#allocation2 + $0x68] sm:$0xff]  ;;  %17336 = vmatpush3.bf16.msra.mxu0 %v20086_v11  ;;  %v509_v50 = vld [vmem:[%s25076_s1 + $0x78] sm:$0xff] }
  0xff   :  { %569 = vst [vmem:[#allocation2 + $0x91] sm:$0xff] %v20956_v2  ;;  %1030 = vst [vmem:[#allocation2 + $0x249] sm:$0xff] %v20958_v3  ;;  %v17191_v18 = vpop.f32.mrb[12].mxu0  ;;  %v1087_v19 = vpack.c.bf16 %v1060_v17, %v1059_v16  ;;  %v4326_v20 = vld [vmem:[#allocation2 + $0x210] sm:$0xff]  ;;  %v4327_v23 = vld [vmem:[#allocation2 + $0x218] sm:$0xff]  ;;  %17337 = vmatprep.subr.bf16.mxu0 %v20087_v56  ;;  %17768 = vmatpush3.bf16.msra.mxu1 %v20092_v31 }
 0x100   :  { %1029 = vst [vmem:[#allocation2 + $0x241] sm:$0xff] %v20970_v13  ;;  %v20983_v11 = vadd.f32 %v17191_v18, %v507_v8  ;;  %v17255_v29 = vpop.f32.mrb[12].mxu1  ;;  %v395_v37 = vpop.f32.mrb[13].mxu0  ;;  %v4354_v39 = vpack.c.bf16 %v4327_v23, %v4326_v20  ;;  %17769 = vmatprep.subr.bf16.mxu1 %v20093_v62  ;;  %v20095_v40 = vld [vmem:[%s25075_s3 + $0x60] sm:$0xff]  }
 0x101   :  { %v20990_v45 = vadd.f32 %v17255_v29, %v15390_v9  ;;  %v20992_v31 = vadd.f32 %v506_v10, %v395_v37  ;;  %v854_v46 = vpop.f32.mrb[13].mxu1  ;;  %17307 = vmatprep.mubr.bf16.mxu0 %v1087_v19  ;;  %v20091_v10 = vld [vmem:[%s25075_s3 + $0x68] sm:$0xff]  }
 0x102   :  { %572 = vst [vmem:[#allocation2 + $0xb1] sm:$0xff] %v20983_v11  ;;  %v21004_v53 = vadd.f32 %v15389_v15, %v854_v46  ;;  %17739 = vmatprep.mubr.bf16.mxu1 %v4354_v39  ;;  %v1061_v55 = vld [vmem:[#allocation2 + $0x78] sm:$0xff]  ;;  %v1062_v59 = vld [vmem:[#allocation2 + $0x80] sm:$0xff]  ;;  %17338 = vmatpush3.bf16.msra.mxu0 %v20087_v56  ;;  %v20096_v19 = vld [vmem:[%s25075_s3 + $0x68] sm:$0xff]  }
 0x103   :  { %1032 = vst [vmem:[#allocation2 + $0x261] sm:$0xff] %v20990_v45  ;;  %571 = vst [vmem:[#allocation2 + $0xa9] sm:$0xff] %v20992_v31  ;;  %v17194_v61 = vpop.f32.mrb[14].mxu0  ;;  %v1088_v4 = vpack.c.bf16 %v1062_v59, %v1061_v55  ;;  %v4328_v8 = vld [vmem:[#allocation2 + $0x228] sm:$0xff]  ;;  %v4329_v9 = vld [vmem:[#allocation2 + $0x230] sm:$0xff]  ;;  %17339 = vmatprep.subr.bf16.mxu0 %v20088_v27  ;;  %17770 = vmatpush3.bf16.msra.mxu1 %v20093_v62 }
 0x104   :  { %1031 = vst [vmem:[#allocation2 + $0x259] sm:$0xff] %v21004_v53  ;;  %v21017_v56 = vadd.f32 %v17194_v61, %v509_v50  ;;  %v405_v16 = vpop.f32.mrb[15].mxu0  ;;  %v17258_v17 = vpop.f32.mrb[14].mxu1  ;;  %v4355_v18 = vpack.c.bf16 %v4329_v9, %v4328_v8  ;;  %17771 = vmatprep.subr.bf16.mxu1 %v20095_v40  ;;  %v511_v37 = vld [vmem:[%s25076_s1 + $0x88] sm:$0xff]  ;;  %v510_v46 = vld [vmem:[%s25076_s1 + $0x80] sm:$0xff] }
 0x105   :  { %v21024_v23 = vadd.f32 %v508_v51, %v405_v16  ;;  %v21026_v62 = vadd.f32 %v17258_v17, %v15392_v52  ;;  %17308 = vmatmul.mubr.bf16.gmra.mrb[40].mxu0 %v1088_v4  ;;  %v864_v29 = vpop.f32.mrb[15].mxu1  ;;  %v15394_v39 = vld [vmem:[%s25076_s1 + $0x188] sm:$0xff]  ;;  %v15393_v51 = vld [vmem:[%s25076_s1 + $0x180] sm:$0xff] }
 0x106   :  { %574 = vst [vmem:[#allocation2 + $0xc9] sm:$0xff] %v21017_v56  ;;  %17740 = vmatmul.mubr.bf16.gmra.mrb[40].mxu1 %v4355_v18  ;;  %v21038_v50 = vadd.f32 %v15391_v60, %v864_v29  ;;  %v1063_v52 = vld [vmem:[#allocation2 + $0x90] sm:$0xff]  ;;  %v1064_v55 = vld [vmem:[#allocation2 + $0x98] sm:$0xff]  ;;  %17340 = vmatpush3.bf16.msra.mxu0 %v20088_v27 }
 0x107   :  { %573 = vst [vmem:[#allocation2 + $0xc1] sm:$0xff] %v21024_v23  ;;  %1034 = vst [vmem:[#allocation2 + $0x279] sm:$0xff] %v21026_v62  ;;  %v17197_v59 = vpop.f32.mrb[16].mxu0  ;;  %v1089_v61 = vpack.c.bf16 %v1064_v55, %v1063_v52  ;;  %v4330_v4 = vld [vmem:[#allocation2 + $0x240] sm:$0xff]  ;;  %v4331_v8 = vld [vmem:[#allocation2 + $0x248] sm:$0xff]  ;;  %17341 = vmatprep.subr.bf16.mxu0 %v20091_v10  ;;  %17772 = vmatpush3.bf16.msra.mxu1 %v20095_v40 }
 0x108   :  { %v20094_v60 = vld [vmem:[%s25075_s3 + $0x70] sm:$0xff]   ;;  %1033 = vst [vmem:[#allocation2 + $0x271] sm:$0xff] %v21038_v50  ;;  %v21051_v27 = vadd.f32 %v17197_v59, %v511_v37  ;;  %v17261_v16 = vpop.f32.mrb[16].mxu1  ;;  %v415_v17 = vpop.f32.mrb[17].mxu0  ;;  %v4356_v18 = vpack.c.bf16 %v4331_v8, %v4330_v4  ;;  %17773 = vmatprep.subr.bf16.mxu1 %v20096_v19  ;;  %v513_v37 = vld [vmem:[%s25076_s1 + $0x98] sm:$0xff] }
 0x109   :  { %v20098_v29 = vld [vmem:[%s25075_s3 + $0x70] sm:$0xff]   ;;  %v21058_v55 = vadd.f32 %v17261_v16, %v15394_v39  ;;  %v21060_v40 = vadd.f32 %v510_v46, %v415_v17  ;;  %v874_v9 = vpop.f32.mrb[17].mxu1  ;;  %17311 = vmatprep.mubr.bf16.mxu0 %v1089_v61  ;;  %v15396_v4 = vld [vmem:[%s25076_s1 + $0x198] sm:$0xff] }
 0x10a   :  { %v512_v59 = vld [vmem:[%s25076_s1 + $0x90] sm:$0xff]  ;;  %576 = vst [vmem:[#allocation2 + $0xe1] sm:$0xff] %v21051_v27  ;;  %v21072_v39 = vadd.f32 %v15393_v51, %v874_v9  ;;  %17743 = vmatprep.mubr.bf16.mxu1 %v4356_v18  ;;  %v1065_v46 = vld [vmem:[#allocation2 + $0xa8] sm:$0xff]  ;;  %17342 = vmatpush3.bf16.msra.mxu0 %v20091_v10  ;;  %v20097_v51 = vld [vmem:[%s25075_s3 + $0x78] sm:$0xff]  }
 0x10b   :  { %v1066_v8 = vld [vmem:[#allocation2 + $0xb0] sm:$0xff]  ;;  %1036 = vst [vmem:[#allocation2 + $0x291] sm:$0xff] %v21058_v55  ;;  %575 = vst [vmem:[#allocation2 + $0xd9] sm:$0xff] %v21060_v40  ;;  %v17200_v16 = vpop.f32.mrb[18].mxu0  ;;  %v4332_v52 = vld [vmem:[#allocation2 + $0x258] sm:$0xff]  ;;  %17343 = vmatprep.subr.bf16.mxu0 %v20094_v60  ;;  %17774 = vmatpush3.bf16.msra.mxu1 %v20096_v19 }
 0x10c   :  { %v15395_v61 = vld [vmem:[%s25076_s1 + $0x190] sm:$0xff]  ;;  %v1090_v17 = vpack.c.bf16 %v1066_v8, %v1065_v46  ;;  %v4333_v20 = vld [vmem:[#allocation2 + $0x260] sm:$0xff]  ;;  %1035 = vst [vmem:[#allocation2 + $0x289] sm:$0xff] %v21072_v39  ;;  %v21085_v10 = vadd.f32 %v17200_v16, %v513_v37  ;;  %v425_v18 = vpop.f32.mrb[19].mxu0  ;;  %v17264_v15 = vpop.f32.mrb[18].mxu1  ;;  %17775 = vmatprep.subr.bf16.mxu1 %v20098_v29  ;;  %v20099_v46 = vld [vmem:[%s25075_s3 + $0x78] sm:$0xff]  }
 0x10d   :  { %v4357_v41 = vpack.c.bf16 %v4333_v20, %v4332_v52  ;;  %v21092_v8 = vadd.f32 %v512_v59, %v425_v18  ;;  %v21094_v28 = vadd.f32 %v17264_v15, %v15396_v4  ;;  %v884_v9 = vpop.f32.mrb[19].mxu1  ;;  %v515_v37 = vld [vmem:[%s25076_s1 + $0xa8] sm:$0xff]  ;;  %v514_v52 = vld [vmem:[%s25076_s1 + $0xa0] sm:$0xff] }
 0x10e   :  { %17312 = vmatmul.mubr.bf16.gmra.mrb[44].mxu0 %v1090_v17  ;;  %v15398_v20 = vld [vmem:[%s25076_s1 + $0x1a8] sm:$0xff]  ;;  %578 = vst [vmem:[#allocation2 + $0xf9] sm:$0xff] %v21085_v10  ;;  %v21106_v59 = vadd.f32 %v15395_v61, %v884_v9  ;;  %v15397_v15 = vld [vmem:[%s25076_s1 + $0x1a0] sm:$0xff] }
 0x10f   :  { %17744 = vmatmul.mubr.bf16.gmra.mrb[44].mxu1 %v4357_v41  ;;  %v1067_v4 = vld [vmem:[#allocation2 + $0xc0] sm:$0xff]  ;;  %v1068_v16 = vld [vmem:[#allocation2 + $0xc8] sm:$0xff]  ;;  %17344 = vmatpush3.bf16.msra.mxu0 %v20094_v60  ;;  %577 = vst [vmem:[#allocation2 + $0xf1] sm:$0xff] %v21092_v8  ;;  %1038 = vst [vmem:[#allocation2 + $0x2a9] sm:$0xff] %v21094_v28  ;;  %v17203_v17 = vpop.f32.mrb[20].mxu0 }
 0x110   :  { %v1091_v18 = vpack.c.bf16 %v1068_v16, %v1067_v4  ;;  %v4334_v19 = vld [vmem:[#allocation2 + $0x270] sm:$0xff]  ;;  %v4335_v1 = vld [vmem:[#allocation2 + $0x278] sm:$0xff]  ;;  %17345 = vmatprep.subr.bf16.mxu0 %v20097_v51  ;;  %17776 = vmatpush3.bf16.msra.mxu1 %v20098_v29  ;;  %v21116_v41 = vld [vmem:[%s25075_s3 + $0x80] sm:$0xff]   ;;  %1037 = vst [vmem:[#allocation2 + $0x2a1] sm:$0xff] %v21106_v59  ;;  %v21121_v60 = vadd.f32 %v17203_v17, %v515_v37  ;;  %v17267_v9 = vpop.f32.mrb[20].mxu1  ;;  %v435_v57 = vpop.f32.mrb[21].mxu0 }
 0x111   :  { %v4358_v32 = vpack.c.bf16 %v4335_v1, %v4334_v19  ;;  %17777 = vmatprep.subr.bf16.mxu1 %v20099_v46  ;;  %v21126_v29 = vld [vmem:[%s25075_s3 + $0x80] sm:$0xff]   ;;  %v21130_v16 = vadd.f32 %v17267_v9, %v15398_v20  ;;  %v21132_v24 = vadd.f32 %v514_v52, %v435_v57  ;;  %v894_v61 = vpop.f32.mrb[21].mxu1  ;;  %v517_v37 = vld [vmem:[%s25076_s1 + $0xb8] sm:$0xff]  ;;  %v516_v1 = vld [vmem:[%s25076_s1 + $0xb0] sm:$0xff] }
 0x112   :  { %17315 = vmatprep.mubr.bf16.mxu0 %v1091_v18  ;;  %580 = vst [vmem:[#allocation2 + $0x111] sm:$0xff] %v21121_v60  ;;  %v21141_v19 = vadd.f32 %v15397_v15, %v894_v61  ;;  %v15400_v57 = vld [vmem:[%s25076_s1 + $0x1b8] sm:$0xff]  ;;  %v1070_v52 = vld [vmem:[#allocation2 + $0xe0] sm:$0xff]  ;;  %v15399_v15 = vld [vmem:[%s25076_s1 + $0x1b0] sm:$0xff] }
 0x113   :  { %25216 = vst [vmem:[#allocation4_spill] sm:$0xff] %v21130_v16  ;;  %25217 = vst [vmem:[#allocation5_spill] sm:$0xff] %v21132_v24  ;;  %17747 = vmatprep.mubr.bf16.mxu1 %v4358_v32  ;;  %v1069_v20 = vld [vmem:[#allocation2 + $0xd8] sm:$0xff]  ;;  %17346 = vmatpush3.bf16.msra.mxu0 %v20097_v51  ;;  %v17206_v17 = vpop.f32.mrb[22].mxu0  ;;  %v4336_v9 = vld [vmem:[#allocation2 + $0x288] sm:$0xff] }
 0x114   :  { %25218 = vst [vmem:[#allocation6_spill] sm:$0xff] %v21141_v19  ;;  %1040 = vst [vmem:[#allocation2 + $0x2c1] sm:$0xff] %v21130_v16  ;;  %v1092_v18 = vpack.c.bf16 %v1070_v52, %v1069_v20  ;;  %v4337_v4 = vld [vmem:[#allocation2 + $0x290] sm:$0xff]  ;;  %17778 = vmatpush3.bf16.msra.mxu1 %v20099_v46  ;;  %17379 = vmatprep.subr.bf16.mxu0 %v21116_v41  ;;  %v21155_v51 = vadd.f32 %v17206_v17, %v517_v37  ;;  %v445_v61 = vpop.f32.mrb[23].mxu0  ;;  %v17270_v5 = vpop.f32.mrb[22].mxu1  ;;  %v519_v32 = vld [vmem:[%s25076_s1 + $0xc8] sm:$0xff] }
 0x115   :  { %579 = vst [vmem:[#allocation2 + $0x109] sm:$0xff] %v21132_v24  ;;  %1039 = vst [vmem:[#allocation2 + $0x2b9] sm:$0xff] %v21141_v19  ;;  %v4359_v63 = vpack.c.bf16 %v4337_v4, %v4336_v9  ;;  %17811 = vmatprep.subr.bf16.mxu1 %v21126_v29  ;;  %v21160_v52 = vadd.f32 %v516_v1, %v445_v61  ;;  %v21162_v46 = vadd.f32 %v17270_v5, %v15400_v57  ;;  %v904_v47 = vpop.f32.mrb[23].mxu1  ;;  %v15402_v37 = vld [vmem:[%s25076_s1 + $0x1c8] sm:$0xff]  ;;  %v518_v5 = vld [vmem:[%s25076_s1 + $0xc0] sm:$0xff] }
 0x116   :  { %25219 = vst [vmem:[#allocation7_spill] sm:$0xff] %v21155_v51  ;;  %17316 = vmatmul.mubr.bf16.gmra.mrb[48].mxu0 %v1092_v18  ;;  %582 = vst [vmem:[#allocation2 + $0x129] sm:$0xff] %v21155_v51  ;;  %v21171_v4 = vadd.f32 %v15399_v15, %v904_v47  ;;  %v1071_v1 = vld [vmem:[#allocation2 + $0xf0] sm:$0xff]  ;;  %v1072_v57 = vld [vmem:[#allocation2 + $0xf8] sm:$0xff] }
 0x117   :  { %25220 = vst [vmem:[#allocation8_spill] sm:$0xff] %v21160_v52  ;;  %25221 = vst [vmem:[#allocation9_spill] sm:$0xff] %v21162_v46  ;;  %17748 = vmatmul.mubr.bf16.gmra.mrb[48].mxu1 %v4359_v63  ;;  %v17209_v17 = vpop.f32.mrb[24].mxu0  ;;  %v15401_v18 = vld [vmem:[%s25076_s1 + $0x1c0] sm:$0xff]  ;;  %v1093_v9 = vpack.c.bf16 %v1072_v57, %v1071_v1  ;;  %v4339_v63 = vld [vmem:[#allocation2 + $0x2a8] sm:$0xff] }
 0x118   :  { %25222 = vst [vmem:[#allocation10_spill] sm:$0xff] %v21171_v4  ;;  %581 = vst [vmem:[#allocation2 + $0x121] sm:$0xff] %v21160_v52  ;;  %v4338_v61 = vld [vmem:[#allocation2 + $0x2a0] sm:$0xff]  ;;  %v21184_v15 = vadd.f32 %v17209_v17, %v519_v32  ;;  %v17273_v20 = vpop.f32.mrb[24].mxu1  ;;  %v455_v43 = vpop.f32.mrb[25].mxu0  ;;  %v521_v57 = vld [vmem:[%s25076_s1 + $0xd8] sm:$0xff] }
 0x119   :  { %1042 = vst [vmem:[#allocation2 + $0x2d9] sm:$0xff] %v21162_v46  ;;  %1041 = vst [vmem:[#allocation2 + $0x2d1] sm:$0xff] %v21171_v4  ;;  %v4360_v33 = vpack.c.bf16 %v4339_v63, %v4338_v61  ;;  %v21188_v16 = vadd.f32 %v17273_v20, %v15402_v37  ;;  %v21190_v24 = vadd.f32 %v518_v5, %v455_v43  ;;  %v914_v1 = vpop.f32.mrb[25].mxu1  ;;  %17319 = vmatprep.mubr.bf16.mxu0 %v1093_v9  ;;  %v520_v32 = vld [vmem:[%s25076_s1 + $0xd0] sm:$0xff]  ;;  %v15404_v43 = vld [vmem:[%s25076_s1 + $0x1d8] sm:$0xff] }
 0x11a   :  { %25223 = vst [vmem:[#allocation11_spill] sm:$0xff] %v21184_v15  ;;  %584 = vst [vmem:[#allocation2 + $0x141] sm:$0xff] %v21184_v15  ;;  %v21199_v17 = vadd.f32 %v15401_v18, %v914_v1  ;;  %v15403_v18 = vld [vmem:[%s25076_s1 + $0x1d0] sm:$0xff] }
 0x11b   :  { %25224 = vst [vmem:[#allocation12_spill] sm:$0xff] %v21188_v16  ;;  %25225 = vst [vmem:[#allocation13_spill] sm:$0xff] %v21190_v24  ;;  %17751 = vmatprep.mubr.bf16.mxu1 %v4360_v33  ;;  %v17212_v5 = vpop.f32.mrb[26].mxu0  ;;  %v523_v33 = vld [vmem:[%s25076_s1 + $0xe8] sm:$0xff] }
 0x11c   :  { %25226 = vst [vmem:[#allocation14_spill] sm:$0xff] %v21199_v17  ;;  %v1073_v20 = vld [vmem:[#allocation2 + $0x108] sm:$0xff]  ;;  %v1074_v37 = vld [vmem:[#allocation2 + $0x110] sm:$0xff]  ;;  %1044 = vst [vmem:[#allocation2 + $0x2f1] sm:$0xff] %v21188_v16  ;;  %v21212_v1 = vadd.f32 %v17212_v5, %v521_v57  ;;  %v465_v19 = vpop.f32.mrb[27].mxu0  ;;  %v17276_v47 = vpop.f32.mrb[26].mxu1 }
 0x11d   :  { %583 = vst [vmem:[#allocation2 + $0x139] sm:$0xff] %v21190_v24  ;;  %v1094_v9 = vpack.c.bf16 %v1074_v37, %v1073_v20  ;;  %v4340_v61 = vld [vmem:[#allocation2 + $0x2b8] sm:$0xff]  ;;  %v4341_v63 = vld [vmem:[#allocation2 + $0x2c0] sm:$0xff]  ;;  %1043 = vst [vmem:[#allocation2 + $0x2e9] sm:$0xff] %v21199_v17  ;;  %v21216_v20 = vadd.f32 %v520_v32, %v465_v19  ;;  %v21218_v37 = vadd.f32 %v17276_v47, %v15404_v43  ;;  %v924_v52 = vpop.f32.mrb[27].mxu1 }
 0x11e   :  { %v4361_v4 = vpack.c.bf16 %v4341_v63, %v4340_v61  ;;  %v15406_v57 = vld [vmem:[%s25076_s1 + $0x1e8] sm:$0xff]  ;;  %586 = vst [vmem:[#allocation2 + $0x159] sm:$0xff] %v21212_v1  ;;  %v21227_v5 = vadd.f32 %v15403_v18, %v924_v52  ;;  %v522_v19 = vld [vmem:[%s25076_s1 + $0xe0] sm:$0xff] }
 0x11f   :  { %25227 = vst [vmem:[#allocation15_spill] sm:$0xff] %v21218_v37  ;;  %17320 = vmatmul.mubr.bf16.gmra.mrb[52].mxu0 %v1094_v9  ;;  %v1075_v47 = vld [vmem:[#allocation2 + $0x120] sm:$0xff]  ;;  %v1076_v32 = vld [vmem:[#allocation2 + $0x128] sm:$0xff]  ;;  %585 = vst [vmem:[#allocation2 + $0x151] sm:$0xff] %v21216_v20  ;;  %v17215_v43 = vpop.f32.mrb[28].mxu0 }
 0x120   :  { %17752 = vmatmul.mubr.bf16.gmra.mrb[52].mxu1 %v4361_v4  ;;  %25228 = vst [vmem:[#allocation16_spill] sm:$0xff] %v21227_v5  ;;  %1046 = vst [vmem:[#allocation2 + $0x309] sm:$0xff] %v21218_v37  ;;  %v15405_v9 = vld [vmem:[%s25076_s1 + $0x1e0] sm:$0xff]  ;;  %v1095_v61 = vpack.c.bf16 %v1076_v32, %v1075_v47  ;;  %v4342_v63 = vld [vmem:[#allocation2 + $0x2d0] sm:$0xff]  ;;  %v21240_v18 = vadd.f32 %v17215_v43, %v523_v33  ;;  %v17279_v46 = vpop.f32.mrb[28].mxu1  ;;  %v475_v17 = vpop.f32.mrb[29].mxu0 }
 0x121   :  { %v4343_v4 = vld [vmem:[#allocation2 + $0x2d8] sm:$0xff]  ;;  %1045 = vst [vmem:[#allocation2 + $0x301] sm:$0xff] %v21227_v5  ;;  %v21244_v15 = vadd.f32 %v17279_v46, %v15406_v57  ;;  %v21246_v51 = vadd.f32 %v522_v19, %v475_v17  ;;  %v934_v47 = vpop.f32.mrb[29].mxu1 }
 0x122   :  { %25229 = vst [vmem:[#allocation17_spill] sm:$0xff] %v21240_v18  ;;  %v4362_v16 = vpack.c.bf16 %v4343_v4, %v4342_v63  ;;  %17323 = vmatprep.mubr.bf16.mxu0 %v1095_v61  ;;  %588 = vst [vmem:[#allocation2 + $0x171] sm:$0xff] %v21240_v18  ;;  %v21249_v32 = vadd.f32 %v15405_v9, %v934_v47  ;;  %v1356_v9 = vld [vmem:[#allocation2 + $0x1] sm:$0xff]  ;;  %v4624_v5 = vld [vmem:[#allocation2 + $0x1b1] sm:$0xff] }
 0x123   :  { %25230 = vst [vmem:[#allocation18_spill] sm:$0xff] %v21246_v51  ;;  %1048 = vst [vmem:[#allocation2 + $0x321] sm:$0xff] %v21244_v15  ;;  %v4625_v37 = vld [vmem:[#allocation2 + $0x1b9] sm:$0xff] }
 0x124   :  { %17755 = vmatprep.mubr.bf16.mxu1 %v4362_v16  ;;  %v1077_v52 = vld [vmem:[#allocation2 + $0x138] sm:$0xff]  ;;  %v1078_v33 = vld [vmem:[#allocation2 + $0x140] sm:$0xff]  ;;  %587 = vst [vmem:[#allocation2 + $0x169] sm:$0xff] %v21246_v51  ;;  %v4344_v63 = vld [vmem:[#allocation2 + $0x2e8] sm:$0xff] }
 0x125   :  { %v1096_v43 = vpack.c.bf16 %v1078_v33, %v1077_v52  ;;  %v4345_v4 = vld [vmem:[#allocation2 + $0x2f0] sm:$0xff]  ;;  %1047 = vst [vmem:[#allocation2 + $0x319] sm:$0xff] %v21249_v32 }
 0x126   :  { %v4363_v17 = vpack.c.bf16 %v4345_v4, %v4344_v63  ;;  %v1079_v16 = vld [vmem:[#allocation2 + $0x150] sm:$0xff]  ;;  %v1080_v19 = vld [vmem:[#allocation2 + $0x158] sm:$0xff] }
 0x127   :  { %17324 = vmatmul.mubr.bf16.gmra.mrb[56].mxu0 %v1096_v43  ;;  %v1097_v61 = vpack.c.bf16 %v1080_v19, %v1079_v16  ;;  %v1357_v52 = vld [vmem:[#allocation2 + $0x9] sm:$0xff]  ;;  %v4656_v43 = vpack.c.bf16 %v4625_v37, %v4624_v5  ;;  %v1359_v16 = vld [vmem:[#allocation2 + $0x21] sm:$0xff]  ;;  %v25231_v37 = vpack.c.bf16 %v20799_v21, %v20806_v25  ;;  %v25232_v5 = vpack.c.bf16 %v20820_v30, %v20824_v34  ;;  %v20103_v25 = vld [vmem:[%s25075_s3 + $0x98] sm:$0xff]  }
 0x128   :  { %17756 = vmatmul.mubr.bf16.gmra.mrb[56].mxu1 %v4363_v17  ;;  %v4346_v47 = vld [vmem:[#allocation2 + $0x300] sm:$0xff]  ;;  %v4347_v24 = vld [vmem:[#allocation2 + $0x308] sm:$0xff]  ;;  %v1388_v63 = vpack.c.bf16 %v1357_v52, %v1356_v9  ;;  %v1389_v19 = vpack.c.bf16 %v1359_v16, %v20801_v22  ;;  %v25233_v22 = vpack.c.bf16 %v20826_v35, %v20832_v38  ;;  %v20108_v21 = vld [vmem:[%s25075_s3 + $0x90] sm:$0xff]   ;;  %v25234_v30 = vpack.c.bf16 %v20848_v44, %v20854_v49 }
 0x129   :  { %v4364_v33 = vpack.c.bf16 %v4347_v24, %v4346_v47  ;;  %17327 = vmatprep.mubr.bf16.mxu0 %v1097_v61  ;;  %v20101_v24 = vld [vmem:[%s25075_s3 + $0x88] sm:$0xff]   ;;  %v20109_v34 = vld [vmem:[%s25075_s3 + $0x98] sm:$0xff]   ;;  %v25235_v35 = vpack.c.bf16 %v20852_v48, %v20866_v54  ;;  %v25236_v38 = vpack.c.bf16 %v20879_v0, %v20886_v6  ;;  %v20104_v44 = vld [vmem:[%s25075_s3 + $0xa0] sm:$0xff]   ;;  %v25238_v0 = vpack.c.bf16 %v20915_v26, %v20924_v12 }
 0x12a   :  { %v20111_v48 = vld [vmem:[%s25075_s3 + $0xa0] sm:$0xff]   ;;  %v20107_v49 = vld [vmem:[%s25075_s3 + $0xa8] sm:$0xff]   ;;  %v525_v54 = vld [vmem:[%s25076_s1 + $0xf8] sm:$0xff]  ;;  %v25241_v26 = vpack.c.bf16 %v20958_v3, %v20970_v13  ;;  %v25243_v13 = vpack.c.bf16 %v20990_v45, %v21004_v53  ;;  %v25244_v61 = vpack.c.bf16 %v21017_v56, %v21024_v23  ;;  %v25245_v47 = vpack.c.bf16 %v21026_v62, %v21038_v50 }
 0x12b   :  { %17759 = vmatprep.mubr.bf16.mxu1 %v4364_v33  ;;  %v1081_v46 = vld [vmem:[#allocation2 + $0x168] sm:$0xff]  ;;  %v1082_v51 = vld [vmem:[#allocation2 + $0x170] sm:$0xff]  ;;  %v20115_v3 = vld [vmem:[%s25075_s3 + $0xb8] sm:$0xff]   ;;  %v25247_v53 = vpack.c.bf16 %v21058_v55, %v21072_v39  ;;  %v25248_v56 = vpack.c.bf16 %v21085_v10, %v21092_v8  ;;  %v25249_v23 = vpack.c.bf16 %v21094_v28, %v21106_v59  ;;  %v17282_v8 = vpop.f32.mrb[30].mxu1 }
 0x12c   :  { %v1098_v4 = vpack.c.bf16 %v1082_v51, %v1081_v46  ;;  %v4348_v18 = vld [vmem:[#allocation2 + $0x318] sm:$0xff]  ;;  %v4349_v57 = vld [vmem:[#allocation2 + $0x320] sm:$0xff]  ;;  %v20106_v51 = vld [vmem:[%s25075_s3 + $0x88] sm:$0xff]   ;;  %v17218_v46 = vpop.f32.mrb[30].mxu0 }
 0x12d   :  { %v4365_v17 = vpack.c.bf16 %v4349_v57, %v4348_v18  ;;  %v20102_v18 = vld [vmem:[%s25075_s3 + $0x90] sm:$0xff]   ;;  %v20112_v6 = vld [vmem:[%s25075_s3 + $0xa8] sm:$0xff]   ;;  %v21330_v12 = vadd.f32 %v17218_v46, %v525_v54  ;;  %v485_v57 = vpop.f32.mrb[31].mxu0  ;;  %v20121_v45 = vld [vmem:[%s25075_s3 + $0xc0] sm:$0xff]  }
 0x12e   :  { %v20110_v9 = vld [vmem:[%s25075_s3 + $0xb0] sm:$0xff]   ;;  %v25250_v62 = vld [vmem:[#allocation5_spill] sm:$0xff]  ;;  %v25252_v52 = vld [vmem:[#allocation4_spill] sm:$0xff] }
 0x12f   :  { %17328 = vmatmul.mubr.bf16.gmra.mrb[60].mxu0 %v1098_v4  ;;  %590 = vst [vmem:[#allocation2 + $0x189] sm:$0xff] %v21330_v12  ;;  %v25251_v50 = vpack.c.bf16 %v21121_v60, %v25250_v62  ;;  %v25255_v33 = vld [vmem:[#allocation7_spill] sm:$0xff]  ;;  %v25258_v39 = vld [vmem:[#allocation9_spill] sm:$0xff]  ;;  %v25259_v4 = vld [vmem:[#allocation10_spill] sm:$0xff] }
 0x130   :  { %17760 = vmatmul.mubr.bf16.gmra.mrb[60].mxu1 %v4365_v17  ;;  %17347 = vmatprep.mubr.bf16.mxu0 %v1388_v63  ;;  %v25256_v63 = vld [vmem:[#allocation8_spill] sm:$0xff]  ;;  %v25260_v10 = vpack.c.bf16 %v25258_v39, %v25259_v4  ;;  %v15408_v28 = vld [vmem:[%s25076_s1 + $0x1f8] sm:$0xff]  ;;  %v15407_v59 = vld [vmem:[%s25076_s1 + $0x1f0] sm:$0xff] }
 0x131   :  { %17779 = vmatprep.mubr.bf16.mxu1 %v4656_v43  ;;  %v25257_v55 = vpack.c.bf16 %v25255_v33, %v25256_v63  ;;  %v1017_v60 = vadd.f32 %v17282_v8, %v15408_v28  ;;  %v944_v43 = vpop.f32.mrb[31].mxu1  ;;  %v25261_v16 = vld [vmem:[#allocation11_spill] sm:$0xff]  ;;  %v4997_v46 = vld [vmem:[#allocation2 + $0x1e2] sm:$0xff] }
 0x132   :  { %v1016_v17 = vadd.f32 %v15407_v59, %v944_v43  ;;  %v1736_v33 = vld [vmem:[#allocation2 + $0x7a] sm:$0xff]  ;;  %v1737_v63 = vld [vmem:[#allocation2 + $0x82] sm:$0xff]  ;;  %v5004_v39 = vld [vmem:[#allocation2 + $0x232] sm:$0xff] }
 0x133   :  { %1050 = vst [vmem:[#allocation2 + $0x339] sm:$0xff] %v1017_v60  ;;  %v20120_v4 = vld [vmem:[%s25075_s3 + $0xe0] sm:$0xff]   ;;  %v5006_v60 = vld [vmem:[#allocation2 + $0x24a] sm:$0xff]  ;;  %v1763_v43 = vpack.c.bf16 %v1737_v63, %v1736_v33  ;;  %v5020_v33 = vld [vmem:[#allocation2 + $0x2f2] sm:$0xff] }
 0x134   :  { %1049 = vst [vmem:[#allocation2 + $0x331] sm:$0xff] %v1016_v17  ;;  %v1739_v8 = vld [vmem:[#allocation2 + $0x9a] sm:$0xff]  ;;  %v5005_v59 = vld [vmem:[#allocation2 + $0x242] sm:$0xff]  ;;  %v1754_v63 = vld [vmem:[#allocation2 + $0x152] sm:$0xff] }
 0x135   :  { %v20127_v28 = vld [vmem:[%s25075_s3 + $0xe0] sm:$0xff]  }
 0x137   :  { %17348 = vmatmul.mubr.bf16.vlgmr.msra.gmra.mrb[32].mxu0 %v1389_v19  ;;  %v25262_v19 = vld [vmem:[#allocation13_spill] sm:$0xff] }
 0x138   :  { %17380 = vmatpush3.bf16.msra.mxu0 %v21116_v41  ;;  %17780 = vmatmul.mubr.bf16.vlgmr.msra.gmra.mrb[32].mxu1 %v25231_v37  ;;  %v25237_v41 = vpack.c.bf16 %v20888_v7, %v20901_v14  ;;  %v524_v7 = vld [vmem:[%s25076_s1 + $0xf0] sm:$0xff]  ;;  %v25239_v14 = vpack.c.bf16 %v20922_v36, %v20936_v42 }
 0x139   :  { %17351 = vmatprep.mubr.bf16.mxu0 %v25232_v5  ;;  %17783 = vmatprep.mubr.bf16.mxu1 %v25233_v22  ;;  %v21335_v36 = vadd.f32 %v524_v7, %v485_v57  ;;  %v20114_v42 = vld [vmem:[%s25075_s3 + $0xb0] sm:$0xff]   ;;  %v25267_v22 = vpack.c.bf16 %v21212_v1, %v21216_v20  ;;  %v1728_v1 = vld [vmem:[#allocation2 + $0x1a] sm:$0xff]  ;;  %v1729_v20 = vld [vmem:[#allocation2 + $0x22] sm:$0xff] }
 0x13a   :  { %17381 = vmatprep.subr.bf16.mxu0 %v20101_v24  ;;  %17812 = vmatpush3.bf16.msra.mxu1 %v21126_v29  ;;  %v25240_v29 = vpack.c.bf16 %v20949_v58, %v20956_v2  ;;  %v20113_v58 = vld [vmem:[%s25075_s3 + $0xb8] sm:$0xff]   ;;  %v25242_v2 = vpack.c.bf16 %v20983_v11, %v20992_v31  ;;  %v20116_v11 = vld [vmem:[%s25075_s3 + $0xc0] sm:$0xff]   ;;  %v25246_v31 = vpack.c.bf16 %v21051_v27, %v21060_v40  ;;  %v25253_v27 = vld [vmem:[#allocation6_spill] sm:$0xff] }
 0x13b   :  { %17813 = vmatprep.subr.bf16.mxu1 %v20106_v51  ;;  %589 = vst [vmem:[#allocation2 + $0x181] sm:$0xff] %v21335_v36  ;;  %v25254_v40 = vpack.c.bf16 %v25252_v52, %v25253_v27  ;;  %v25265_v37 = vld [vmem:[#allocation14_spill] sm:$0xff]  ;;  %v1759_v57 = vpack.c.bf16 %v1729_v20, %v1728_v1  ;;  %v20119_v27 = vld [vmem:[%s25075_s3 + $0xd8] sm:$0xff]  }
 0x13c   :  { %17382 = vmatpush3.bf16.msra.mxu0 %v20101_v24  ;;  %v25263_v24 = vpack.c.bf16 %v25261_v16, %v25262_v19  ;;  %v4996_v7 = vld [vmem:[#allocation2 + $0x1d2] sm:$0xff]  ;;  %v20123_v19 = vld [vmem:[%s25075_s3 + $0xe8] sm:$0xff]   ;;  %v1744_v20 = vld [vmem:[#allocation2 + $0xda] sm:$0xff] }
 0x13d   :  { %17383 = vmatprep.subr.bf16.mxu0 %v20102_v18  ;;  %v20131_v1 = vld [vmem:[%s25075_s3 + $0xf8] sm:$0xff]  }
 0x13e   :  { %17814 = vmatpush3.bf16.msra.mxu1 %v20106_v51  ;;  %v25264_v51 = vld [vmem:[#allocation12_spill] sm:$0xff] }
 0x13f   :  { %17352 = vmatmul.mubr.bf16.gmra.mrb[36].mxu0 %v25234_v30  ;;  %17815 = vmatprep.subr.bf16.mxu1 %v20108_v21  ;;  %v25266_v5 = vpack.c.bf16 %v25264_v51, %v25265_v37  ;;  %v1726_v30 = vld [vmem:[#allocation2 + $0x2] sm:$0xff]  ;;  %v1740_v37 = vld [vmem:[#allocation2 + $0xaa] sm:$0xff] }
 0x140   :  { %17784 = vmatmul.mubr.bf16.gmra.mrb[36].mxu1 %v25235_v35  ;;  %17355 = vmatprep.mubr.bf16.mxu0 %v25236_v38  ;;  %v4993_v35 = vld [vmem:[#allocation2 + $0x1b2] sm:$0xff]  ;;  %v4994_v38 = vld [vmem:[#allocation2 + $0x1ba] sm:$0xff]  ;;  %v20128_v51 = vld [vmem:[%s25075_s3 + $0xe8] sm:$0xff]  }
 0x141   :  { %17787 = vmatprep.mubr.bf16.mxu1 %v25237_v41  ;;  %17384 = vmatpush3.bf16.msra.mxu0 %v20102_v18  ;;  %v25268_v18 = vld [vmem:[#allocation15_spill] sm:$0xff] }
 0x142   :  { %17385 = vmatprep.subr.bf16.mxu0 %v20103_v25  ;;  %17816 = vmatpush3.bf16.msra.mxu1 %v20108_v21  ;;  %v25269_v21 = vld [vmem:[#allocation16_spill] sm:$0xff] }
 0x143   :  { %17817 = vmatprep.subr.bf16.mxu1 %v20109_v34 }
 0x145   :  { %17386 = vmatpush3.bf16.msra.mxu0 %v20103_v25  ;;  %v25270_v25 = vpack.c.bf16 %v25268_v18, %v25269_v21  ;;  %v5008_v18 = vld [vmem:[#allocation2 + $0x262] sm:$0xff]  ;;  %v20126_v21 = vld [vmem:[%s25075_s3 + $0xf0] sm:$0xff]  }
 0x146   :  { %17387 = vmatprep.subr.bf16.mxu0 %v20104_v44  ;;  %17818 = vmatpush3.bf16.msra.mxu1 %v20109_v34  ;;  %v1727_v34 = vld [vmem:[#allocation2 + $0xa] sm:$0xff] }
 0x147   :  { %17356 = vmatmul.mubr.bf16.gmra.mrb[40].mxu0 %v25238_v0  ;;  %17819 = vmatprep.subr.bf16.mxu1 %v20111_v48  ;;  %v1758_v41 = vpack.c.bf16 %v1727_v34, %v1726_v30  ;;  %v25274_v0 = vpack.c.bf16 %v21244_v15, %v21249_v32  ;;  %v20122_v32 = vld [vmem:[%s25075_s3 + $0xc8] sm:$0xff]  }
 0x148   :  { %17788 = vmatmul.mubr.bf16.gmra.mrb[40].mxu1 %v25239_v14  ;;  %17359 = vmatprep.mubr.bf16.mxu0 %v25240_v29  ;;  %v1731_v14 = vld [vmem:[#allocation2 + $0x3a] sm:$0xff]  ;;  %v1730_v29 = vld [vmem:[#allocation2 + $0x32] sm:$0xff]  ;;  %v1742_v30 = vld [vmem:[#allocation2 + $0xc2] sm:$0xff] }
 0x149   :  { %17791 = vmatprep.mubr.bf16.mxu1 %v25241_v26  ;;  %17388 = vmatpush3.bf16.msra.mxu0 %v20104_v44  ;;  %v5025_v44 = vpack.c.bf16 %v4994_v38, %v4993_v35  ;;  %v4998_v26 = vld [vmem:[#allocation2 + $0x1ea] sm:$0xff]  ;;  %v5009_v38 = vld [vmem:[#allocation2 + $0x272] sm:$0xff] }
 0x14a   :  { %17389 = vmatprep.subr.bf16.mxu0 %v20107_v49  ;;  %17820 = vmatpush3.bf16.msra.mxu1 %v20111_v48  ;;  %v25271_v48 = vld [vmem:[#allocation17_spill] sm:$0xff]  ;;  %v5027_v15 = vpack.c.bf16 %v4998_v26, %v4997_v46  ;;  %v20130_v35 = vld [vmem:[%s25075_s3 + $0xf0] sm:$0xff]   ;;  %v1747_v26 = vld [vmem:[#allocation2 + $0xfa] sm:$0xff] }
 0x14b   :  { %17821 = vmatprep.subr.bf16.mxu1 %v20112_v6  ;;  %v1743_v34 = vld [vmem:[#allocation2 + $0xca] sm:$0xff]  ;;  %v1746_v46 = vld [vmem:[#allocation2 + $0xf2] sm:$0xff] }
 0x14d   :  { %17390 = vmatpush3.bf16.msra.mxu0 %v20107_v49  ;;  %v25272_v49 = vld [vmem:[#allocation18_spill] sm:$0xff] }
 0x14e   :  { %17391 = vmatprep.subr.bf16.mxu0 %v20110_v9  ;;  %17822 = vmatpush3.bf16.msra.mxu1 %v20112_v6  ;;  %v25273_v54 = vpack.c.bf16 %v25271_v48, %v25272_v49  ;;  %v4995_v6 = vld [vmem:[#allocation2 + $0x1ca] sm:$0xff]  ;;  %v1766_v49 = vpack.c.bf16 %v1743_v34, %v1742_v30  ;;  %v2099_v34 = vld [vmem:[#allocation2 + $0x38] sm:$0xff] }
 0x14f   :  { %17360 = vmatmul.mubr.bf16.gmra.mrb[44].mxu0 %v25242_v2  ;;  %17823 = vmatprep.subr.bf16.mxu1 %v20114_v42  ;;  %v1733_v2 = vld [vmem:[#allocation2 + $0x52] sm:$0xff] }
 0x150   :  { %17792 = vmatmul.mubr.bf16.gmra.mrb[44].mxu1 %v25243_v13  ;;  %17363 = vmatprep.mubr.bf16.mxu0 %v25244_v61  ;;  %v1732_v13 = vld [vmem:[#allocation2 + $0x4a] sm:$0xff]  ;;  %v4999_v61 = vld [vmem:[#allocation2 + $0x1fa] sm:$0xff] }
 0x151   :  { %17795 = vmatprep.mubr.bf16.mxu1 %v25245_v47  ;;  %17392 = vmatpush3.bf16.msra.mxu0 %v20110_v9  ;;  %v5026_v9 = vpack.c.bf16 %v4996_v7, %v4995_v6  ;;  %v5000_v47 = vld [vmem:[#allocation2 + $0x202] sm:$0xff]  ;;  %v1761_v62 = vpack.c.bf16 %v1733_v2, %v1732_v13  ;;  %v5011_v7 = vld [vmem:[#allocation2 + $0x28a] sm:$0xff]  ;;  %v1749_v13 = vld [vmem:[#allocation2 + $0x112] sm:$0xff] }
 0x152   :  { %17393 = vmatprep.subr.bf16.mxu0 %v20113_v58  ;;  %17824 = vmatpush3.bf16.msra.mxu1 %v20114_v42  ;;  %v20117_v42 = vld [vmem:[%s25075_s3 + $0xc8] sm:$0xff]   ;;  %v2098_v30 = vld [vmem:[#allocation2 + $0x30] sm:$0xff] }
 0x153   :  { %17825 = vmatprep.subr.bf16.mxu1 %v20115_v3  ;;  %v1745_v6 = vld [vmem:[#allocation2 + $0xe2] sm:$0xff] }
 0x155   :  { %17394 = vmatpush3.bf16.msra.mxu0 %v20113_v58  ;;  %v1760_v58 = vpack.c.bf16 %v1731_v14, %v1730_v29  ;;  %v5012_v14 = vld [vmem:[#allocation2 + $0x292] sm:$0xff]  ;;  %v21461_v29 = vld [vmem:[%s25075_s3 + $0x100] sm:$0xff]  }
 0x156   :  { %17826 = vmatpush3.bf16.msra.mxu1 %v20115_v3  ;;  %17427 = vmatprep.subr.bf16.mxu0 %v20116_v11  ;;  %v20118_v3 = vld [vmem:[%s25075_s3 + $0xd0] sm:$0xff]  }
 0x157   :  { %17364 = vmatmul.mubr.bf16.gmra.mrb[48].mxu0 %v25246_v31  ;;  %17859 = vmatprep.subr.bf16.mxu1 %v20121_v45  ;;  %v1734_v31 = vld [vmem:[#allocation2 + $0x62] sm:$0xff] }
 0x158   :  { %17796 = vmatmul.mubr.bf16.gmra.mrb[48].mxu1 %v25247_v53  ;;  %17367 = vmatprep.mubr.bf16.mxu0 %v25248_v56  ;;  %v1735_v53 = vld [vmem:[#allocation2 + $0x6a] sm:$0xff]  ;;  %v5001_v56 = vld [vmem:[#allocation2 + $0x212] sm:$0xff] }
 0x159   :  { %17799 = vmatprep.mubr.bf16.mxu1 %v25249_v23  ;;  %v5002_v23 = vld [vmem:[#allocation2 + $0x21a] sm:$0xff]  ;;  %v1762_v52 = vpack.c.bf16 %v1735_v53, %v1734_v31  ;;  %v1750_v31 = vld [vmem:[#allocation2 + $0x122] sm:$0xff]  ;;  %v1751_v53 = vld [vmem:[#allocation2 + $0x12a] sm:$0xff] }
 0x15f   :  { %17368 = vmatmul.mubr.bf16.gmra.mrb[52].mxu0 %v25251_v50  ;;  %v5028_v50 = vpack.c.bf16 %v5000_v47, %v4999_v61  ;;  %v5015_v61 = vld [vmem:[#allocation2 + $0x2ba] sm:$0xff]  ;;  %v5016_v47 = vld [vmem:[#allocation2 + $0x2c2] sm:$0xff] }
 0x160   :  { %17800 = vmatmul.mubr.bf16.gmra.mrb[52].mxu1 %v25254_v40  ;;  %17371 = vmatprep.mubr.bf16.mxu0 %v25257_v55  ;;  %v20125_v40 = vld [vmem:[%s25075_s3 + $0xd8] sm:$0xff]   ;;  %v5003_v55 = vld [vmem:[#allocation2 + $0x22a] sm:$0xff] }
 0x161   :  { %17803 = vmatprep.mubr.bf16.mxu1 %v25260_v10  ;;  %v1738_v10 = vld [vmem:[#allocation2 + $0x92] sm:$0xff]  ;;  %v5030_v17 = vpack.c.bf16 %v5004_v39, %v5003_v55  ;;  %v1755_v55 = vld [vmem:[#allocation2 + $0x15a] sm:$0xff]  ;;  %v5021_v39 = vld [vmem:[#allocation2 + $0x302] sm:$0xff] }
 0x162   :  { %v1764_v16 = vpack.c.bf16 %v1739_v8, %v1738_v10 }
 0x167   :  { %17372 = vmatmul.mubr.bf16.gmra.mrb[56].mxu0 %v25263_v24  ;;  %v5031_v24 = vpack.c.bf16 %v5006_v60, %v5005_v59  ;;  %v1756_v60 = vld [vmem:[#allocation2 + $0x16a] sm:$0xff] }
 0x168   :  { %17804 = vmatmul.mubr.bf16.gmra.mrb[56].mxu1 %v25266_v5  ;;  %17375 = vmatprep.mubr.bf16.mxu0 %v25267_v22  ;;  %v1741_v5 = vld [vmem:[#allocation2 + $0xb2] sm:$0xff]  ;;  %v5007_v22 = vld [vmem:[#allocation2 + $0x25a] sm:$0xff] }
 0x169   :  { %17807 = vmatprep.mubr.bf16.mxu1 %v25270_v25  ;;  %v2513_v25 = vpack.c.bf16 %v21330_v12, %v21335_v36  ;;  %v5032_v48 = vpack.c.bf16 %v5008_v18, %v5007_v22 }
 0x16f   :  { %17376 = vmatmul.mubr.bf16.gmra.mrb[60].mxu0 %v25273_v54  ;;  %v20129_v54 = vld [vmem:[%s25075_s3 + $0xf8] sm:$0xff]  }
 0x170   :  { %17808 = vmatmul.mubr.bf16.gmra.mrb[60].mxu1 %v25274_v0  ;;  %17395 = vmatprep.mubr.bf16.mxu0 %v1758_v41  ;;  %v5010_v41 = vld [vmem:[#allocation2 + $0x27a] sm:$0xff] }
 0x171   :  { %17827 = vmatprep.mubr.bf16.mxu1 %v5025_v44  ;;  %v1765_v44 = vpack.c.bf16 %v1741_v5, %v1740_v37  ;;  %v5033_v0 = vpack.c.bf16 %v5010_v41, %v5009_v38  ;;  %v5363_v37 = vld [vmem:[#allocation2 + $0x1d0] sm:$0xff]  ;;  %v5365_v38 = vld [vmem:[#allocation2 + $0x1e8] sm:$0xff] }
 0x172   :  { %v2100_v41 = vld [vmem:[#allocation2 + $0x48] sm:$0xff] }
 0x177   :  { %17396 = vmatmul.mubr.bf16.vlgmr.msra.gmra.mrb[32].mxu0 %v1759_v57  ;;  %v21466_v57 = vld [vmem:[%s25075_s3 + $0x100] sm:$0xff]  }
 0x178   :  { %17428 = vmatpush3.bf16.msra.mxu0 %v20116_v11  ;;  %17828 = vmatmul.mubr.bf16.vlgmr.msra.gmra.mrb[32].mxu1 %v5026_v9  ;;  %v20124_v11 = vld [vmem:[%s25075_s3 + $0xd0] sm:$0xff]   ;;  %v5013_v9 = vld [vmem:[#allocation2 + $0x2a2] sm:$0xff] }
 0x179   :  { %17399 = vmatprep.mubr.bf16.mxu0 %v1760_v58  ;;  %17831 = vmatprep.mubr.bf16.mxu1 %v5027_v15  ;;  %v1767_v58 = vpack.c.bf16 %v1745_v6, %v1744_v20  ;;  %v5034_v15 = vpack.c.bf16 %v5012_v14, %v5011_v7  ;;  %v20138_v7 = vld [vmem:[%s25075_s3 + $0x108] sm:$0xff]   ;;  %v2102_v14 = vld [vmem:[#allocation2 + $0x60] sm:$0xff] }
 0x17a   :  { %17429 = vmatprep.subr.bf16.mxu0 %v20117_v42  ;;  %17860 = vmatpush3.bf16.msra.mxu1 %v20121_v45  ;;  %v5029_v45 = vpack.c.bf16 %v5002_v23, %v5001_v56  ;;  %v5018_v56 = vld [vmem:[#allocation2 + $0x2da] sm:$0xff] }
 0x17b   :  { %17861 = vmatprep.subr.bf16.mxu1 %v20122_v32 }
 0x17c   :  { %17430 = vmatpush3.bf16.msra.mxu0 %v20117_v42  ;;  %v5014_v42 = vld [vmem:[#allocation2 + $0x2aa] sm:$0xff] }
 0x17d   :  { %17431 = vmatprep.subr.bf16.mxu0 %v20118_v3  ;;  %v5035_v2 = vpack.c.bf16 %v5014_v42, %v5013_v9  ;;  %v5368_v9 = vld [vmem:[#allocation2 + $0x210] sm:$0xff]  ;;  %v5369_v42 = vld [vmem:[#allocation2 + $0x218] sm:$0xff] }
 0x17e   :  { %17862 = vmatpush3.bf16.msra.mxu1 %v20122_v32  ;;  %v1768_v32 = vpack.c.bf16 %v1747_v26, %v1746_v46  ;;  %v20134_v46 = vld [vmem:[%s25075_s3 + $0x110] sm:$0xff]   ;;  %v2103_v26 = vld [vmem:[#allocation2 + $0x68] sm:$0xff] }
 0x17f   :  { %17400 = vmatmul.mubr.bf16.gmra.mrb[36].mxu0 %v1761_v62  ;;  %17863 = vmatprep.subr.bf16.mxu1 %v20124_v11  ;;  %v5036_v62 = vpack.c.bf16 %v5016_v47, %v5015_v61  ;;  %v20135_v47 = vld [vmem:[%s25075_s3 + $0x118] sm:$0xff]  }
 0x180   :  { %17832 = vmatmul.mubr.bf16.gmra.mrb[36].mxu1 %v5028_v50  ;;  %17403 = vmatprep.mubr.bf16.mxu0 %v1762_v52  ;;  %v1770_v50 = vpack.c.bf16 %v1751_v53, %v1750_v31  ;;  %v20141_v31 = vld [vmem:[%s25075_s3 + $0x118] sm:$0xff]   ;;  %v2106_v53 = vld [vmem:[#allocation2 + $0x90] sm:$0xff] }
 0x181   :  { %17835 = vmatprep.mubr.bf16.mxu1 %v5029_v45  ;;  %17432 = vmatpush3.bf16.msra.mxu0 %v20118_v3  ;;  %v1748_v3 = vld [vmem:[#allocation2 + $0x10a] sm:$0xff]  ;;  %v1753_v45 = vld [vmem:[#allocation2 + $0x142] sm:$0xff] }
 0x182   :  { %17433 = vmatprep.subr.bf16.mxu0 %v20119_v27  ;;  %17864 = vmatpush3.bf16.msra.mxu1 %v20124_v11  ;;  %v5017_v11 = vld [vmem:[#allocation2 + $0x2d2] sm:$0xff]  ;;  %v1769_v23 = vpack.c.bf16 %v1749_v13, %v1748_v3  ;;  %v2131_v3 = vpack.c.bf16 %v2103_v26, %v2102_v14  ;;  %v5397_v13 = vpack.c.bf16 %v5369_v42, %v5368_v9  ;;  %v2119_v26 = vld [vmem:[#allocation2 + $0x128] sm:$0xff] }
 0x183   :  { %17865 = vmatprep.subr.bf16.mxu1 %v20125_v40  ;;  %v5037_v52 = vpack.c.bf16 %v5018_v56, %v5017_v11  ;;  %v2107_v11 = vld [vmem:[#allocation2 + $0x98] sm:$0xff]  ;;  %v5372_v56 = vld [vmem:[#allocation2 + $0x240] sm:$0xff]  ;;  %v5384_v9 = vld [vmem:[#allocation2 + $0x2d0] sm:$0xff] }
 0x184   :  { %v5385_v42 = vld [vmem:[#allocation2 + $0x2d8] sm:$0xff] }
 0x185   :  { %17434 = vmatpush3.bf16.msra.mxu0 %v20119_v27  ;;  %v1752_v27 = vld [vmem:[#allocation2 + $0x13a] sm:$0xff] }
 0x186   :  { %17435 = vmatprep.subr.bf16.mxu0 %v20120_v4  ;;  %17866 = vmatpush3.bf16.msra.mxu1 %v20125_v40  ;;  %v5019_v40 = vld [vmem:[#allocation2 + $0x2ea] sm:$0xff]  ;;  %v1771_v10 = vpack.c.bf16 %v1753_v45, %v1752_v27  ;;  %v20143_v27 = vld [vmem:[%s25075_s3 + $0x120] sm:$0xff]   ;;  %v5374_v45 = vld [vmem:[#allocation2 + $0x258] sm:$0xff] }
 0x187   :  { %17404 = vmatmul.mubr.bf16.gmra.mrb[40].mxu0 %v1763_v43  ;;  %17867 = vmatprep.subr.bf16.mxu1 %v20127_v28  ;;  %v5038_v8 = vpack.c.bf16 %v5020_v33, %v5019_v40  ;;  %v1757_v43 = vld [vmem:[#allocation2 + $0x172] sm:$0xff]  ;;  %v5375_v40 = vld [vmem:[#allocation2 + $0x260] sm:$0xff]  ;;  %v2133_v33 = vpack.c.bf16 %v2107_v11, %v2106_v53  ;;  %v5389_v53 = vld [vmem:[#allocation2 + $0x308] sm:$0xff] }
 0x188   :  { %17836 = vmatmul.mubr.bf16.gmra.mrb[40].mxu1 %v5030_v17  ;;  %17407 = vmatprep.mubr.bf16.mxu0 %v1764_v16  ;;  %v2096_v17 = vld [vmem:[#allocation2 + $0x18] sm:$0xff]  ;;  %v1773_v5 = vpack.c.bf16 %v1757_v43, %v1756_v60  ;;  %v20142_v43 = vld [vmem:[%s25075_s3 + $0x130] sm:$0xff]   ;;  %v2124_v11 = vld [vmem:[#allocation2 + $0x168] sm:$0xff] }
 0x189   :  { %17839 = vmatprep.mubr.bf16.mxu1 %v5031_v24  ;;  %17436 = vmatpush3.bf16.msra.mxu0 %v20120_v4  ;;  %v5022_v4 = vld [vmem:[#allocation2 + $0x30a] sm:$0xff]  ;;  %v5023_v16 = vld [vmem:[#allocation2 + $0x31a] sm:$0xff] }
 0x18a   :  { %17437 = vmatprep.subr.bf16.mxu0 %v20123_v19  ;;  %17868 = vmatpush3.bf16.msra.mxu1 %v20127_v28  ;;  %v1772_v28 = vpack.c.bf16 %v1755_v55, %v1754_v63  ;;  %v5039_v59 = vpack.c.bf16 %v5022_v4, %v5021_v39  ;;  %v2097_v24 = vld [vmem:[#allocation2 + $0x20] sm:$0xff]  ;;  %v20139_v39 = vld [vmem:[%s25075_s3 + $0x128] sm:$0xff]   ;;  %v5400_v4 = vpack.c.bf16 %v5375_v40, %v5374_v45  ;;  %v5377_v60 = vld [vmem:[#allocation2 + $0x278] sm:$0xff] }
 0x18b   :  { %17869 = vmatprep.subr.bf16.mxu1 %v20128_v51  ;;  %v2128_v18 = vpack.c.bf16 %v2097_v24, %v2096_v17  ;;  %v2112_v17 = vld [vmem:[#allocation2 + $0xd8] sm:$0xff]  ;;  %v5378_v24 = vld [vmem:[#allocation2 + $0x288] sm:$0xff]  ;;  %v5392_v40 = vld [vmem:[#allocation2 + $0x330] sm:$0xff] }
 0x18d   :  { %17438 = vmatpush3.bf16.msra.mxu0 %v20123_v19  ;;  %v5024_v19 = vld [vmem:[#allocation2 + $0x322] sm:$0xff] }
 0x18e   :  { %17439 = vmatprep.subr.bf16.mxu0 %v20126_v21  ;;  %17870 = vmatpush3.bf16.msra.mxu1 %v20128_v51  ;;  %v5362_v51 = vld [vmem:[#allocation2 + $0x1c8] sm:$0xff]  ;;  %v5040_v22 = vpack.c.bf16 %v5024_v19, %v5023_v16  ;;  %v2113_v16 = vld [vmem:[#allocation2 + $0xe0] sm:$0xff]  ;;  %v20146_v19 = vld [vmem:[%s25075_s3 + $0x130] sm:$0xff]  }
 0x18f   :  { %17408 = vmatmul.mubr.bf16.gmra.mrb[44].mxu0 %v1765_v44  ;;  %17871 = vmatprep.subr.bf16.mxu1 %v20130_v35  ;;  %v2101_v44 = vld [vmem:[#allocation2 + $0x50] sm:$0xff] }
 0x190   :  { %17840 = vmatmul.mubr.bf16.gmra.mrb[44].mxu1 %v5032_v48  ;;  %17411 = vmatprep.mubr.bf16.mxu0 %v1766_v49  ;;  %v5366_v48 = vld [vmem:[#allocation2 + $0x1f8] sm:$0xff]  ;;  %v5367_v49 = vld [vmem:[#allocation2 + $0x200] sm:$0xff]  ;;  %v2130_v20 = vpack.c.bf16 %v2101_v44, %v2100_v41  ;;  %v5381_v41 = vld [vmem:[#allocation2 + $0x2a8] sm:$0xff] }
 0x191   :  { %17843 = vmatprep.mubr.bf16.mxu1 %v5033_v0  ;;  %17440 = vmatpush3.bf16.msra.mxu0 %v20126_v21  ;;  %v5394_v21 = vpack.c.bf16 %v5363_v37, %v5362_v51  ;;  %v5396_v6 = vpack.c.bf16 %v5367_v49, %v5366_v48  ;;  %v5379_v51 = vld [vmem:[#allocation2 + $0x290] sm:$0xff]  ;;  %v21517_v44 = vld [vmem:[%s25075_s3 + $0x140] sm:$0xff]   ;;  %v2116_v48 = vld [vmem:[#allocation2 + $0x108] sm:$0xff] }
 0x192   :  { %17441 = vmatprep.subr.bf16.mxu0 %v20129_v54  ;;  %17872 = vmatpush3.bf16.msra.mxu1 %v20130_v35  ;;  %v5364_v35 = vld [vmem:[#allocation2 + $0x1e0] sm:$0xff]  ;;  %v2117_v49 = vld [vmem:[#allocation2 + $0x110] sm:$0xff] }
 0x193   :  { %17873 = vmatprep.subr.bf16.mxu1 %v20131_v1  ;;  %v5395_v0 = vpack.c.bf16 %v5365_v38, %v5364_v35  ;;  %v2115_v35 = vld [vmem:[#allocation2 + $0xf8] sm:$0xff]  ;;  %v5380_v38 = vld [vmem:[#allocation2 + $0x2a0] sm:$0xff] }
 0x195   :  { %17442 = vmatpush3.bf16.msra.mxu0 %v20129_v54  ;;  %v2129_v54 = vpack.c.bf16 %v2099_v34, %v2098_v30  ;;  %v20147_v30 = vld [vmem:[%s25075_s3 + $0x138] sm:$0xff]   ;;  %v2114_v34 = vld [vmem:[#allocation2 + $0xf0] sm:$0xff] }
 0x196   :  { %17874 = vmatpush3.bf16.msra.mxu1 %v20131_v1  ;;  %17475 = vmatprep.subr.bf16.mxu0 %v21461_v29  ;;  %v20133_v1 = vld [vmem:[%s25075_s3 + $0x108] sm:$0xff]  }
 0x197   :  { %17412 = vmatmul.mubr.bf16.gmra.mrb[48].mxu0 %v1767_v58  ;;  %17907 = vmatprep.subr.bf16.mxu1 %v21466_v57  ;;  %v2104_v58 = vld [vmem:[#allocation2 + $0x78] sm:$0xff] }
 0x198   :  { %17844 = vmatmul.mubr.bf16.gmra.mrb[48].mxu1 %v5034_v15  ;;  %17415 = vmatprep.mubr.bf16.mxu0 %v1768_v32  ;;  %v2105_v15 = vld [vmem:[#allocation2 + $0x80] sm:$0xff]  ;;  %v5370_v32 = vld [vmem:[#allocation2 + $0x228] sm:$0xff] }
 0x199   :  { %17847 = vmatprep.mubr.bf16.mxu1 %v5035_v2  ;;  %v5371_v2 = vld [vmem:[#allocation2 + $0x230] sm:$0xff]  ;;  %v2132_v61 = vpack.c.bf16 %v2105_v15, %v2104_v58  ;;  %v2120_v58 = vld [vmem:[#allocation2 + $0x138] sm:$0xff]  ;;  %v2121_v15 = vld [vmem:[#allocation2 + $0x140] sm:$0xff] }
 0x19f   :  { %17416 = vmatmul.mubr.bf16.gmra.mrb[52].mxu0 %v1769_v23  ;;  %v5373_v23 = vld [vmem:[#allocation2 + $0x248] sm:$0xff] }
 0x1a0   :  { %17848 = vmatmul.mubr.bf16.gmra.mrb[52].mxu1 %v5036_v62  ;;  %17419 = vmatprep.mubr.bf16.mxu0 %v1770_v50  ;;  %v20136_v62 = vld [vmem:[%s25075_s3 + $0x120] sm:$0xff]   ;;  %v2108_v50 = vld [vmem:[#allocation2 + $0xa8] sm:$0xff]  ;;  %v5399_v63 = vpack.c.bf16 %v5373_v23, %v5372_v56  ;;  %v2125_v56 = vld [vmem:[#allocation2 + $0x170] sm:$0xff] }
 0x1a1   :  { %17851 = vmatprep.mubr.bf16.mxu1 %v5037_v52  ;;  %v2109_v52 = vld [vmem:[#allocation2 + $0xb0] sm:$0xff]  ;;  %v5390_v23 = vld [vmem:[#allocation2 + $0x318] sm:$0xff] }
 0x1a2   :  { %v2134_v55 = vpack.c.bf16 %v2109_v52, %v2108_v50 }
 0x1a7   :  { %17420 = vmatmul.mubr.bf16.gmra.mrb[56].mxu0 %v1771_v10  ;;  %v20144_v10 = vld [vmem:[%s25075_s3 + $0x128] sm:$0xff]  }
 0x1a8   :  { %17852 = vmatmul.mubr.bf16.gmra.mrb[56].mxu1 %v5038_v8  ;;  %17423 = vmatprep.mubr.bf16.mxu0 %v1772_v28  ;;  %v2110_v8 = vld [vmem:[#allocation2 + $0xc0] sm:$0xff]  ;;  %v2111_v28 = vld [vmem:[#allocation2 + $0xc8] sm:$0xff] }
 0x1a9   :  { %17855 = vmatprep.mubr.bf16.mxu1 %v5039_v59  ;;  %v5376_v59 = vld [vmem:[#allocation2 + $0x270] sm:$0xff]  ;;  %v2135_v37 = vpack.c.bf16 %v2111_v28, %v2110_v8 }
 0x1aa   :  { %v5731_v8 = vld [vmem:[#allocation2 + $0x1c9] sm:$0xff]  ;;  %v5732_v28 = vld [vmem:[#allocation2 + $0x1d1] sm:$0xff] }
 0x1af   :  { %17424 = vmatmul.mubr.bf16.gmra.mrb[60].mxu0 %v1773_v5  ;;  %v5401_v5 = vpack.c.bf16 %v5377_v60, %v5376_v59 }
 0x1b0   :  { %17856 = vmatmul.mubr.bf16.gmra.mrb[60].mxu1 %v5040_v22  ;;  %17443 = vmatprep.mubr.bf16.mxu0 %v2128_v18  ;;  %v2136_v22 = vpack.c.bf16 %v2113_v16, %v2112_v17  ;;  %v20145_v18 = vld [vmem:[%s25075_s3 + $0x138] sm:$0xff]  }
 0x1b1   :  { %17875 = vmatprep.mubr.bf16.mxu1 %v5394_v21  ;;  %v5402_v21 = vpack.c.bf16 %v5379_v51, %v5378_v24  ;;  %v2468_v17 = vld [vmem:[#allocation2 + $0x31] sm:$0xff]  ;;  %v2469_v16 = vld [vmem:[#allocation2 + $0x39] sm:$0xff]  ;;  %v5734_v24 = vld [vmem:[#allocation2 + $0x1e9] sm:$0xff] }
 0x1b2   :  { %v2470_v51 = vld [vmem:[#allocation2 + $0x49] sm:$0xff] }
 0x1b7   :  { %17444 = vmatmul.mubr.bf16.vlgmr.msra.gmra.mrb[32].mxu0 %v2129_v54  ;;  %v21522_v54 = vld [vmem:[%s25075_s3 + $0x140] sm:$0xff]  }
 0x1b8   :  { %17476 = vmatpush3.bf16.msra.mxu0 %v21461_v29  ;;  %17876 = vmatmul.mubr.bf16.vlgmr.msra.gmra.mrb[32].mxu1 %v5395_v0  ;;  %v20140_v29 = vld [vmem:[%s25075_s3 + $0x110] sm:$0xff]   ;;  %v5382_v0 = vld [vmem:[#allocation2 + $0x2b8] sm:$0xff] }
 0x1b9   :  { %17447 = vmatprep.mubr.bf16.mxu0 %v2130_v20  ;;  %17879 = vmatprep.mubr.bf16.mxu1 %v5396_v6  ;;  %v2137_v20 = vpack.c.bf16 %v2115_v35, %v2114_v34  ;;  %v5403_v6 = vpack.c.bf16 %v5381_v41, %v5380_v38  ;;  %v20154_v38 = vld [vmem:[%s25075_s3 + $0x148] sm:$0xff]  }
 0x1ba   :  { %17477 = vmatprep.subr.bf16.mxu0 %v20133_v1  ;;  %17908 = vmatpush3.bf16.msra.mxu1 %v21466_v57  ;;  %v5398_v57 = vpack.c.bf16 %v5371_v2, %v5370_v32  ;;  %v5387_v32 = vld [vmem:[#allocation2 + $0x2f0] sm:$0xff]  ;;  %v2472_v41 = vld [vmem:[#allocation2 + $0x61] sm:$0xff] }
 0x1bb   :  { %17909 = vmatprep.subr.bf16.mxu1 %v20138_v7 }
 0x1bc   :  { %17478 = vmatpush3.bf16.msra.mxu0 %v20133_v1  ;;  %v5383_v1 = vld [vmem:[#allocation2 + $0x2c0] sm:$0xff] }
 0x1bd   :  { %17479 = vmatprep.subr.bf16.mxu0 %v20134_v46  ;;  %v5404_v14 = vpack.c.bf16 %v5383_v1, %v5382_v0  ;;  %v5737_v0 = vld [vmem:[#allocation2 + $0x211] sm:$0xff]  ;;  %v5738_v1 = vld [vmem:[#allocation2 + $0x219] sm:$0xff] }
 0x1be   :  { %17910 = vmatpush3.bf16.msra.mxu1 %v20138_v7  ;;  %v2138_v7 = vpack.c.bf16 %v2117_v49, %v2116_v48  ;;  %v20150_v48 = vld [vmem:[%s25075_s3 + $0x150] sm:$0xff]  }
 0x1bf   :  { %17448 = vmatmul.mubr.bf16.gmra.mrb[36].mxu0 %v2131_v3  ;;  %17911 = vmatprep.subr.bf16.mxu1 %v20140_v29  ;;  %v5405_v3 = vpack.c.bf16 %v5385_v42, %v5384_v9  ;;  %v2473_v49 = vld [vmem:[#allocation2 + $0x69] sm:$0xff]  ;;  %v20151_v42 = vld [vmem:[%s25075_s3 + $0x158] sm:$0xff]  }
 0x1c0   :  { %17880 = vmatmul.mubr.bf16.gmra.mrb[36].mxu1 %v5397_v13  ;;  %17451 = vmatprep.mubr.bf16.mxu0 %v2132_v61  ;;  %v2140_v13 = vpack.c.bf16 %v2121_v15, %v2120_v58  ;;  %v20157_v58 = vld [vmem:[%s25075_s3 + $0x158] sm:$0xff]  }
 0x1c1   :  { %17883 = vmatprep.mubr.bf16.mxu1 %v5398_v57  ;;  %17480 = vmatpush3.bf16.msra.mxu0 %v20134_v46  ;;  %v2118_v46 = vld [vmem:[#allocation2 + $0x120] sm:$0xff]  ;;  %v2123_v57 = vld [vmem:[#allocation2 + $0x158] sm:$0xff] }
 0x1c2   :  { %17481 = vmatprep.subr.bf16.mxu0 %v20135_v47  ;;  %17912 = vmatpush3.bf16.msra.mxu1 %v20140_v29  ;;  %v5386_v29 = vld [vmem:[#allocation2 + $0x2e8] sm:$0xff]  ;;  %v2139_v2 = vpack.c.bf16 %v2119_v26, %v2118_v46  ;;  %v2501_v46 = vpack.c.bf16 %v2473_v49, %v2472_v41  ;;  %v5766_v26 = vpack.c.bf16 %v5738_v1, %v5737_v0  ;;  %v2476_v15 = vld [vmem:[#allocation2 + $0x91] sm:$0xff]  ;;  %v5754_v1 = vld [vmem:[#allocation2 + $0x2d9] sm:$0xff] }
 0x1c3   :  { %17913 = vmatprep.subr.bf16.mxu1 %v20141_v31  ;;  %v5406_v61 = vpack.c.bf16 %v5387_v32, %v5386_v29  ;;  %v2477_v29 = vld [vmem:[#allocation2 + $0x99] sm:$0xff]  ;;  %v5741_v32 = vld [vmem:[#allocation2 + $0x241] sm:$0xff]  ;;  %v2489_v49 = vld [vmem:[#allocation2 + $0x129] sm:$0xff] }
 0x1c4   :  { %v5753_v0 = vld [vmem:[#allocation2 + $0x2d1] sm:$0xff] }
 0x1c5   :  { %17482 = vmatpush3.bf16.msra.mxu0 %v20135_v47  ;;  %v2122_v47 = vld [vmem:[#allocation2 + $0x150] sm:$0xff] }
 0x1c6   :  { %17483 = vmatprep.subr.bf16.mxu0 %v20136_v62  ;;  %17914 = vmatpush3.bf16.msra.mxu1 %v20141_v31  ;;  %v5388_v31 = vld [vmem:[#allocation2 + $0x300] sm:$0xff]  ;;  %v2141_v50 = vpack.c.bf16 %v2123_v57, %v2122_v47 }
 0x1c7   :  { %17452 = vmatmul.mubr.bf16.gmra.mrb[40].mxu0 %v2133_v33  ;;  %17915 = vmatprep.subr.bf16.mxu1 %v20143_v27  ;;  %v5407_v52 = vpack.c.bf16 %v5389_v53, %v5388_v31  ;;  %v5393_v33 = vld [vmem:[#allocation2 + $0x338] sm:$0xff]  ;;  %v20159_v47 = vld [vmem:[%s25075_s3 + $0x160] sm:$0xff]   ;;  %v2503_v53 = vpack.c.bf16 %v2477_v29, %v2476_v15  ;;  %v5758_v15 = vld [vmem:[#allocation2 + $0x309] sm:$0xff] }
 0x1c8   :  { %17884 = vmatmul.mubr.bf16.gmra.mrb[40].mxu1 %v5399_v63  ;;  %17455 = vmatprep.mubr.bf16.mxu0 %v2134_v55  ;;  %v2126_v63 = vld [vmem:[#allocation2 + $0x180] sm:$0xff]  ;;  %v2127_v55 = vld [vmem:[#allocation2 + $0x188] sm:$0xff] }
 0x1c9   :  { %17887 = vmatprep.mubr.bf16.mxu1 %v5400_v4  ;;  %17484 = vmatpush3.bf16.msra.mxu0 %v20136_v62  ;;  %v5391_v62 = vld [vmem:[#allocation2 + $0x320] sm:$0xff]  ;;  %v2143_v59 = vpack.c.bf16 %v2127_v55, %v2126_v63  ;;  %v2494_v29 = vld [vmem:[#allocation2 + $0x169] sm:$0xff] }
 0x1ca   :  { %17485 = vmatprep.subr.bf16.mxu0 %v20139_v39  ;;  %17916 = vmatpush3.bf16.msra.mxu1 %v20143_v27  ;;  %v2142_v27 = vpack.c.bf16 %v2125_v56, %v2124_v11  ;;  %v5408_v45 = vpack.c.bf16 %v5391_v62, %v5390_v23  ;;  %v2467_v4 = vld [vmem:[#allocation2 + $0x21] sm:$0xff]  ;;  %v5743_v57 = vld [vmem:[#allocation2 + $0x259] sm:$0xff] }
 0x1cb   :  { %17917 = vmatprep.subr.bf16.mxu1 %v20144_v10  ;;  %v5744_v31 = vld [vmem:[#allocation2 + $0x261] sm:$0xff]  ;;  %v2482_v63 = vld [vmem:[#allocation2 + $0xd9] sm:$0xff] }
 0x1cc   :  { %v20155_v23 = vld [vmem:[%s25075_s3 + $0x168] sm:$0xff]   ;;  %v5769_v62 = vpack.c.bf16 %v5744_v31, %v5743_v57  ;;  %v2836_v31 = vld [vmem:[#allocation2 + $0x1a] sm:$0xff] }
 0x1cd   :  { %17486 = vmatpush3.bf16.msra.mxu0 %v20139_v39  ;;  %v2466_v39 = vld [vmem:[#allocation2 + $0x19] sm:$0xff]  ;;  %v2483_v55 = vld [vmem:[#allocation2 + $0xe1] sm:$0xff] }
 0x1ce   :  { %17487 = vmatprep.subr.bf16.mxu0 %v20142_v43  ;;  %17918 = vmatpush3.bf16.msra.mxu1 %v20144_v10  ;;  %v5409_v10 = vpack.c.bf16 %v5393_v33, %v5392_v40  ;;  %v2498_v60 = vpack.c.bf16 %v2467_v4, %v2466_v39  ;;  %v5746_v40 = vld [vmem:[#allocation2 + $0x279] sm:$0xff]  ;;  %v20158_v33 = vld [vmem:[%s25075_s3 + $0x170] sm:$0xff]  }
 0x1cf   :  { %17456 = vmatmul.mubr.bf16.gmra.mrb[44].mxu0 %v2135_v37  ;;  %17919 = vmatprep.subr.bf16.mxu1 %v20146_v19  ;;  %v2471_v37 = vld [vmem:[#allocation2 + $0x51] sm:$0xff]  ;;  %v5747_v4 = vld [vmem:[#allocation2 + $0x289] sm:$0xff] }
 0x1d0   :  { %17888 = vmatmul.mubr.bf16.gmra.mrb[44].mxu1 %v5401_v5  ;;  %17459 = vmatprep.mubr.bf16.mxu0 %v2136_v22  ;;  %v5735_v5 = vld [vmem:[#allocation2 + $0x1f9] sm:$0xff]  ;;  %v5736_v22 = vld [vmem:[#allocation2 + $0x201] sm:$0xff]  ;;  %v2500_v34 = vpack.c.bf16 %v2471_v37, %v2470_v51  ;;  %v20162_v39 = vld [vmem:[%s25075_s3 + $0x170] sm:$0xff]  }
 0x1d1   :  { %17891 = vmatprep.mubr.bf16.mxu1 %v5402_v21  ;;  %17488 = vmatpush3.bf16.msra.mxu0 %v20142_v43  ;;  %v5763_v43 = vpack.c.bf16 %v5732_v28, %v5731_v8  ;;  %v5765_v35 = vpack.c.bf16 %v5736_v22, %v5735_v5  ;;  %v5750_v51 = vld [vmem:[#allocation2 + $0x2a9] sm:$0xff]  ;;  %v21573_v37 = vld [vmem:[%s25075_s3 + $0x180] sm:$0xff]   ;;  %v2487_v22 = vld [vmem:[#allocation2 + $0x111] sm:$0xff] }
 0x1d2   :  { %17489 = vmatprep.subr.bf16.mxu0 %v20145_v18  ;;  %17920 = vmatpush3.bf16.msra.mxu1 %v20146_v19  ;;  %v5733_v19 = vld [vmem:[#allocation2 + $0x1e1] sm:$0xff]  ;;  %v2486_v5 = vld [vmem:[#allocation2 + $0x109] sm:$0xff] }
 0x1d3   :  { %17921 = vmatprep.subr.bf16.mxu1 %v20147_v30  ;;  %v5764_v21 = vpack.c.bf16 %v5734_v24, %v5733_v19  ;;  %v2485_v19 = vld [vmem:[#allocation2 + $0xf9] sm:$0xff]  ;;  %v5749_v24 = vld [vmem:[#allocation2 + $0x2a1] sm:$0xff] }
 0x1d5   :  { %17490 = vmatpush3.bf16.msra.mxu0 %v20145_v18  ;;  %v2499_v18 = vpack.c.bf16 %v2469_v16, %v2468_v17  ;;  %v20163_v17 = vld [vmem:[%s25075_s3 + $0x178] sm:$0xff]  }
 0x1d6   :  { %17922 = vmatpush3.bf16.msra.mxu1 %v20147_v30  ;;  %17523 = vmatprep.subr.bf16.mxu0 %v21517_v44  ;;  %v20149_v30 = vld [vmem:[%s25075_s3 + $0x148] sm:$0xff]   ;;  %v2484_v16 = vld [vmem:[#allocation2 + $0xf1] sm:$0xff] }
 0x1d7   :  { %17460 = vmatmul.mubr.bf16.gmra.mrb[48].mxu0 %v2137_v20  ;;  %17955 = vmatprep.subr.bf16.mxu1 %v21522_v54  ;;  %v2474_v20 = vld [vmem:[#allocation2 + $0x79] sm:$0xff] }
 0x1d8   :  { %17892 = vmatmul.mubr.bf16.gmra.mrb[48].mxu1 %v5403_v6  ;;  %17463 = vmatprep.mubr.bf16.mxu0 %v2138_v7  ;;  %v2475_v6 = vld [vmem:[#allocation2 + $0x81] sm:$0xff]  ;;  %v5739_v7 = vld [vmem:[#allocation2 + $0x229] sm:$0xff] }
 0x1d9   :  { %17895 = vmatprep.mubr.bf16.mxu1 %v5404_v14  ;;  %v5740_v14 = vld [vmem:[#allocation2 + $0x231] sm:$0xff]  ;;  %v2502_v9 = vpack.c.bf16 %v2475_v6, %v2474_v20  ;;  %v2490_v20 = vld [vmem:[#allocation2 + $0x139] sm:$0xff]  ;;  %v2491_v6 = vld [vmem:[#allocation2 + $0x141] sm:$0xff] }
 0x1df   :  { %17464 = vmatmul.mubr.bf16.gmra.mrb[52].mxu0 %v2139_v2  ;;  %v5742_v2 = vld [vmem:[#allocation2 + $0x249] sm:$0xff] }
 0x1e0   :  { %17896 = vmatmul.mubr.bf16.gmra.mrb[52].mxu1 %v5405_v3  ;;  %17467 = vmatprep.mubr.bf16.mxu0 %v2140_v13  ;;  %v20152_v3 = vld [vmem:[%s25075_s3 + $0x160] sm:$0xff]   ;;  %v2478_v13 = vld [vmem:[#allocation2 + $0xa9] sm:$0xff]  ;;  %v5768_v11 = vpack.c.bf16 %v5742_v2, %v5741_v32  ;;  %v2495_v32 = vld [vmem:[#allocation2 + $0x171] sm:$0xff] }
 0x1e1   :  { %17899 = vmatprep.mubr.bf16.mxu1 %v5406_v61  ;;  %v2479_v61 = vld [vmem:[#allocation2 + $0xb1] sm:$0xff]  ;;  %v5759_v2 = vld [vmem:[#allocation2 + $0x319] sm:$0xff] }
 0x1e2   :  { %v2504_v56 = vpack.c.bf16 %v2479_v61, %v2478_v13 }
 0x1e7   :  { %17468 = vmatmul.mubr.bf16.gmra.mrb[56].mxu0 %v2141_v50  ;;  %v20160_v50 = vld [vmem:[%s25075_s3 + $0x168] sm:$0xff]  }
 0x1e8   :  { %17900 = vmatmul.mubr.bf16.gmra.mrb[56].mxu1 %v5407_v52  ;;  %17471 = vmatprep.mubr.bf16.mxu0 %v2142_v27  ;;  %v2480_v52 = vld [vmem:[#allocation2 + $0xc1] sm:$0xff]  ;;  %v2481_v27 = vld [vmem:[#allocation2 + $0xc9] sm:$0xff] }
 0x1e9   :  { %17903 = vmatprep.mubr.bf16.mxu1 %v5408_v45  ;;  %v5745_v45 = vld [vmem:[#allocation2 + $0x271] sm:$0xff]  ;;  %v2505_v8 = vpack.c.bf16 %v2481_v27, %v2480_v52 }
 0x1ea   :  { %v5770_v28 = vpack.c.bf16 %v5746_v40, %v5745_v45  ;;  %v2838_v45 = vld [vmem:[#allocation2 + $0x32] sm:$0xff]  ;;  %v2839_v40 = vld [vmem:[#allocation2 + $0x3a] sm:$0xff] }
 0x1ef   :  { %17472 = vmatmul.mubr.bf16.gmra.mrb[60].mxu0 %v2143_v59  ;;  %v2506_v59 = vpack.c.bf16 %v2483_v55, %v2482_v63  ;;  %v6103_v63 = vld [vmem:[#allocation2 + $0x1ea] sm:$0xff] }
 0x1f0   :  { %17904 = vmatmul.mubr.bf16.gmra.mrb[60].mxu1 %v5409_v10  ;;  %17491 = vmatprep.mubr.bf16.mxu0 %v2498_v60  ;;  %v5748_v10 = vld [vmem:[#allocation2 + $0x291] sm:$0xff] }
 0x1f1   :  { %17923 = vmatprep.mubr.bf16.mxu1 %v5763_v43  ;;  %v20161_v60 = vld [vmem:[%s25075_s3 + $0x178] sm:$0xff]   ;;  %v5771_v43 = vpack.c.bf16 %v5748_v10, %v5747_v4  ;;  %v2840_v55 = vld [vmem:[#allocation2 + $0x4a] sm:$0xff]  ;;  %v6105_v10 = vld [vmem:[#allocation2 + $0x202] sm:$0xff] }
 0x1f2   :  { %v6104_v4 = vld [vmem:[#allocation2 + $0x1fa] sm:$0xff] }
 0x1f3   :  { %v6134_v36 = vpack.c.bf16 %v6105_v10, %v6104_v4  ;;  %v6120_v4 = vld [vmem:[#allocation2 + $0x2ba] sm:$0xff]  ;;  %v6121_v10 = vld [vmem:[#allocation2 + $0x2c2] sm:$0xff] }
 0x1f7   :  { %17492 = vmatmul.mubr.bf16.vlgmr.msra.gmra.mrb[32].mxu0 %v2499_v18  ;;  %v21578_v18 = vld [vmem:[%s25075_s3 + $0x180] sm:$0xff]  }
 0x1f8   :  { %17524 = vmatpush3.bf16.msra.mxu0 %v21517_v44  ;;  %17924 = vmatmul.mubr.bf16.vlgmr.msra.gmra.mrb[32].mxu1 %v5764_v21  ;;  %v20156_v44 = vld [vmem:[%s25075_s3 + $0x150] sm:$0xff]   ;;  %v5751_v21 = vld [vmem:[#allocation2 + $0x2b9] sm:$0xff] }
 0x1f9   :  { %17495 = vmatprep.mubr.bf16.mxu0 %v2500_v34  ;;  %17927 = vmatprep.mubr.bf16.mxu1 %v5765_v35  ;;  %v2507_v34 = vpack.c.bf16 %v2485_v19, %v2484_v16  ;;  %v5772_v35 = vpack.c.bf16 %v5750_v51, %v5749_v24  ;;  %v6106_v16 = vld [vmem:[#allocation2 + $0x212] sm:$0xff]  ;;  %v6107_v19 = vld [vmem:[#allocation2 + $0x21a] sm:$0xff]  ;;  %v2845_v51 = vld [vmem:[#allocation2 + $0x82] sm:$0xff] }
 0x1fa   :  { %17525 = vmatprep.subr.bf16.mxu0 %v20149_v30  ;;  %17956 = vmatpush3.bf16.msra.mxu1 %v21522_v54  ;;  %v5767_v54 = vpack.c.bf16 %v5740_v14, %v5739_v7  ;;  %v5756_v7 = vld [vmem:[#allocation2 + $0x2f1] sm:$0xff]  ;;  %v2844_v24 = vld [vmem:[#allocation2 + $0x7a] sm:$0xff] }
 0x1fb   :  { %17957 = vmatprep.subr.bf16.mxu1 %v20154_v38 }
 0x1fc   :  { %17526 = vmatpush3.bf16.msra.mxu0 %v20149_v30  ;;  %v5752_v30 = vld [vmem:[#allocation2 + $0x2c1] sm:$0xff] }
 0x1fd   :  { %17527 = vmatprep.subr.bf16.mxu0 %v20150_v48  ;;  %v5773_v41 = vpack.c.bf16 %v5752_v30, %v5751_v21  ;;  %v6135_v30 = vpack.c.bf16 %v6107_v19, %v6106_v16  ;;  %v2861_v16 = vld [vmem:[#allocation2 + $0x142] sm:$0xff]  ;;  %v6124_v19 = vld [vmem:[#allocation2 + $0x2ea] sm:$0xff] }
 0x1fe   :  { %17958 = vmatpush3.bf16.msra.mxu1 %v20154_v38  ;;  %v2508_v38 = vpack.c.bf16 %v2487_v22, %v2486_v5  ;;  %v6108_v5 = vld [vmem:[#allocation2 + $0x22a] sm:$0xff]  ;;  %v6109_v22 = vld [vmem:[#allocation2 + $0x232] sm:$0xff] }
 0x1ff   :  { %17496 = vmatmul.mubr.bf16.gmra.mrb[36].mxu0 %v2501_v46  ;;  %17959 = vmatprep.subr.bf16.mxu1 %v20156_v44  ;;  %v5774_v46 = vpack.c.bf16 %v5754_v1, %v5753_v0  ;;  %v6111_v0 = vld [vmem:[#allocation2 + $0x24a] sm:$0xff]  ;;  %v20168_v1 = vld [vmem:[%s25075_s3 + $0x1a0] sm:$0xff]  }
 0x200   :  { %17928 = vmatmul.mubr.bf16.gmra.mrb[36].mxu1 %v5766_v26  ;;  %17499 = vmatprep.mubr.bf16.mxu0 %v2502_v9  ;;  %v2510_v26 = vpack.c.bf16 %v2491_v6, %v2490_v20  ;;  %v2848_v20 = vld [vmem:[#allocation2 + $0xaa] sm:$0xff]  ;;  %v2849_v6 = vld [vmem:[#allocation2 + $0xb2] sm:$0xff] }
 0x201   :  { %17931 = vmatprep.mubr.bf16.mxu1 %v5767_v54  ;;  %17528 = vmatpush3.bf16.msra.mxu0 %v20150_v48  ;;  %v2488_v48 = vld [vmem:[#allocation2 + $0x121] sm:$0xff]  ;;  %v2493_v54 = vld [vmem:[#allocation2 + $0x159] sm:$0xff] }
 0x202   :  { %17529 = vmatprep.subr.bf16.mxu0 %v20151_v42  ;;  %17960 = vmatpush3.bf16.msra.mxu1 %v20156_v44  ;;  %v5755_v44 = vld [vmem:[#allocation2 + $0x2e9] sm:$0xff]  ;;  %v2509_v14 = vpack.c.bf16 %v2489_v49, %v2488_v48  ;;  %v2847_v48 = vld [vmem:[#allocation2 + $0x9a] sm:$0xff] }
 0x203   :  { %17961 = vmatprep.subr.bf16.mxu1 %v20157_v58  ;;  %v5775_v9 = vpack.c.bf16 %v5756_v7, %v5755_v44  ;;  %v6110_v49 = vld [vmem:[#allocation2 + $0x242] sm:$0xff]  ;;  %v6112_v7 = vld [vmem:[#allocation2 + $0x25a] sm:$0xff] }
 0x204   :  { %v20175_v44 = vld [vmem:[%s25075_s3 + $0x1a0] sm:$0xff]  }
 0x205   :  { %17530 = vmatpush3.bf16.msra.mxu0 %v20151_v42  ;;  %v2492_v42 = vld [vmem:[#allocation2 + $0x151] sm:$0xff] }
 0x206   :  { %17531 = vmatprep.subr.bf16.mxu0 %v20152_v3  ;;  %17962 = vmatpush3.bf16.msra.mxu1 %v20157_v58  ;;  %v5757_v58 = vld [vmem:[#allocation2 + $0x301] sm:$0xff]  ;;  %v2511_v13 = vpack.c.bf16 %v2493_v54, %v2492_v42 }
 0x207   :  { %17500 = vmatmul.mubr.bf16.gmra.mrb[40].mxu0 %v2503_v53  ;;  %17963 = vmatprep.subr.bf16.mxu1 %v20159_v47  ;;  %v5776_v61 = vpack.c.bf16 %v5758_v15, %v5757_v58  ;;  %v2837_v53 = vld [vmem:[#allocation2 + $0x22] sm:$0xff] }
 0x208   :  { %17932 = vmatmul.mubr.bf16.gmra.mrb[40].mxu1 %v5768_v11  ;;  %17503 = vmatprep.mubr.bf16.mxu0 %v2504_v56  ;;  %v6100_v11 = vld [vmem:[#allocation2 + $0x1ca] sm:$0xff]  ;;  %v6101_v56 = vld [vmem:[#allocation2 + $0x1d2] sm:$0xff]  ;;  %v2868_v52 = vpack.c.bf16 %v2837_v53, %v2836_v31  ;;  %v2850_v15 = vld [vmem:[#allocation2 + $0xc2] sm:$0xff] }
 0x209   :  { %17935 = vmatprep.mubr.bf16.mxu1 %v5769_v62  ;;  %17532 = vmatpush3.bf16.msra.mxu0 %v20152_v3  ;;  %v5760_v3 = vld [vmem:[#allocation2 + $0x321] sm:$0xff]  ;;  %v20362_v62 = vld [vmem:[#allocation2 + $0x331] sm:$0xff]  ;;  %v6132_v27 = vpack.c.bf16 %v6101_v56, %v6100_v11 }
 0x20a   :  { %17533 = vmatprep.subr.bf16.mxu0 %v20155_v23  ;;  %17964 = vmatpush3.bf16.msra.mxu1 %v20159_v47  ;;  %v2512_v47 = vpack.c.bf16 %v2495_v32, %v2494_v29  ;;  %v5777_v57 = vpack.c.bf16 %v5760_v3, %v5759_v2  ;;  %v20171_v42 = vld [vmem:[%s25075_s3 + $0x1a8] sm:$0xff]   ;;  %v6114_v32 = vld [vmem:[#allocation2 + $0x272] sm:$0xff]  ;;  %v6115_v2 = vld [vmem:[#allocation2 + $0x27a] sm:$0xff] }
 0x20b   :  { %17965 = vmatprep.subr.bf16.mxu1 %v20160_v50  ;;  %v20176_v58 = vld [vmem:[%s25075_s3 + $0x1a8] sm:$0xff]   ;;  %v20174_v3 = vld [vmem:[%s25075_s3 + $0x1b0] sm:$0xff]   ;;  %v6139_v11 = vpack.c.bf16 %v6115_v2, %v6114_v32 }
 0x20c   :  { %v2851_v29 = vld [vmem:[#allocation2 + $0xca] sm:$0xff]  ;;  %v6117_v31 = vld [vmem:[#allocation2 + $0x292] sm:$0xff] }
 0x20d   :  { %17534 = vmatpush3.bf16.msra.mxu0 %v20155_v23  ;;  %v20361_v23 = vld [vmem:[#allocation2 + $0x339] sm:$0xff]  ;;  %v2875_v53 = vpack.c.bf16 %v2851_v29, %v2850_v15  ;;  %v3209_v32 = vld [vmem:[#allocation2 + $0x48] sm:$0xff]  ;;  %v3210_v2 = vld [vmem:[#allocation2 + $0x50] sm:$0xff] }
 0x20e   :  { %17535 = vmatprep.subr.bf16.mxu0 %v20158_v33  ;;  %17966 = vmatpush3.bf16.msra.mxu1 %v20160_v50  ;;  %v5778_v50 = vpack.c.bf16 %v20361_v23, %v20362_v62  ;;  %v20177_v23 = vld [vmem:[%s25075_s3 + $0x1b8] sm:$0xff]  }
 0x20f   :  { %17504 = vmatmul.mubr.bf16.gmra.mrb[44].mxu0 %v2505_v8  ;;  %17967 = vmatprep.subr.bf16.mxu1 %v20162_v39  ;;  %v2869_v8 = vpack.c.bf16 %v2839_v40, %v2838_v45  ;;  %v6118_v45 = vld [vmem:[#allocation2 + $0x2a2] sm:$0xff]  ;;  %v6119_v40 = vld [vmem:[#allocation2 + $0x2aa] sm:$0xff] }
 0x210   :  { %17936 = vmatmul.mubr.bf16.gmra.mrb[44].mxu1 %v5770_v28  ;;  %17507 = vmatprep.mubr.bf16.mxu0 %v2506_v59  ;;  %v20165_v59 = vld [vmem:[%s25075_s3 + $0x188] sm:$0xff]  }
 0x211   :  { %17939 = vmatprep.mubr.bf16.mxu1 %v5771_v43  ;;  %17536 = vmatpush3.bf16.msra.mxu0 %v20158_v33  ;;  %v6102_v33 = vld [vmem:[#allocation2 + $0x1e2] sm:$0xff]  ;;  %v20166_v43 = vld [vmem:[%s25075_s3 + $0x190] sm:$0xff]  }
 0x212   :  { %17537 = vmatprep.subr.bf16.mxu0 %v20161_v60  ;;  %17968 = vmatpush3.bf16.msra.mxu1 %v20162_v39  ;;  %v2841_v39 = vld [vmem:[#allocation2 + $0x52] sm:$0xff]  ;;  %v6133_v28 = vpack.c.bf16 %v6103_v63, %v6102_v33  ;;  %v21632_v33 = vld [vmem:[%s25075_s3 + $0x1c0] sm:$0xff]   ;;  %v2856_v63 = vld [vmem:[#allocation2 + $0x10a] sm:$0xff] }
 0x213   :  { %17969 = vmatprep.subr.bf16.mxu1 %v20163_v17  ;;  %v2870_v12 = vpack.c.bf16 %v2841_v39, %v2840_v55  ;;  %v2857_v55 = vld [vmem:[#allocation2 + $0x112] sm:$0xff]  ;;  %v21637_v39 = vld [vmem:[%s25075_s3 + $0x1c0] sm:$0xff]  }
 0x215   :  { %17538 = vmatpush3.bf16.msra.mxu0 %v20161_v60  ;;  %v2842_v60 = vld [vmem:[#allocation2 + $0x62] sm:$0xff] }
 0x216   :  { %17970 = vmatpush3.bf16.msra.mxu1 %v20163_v17  ;;  %17571 = vmatprep.subr.bf16.mxu0 %v21573_v37  ;;  %v2843_v17 = vld [vmem:[#allocation2 + $0x6a] sm:$0xff] }
 0x217   :  { %17508 = vmatmul.mubr.bf16.gmra.mrb[48].mxu0 %v2507_v34  ;;  %18003 = vmatprep.subr.bf16.mxu1 %v21578_v18  ;;  %v2871_v21 = vpack.c.bf16 %v2843_v17, %v2842_v60  ;;  %v2872_v34 = vpack.c.bf16 %v2845_v51, %v2844_v24  ;;  %v6122_v60 = vld [vmem:[#allocation2 + $0x2d2] sm:$0xff]  ;;  %v2860_v17 = vld [vmem:[#allocation2 + $0x13a] sm:$0xff] }
 0x218   :  { %17940 = vmatmul.mubr.bf16.gmra.mrb[48].mxu1 %v5772_v35  ;;  %17511 = vmatprep.mubr.bf16.mxu0 %v2508_v38  ;;  %v20167_v35 = vld [vmem:[%s25075_s3 + $0x198] sm:$0xff]  }
 0x219   :  { %17943 = vmatprep.mubr.bf16.mxu1 %v5773_v41  ;;  %v20173_v38 = vld [vmem:[%s25075_s3 + $0x198] sm:$0xff]  }
 0x21a   :  { %v2846_v41 = vld [vmem:[#allocation2 + $0x92] sm:$0xff] }
 0x21b   :  { %v6125_v24 = vld [vmem:[#allocation2 + $0x2f2] sm:$0xff] }
 0x21f   :  { %17512 = vmatmul.mubr.bf16.gmra.mrb[52].mxu0 %v2509_v14  ;;  %v6113_v14 = vld [vmem:[#allocation2 + $0x262] sm:$0xff] }
 0x220   :  { %17944 = vmatmul.mubr.bf16.gmra.mrb[52].mxu1 %v5774_v46  ;;  %17515 = vmatprep.mubr.bf16.mxu0 %v2510_v26  ;;  %v2873_v46 = vpack.c.bf16 %v2847_v48, %v2846_v41  ;;  %v6137_v26 = vpack.c.bf16 %v6111_v0, %v6110_v49  ;;  %v6138_v54 = vpack.c.bf16 %v6113_v14, %v6112_v7  ;;  %v6128_v41 = vld [vmem:[#allocation2 + $0x31a] sm:$0xff]  ;;  %v6129_v48 = vld [vmem:[#allocation2 + $0x322] sm:$0xff]  ;;  %v3207_v7 = vld [vmem:[#allocation2 + $0x30] sm:$0xff] }
 0x221   :  { %17947 = vmatprep.mubr.bf16.mxu1 %v5775_v9  ;;  %v2874_v9 = vpack.c.bf16 %v2849_v6, %v2848_v20  ;;  %v6146_v20 = vpack.c.bf16 %v6129_v48, %v6128_v41  ;;  %v2866_v6 = vld [vmem:[#allocation2 + $0x182] sm:$0xff]  ;;  %v6130_v14 = vld [vmem:[#allocation2 + $0x332] sm:$0xff] }
 0x222   :  { %v3221_v41 = vld [vmem:[#allocation2 + $0xd8] sm:$0xff]  ;;  %v3222_v48 = vld [vmem:[#allocation2 + $0xe0] sm:$0xff] }
 0x227   :  { %17516 = vmatmul.mubr.bf16.gmra.mrb[56].mxu0 %v2511_v13  ;;  %v2852_v13 = vld [vmem:[#allocation2 + $0xda] sm:$0xff] }
 0x228   :  { %17948 = vmatmul.mubr.bf16.gmra.mrb[56].mxu1 %v5776_v61  ;;  %17519 = vmatprep.mubr.bf16.mxu0 %v2512_v47  ;;  %v2853_v61 = vld [vmem:[#allocation2 + $0xe2] sm:$0xff]  ;;  %v20178_v47 = vld [vmem:[%s25075_s3 + $0x1b0] sm:$0xff]  }
 0x229   :  { %17951 = vmatprep.mubr.bf16.mxu1 %v5777_v57  ;;  %v6116_v57 = vld [vmem:[#allocation2 + $0x28a] sm:$0xff]  ;;  %v2876_v56 = vpack.c.bf16 %v2853_v61, %v2852_v13  ;;  %v6473_v13 = vld [vmem:[#allocation2 + $0x200] sm:$0xff] }
 0x22a   :  { %v6140_v62 = vpack.c.bf16 %v6117_v31, %v6116_v57  ;;  %v3211_v61 = vld [vmem:[#allocation2 + $0x60] sm:$0xff]  ;;  %v6474_v57 = vld [vmem:[#allocation2 + $0x210] sm:$0xff]  ;;  %v6475_v31 = vld [vmem:[#allocation2 + $0x218] sm:$0xff] }
 0x22f   :  { %17520 = vmatmul.mubr.bf16.gmra.mrb[60].mxu0 %v2513_v25  ;;  %v20170_v25 = vld [vmem:[%s25075_s3 + $0x188] sm:$0xff]  }
 0x230   :  { %17952 = vmatmul.mubr.bf16.gmra.mrb[60].mxu1 %v5778_v50  ;;  %17539 = vmatprep.mubr.bf16.mxu0 %v2868_v52  ;;  %v20179_v50 = vld [vmem:[%s25075_s3 + $0x1b8] sm:$0xff]  }
 0x231   :  { %17971 = vmatprep.mubr.bf16.mxu1 %v6132_v27  ;;  %v2854_v52 = vld [vmem:[#allocation2 + $0xf2] sm:$0xff]  ;;  %v2855_v27 = vld [vmem:[#allocation2 + $0xfa] sm:$0xff] }
 0x237   :  { %17540 = vmatmul.mubr.bf16.vlgmr.msra.gmra.mrb[32].mxu0 %v2869_v8  ;;  %v2877_v8 = vpack.c.bf16 %v2855_v27, %v2854_v52  ;;  %v3213_v52 = vld [vmem:[#allocation2 + $0x78] sm:$0xff]  ;;  %v20182_v27 = vld [vmem:[%s25075_s3 + $0x1d0] sm:$0xff]  }
 0x238   :  { %17572 = vmatpush3.bf16.msra.mxu0 %v21573_v37  ;;  %17972 = vmatmul.mubr.bf16.vlgmr.msra.gmra.mrb[32].mxu1 %v6133_v28  ;;  %v20172_v37 = vld [vmem:[%s25075_s3 + $0x190] sm:$0xff]   ;;  %v6141_v28 = vpack.c.bf16 %v6119_v40, %v6118_v45  ;;  %v3214_v45 = vld [vmem:[#allocation2 + $0x80] sm:$0xff]  ;;  %v6476_v40 = vld [vmem:[#allocation2 + $0x228] sm:$0xff] }
 0x239   :  { %17543 = vmatprep.mubr.bf16.mxu0 %v2870_v12  ;;  %17975 = vmatprep.mubr.bf16.mxu1 %v6134_v36  ;;  %v6142_v12 = vpack.c.bf16 %v6121_v10, %v6120_v4  ;;  %v2858_v36 = vld [vmem:[#allocation2 + $0x122] sm:$0xff]  ;;  %v3216_v4 = vld [vmem:[#allocation2 + $0x98] sm:$0xff] }
 0x23a   :  { %17573 = vmatprep.subr.bf16.mxu0 %v20165_v59  ;;  %18004 = vmatpush3.bf16.msra.mxu1 %v21578_v18  ;;  %v6136_v18 = vpack.c.bf16 %v6109_v22, %v6108_v5  ;;  %v2880_v5 = vpack.c.bf16 %v2861_v16, %v2860_v17  ;;  %v6144_v22 = vpack.c.bf16 %v6125_v24, %v6124_v19  ;;  %v6478_v10 = vld [vmem:[#allocation2 + $0x240] sm:$0xff]  ;;  %v6480_v17 = vld [vmem:[#allocation2 + $0x258] sm:$0xff] }
 0x23b   :  { %18005 = vmatprep.subr.bf16.mxu1 %v20170_v25  ;;  %v6481_v16 = vld [vmem:[#allocation2 + $0x260] sm:$0xff] }
 0x23c   :  { %17574 = vmatpush3.bf16.msra.mxu0 %v20165_v59  ;;  %v2878_v59 = vpack.c.bf16 %v2857_v55, %v2856_v63  ;;  %v6477_v63 = vld [vmem:[#allocation2 + $0x230] sm:$0xff]  ;;  %v20184_v19 = vld [vmem:[%s25075_s3 + $0x1e0] sm:$0xff]  }
 0x23d   :  { %17575 = vmatprep.subr.bf16.mxu0 %v20166_v43  ;;  %v3215_v55 = vld [vmem:[#allocation2 + $0x90] sm:$0xff]  ;;  %v3219_v24 = vld [vmem:[#allocation2 + $0xc0] sm:$0xff] }
 0x23e   :  { %18006 = vmatpush3.bf16.msra.mxu1 %v20170_v25  ;;  %v2859_v25 = vld [vmem:[#allocation2 + $0x12a] sm:$0xff] }
 0x23f   :  { %17544 = vmatmul.mubr.bf16.gmra.mrb[36].mxu0 %v2871_v21  ;;  %18007 = vmatprep.subr.bf16.mxu1 %v20172_v37  ;;  %v2879_v51 = vpack.c.bf16 %v2859_v25, %v2858_v36  ;;  %v2862_v21 = vld [vmem:[#allocation2 + $0x152] sm:$0xff] }
 0x240   :  { %17976 = vmatmul.mubr.bf16.gmra.mrb[36].mxu1 %v6135_v30  ;;  %17547 = vmatprep.mubr.bf16.mxu0 %v2872_v34  ;;  %v2863_v30 = vld [vmem:[#allocation2 + $0x15a] sm:$0xff]  ;;  %v6126_v34 = vld [vmem:[#allocation2 + $0x302] sm:$0xff] }
 0x241   :  { %17979 = vmatprep.mubr.bf16.mxu1 %v6136_v18  ;;  %17576 = vmatpush3.bf16.msra.mxu0 %v20166_v43  ;;  %v6123_v43 = vld [vmem:[#allocation2 + $0x2da] sm:$0xff]  ;;  %v2864_v18 = vld [vmem:[#allocation2 + $0x16a] sm:$0xff]  ;;  %v2881_v49 = vpack.c.bf16 %v2863_v30, %v2862_v21  ;;  %v6507_v30 = vpack.c.bf16 %v6481_v16, %v6480_v17 }
 0x242   :  { %17577 = vmatprep.subr.bf16.mxu0 %v20167_v35  ;;  %18008 = vmatpush3.bf16.msra.mxu1 %v20172_v37  ;;  %v6143_v37 = vpack.c.bf16 %v6123_v43, %v6122_v60  ;;  %v20183_v36 = vld [vmem:[%s25075_s3 + $0x1d8] sm:$0xff]   ;;  %v3217_v60 = vld [vmem:[#allocation2 + $0xa8] sm:$0xff]  ;;  %v3218_v43 = vld [vmem:[#allocation2 + $0xb0] sm:$0xff] }
 0x243   :  { %18009 = vmatprep.subr.bf16.mxu1 %v20173_v38  ;;  %v20189_v25 = vld [vmem:[%s25075_s3 + $0x1d8] sm:$0xff]   ;;  %v3244_v21 = vpack.c.bf16 %v3218_v43, %v3217_v60  ;;  %v6498_v60 = vld [vmem:[#allocation2 + $0x330] sm:$0xff] }
 0x244   :  { %v6499_v43 = vld [vmem:[#allocation2 + $0x338] sm:$0xff] }
 0x245   :  { %17578 = vmatpush3.bf16.msra.mxu0 %v20167_v35  ;;  %v6127_v35 = vld [vmem:[#allocation2 + $0x30a] sm:$0xff] }
 0x246   :  { %17579 = vmatprep.subr.bf16.mxu0 %v20168_v1  ;;  %18010 = vmatpush3.bf16.msra.mxu1 %v20173_v38  ;;  %v2865_v38 = vld [vmem:[#allocation2 + $0x172] sm:$0xff]  ;;  %v6145_v0 = vpack.c.bf16 %v6127_v35, %v6126_v34  ;;  %v20187_v35 = vld [vmem:[%s25075_s3 + $0x1e8] sm:$0xff]  }
 0x247   :  { %17548 = vmatmul.mubr.bf16.gmra.mrb[40].mxu0 %v2873_v46  ;;  %18011 = vmatprep.subr.bf16.mxu1 %v20175_v44  ;;  %v6131_v46 = vld [vmem:[#allocation2 + $0x33a] sm:$0xff] }
 0x248   :  { %17980 = vmatmul.mubr.bf16.gmra.mrb[40].mxu1 %v6137_v26  ;;  %17551 = vmatprep.mubr.bf16.mxu0 %v2874_v9  ;;  %v3208_v26 = vld [vmem:[#allocation2 + $0x38] sm:$0xff]  ;;  %v6470_v9 = vld [vmem:[#allocation2 + $0x1e0] sm:$0xff] }
 0x249   :  { %17983 = vmatprep.mubr.bf16.mxu1 %v6138_v54  ;;  %17580 = vmatpush3.bf16.msra.mxu0 %v20168_v1  ;;  %v2882_v1 = vpack.c.bf16 %v2865_v38, %v2864_v18  ;;  %v3239_v15 = vpack.c.bf16 %v3208_v26, %v3207_v7  ;;  %v20192_v38 = vld [vmem:[%s25075_s3 + $0x1e8] sm:$0xff]   ;;  %v6486_v7 = vld [vmem:[#allocation2 + $0x2a0] sm:$0xff] }
 0x24a   :  { %17581 = vmatprep.subr.bf16.mxu0 %v20171_v42  ;;  %18012 = vmatpush3.bf16.msra.mxu1 %v20175_v44  ;;  %v2867_v44 = vld [vmem:[#allocation2 + $0x18a] sm:$0xff] }
 0x24b   :  { %18013 = vmatprep.subr.bf16.mxu1 %v20176_v58  ;;  %v2883_v54 = vpack.c.bf16 %v2867_v44, %v2866_v6  ;;  %v3224_v6 = vld [vmem:[#allocation2 + $0xf8] sm:$0xff]  ;;  %v20194_v44 = vld [vmem:[%s25075_s3 + $0x1f0] sm:$0xff]  }
 0x24d   :  { %17582 = vmatpush3.bf16.msra.mxu0 %v20171_v42  ;;  %v6471_v42 = vld [vmem:[#allocation2 + $0x1e8] sm:$0xff] }
 0x24e   :  { %17583 = vmatprep.subr.bf16.mxu0 %v20174_v3  ;;  %18014 = vmatpush3.bf16.msra.mxu1 %v20176_v58  ;;  %v6147_v58 = vpack.c.bf16 %v6131_v46, %v6130_v14  ;;  %v6502_v29 = vpack.c.bf16 %v6471_v42, %v6470_v9  ;;  %v6487_v14 = vld [vmem:[#allocation2 + $0x2a8] sm:$0xff]  ;;  %v3246_v46 = vpack.c.bf16 %v3222_v48, %v3221_v41  ;;  %v20193_v42 = vld [vmem:[%s25075_s3 + $0x1f8] sm:$0xff]  }
 0x24f   :  { %17552 = vmatmul.mubr.bf16.gmra.mrb[44].mxu0 %v2875_v53  ;;  %18015 = vmatprep.subr.bf16.mxu1 %v20178_v47  ;;  %v3240_v53 = vpack.c.bf16 %v3210_v2, %v3209_v32  ;;  %v6488_v32 = vld [vmem:[#allocation2 + $0x2b8] sm:$0xff]  ;;  %v6489_v2 = vld [vmem:[#allocation2 + $0x2c0] sm:$0xff] }
 0x250   :  { %17984 = vmatmul.mubr.bf16.gmra.mrb[44].mxu1 %v6139_v11  ;;  %17555 = vmatprep.mubr.bf16.mxu0 %v2876_v56  ;;  %v20181_v56 = vld [vmem:[%s25075_s3 + $0x1c8] sm:$0xff]   ;;  %v6841_v41 = vld [vmem:[#allocation2 + $0x1f9] sm:$0xff] }
 0x251   :  { %17987 = vmatprep.mubr.bf16.mxu1 %v6140_v62  ;;  %17584 = vmatpush3.bf16.msra.mxu0 %v20174_v3  ;;  %v6472_v3 = vld [vmem:[#allocation2 + $0x1f8] sm:$0xff]  ;;  %v6504_v62 = vpack.c.bf16 %v6475_v31, %v6474_v57  ;;  %v6490_v57 = vld [vmem:[#allocation2 + $0x2d0] sm:$0xff]  ;;  %v6842_v48 = vld [vmem:[#allocation2 + $0x201] sm:$0xff] }
 0x252   :  { %17585 = vmatprep.subr.bf16.mxu0 %v20177_v23  ;;  %18016 = vmatpush3.bf16.msra.mxu1 %v20178_v47  ;;  %v3212_v47 = vld [vmem:[#allocation2 + $0x68] sm:$0xff]  ;;  %v6503_v11 = vpack.c.bf16 %v6473_v13, %v6472_v3  ;;  %v21688_v3 = vld [vmem:[%s25075_s3 + $0x200] sm:$0xff]   ;;  %v6491_v31 = vld [vmem:[#allocation2 + $0x2d8] sm:$0xff] }
 0x253   :  { %18017 = vmatprep.subr.bf16.mxu1 %v20179_v50  ;;  %v3227_v13 = vld [vmem:[#allocation2 + $0x120] sm:$0xff] }
 0x255   :  { %17586 = vmatpush3.bf16.msra.mxu0 %v20177_v23  ;;  %v3241_v23 = vpack.c.bf16 %v3212_v47, %v3211_v61  ;;  %v3228_v61 = vld [vmem:[#allocation2 + $0x128] sm:$0xff]  ;;  %v21693_v47 = vld [vmem:[%s25075_s3 + $0x200] sm:$0xff]  }
 0x256   :  { %18018 = vmatpush3.bf16.msra.mxu1 %v20179_v50  ;;  %17619 = vmatprep.subr.bf16.mxu0 %v21632_v33  ;;  %v20186_v50 = vld [vmem:[%s25075_s3 + $0x1c8] sm:$0xff]  }
 0x257   :  { %17556 = vmatmul.mubr.bf16.gmra.mrb[48].mxu0 %v2877_v8  ;;  %18051 = vmatprep.subr.bf16.mxu1 %v21637_v39  ;;  %v6479_v8 = vld [vmem:[#allocation2 + $0x248] sm:$0xff] }
 0x258   :  { %17988 = vmatmul.mubr.bf16.gmra.mrb[48].mxu1 %v6141_v28  ;;  %17559 = vmatprep.mubr.bf16.mxu0 %v2878_v59  ;;  %v3242_v28 = vpack.c.bf16 %v3214_v45, %v3213_v52  ;;  %v6505_v59 = vpack.c.bf16 %v6477_v63, %v6476_v40  ;;  %v6492_v52 = vld [vmem:[#allocation2 + $0x2e8] sm:$0xff]  ;;  %v3231_v45 = vld [vmem:[#allocation2 + $0x150] sm:$0xff]  ;;  %v3232_v40 = vld [vmem:[#allocation2 + $0x158] sm:$0xff] }
 0x259   :  { %17991 = vmatprep.mubr.bf16.mxu1 %v6142_v12  ;;  %v3243_v12 = vpack.c.bf16 %v3216_v4, %v3215_v55  ;;  %v6494_v63 = vld [vmem:[#allocation2 + $0x300] sm:$0xff]  ;;  %v6495_v55 = vld [vmem:[#allocation2 + $0x308] sm:$0xff] }
 0x25f   :  { %17560 = vmatmul.mubr.bf16.gmra.mrb[52].mxu0 %v2879_v51  ;;  %v3220_v51 = vld [vmem:[#allocation2 + $0xc8] sm:$0xff] }
 0x260   :  { %17992 = vmatmul.mubr.bf16.gmra.mrb[52].mxu1 %v6143_v37  ;;  %17563 = vmatprep.mubr.bf16.mxu0 %v2880_v5  ;;  %v20191_v37 = vld [vmem:[%s25075_s3 + $0x1e0] sm:$0xff]   ;;  %v6482_v5 = vld [vmem:[#allocation2 + $0x270] sm:$0xff]  ;;  %v3245_v34 = vpack.c.bf16 %v3220_v51, %v3219_v24  ;;  %v6516_v24 = vpack.c.bf16 %v6499_v43, %v6498_v60 }
 0x261   :  { %17995 = vmatprep.mubr.bf16.mxu1 %v6144_v22  ;;  %v6483_v22 = vld [vmem:[#allocation2 + $0x278] sm:$0xff]  ;;  %v20363_v51 = vld [vmem:[#allocation2] sm:$0xff]  ;;  %v20206_v60 = vld [vmem:[%s25075_s3 + $0x230] sm:$0xff]  }
 0x262   :  { %v6508_v18 = vpack.c.bf16 %v6483_v22, %v6482_v5  ;;  %v3577_v5 = vld [vmem:[#allocation2 + $0x31] sm:$0xff]  ;;  %v3578_v22 = vld [vmem:[#allocation2 + $0x39] sm:$0xff] }
 0x263   :  { %v3593_v43 = vld [vmem:[#allocation2 + $0xf1] sm:$0xff] }
 0x267   :  { %17564 = vmatmul.mubr.bf16.gmra.mrb[56].mxu0 %v2881_v49  ;;  %v6484_v49 = vld [vmem:[#allocation2 + $0x288] sm:$0xff] }
 0x268   :  { %17996 = vmatmul.mubr.bf16.gmra.mrb[56].mxu1 %v6145_v0  ;;  %17567 = vmatprep.mubr.bf16.mxu0 %v2882_v1  ;;  %v6485_v0 = vld [vmem:[#allocation2 + $0x290] sm:$0xff] }
 0x269   :  { %17999 = vmatprep.mubr.bf16.mxu1 %v6146_v20  ;;  %v20190_v1 = vld [vmem:[%s25075_s3 + $0x1f0] sm:$0xff]   ;;  %v6509_v26 = vpack.c.bf16 %v6485_v0, %v6484_v49  ;;  %v3581_v49 = vld [vmem:[#allocation2 + $0x61] sm:$0xff] }
 0x26a   :  { %v3223_v20 = vld [vmem:[#allocation2 + $0xf0] sm:$0xff] }
 0x26b   :  { %v3247_v9 = vpack.c.bf16 %v3224_v6, %v3223_v20  ;;  %v3582_v0 = vld [vmem:[#allocation2 + $0x69] sm:$0xff]  ;;  %v6844_v20 = vld [vmem:[#allocation2 + $0x219] sm:$0xff] }
 0x26f   :  { %17568 = vmatmul.mubr.bf16.gmra.mrb[60].mxu0 %v2883_v54  ;;  %v6510_v54 = vpack.c.bf16 %v6487_v14, %v6486_v7  ;;  %v20197_v7 = vld [vmem:[%s25075_s3 + $0x208] sm:$0xff]   ;;  %v3611_v14 = vpack.c.bf16 %v3582_v0, %v3581_v49  ;;  %v6859_v49 = vld [vmem:[#allocation2 + $0x2d1] sm:$0xff]  ;;  %v6860_v0 = vld [vmem:[#allocation2 + $0x2d9] sm:$0xff] }
 0x270   :  { %18000 = vmatmul.mubr.bf16.gmra.mrb[60].mxu1 %v6147_v58  ;;  %17587 = vmatprep.mubr.bf16.mxu0 %v3239_v15  ;;  %v20195_v58 = vld [vmem:[%s25075_s3 + $0x1f8] sm:$0xff]   ;;  %v3225_v15 = vld [vmem:[#allocation2 + $0x108] sm:$0xff] }
 0x271   :  { %18019 = vmatprep.mubr.bf16.mxu1 %v6502_v29  ;;  %v3226_v29 = vld [vmem:[#allocation2 + $0x110] sm:$0xff] }
 0x277   :  { %17588 = vmatmul.mubr.bf16.vlgmr.msra.gmra.mrb[32].mxu0 %v3240_v53  ;;  %v3248_v53 = vpack.c.bf16 %v3226_v29, %v3225_v15  ;;  %v6846_v15 = vld [vmem:[#allocation2 + $0x231] sm:$0xff] }
 0x278   :  { %17620 = vmatpush3.bf16.msra.mxu0 %v21632_v33  ;;  %18020 = vmatmul.mubr.bf16.vlgmr.msra.gmra.mrb[32].mxu1 %v6503_v11  ;;  %v20188_v33 = vld [vmem:[%s25075_s3 + $0x1d0] sm:$0xff]   ;;  %v6511_v11 = vpack.c.bf16 %v6489_v2, %v6488_v32  ;;  %v3586_v32 = vld [vmem:[#allocation2 + $0x99] sm:$0xff] }
 0x279   :  { %17591 = vmatprep.mubr.bf16.mxu0 %v3241_v23  ;;  %18023 = vmatprep.mubr.bf16.mxu1 %v6504_v62  ;;  %v6512_v23 = vpack.c.bf16 %v6491_v31, %v6490_v57  ;;  %v3229_v62 = vld [vmem:[#allocation2 + $0x138] sm:$0xff]  ;;  %v20204_v2 = vld [vmem:[%s25075_s3 + $0x210] sm:$0xff]  }
 0x27a   :  { %17621 = vmatprep.subr.bf16.mxu0 %v20181_v56  ;;  %18052 = vmatpush3.bf16.msra.mxu1 %v21637_v39  ;;  %v6506_v39 = vpack.c.bf16 %v6479_v8, %v6478_v10  ;;  %v3251_v10 = vpack.c.bf16 %v3232_v40, %v3231_v45  ;;  %v6514_v8 = vpack.c.bf16 %v6495_v55, %v6494_v63  ;;  %v3585_v29 = vld [vmem:[#allocation2 + $0x91] sm:$0xff]  ;;  %v3590_v45 = vld [vmem:[#allocation2 + $0xc9] sm:$0xff]  ;;  %v20207_v40 = vld [vmem:[%s25075_s3 + $0x220] sm:$0xff]  }
 0x27b   :  { %18053 = vmatprep.subr.bf16.mxu1 %v20186_v50  ;;  %v3613_v31 = vpack.c.bf16 %v3586_v32, %v3585_v29  ;;  %v6851_v63 = vld [vmem:[#allocation2 + $0x271] sm:$0xff]  ;;  %v6852_v55 = vld [vmem:[#allocation2 + $0x279] sm:$0xff] }
 0x27c   :  { %17622 = vmatpush3.bf16.msra.mxu0 %v20181_v56  ;;  %v3249_v56 = vpack.c.bf16 %v3228_v61, %v3227_v13  ;;  %v6848_v13 = vld [vmem:[#allocation2 + $0x249] sm:$0xff] }
 0x27d   :  { %17623 = vmatprep.subr.bf16.mxu0 %v20182_v27 }
 0x27e   :  { %18054 = vmatpush3.bf16.msra.mxu1 %v20186_v50  ;;  %v3230_v50 = vld [vmem:[#allocation2 + $0x140] sm:$0xff] }
 0x27f   :  { %17592 = vmatmul.mubr.bf16.gmra.mrb[36].mxu0 %v3242_v28  ;;  %18055 = vmatprep.subr.bf16.mxu1 %v20188_v33  ;;  %v3250_v4 = vpack.c.bf16 %v3230_v50, %v3229_v62  ;;  %v3233_v28 = vld [vmem:[#allocation2 + $0x168] sm:$0xff]  ;;  %v6849_v62 = vld [vmem:[#allocation2 + $0x259] sm:$0xff] }
 0x280   :  { %18024 = vmatmul.mubr.bf16.gmra.mrb[36].mxu1 %v6505_v59  ;;  %17595 = vmatprep.mubr.bf16.mxu0 %v3243_v12  ;;  %v3234_v59 = vld [vmem:[#allocation2 + $0x170] sm:$0xff]  ;;  %v6496_v12 = vld [vmem:[#allocation2 + $0x318] sm:$0xff]  ;;  %v6850_v50 = vld [vmem:[#allocation2 + $0x261] sm:$0xff] }
 0x281   :  { %18027 = vmatprep.mubr.bf16.mxu1 %v6506_v39  ;;  %17624 = vmatpush3.bf16.msra.mxu0 %v20182_v27  ;;  %v6493_v27 = vld [vmem:[#allocation2 + $0x2f0] sm:$0xff]  ;;  %v3235_v39 = vld [vmem:[#allocation2 + $0x180] sm:$0xff]  ;;  %v3252_v17 = vpack.c.bf16 %v3234_v59, %v3233_v28  ;;  %v6877_v28 = vpack.c.bf16 %v6852_v55, %v6851_v63  ;;  %v20208_v59 = vld [vmem:[%s25075_s3 + $0x228] sm:$0xff]  }
 0x282   :  { %17625 = vmatprep.subr.bf16.mxu0 %v20183_v36  ;;  %18056 = vmatpush3.bf16.msra.mxu1 %v20188_v33  ;;  %v6513_v33 = vpack.c.bf16 %v6493_v27, %v6492_v52  ;;  %v20200_v52 = vld [vmem:[%s25075_s3 + $0x220] sm:$0xff]   ;;  %v3947_v55 = vld [vmem:[#allocation2 + $0x32] sm:$0xff] }
 0x283   :  { %18057 = vmatprep.subr.bf16.mxu1 %v20189_v25  ;;  %v3589_v27 = vld [vmem:[#allocation2 + $0xc1] sm:$0xff] }
 0x285   :  { %17626 = vmatpush3.bf16.msra.mxu0 %v20183_v36  ;;  %v6497_v36 = vld [vmem:[#allocation2 + $0x320] sm:$0xff] }
 0x286   :  { %17627 = vmatprep.subr.bf16.mxu0 %v20184_v19  ;;  %18058 = vmatpush3.bf16.msra.mxu1 %v20189_v25  ;;  %v3236_v25 = vld [vmem:[#allocation2 + $0x188] sm:$0xff]  ;;  %v6515_v16 = vpack.c.bf16 %v6497_v36, %v6496_v12  ;;  %v3591_v12 = vld [vmem:[#allocation2 + $0xd9] sm:$0xff] }
 0x287   :  { %17596 = vmatmul.mubr.bf16.gmra.mrb[40].mxu0 %v3244_v21  ;;  %18059 = vmatprep.subr.bf16.mxu1 %v20191_v37  ;;  %v6839_v21 = vld [vmem:[#allocation2 + $0x1e1] sm:$0xff] }
 0x288   :  { %18028 = vmatmul.mubr.bf16.gmra.mrb[40].mxu1 %v6507_v30  ;;  %17599 = vmatprep.mubr.bf16.mxu0 %v3245_v34  ;;  %v6840_v30 = vld [vmem:[#allocation2 + $0x1e9] sm:$0xff]  ;;  %v3609_v34 = vpack.c.bf16 %v3578_v22, %v3577_v5  ;;  %v3592_v36 = vld [vmem:[#allocation2 + $0xe1] sm:$0xff]  ;;  %v20209_v22 = vld [vmem:[%s25075_s3 + $0x238] sm:$0xff]  }
 0x289   :  { %18031 = vmatprep.mubr.bf16.mxu1 %v6508_v18  ;;  %17628 = vmatpush3.bf16.msra.mxu0 %v20184_v19  ;;  %v3253_v19 = vpack.c.bf16 %v3236_v25, %v3235_v39  ;;  %v3579_v18 = vld [vmem:[#allocation2 + $0x49] sm:$0xff]  ;;  %v6854_v25 = vld [vmem:[#allocation2 + $0x291] sm:$0xff] }
 0x28a   :  { %17629 = vmatprep.subr.bf16.mxu0 %v20187_v35  ;;  %18060 = vmatpush3.bf16.msra.mxu1 %v20191_v37  ;;  %v3254_v37 = vpack.c.bf16 %v20363_v51, %v20363_v51  ;;  %v6853_v39 = vld [vmem:[#allocation2 + $0x289] sm:$0xff]  ;;  %v3616_v51 = vpack.c.bf16 %v3592_v36, %v3591_v12  ;;  %v3950_v36 = vld [vmem:[#allocation2 + $0x52] sm:$0xff] }
 0x28b   :  { %18061 = vmatprep.subr.bf16.mxu1 %v20192_v38  ;;  %v3949_v12 = vld [vmem:[#allocation2 + $0x4a] sm:$0xff] }
 0x28d   :  { %17630 = vmatpush3.bf16.msra.mxu0 %v20187_v35  ;;  %v6871_v35 = vpack.c.bf16 %v6840_v30, %v6839_v21  ;;  %v20211_v30 = vld [vmem:[%s25075_s3 + $0x238] sm:$0xff]  }
 0x28e   :  { %17631 = vmatprep.subr.bf16.mxu0 %v20190_v1  ;;  %18062 = vmatpush3.bf16.msra.mxu1 %v20192_v38  ;;  %v3580_v38 = vld [vmem:[#allocation2 + $0x51] sm:$0xff] }
 0x28f   :  { %17600 = vmatmul.mubr.bf16.gmra.mrb[44].mxu0 %v3246_v46  ;;  %18063 = vmatprep.subr.bf16.mxu1 %v20194_v44  ;;  %v3610_v6 = vpack.c.bf16 %v3580_v38, %v3579_v18  ;;  %v6857_v18 = vld [vmem:[#allocation2 + $0x2b9] sm:$0xff]  ;;  %v6858_v38 = vld [vmem:[#allocation2 + $0x2c1] sm:$0xff] }
 0x290   :  { %18032 = vmatmul.mubr.bf16.gmra.mrb[44].mxu1 %v6509_v26  ;;  %17603 = vmatprep.mubr.bf16.mxu0 %v3247_v9  ;;  %v20202_v26 = vld [vmem:[%s25075_s3 + $0x208] sm:$0xff]   ;;  %v3583_v9 = vld [vmem:[#allocation2 + $0x79] sm:$0xff] }
 0x291   :  { %18035 = vmatprep.mubr.bf16.mxu1 %v6510_v54  ;;  %17632 = vmatpush3.bf16.msra.mxu0 %v20190_v1  ;;  %v6843_v1 = vld [vmem:[#allocation2 + $0x211] sm:$0xff]  ;;  %v3584_v54 = vld [vmem:[#allocation2 + $0x81] sm:$0xff] }
 0x292   :  { %17633 = vmatprep.subr.bf16.mxu0 %v20193_v42  ;;  %18064 = vmatpush3.bf16.msra.mxu1 %v20194_v44  ;;  %v6872_v44 = vpack.c.bf16 %v6842_v48, %v6841_v41  ;;  %v6873_v46 = vpack.c.bf16 %v6844_v20, %v6843_v1  ;;  %v3612_v61 = vpack.c.bf16 %v3584_v54, %v3583_v9  ;;  %v3597_v41 = vld [vmem:[#allocation2 + $0x121] sm:$0xff]  ;;  %v3598_v48 = vld [vmem:[#allocation2 + $0x129] sm:$0xff]  ;;  %v3601_v9 = vld [vmem:[#allocation2 + $0x151] sm:$0xff] }
 0x293   :  { %18065 = vmatprep.subr.bf16.mxu1 %v20195_v58  ;;  %v6880_v20 = vpack.c.bf16 %v6858_v38, %v6857_v18  ;;  %v6863_v54 = vld [vmem:[#allocation2 + $0x301] sm:$0xff]  ;;  %v7217_v38 = vld [vmem:[#allocation2 + $0x24a] sm:$0xff] }
 0x294   :  { %v7216_v18 = vld [vmem:[#allocation2 + $0x242] sm:$0xff] }
 0x295   :  { %17634 = vmatpush3.bf16.msra.mxu0 %v20193_v42  ;;  %v20198_v42 = vld [vmem:[%s25075_s3 + $0x210] sm:$0xff]  }
 0x296   :  { %18066 = vmatpush3.bf16.msra.mxu1 %v20195_v58  ;;  %17667 = vmatprep.subr.bf16.mxu0 %v21688_v3  ;;  %v6845_v58 = vld [vmem:[#allocation2 + $0x229] sm:$0xff] }
 0x297   :  { %17604 = vmatmul.mubr.bf16.gmra.mrb[48].mxu0 %v3248_v53  ;;  %18099 = vmatprep.subr.bf16.mxu1 %v21693_v47  ;;  %v6874_v57 = vpack.c.bf16 %v6846_v15, %v6845_v58  ;;  %v20199_v53 = vld [vmem:[%s25075_s3 + $0x218] sm:$0xff]   ;;  %v6864_v58 = vld [vmem:[#allocation2 + $0x309] sm:$0xff] }
 0x298   :  { %18036 = vmatmul.mubr.bf16.gmra.mrb[48].mxu1 %v6511_v11  ;;  %17607 = vmatprep.mubr.bf16.mxu0 %v3249_v56  ;;  %v20205_v11 = vld [vmem:[%s25075_s3 + $0x218] sm:$0xff]   ;;  %v3587_v56 = vld [vmem:[#allocation2 + $0xa9] sm:$0xff] }
 0x299   :  { %18039 = vmatprep.mubr.bf16.mxu1 %v6512_v23  ;;  %v3588_v23 = vld [vmem:[#allocation2 + $0xb1] sm:$0xff] }
 0x29f   :  { %17608 = vmatmul.mubr.bf16.gmra.mrb[52].mxu0 %v3250_v4  ;;  %v3614_v4 = vpack.c.bf16 %v3588_v23, %v3587_v56 }
 0x2a0   :  { %18040 = vmatmul.mubr.bf16.gmra.mrb[52].mxu1 %v6513_v33  ;;  %17611 = vmatprep.mubr.bf16.mxu0 %v3251_v10  ;;  %v6876_v33 = vpack.c.bf16 %v6850_v50, %v6849_v62  ;;  %v3615_v10 = vpack.c.bf16 %v3590_v45, %v3589_v27  ;;  %v3608_v27 = vld [vmem:[#allocation2 + $0x1a1] sm:$0xff]  ;;  %v6869_v45 = vld [vmem:[#allocation2 + $0x349] sm:$0xff] }
 0x2a1   :  { %18043 = vmatprep.mubr.bf16.mxu1 %v6514_v8  ;;  %v20203_v8 = vld [vmem:[%s25075_s3 + $0x228] sm:$0xff]  }
 0x2a7   :  { %17612 = vmatmul.mubr.bf16.gmra.mrb[56].mxu0 %v3252_v17  ;;  %v3594_v17 = vld [vmem:[#allocation2 + $0xf9] sm:$0xff] }
 0x2a8   :  { %18044 = vmatmul.mubr.bf16.gmra.mrb[56].mxu1 %v6515_v16  ;;  %17615 = vmatprep.mubr.bf16.mxu0 %v3253_v19  ;;  %v20210_v16 = vld [vmem:[%s25075_s3 + $0x230] sm:$0xff]   ;;  %v6855_v19 = vld [vmem:[#allocation2 + $0x2a1] sm:$0xff]  ;;  %v3617_v5 = vpack.c.bf16 %v3594_v17, %v3593_v43 }
 0x2a9   :  { %18047 = vmatprep.mubr.bf16.mxu1 %v6516_v24  ;;  %v6856_v24 = vld [vmem:[#allocation2 + $0x2a9] sm:$0xff]  ;;  %v7212_v17 = vld [vmem:[#allocation2 + $0x212] sm:$0xff] }
 0x2aa   :  { %v6879_v21 = vpack.c.bf16 %v6856_v24, %v6855_v19  ;;  %v3952_v43 = vld [vmem:[#allocation2 + $0x6a] sm:$0xff]  ;;  %v3980_v19 = vpack.c.bf16 %v3950_v36, %v3949_v12  ;;  %v3971_v12 = vld [vmem:[#allocation2 + $0x152] sm:$0xff]  ;;  %v3972_v36 = vld [vmem:[#allocation2 + $0x15a] sm:$0xff] }
 0x2af   :  { %17616 = vmatmul.mubr.bf16.gmra.mrb[60].mxu0 %v3254_v37 }
 0x2b0   :  { %18048 = vmatmul.mubr.bf16.gmra.mrb[60].mxu1 %v3254_v37  ;;  %17635 = vmatprep.mubr.bf16.mxu0 %v3609_v34  ;;  %v6878_v37 = vpack.c.bf16 %v6854_v25, %v6853_v39  ;;  %v3595_v34 = vld [vmem:[#allocation2 + $0x109] sm:$0xff]  ;;  %v7210_v39 = vld [vmem:[#allocation2 + $0x1fa] sm:$0xff] }
 0x2b1   :  { %18067 = vmatprep.mubr.bf16.mxu1 %v6871_v35  ;;  %v3596_v35 = vld [vmem:[#allocation2 + $0x111] sm:$0xff]  ;;  %v7211_v25 = vld [vmem:[#allocation2 + $0x202] sm:$0xff] }
 0x2b2   :  { %v3618_v1 = vpack.c.bf16 %v3596_v35, %v3595_v34  ;;  %v7241_v24 = vpack.c.bf16 %v7211_v25, %v7210_v39  ;;  %v3955_v34 = vld [vmem:[#allocation2 + $0x92] sm:$0xff]  ;;  %v3956_v35 = vld [vmem:[#allocation2 + $0x9a] sm:$0xff]  ;;  %v7232_v39 = vld [vmem:[#allocation2 + $0x302] sm:$0xff] }
 0x2b3   :  { %v7233_v25 = vld [vmem:[#allocation2 + $0x30a] sm:$0xff] }
 0x2b7   :  { %17636 = vmatmul.mubr.bf16.vlgmr.msra.gmra.mrb[32].mxu0 %v3610_v6  ;;  %v3619_v6 = vpack.c.bf16 %v3598_v48, %v3597_v41 }
 0x2b8   :  { %17668 = vmatpush3.bf16.msra.mxu0 %v21688_v3  ;;  %18068 = vmatmul.mubr.bf16.vlgmr.msra.gmra.mrb[32].mxu1 %v6872_v44  ;;  %v6847_v3 = vld [vmem:[#allocation2 + $0x241] sm:$0xff]  ;;  %v6881_v44 = vpack.c.bf16 %v6860_v0, %v6859_v49  ;;  %v3983_v49 = vpack.c.bf16 %v3956_v35, %v3955_v34  ;;  %v7244_v0 = vpack.c.bf16 %v7217_v38, %v7216_v18 }
 0x2b9   :  { %17639 = vmatprep.mubr.bf16.mxu0 %v3611_v14  ;;  %18071 = vmatprep.mubr.bf16.mxu1 %v6873_v46  ;;  %v3600_v14 = vld [vmem:[#allocation2 + $0x141] sm:$0xff]  ;;  %v6861_v46 = vld [vmem:[#allocation2 + $0x2e9] sm:$0xff] }
 0x2ba   :  { %17669 = vmatprep.subr.bf16.mxu0 %v20197_v7  ;;  %18100 = vmatpush3.bf16.msra.mxu1 %v21693_v47  ;;  %v6875_v47 = vpack.c.bf16 %v6848_v13, %v6847_v3  ;;  %v3603_v3 = vld [vmem:[#allocation2 + $0x169] sm:$0xff]  ;;  %v3604_v13 = vld [vmem:[#allocation2 + $0x171] sm:$0xff] }
 0x2bb   :  { %18101 = vmatprep.subr.bf16.mxu1 %v20202_v26  ;;  %v3622_v56 = vpack.c.bf16 %v3604_v13, %v3603_v3  ;;  %v3963_v3 = vld [vmem:[#allocation2 + $0xf2] sm:$0xff]  ;;  %v3964_v13 = vld [vmem:[#allocation2 + $0xfa] sm:$0xff] }
 0x2bc   :  { %17670 = vmatpush3.bf16.msra.mxu0 %v20197_v7  ;;  %v3599_v7 = vld [vmem:[#allocation2 + $0x139] sm:$0xff] }
 0x2bd   :  { %17671 = vmatprep.subr.bf16.mxu0 %v20198_v42  ;;  %v3620_v15 = vpack.c.bf16 %v3600_v14, %v3599_v7  ;;  %v3959_v7 = vld [vmem:[#allocation2 + $0xc2] sm:$0xff]  ;;  %v3960_v14 = vld [vmem:[#allocation2 + $0xca] sm:$0xff] }
 0x2be   :  { %18102 = vmatpush3.bf16.msra.mxu1 %v20202_v26  ;;  %v6862_v26 = vld [vmem:[#allocation2 + $0x2f1] sm:$0xff] }
 0x2bf   :  { %17640 = vmatmul.mubr.bf16.gmra.mrb[36].mxu0 %v3612_v61  ;;  %18103 = vmatprep.subr.bf16.mxu1 %v20204_v2  ;;  %v6882_v29 = vpack.c.bf16 %v6862_v26, %v6861_v46  ;;  %v6865_v61 = vld [vmem:[#allocation2 + $0x319] sm:$0xff] }
 0x2c0   :  { %18072 = vmatmul.mubr.bf16.gmra.mrb[36].mxu1 %v6874_v57  ;;  %17643 = vmatprep.mubr.bf16.mxu0 %v3613_v31  ;;  %v6866_v57 = vld [vmem:[#allocation2 + $0x321] sm:$0xff]  ;;  %v7220_v46 = vld [vmem:[#allocation2 + $0x272] sm:$0xff] }
 0x2c1   :  { %18075 = vmatprep.mubr.bf16.mxu1 %v6875_v47  ;;  %17672 = vmatpush3.bf16.msra.mxu0 %v20198_v42  ;;  %v3602_v42 = vld [vmem:[#allocation2 + $0x159] sm:$0xff]  ;;  %v3605_v31 = vld [vmem:[#allocation2 + $0x181] sm:$0xff]  ;;  %v6867_v47 = vld [vmem:[#allocation2 + $0x331] sm:$0xff]  ;;  %v6884_v23 = vpack.c.bf16 %v6866_v57, %v6865_v61 }
 0x2c2   :  { %17673 = vmatprep.subr.bf16.mxu0 %v20199_v53  ;;  %18104 = vmatpush3.bf16.msra.mxu1 %v20204_v2  ;;  %v3621_v32 = vpack.c.bf16 %v3602_v42, %v3601_v9  ;;  %v6883_v2 = vpack.c.bf16 %v6864_v58, %v6863_v54  ;;  %v7221_v26 = vld [vmem:[#allocation2 + $0x27a] sm:$0xff]  ;;  %v3985_v54 = vpack.c.bf16 %v3960_v14, %v3959_v7  ;;  %v7224_v61 = vld [vmem:[#allocation2 + $0x2a2] sm:$0xff]  ;;  %v7225_v57 = vld [vmem:[#allocation2 + $0x2aa] sm:$0xff] }
 0x2c3   :  { %18105 = vmatprep.subr.bf16.mxu1 %v20205_v11  ;;  %v7246_v58 = vpack.c.bf16 %v7221_v26, %v7220_v46 }
 0x2c5   :  { %17674 = vmatpush3.bf16.msra.mxu0 %v20199_v53  ;;  %v3606_v53 = vld [vmem:[#allocation2 + $0x189] sm:$0xff] }
 0x2c6   :  { %17675 = vmatprep.subr.bf16.mxu0 %v20200_v52  ;;  %18106 = vmatpush3.bf16.msra.mxu1 %v20205_v11  ;;  %v6868_v11 = vld [vmem:[#allocation2 + $0x339] sm:$0xff]  ;;  %v3623_v62 = vpack.c.bf16 %v3606_v53, %v3605_v31 }
 0x2c7   :  { %17644 = vmatmul.mubr.bf16.gmra.mrb[40].mxu0 %v3614_v4  ;;  %18107 = vmatprep.subr.bf16.mxu1 %v20207_v40  ;;  %v6885_v50 = vpack.c.bf16 %v6868_v11, %v6867_v47  ;;  %v3948_v4 = vld [vmem:[#allocation2 + $0x3a] sm:$0xff]  ;;  %v3987_v47 = vpack.c.bf16 %v3964_v13, %v3963_v3  ;;  %v7248_v11 = vpack.c.bf16 %v7225_v57, %v7224_v61 }
 0x2c8   :  { %18076 = vmatmul.mubr.bf16.gmra.mrb[40].mxu1 %v6876_v33  ;;  %17647 = vmatprep.mubr.bf16.mxu0 %v3615_v10  ;;  %v7208_v10 = vld [vmem:[#allocation2 + $0x1e2] sm:$0xff] }
 0x2c9   :  { %18079 = vmatprep.mubr.bf16.mxu1 %v6877_v28  ;;  %17676 = vmatpush3.bf16.msra.mxu0 %v20200_v52  ;;  %v3607_v52 = vld [vmem:[#allocation2 + $0x199] sm:$0xff]  ;;  %v3979_v28 = vpack.c.bf16 %v3948_v4, %v3947_v55 }
 0x2ca   :  { %17677 = vmatprep.subr.bf16.mxu0 %v20203_v8  ;;  %18108 = vmatpush3.bf16.msra.mxu1 %v20207_v40  ;;  %v6870_v40 = vld [vmem:[#allocation2 + $0x351] sm:$0xff]  ;;  %v3624_v63 = vpack.c.bf16 %v3608_v27, %v3607_v52  ;;  %v3967_v52 = vld [vmem:[#allocation2 + $0x122] sm:$0xff] }
 0x2cb   :  { %18109 = vmatprep.subr.bf16.mxu1 %v20208_v59  ;;  %v6886_v33 = vpack.c.bf16 %v6870_v40, %v6869_v45  ;;  %v3968_v27 = vld [vmem:[#allocation2 + $0x12a] sm:$0xff]  ;;  %v7228_v45 = vld [vmem:[#allocation2 + $0x2d2] sm:$0xff]  ;;  %v7229_v40 = vld [vmem:[#allocation2 + $0x2da] sm:$0xff] }
 0x2cc   :  { %v3989_v4 = vpack.c.bf16 %v3968_v27, %v3967_v52 }
 0x2cd   :  { %17678 = vmatpush3.bf16.msra.mxu0 %v20203_v8  ;;  %v7209_v8 = vld [vmem:[#allocation2 + $0x1ea] sm:$0xff] }
 0x2ce   :  { %17679 = vmatprep.subr.bf16.mxu0 %v20206_v60  ;;  %18110 = vmatpush3.bf16.msra.mxu1 %v20208_v59  ;;  %v7240_v59 = vpack.c.bf16 %v7209_v8, %v7208_v10  ;;  %v3969_v10 = vld [vmem:[#allocation2 + $0x13a] sm:$0xff]  ;;  %v3970_v8 = vld [vmem:[#allocation2 + $0x142] sm:$0xff] }
 0x2cf   :  { %17648 = vmatmul.mubr.bf16.gmra.mrb[44].mxu0 %v3616_v51  ;;  %18111 = vmatprep.subr.bf16.mxu1 %v20210_v16 }
 0x2d0   :  { %18080 = vmatmul.mubr.bf16.gmra.mrb[44].mxu1 %v6878_v37  ;;  %17651 = vmatprep.mubr.bf16.mxu0 %v3617_v5  ;;  %v3953_v5 = vld [vmem:[#allocation2 + $0x7a] sm:$0xff] }
 0x2d1   :  { %18083 = vmatprep.mubr.bf16.mxu1 %v6879_v21  ;;  %17680 = vmatpush3.bf16.msra.mxu0 %v20206_v60  ;;  %v3951_v60 = vld [vmem:[#allocation2 + $0x62] sm:$0xff]  ;;  %v7214_v21 = vld [vmem:[#allocation2 + $0x22a] sm:$0xff] }
 0x2d2   :  { %17681 = vmatprep.subr.bf16.mxu0 %v20209_v22  ;;  %18112 = vmatpush3.bf16.msra.mxu1 %v20210_v16  ;;  %v7213_v16 = vld [vmem:[#allocation2 + $0x21a] sm:$0xff]  ;;  %v3981_v51 = vpack.c.bf16 %v3952_v43, %v3951_v60  ;;  %v3990_v60 = vpack.c.bf16 %v3970_v8, %v3969_v10 }
 0x2d3   :  { %18113 = vmatprep.subr.bf16.mxu1 %v20211_v30  ;;  %v7242_v37 = vpack.c.bf16 %v7213_v16, %v7212_v17  ;;  %v3991_v17 = vpack.c.bf16 %v3972_v36, %v3971_v12  ;;  %v7252_v16 = vpack.c.bf16 %v7233_v25, %v7232_v39 }
 0x2d5   :  { %17682 = vmatpush3.bf16.msra.mxu0 %v20209_v22  ;;  %v3954_v22 = vld [vmem:[#allocation2 + $0x82] sm:$0xff] }
 0x2d6   :  { %18114 = vmatpush3.bf16.msra.mxu1 %v20211_v30  ;;  %v7215_v30 = vld [vmem:[#allocation2 + $0x232] sm:$0xff]  ;;  %v3982_v41 = vpack.c.bf16 %v3954_v22, %v3953_v5  ;;  %v3975_v5 = vld [vmem:[#allocation2 + $0x182] sm:$0xff]  ;;  %v3976_v22 = vld [vmem:[#allocation2 + $0x18a] sm:$0xff] }
 0x2d7   :  { %17652 = vmatmul.mubr.bf16.gmra.mrb[48].mxu0 %v3618_v1  ;;  %v7243_v48 = vpack.c.bf16 %v7215_v30, %v7214_v21  ;;  %v3957_v1 = vld [vmem:[#allocation2 + $0xaa] sm:$0xff]  ;;  %v7236_v21 = vld [vmem:[#allocation2 + $0x332] sm:$0xff]  ;;  %v7237_v30 = vld [vmem:[#allocation2 + $0x33a] sm:$0xff]  ;;  %v3993_v18 = vpack.c.bf16 %v3976_v22, %v3975_v5 }
 0x2d8   :  { %18084 = vmatmul.mubr.bf16.gmra.mrb[48].mxu1 %v6880_v20  ;;  %17655 = vmatprep.mubr.bf16.mxu0 %v3619_v6  ;;  %v3958_v20 = vld [vmem:[#allocation2 + $0xb2] sm:$0xff]  ;;  %v7218_v6 = vld [vmem:[#allocation2 + $0x25a] sm:$0xff]  ;;  %v7254_v38 = vpack.c.bf16 %v7237_v30, %v7236_v21 }
 0x2d9   :  { %18087 = vmatprep.mubr.bf16.mxu1 %v6881_v44  ;;  %v7219_v44 = vld [vmem:[#allocation2 + $0x262] sm:$0xff]  ;;  %v3984_v9 = vpack.c.bf16 %v3958_v20, %v3957_v1 }
 0x2da   :  { %v7245_v42 = vpack.c.bf16 %v7219_v44, %v7218_v6 }
 0x2df   :  { %17656 = vmatmul.mubr.bf16.gmra.mrb[52].mxu0 %v3620_v15  ;;  %v3961_v15 = vld [vmem:[#allocation2 + $0xda] sm:$0xff] }
 0x2e0   :  { %18088 = vmatmul.mubr.bf16.gmra.mrb[52].mxu1 %v6882_v29  ;;  %17659 = vmatprep.mubr.bf16.mxu0 %v3621_v32  ;;  %v3962_v29 = vld [vmem:[#allocation2 + $0xe2] sm:$0xff]  ;;  %v7222_v32 = vld [vmem:[#allocation2 + $0x28a] sm:$0xff] }
 0x2e1   :  { %18091 = vmatprep.mubr.bf16.mxu1 %v6883_v2  ;;  %v7223_v2 = vld [vmem:[#allocation2 + $0x292] sm:$0xff]  ;;  %v3986_v31 = vpack.c.bf16 %v3962_v29, %v3961_v15 }
 0x2e2   :  { %v7247_v53 = vpack.c.bf16 %v7223_v2, %v7222_v32 }
 0x2e7   :  { %17660 = vmatmul.mubr.bf16.gmra.mrb[56].mxu0 %v3622_v56  ;;  %v3965_v56 = vld [vmem:[#allocation2 + $0x10a] sm:$0xff] }
 0x2e8   :  { %18092 = vmatmul.mubr.bf16.gmra.mrb[56].mxu1 %v6884_v23  ;;  %17663 = vmatprep.mubr.bf16.mxu0 %v3623_v62  ;;  %v3966_v23 = vld [vmem:[#allocation2 + $0x112] sm:$0xff]  ;;  %v7226_v62 = vld [vmem:[#allocation2 + $0x2ba] sm:$0xff] }
 0x2e9   :  { %18095 = vmatprep.mubr.bf16.mxu1 %v6885_v50  ;;  %v7227_v50 = vld [vmem:[#allocation2 + $0x2c2] sm:$0xff] }
 0x2ea   :  { %v7249_v55 = vpack.c.bf16 %v7227_v50, %v7226_v62 }
 0x2ef   :  { %17664 = vmatmul.mubr.bf16.gmra.mrb[60].mxu0 %v3624_v63  ;;  %v3988_v63 = vpack.c.bf16 %v3966_v23, %v3965_v56 }
 0x2f0   :  { %18096 = vmatmul.mubr.bf16.gmra.mrb[60].mxu1 %v6886_v33  ;;  %17683 = vmatprep.mubr.bf16.mxu0 %v3979_v28  ;;  %v7250_v33 = vpack.c.bf16 %v7229_v40, %v7228_v45  ;;  %v7230_v28 = vld [vmem:[#allocation2 + $0x2ea] sm:$0xff] }
 0x2f1   :  { %18115 = vmatprep.mubr.bf16.mxu1 %v7240_v59  ;;  %v7231_v59 = vld [vmem:[#allocation2 + $0x2f2] sm:$0xff] }
 0x2f2   :  { %v7251_v43 = vpack.c.bf16 %v7231_v59, %v7230_v28 }
 0x2f7   :  { %17684 = vmatmul.mubr.bf16.vlgmr.msra.gmra.mrb[32].mxu0 %v3980_v19  ;;  %v3973_v19 = vld [vmem:[#allocation2 + $0x16a] sm:$0xff] }
 0x2f8   :  { %18116 = vmatmul.mubr.bf16.vlgmr.msra.gmra.mrb[32].mxu1 %v7241_v24  ;;  %17687 = vmatprep.mubr.bf16.mxu0 %v3981_v51  ;;  %v3974_v24 = vld [vmem:[#allocation2 + $0x172] sm:$0xff]  ;;  %v7234_v51 = vld [vmem:[#allocation2 + $0x31a] sm:$0xff] }
 0x2f9   :  { %18119 = vmatprep.mubr.bf16.mxu1 %v7242_v37  ;;  %v7235_v37 = vld [vmem:[#allocation2 + $0x322] sm:$0xff]  ;;  %v3992_v34 = vpack.c.bf16 %v3974_v24, %v3973_v19 }
 0x2fa   :  { %v7253_v35 = vpack.c.bf16 %v7235_v37, %v7234_v51 }
 0x2ff   :  { %17688 = vmatmul.mubr.bf16.gmra.mrb[36].mxu0 %v3982_v41  ;;  %v3977_v41 = vld [vmem:[#allocation2 + $0x19a] sm:$0xff] }
 0x300   :  { %18120 = vmatmul.mubr.bf16.gmra.mrb[36].mxu1 %v7243_v48  ;;  %17691 = vmatprep.mubr.bf16.mxu0 %v3983_v49  ;;  %v3978_v48 = vld [vmem:[#allocation2 + $0x1a2] sm:$0xff]  ;;  %v7238_v49 = vld [vmem:[#allocation2 + $0x34a] sm:$0xff] }
 0x301   :  { %18123 = vmatprep.mubr.bf16.mxu1 %v7244_v0  ;;  %v7239_v0 = vld [vmem:[#allocation2 + $0x352] sm:$0xff]  ;;  %v3994_v1 = vpack.c.bf16 %v3978_v48, %v3977_v41 }
 0x302   :  { %v7255_v20 = vpack.c.bf16 %v7239_v0, %v7238_v49 }
 0x307   :  { %17692 = vmatmul.mubr.bf16.gmra.mrb[40].mxu0 %v3984_v9 }
 0x308   :  { %18124 = vmatmul.mubr.bf16.gmra.mrb[40].mxu1 %v7245_v42  ;;  %17695 = vmatprep.mubr.bf16.mxu0 %v3985_v54 }
 0x309   :  { %18127 = vmatprep.mubr.bf16.mxu1 %v7246_v58 }
 0x30f   :  { %17696 = vmatmul.mubr.bf16.gmra.mrb[44].mxu0 %v3986_v31 }
 0x310   :  { %18128 = vmatmul.mubr.bf16.gmra.mrb[44].mxu1 %v7247_v53  ;;  %17699 = vmatprep.mubr.bf16.mxu0 %v3987_v47 }
 0x311   :  { %18131 = vmatprep.mubr.bf16.mxu1 %v7248_v11 }
 0x317   :  { %17700 = vmatmul.mubr.bf16.gmra.mrb[48].mxu0 %v3988_v63 }
 0x318   :  { %18132 = vmatmul.mubr.bf16.gmra.mrb[48].mxu1 %v7249_v55  ;;  %17703 = vmatprep.mubr.bf16.mxu0 %v3989_v4 }
 0x319   :  { %18135 = vmatprep.mubr.bf16.mxu1 %v7250_v33 }
 0x31f   :  { %17704 = vmatmul.mubr.bf16.gmra.mrb[52].mxu0 %v3990_v60 }
 0x320   :  { %18136 = vmatmul.mubr.bf16.gmra.mrb[52].mxu1 %v7251_v43  ;;  %17707 = vmatprep.mubr.bf16.mxu0 %v3991_v17 }
 0x321   :  { %18139 = vmatprep.mubr.bf16.mxu1 %v7252_v16 }
 0x327   :  { %17708 = vmatmul.mubr.bf16.gmra.mrb[56].mxu0 %v3992_v34 }
 0x328   :  { %18140 = vmatmul.mubr.bf16.gmra.mrb[56].mxu1 %v7253_v35  ;;  %17711 = vmatprep.mubr.bf16.mxu0 %v3993_v18 }
 0x329   :  { %18143 = vmatprep.mubr.bf16.mxu1 %v7254_v38 }
 0x32f   :  { %17712 = vmatmul.mubr.bf16.gmra.mrb[60].mxu0 %v3994_v1 }
 0x330   :  { %18144 = vmatmul.mubr.bf16.gmra.mrb[60].mxu1 %v7255_v20 }
 0x3ca   :  { %v21741_v6 = vpop.f32.mrb[32].mxu0 }
 0x3cb   :  { %v21743_v44 = vpop.f32.mrb[32].mxu1  ;;  %v21745_v7 = vpop.f32.mrb[33].mxu0 }
 0x3cc   :  { %v21747_v14 = vpop.f32.mrb[33].mxu1  ;;  %v21749_v46 = vpop.f32.mrb[34].mxu0 }
 0x3cd   :  { %v21751_v26 = vpop.f32.mrb[34].mxu1  ;;  %v21753_v9 = vpop.f32.mrb[35].mxu0 }
 0x3ce   :  { %v7643_v42 = vadd.f32 %v21753_v9, %v21745_v7  ;;  %v21757_v54 = vpop.f32.mrb[35].mxu1 }
 0x3d0   :  { %v7644_v58 = vadd.f32 %v21741_v6, %v7643_v42 }
 0x3d2   :  { %v21760_v15 = vpop.f32.mrb[36].mxu0  ;;  %v7645_v29 = vadd.f32 %v21749_v46, %v7644_v58 }
 0x3d3   :  { %v21763_v32 = vpop.f32.mrb[36].mxu1  ;;  %v21765_v2 = vpop.f32.mrb[37].mxu0 }
 0x3d4   :  { %v7646_v3 = vadd.f32 %v7645_v29, %v21765_v2  ;;  %v21768_v13 = vpop.f32.mrb[37].mxu1  ;;  %v21770_v61 = vpop.f32.mrb[38].mxu0 }
 0x3d5   :  { %v21772_v57 = vpop.f32.mrb[38].mxu1  ;;  %v21774_v31 = vpop.f32.mrb[39].mxu0 }
 0x3d6   :  { %v7647_v53 = vadd.f32 %v7646_v3, %v21774_v31  ;;  %v21777_v47 = vpop.f32.mrb[39].mxu1 }
 0x3d8   :  { %v7648_v11 = vadd.f32 %v21760_v15, %v7647_v53 }
 0x3da   :  { %v21780_v56 = vpop.f32.mrb[40].mxu0  ;;  %v7649_v23 = vadd.f32 %v21770_v61, %v7648_v11 }
 0x3db   :  { %v21783_v62 = vpop.f32.mrb[40].mxu1  ;;  %v21785_v50 = vpop.f32.mrb[41].mxu0 }
 0x3dc   :  { %v7650_v52 = vadd.f32 %v7649_v23, %v21785_v50  ;;  %v21788_v27 = vpop.f32.mrb[41].mxu1  ;;  %v21790_v45 = vpop.f32.mrb[42].mxu0 }
 0x3dd   :  { %v21792_v40 = vpop.f32.mrb[42].mxu1  ;;  %v21794_v63 = vpop.f32.mrb[43].mxu0 }
 0x3de   :  { %v7651_v55 = vadd.f32 %v7650_v52, %v21794_v63  ;;  %v21797_v4 = vpop.f32.mrb[43].mxu1 }
 0x3e0   :  { %v7652_v33 = vadd.f32 %v21780_v56, %v7651_v55 }
 0x3e2   :  { %v21800_v10 = vpop.f32.mrb[44].mxu0  ;;  %v7653_v8 = vadd.f32 %v21790_v45, %v7652_v33 }
 0x3e3   :  { %v21803_v28 = vpop.f32.mrb[44].mxu1  ;;  %v21805_v59 = vpop.f32.mrb[45].mxu0 }
 0x3e4   :  { %v7654_v12 = vadd.f32 %v7653_v8, %v21805_v59  ;;  %v21808_v36 = vpop.f32.mrb[45].mxu1  ;;  %v21810_v39 = vpop.f32.mrb[46].mxu0 }
 0x3e5   :  { %v21812_v25 = vpop.f32.mrb[46].mxu1  ;;  %v21814_v60 = vpop.f32.mrb[47].mxu0 }
 0x3e6   :  { %v7655_v43 = vadd.f32 %v7654_v12, %v21814_v60  ;;  %v21817_v17 = vpop.f32.mrb[47].mxu1 }
 0x3e8   :  { %v7656_v16 = vadd.f32 %v21800_v10, %v7655_v43 }
 0x3ea   :  { %v21820_v19 = vpop.f32.mrb[48].mxu0  ;;  %v7657_v24 = vadd.f32 %v21810_v39, %v7656_v16 }
 0x3eb   :  { %v21823_v51 = vpop.f32.mrb[48].mxu1  ;;  %v21825_v37 = vpop.f32.mrb[49].mxu0 }
 0x3ec   :  { %v7658_v5 = vadd.f32 %v7657_v24, %v21825_v37  ;;  %v21828_v22 = vpop.f32.mrb[49].mxu1  ;;  %v21830_v21 = vpop.f32.mrb[50].mxu0 }
 0x3ed   :  { %25275 = vst [vmem:[#allocation5_spill] sm:$0xff] %v21830_v21  ;;  %v21832_v30 = vpop.f32.mrb[50].mxu1  ;;  %v21834_v34 = vpop.f32.mrb[51].mxu0 }
 0x3ee   :  { %v7659_v35 = vadd.f32 %v7658_v5, %v21834_v34  ;;  %v21837_v18 = vpop.f32.mrb[51].mxu1 }
 0x3f0   :  { %v7660_v38 = vadd.f32 %v21820_v19, %v7659_v35 }
 0x3f2   :  { %v21840_v41 = vpop.f32.mrb[52].mxu0  ;;  %v7661_v48 = vadd.f32 %v21830_v21, %v7660_v38 }
 0x3f3   :  { %25276 = vst [vmem:[#allocation4_spill] sm:$0xff] %v21840_v41  ;;  %v21843_v49 = vpop.f32.mrb[52].mxu1  ;;  %v21845_v0 = vpop.f32.mrb[53].mxu0 }
 0x3f4   :  { %25277 = vst [vmem:[#allocation6_spill] sm:$0xff] %v21843_v49  ;;  %25278 = vst [vmem:[#allocation7_spill] sm:$0xff] %v21845_v0  ;;  %v7662_v1 = vadd.f32 %v7661_v48, %v21845_v0  ;;  %v21848_v20 = vpop.f32.mrb[53].mxu1  ;;  %v21850_v42 = vpop.f32.mrb[54].mxu0 }
 0x3f5   :  { %25279 = vst [vmem:[#allocation8_spill] sm:$0xff] %v21850_v42  ;;  %v21852_v58 = vpop.f32.mrb[54].mxu1  ;;  %v21854_v29 = vpop.f32.mrb[55].mxu0 }
 0x3f6   :  { %25280 = vst [vmem:[#allocation9_spill] sm:$0xff] %v21852_v58  ;;  %25281 = vst [vmem:[#allocation10_spill] sm:$0xff] %v21854_v29  ;;  %v7663_v3 = vadd.f32 %v7662_v1, %v21854_v29  ;;  %v21857_v53 = vpop.f32.mrb[55].mxu1 }
 0x3f7   :  { %25282 = vst [vmem:[#allocation11_spill] sm:$0xff] %v21857_v53 }
 0x3f8   :  { %v7664_v11 = vadd.f32 %v21840_v41, %v7663_v3 }
 0x3fa   :  { %v21860_v23 = vpop.f32.mrb[56].mxu0  ;;  %v7665_v52 = vadd.f32 %v21850_v42, %v7664_v11 }
 0x3fb   :  { %25283 = vst [vmem:[#allocation13_spill] sm:$0xff] %v21860_v23  ;;  %v21863_v55 = vpop.f32.mrb[56].mxu1  ;;  %v21865_v33 = vpop.f32.mrb[57].mxu0 }
 0x3fc   :  { %25284 = vst [vmem:[#allocation12_spill] sm:$0xff] %v21865_v33  ;;  %v7666_v8 = vadd.f32 %v7665_v52, %v21865_v33  ;;  %v21868_v12 = vpop.f32.mrb[57].mxu1  ;;  %v21870_v43 = vpop.f32.mrb[58].mxu0 }
 0x3fd   :  { %25285 = vst [vmem:[#allocation14_spill] sm:$0xff] %v21868_v12  ;;  %25286 = vst [vmem:[#allocation15_spill] sm:$0xff] %v21870_v43  ;;  %v21872_v16 = vpop.f32.mrb[58].mxu1  ;;  %v21874_v24 = vpop.f32.mrb[59].mxu0 }
 0x3fe   :  { %25287 = vst [vmem:[#allocation16_spill] sm:$0xff] %v21874_v24  ;;  %v7667_v5 = vadd.f32 %v7666_v8, %v21874_v24  ;;  %v21877_v35 = vpop.f32.mrb[59].mxu1 }
 0x400   :  { %v7668_v38 = vadd.f32 %v21860_v23, %v7667_v5 }
 0x402   :  { %v21880_v48 = vpop.f32.mrb[60].mxu0  ;;  %v7669_v1 = vadd.f32 %v21870_v43, %v7668_v38 }
 0x403   :  { %v21883_v3 = vpop.f32.mrb[60].mxu1  ;;  %v21885_v11 = vpop.f32.mrb[61].mxu0 }
 0x404   :  { %25288 = vst [vmem:[#allocation17_spill] sm:$0xff] %v21885_v11  ;;  %v7670_v52 = vadd.f32 %v7669_v1, %v21885_v11  ;;  %v21888_v33 = vpop.f32.mrb[61].mxu1  ;;  %v21890_v42 = vpop.f32.mrb[62].mxu0 }
 0x405   :  { %v21892_v41 = vpop.f32.mrb[62].mxu1  ;;  %v21894_v8 = vpop.f32.mrb[63].mxu0 }
 0x406   :  { %25289 = vst [vmem:[#allocation18_spill] sm:$0xff] %v21894_v8  ;;  %v7671_v5 = vadd.f32 %v7670_v52, %v21894_v8  ;;  %v21897_v23 = vpop.f32.mrb[63].mxu1 }
 0x408   :  { %v7672_v38 = vadd.f32 %v21880_v48, %v7671_v5 }
 0x40a   :  { %v7673_v43 = vadd.f32 %v21890_v42, %v7672_v38 }
 0x40c   :  { %v7674_v24 = vadd.f32 %v7673_v43, %v21747_v14 }
 0x40e   :  { %v7675_v1 = vadd.f32 %v7674_v24, %v21757_v54 }
 0x410   :  { %v7676_v11 = vadd.f32 %v21743_v44, %v7675_v1 }
 0x412   :  { %v7677_v29 = vadd.f32 %v21751_v26, %v7676_v11 }
 0x414   :  { %v7678_v0 = vadd.f32 %v7677_v29, %v21768_v13 }
 0x416   :  { %v7679_v21 = vadd.f32 %v7678_v0, %v21777_v47 }
 0x418   :  { %v7680_v52 = vadd.f32 %v21763_v32, %v7679_v21 }
 0x41a   :  { %v7681_v8 = vadd.f32 %v21772_v57, %v7680_v52 }
 0x41c   :  { %v7682_v5 = vadd.f32 %v7681_v8, %v21788_v27 }
 0x41e   :  { %v7683_v38 = vadd.f32 %v7682_v5, %v21797_v4 }
 0x420   :  { %v7684_v43 = vadd.f32 %v21783_v62, %v7683_v38 }
 0x422   :  { %v7685_v24 = vadd.f32 %v21792_v40, %v7684_v43 }
 0x424   :  { %v7686_v1 = vadd.f32 %v7685_v24, %v21808_v36 }
 0x426   :  { %v7687_v11 = vadd.f32 %v7686_v1, %v21817_v17 }
 0x428   :  { %v7688_v29 = vadd.f32 %v21803_v28, %v7687_v11 }
 0x42a   :  { %v7689_v0 = vadd.f32 %v21812_v25, %v7688_v29 }
 0x42c   :  { %v7690_v21 = vadd.f32 %v7689_v0, %v21828_v22 }
 0x42e   :  { %v7691_v52 = vadd.f32 %v7690_v21, %v21837_v18 }
 0x430   :  { %v7692_v8 = vadd.f32 %v21823_v51, %v7691_v52 }
 0x432   :  { %v7693_v5 = vadd.f32 %v21832_v30, %v7692_v8 }
 0x434   :  { %v7694_v38 = vadd.f32 %v7693_v5, %v21848_v20 }
 0x436   :  { %v7695_v43 = vadd.f32 %v7694_v38, %v21857_v53 }
 0x438   :  { %v7696_v24 = vadd.f32 %v21843_v49, %v7695_v43 }
 0x43a   :  { %v7697_v1 = vadd.f32 %v21852_v58, %v7696_v24 }
 0x43c   :  { %v7698_v11 = vadd.f32 %v7697_v1, %v21868_v12 }
 0x43e   :  { %v7699_v29 = vadd.f32 %v7698_v11, %v21877_v35 }
 0x440   :  { %v7700_v0 = vadd.f32 %v21863_v55, %v7699_v29 }
 0x442   :  { %v7701_v21 = vadd.f32 %v21872_v16, %v7700_v0 }
 0x444   :  { %v7702_v52 = vadd.f32 %v7701_v21, %v21888_v33  ;;  %v25296_v21 = vld [vmem:[#allocation7_spill] sm:$0xff] }
 0x446   :  { %v7703_v8 = vadd.f32 %v7702_v52, %v21897_v23  ;;  %v25297_v52 = vld [vmem:[#allocation10_spill] sm:$0xff] }
 0x448   :  { %v7704_v5 = vadd.f32 %v21883_v3, %v7703_v8  ;;  %v25298_v8 = vld [vmem:[#allocation4_spill] sm:$0xff] }
 0x44a   :  { %v7705_v38 = vadd.f32 %v21892_v41, %v7704_v5  ;;  %v25300_v5 = vld [vmem:[#allocation8_spill] sm:$0xff] }
 0x44c   :  { %v7706_v53 = vrot.slane %v7705_v38, 4 }
 0x44e   :  { %v7707_v43 = vadd.f32 %v7706_v53, %v7705_v38  ;;  %v25302_v38 = vld [vmem:[#allocation12_spill] sm:$0xff] }
 0x450   :  { %v7708_v49 = vrot.slane %v7707_v43, 2 }
 0x452   :  { %v7709_v24 = vadd.f32 %v7708_v49, %v7707_v43 }
 0x454   :  { %v7710_v58 = vrot.slane %v7709_v24, 1 }
 0x456   :  { %v7711_v1 = vadd.f32 %v7710_v58, %v7709_v24  ;;  %v25295_v58 = vld [vmem:[#allocation5_spill] sm:$0xff]  ;;  %v25303_v24 = vld [vmem:[#allocation16_spill] sm:$0xff] }
 0x458   :  { %v21933_v12 = vmul.f32 0.001953125, %v7711_v1 }
 0x45a   :  { %v21937_v11 = vsub.f32 %v21745_v7, %v21933_v12  ;;  %v21941_v29 = vsub.f32 %v21753_v9, %v21933_v12  ;;  %v21945_v0 = vsub.f32 %v21741_v6, %v21933_v12  ;;  %v21949_v53 = vsub.f32 %v21749_v46, %v21933_v12 }
 0x45b   :  { %v21953_v49 = vsub.f32 %v21765_v2, %v21933_v12  ;;  %v21957_v7 = vsub.f32 %v21774_v31, %v21933_v12  ;;  %v21961_v9 = vsub.f32 %v21760_v15, %v21933_v12  ;;  %v21965_v6 = vsub.f32 %v21770_v61, %v21933_v12 }
 0x45c   :  { %25290 = vst [vmem:[#allocation19_spill] sm:$0xff] %v21937_v11  ;;  %25291 = vst [vmem:[#allocation20_spill] sm:$0xff] %v21941_v29  ;;  %v21969_v46 = vsub.f32 %v21785_v50, %v21933_v12  ;;  %v21973_v2 = vsub.f32 %v21794_v63, %v21933_v12  ;;  %v21977_v31 = vsub.f32 %v21780_v56, %v21933_v12 }
 0x45d   :  { %25292 = vst [vmem:[#allocation21_spill] sm:$0xff] %v21945_v0  ;;  %v21981_v15 = vsub.f32 %v21790_v45, %v21933_v12  ;;  %v21985_v61 = vsub.f32 %v21805_v59, %v21933_v12  ;;  %v21989_v50 = vsub.f32 %v21814_v60, %v21933_v12  ;;  %v21993_v63 = vsub.f32 %v21800_v10, %v21933_v12 }
 0x45e   :  { %v21997_v56 = vsub.f32 %v21810_v39, %v21933_v12  ;;  %v22001_v45 = vsub.f32 %v21825_v37, %v21933_v12  ;;  %v22005_v59 = vsub.f32 %v21834_v34, %v21933_v12  ;;  %v22009_v60 = vsub.f32 %v21820_v19, %v21933_v12 }
 0x45f   :  { %v22013_v10 = vsub.f32 %v25295_v58, %v21933_v12  ;;  %v22017_v39 = vsub.f32 %v25296_v21, %v21933_v12  ;;  %v22021_v37 = vsub.f32 %v25297_v52, %v21933_v12  ;;  %v22025_v34 = vsub.f32 %v25298_v8, %v21933_v12  ;;  %v25304_v58 = vld [vmem:[#allocation13_spill] sm:$0xff]  ;;  %v25305_v52 = vld [vmem:[#allocation15_spill] sm:$0xff] }
 0x460   :  { %25293 = vst [vmem:[#allocation22_spill] sm:$0xff] %v22005_v59  ;;  %25294 = vst [vmem:[#allocation23_spill] sm:$0xff] %v22009_v60  ;;  %v22029_v19 = vsub.f32 %v25300_v5, %v21933_v12  ;;  %v22033_v43 = vsub.f32 %v25302_v38, %v21933_v12  ;;  %v22037_v1 = vsub.f32 %v25303_v24, %v21933_v12 }
 0x461   :  { %25299 = vst [vmem:[#allocation5_spill] sm:$0xff] %v22025_v34  ;;  %v22041_v21 = vsub.f32 %v25304_v58, %v21933_v12  ;;  %v22045_v8 = vsub.f32 %v25305_v52, %v21933_v12  ;;  %v25306_v34 = vld [vmem:[#allocation17_spill] sm:$0xff]  ;;  %v22057_v24 = vsub.f32 %v21880_v48, %v21933_v12  ;;  %v22061_v58 = vsub.f32 %v21890_v42, %v21933_v12 }
 0x462   :  { %25301 = vst [vmem:[#allocation7_spill] sm:$0xff] %v22029_v19  ;;  %v22049_v5 = vsub.f32 %v25306_v34, %v21933_v12  ;;  %v25307_v19 = vld [vmem:[#allocation18_spill] sm:$0xff]  ;;  %v22065_v52 = vsub.f32 %v21747_v14, %v21933_v12  ;;  %v22069_v34 = vsub.f32 %v21757_v54, %v21933_v12  ;;  %v22077_v48 = vsub.f32 %v21751_v26, %v21933_v12 }
 0x463   :  { %v22053_v38 = vsub.f32 %v25307_v19, %v21933_v12  ;;  %v22073_v19 = vsub.f32 %v21743_v44, %v21933_v12  ;;  %v22081_v42 = vsub.f32 %v21768_v13, %v21933_v12  ;;  %v22085_v14 = vsub.f32 %v21777_v47, %v21933_v12 }
 0x464   :  { %v22089_v54 = vsub.f32 %v21763_v32, %v21933_v12  ;;  %v22093_v44 = vsub.f32 %v21772_v57, %v21933_v12  ;;  %v22097_v26 = vsub.f32 %v21788_v27, %v21933_v12  ;;  %v22101_v13 = vsub.f32 %v21797_v4, %v21933_v12 }
 0x465   :  { %v22105_v47 = vsub.f32 %v21783_v62, %v21933_v12  ;;  %v22109_v32 = vsub.f32 %v21792_v40, %v21933_v12  ;;  %v22113_v57 = vsub.f32 %v21808_v36, %v21933_v12  ;;  %v22117_v27 = vsub.f32 %v21817_v17, %v21933_v12 }
 0x466   :  { %v22121_v4 = vsub.f32 %v21803_v28, %v21933_v12  ;;  %v22125_v62 = vsub.f32 %v21812_v25, %v21933_v12  ;;  %v22129_v40 = vsub.f32 %v21828_v22, %v21933_v12  ;;  %v22133_v36 = vsub.f32 %v21837_v18, %v21933_v12 }
 0x467   :  { %25308 = vst [vmem:[#allocation10_spill] sm:$0xff] %v22109_v32  ;;  %25309 = vst [vmem:[#allocation4_spill] sm:$0xff] %v22113_v57  ;;  %v22137_v17 = vsub.f32 %v21823_v51, %v21933_v12  ;;  %v22141_v28 = vsub.f32 %v21832_v30, %v21933_v12  ;;  %v22145_v25 = vsub.f32 %v21848_v20, %v21933_v12 }
 0x468   :  { %25310 = vst [vmem:[#allocation8_spill] sm:$0xff] %v22121_v4  ;;  %25311 = vst [vmem:[#allocation12_spill] sm:$0xff] %v22125_v62  ;;  %v25315_v62 = vld [vmem:[#allocation11_spill] sm:$0xff]  ;;  %v22165_v20 = vsub.f32 %v21877_v35, %v21933_v12  ;;  %v22185_v35 = vsub.f32 %v21883_v3, %v21933_v12  ;;  %v7781_v3 = vmul.f32 %v21953_v49, %v21953_v49 }
 0x469   :  { %25312 = vst [vmem:[#allocation16_spill] sm:$0xff] %v22129_v40  ;;  %25313 = vst [vmem:[#allocation13_spill] sm:$0xff] %v22133_v36  ;;  %v22149_v22 = vsub.f32 %v25315_v62, %v21933_v12  ;;  %v25317_v40 = vld [vmem:[#allocation6_spill] sm:$0xff]  ;;  %v25319_v36 = vld [vmem:[#allocation9_spill] sm:$0xff]  ;;  %v22169_v62 = vsub.f32 %v21863_v55, %v21933_v12  ;;  %v22189_v55 = vsub.f32 %v21892_v41, %v21933_v12 }
 0x46a   :  { %25314 = vst [vmem:[#allocation15_spill] sm:$0xff] %v22137_v17  ;;  %v22153_v18 = vsub.f32 %v25317_v40, %v21933_v12  ;;  %v22157_v51 = vsub.f32 %v25319_v36, %v21933_v12  ;;  %v25321_v17 = vld [vmem:[#allocation14_spill] sm:$0xff]  ;;  %25323 = vst [vmem:[#allocation9_spill] sm:$0xff] %v22165_v20  ;;  %v22173_v40 = vsub.f32 %v21872_v16, %v21933_v12 }
 0x46b   :  { %25316 = vst [vmem:[#allocation17_spill] sm:$0xff] %v22149_v22  ;;  %v22161_v30 = vsub.f32 %v25321_v17, %v21933_v12  ;;  %25324 = vst [vmem:[#allocation14_spill] sm:$0xff] %v22169_v62  ;;  %v22177_v36 = vsub.f32 %v21888_v33, %v21933_v12  ;;  %v22181_v17 = vsub.f32 %v21897_v23, %v21933_v12 }
 0x46c   :  { %25318 = vst [vmem:[#allocation18_spill] sm:$0xff] %v22153_v18  ;;  %25320 = vst [vmem:[#allocation11_spill] sm:$0xff] %v22157_v51  ;;  %v7777_v16 = vmul.f32 %v21937_v11, %v21937_v11  ;;  %v7779_v33 = vmul.f32 %v21945_v0, %v21945_v0  ;;  %v7780_v23 = vmul.f32 %v21949_v53, %v21949_v53 }
 0x46d   :  { %25322 = vst [vmem:[#allocation6_spill] sm:$0xff] %v22161_v30  ;;  %25325 = vst [vmem:[#allocation24_spill] sm:$0xff] %v22173_v40  ;;  %v7778_v40 = vmul.f32 %v21941_v29, %v21941_v29  ;;  %v7782_v41 = vmul.f32 %v21957_v7, %v21957_v7  ;;  %v7783_v11 = vmul.f32 %v21961_v9, %v21961_v9 }
 0x46e   :  { %25326 = vst [vmem:[#allocation25_spill] sm:$0xff] %v22177_v36  ;;  %25327 = vst [vmem:[#allocation26_spill] sm:$0xff] %v22181_v17  ;;  %v7784_v0 = vmul.f32 %v21965_v6, %v21965_v6 }
 0x46f   :  { %25328 = vst [vmem:[#allocation27_spill] sm:$0xff] %v22185_v35  ;;  %v7841_v36 = vadd.f32 %v7778_v40, %v7777_v16  ;;  %v7785_v16 = vmul.f32 %v21969_v46, %v21969_v46 }
 0x471   :  { %v7842_v17 = vadd.f32 %v7841_v36, %v7779_v33  ;;  %v7786_v33 = vmul.f32 %v21973_v2, %v21973_v2 }
 0x473   :  { %v7843_v35 = vadd.f32 %v7842_v17, %v7780_v23  ;;  %v7787_v23 = vmul.f32 %v21977_v31, %v21977_v31 }
 0x475   :  { %v7844_v12 = vadd.f32 %v7843_v35, %v7781_v3  ;;  %v7788_v3 = vmul.f32 %v21981_v15, %v21981_v15 }
 0x477   :  { %v7845_v29 = vadd.f32 %v7844_v12, %v7782_v41  ;;  %v7789_v12 = vmul.f32 %v21985_v61, %v21985_v61 }
 0x479   :  { %v7846_v40 = vadd.f32 %v7845_v29, %v7783_v11  ;;  %v7790_v29 = vmul.f32 %v21989_v50, %v21989_v50 }
 0x47b   :  { %v7847_v36 = vadd.f32 %v7846_v40, %v7784_v0  ;;  %v7791_v40 = vmul.f32 %v21993_v63, %v21993_v63 }
 0x47d   :  { %v7848_v17 = vadd.f32 %v7847_v36, %v7785_v16  ;;  %v7792_v36 = vmul.f32 %v21997_v56, %v21997_v56 }
 0x47f   :  { %v7849_v35 = vadd.f32 %v7848_v17, %v7786_v33  ;;  %v7793_v17 = vmul.f32 %v22001_v45, %v22001_v45 }
 0x481   :  { %v7850_v41 = vadd.f32 %v7849_v35, %v7787_v23  ;;  %v7794_v35 = vmul.f32 %v22005_v59, %v22005_v59 }
 0x483   :  { %v7851_v11 = vadd.f32 %v7850_v41, %v7788_v3  ;;  %v7795_v41 = vmul.f32 %v22009_v60, %v22009_v60 }
 0x485   :  { %v7852_v0 = vadd.f32 %v7851_v11, %v7789_v12  ;;  %v7796_v11 = vmul.f32 %v22013_v10, %v22013_v10 }
 0x487   :  { %v7853_v16 = vadd.f32 %v7852_v0, %v7790_v29  ;;  %v7797_v0 = vmul.f32 %v22017_v39, %v22017_v39 }
 0x489   :  { %v7854_v33 = vadd.f32 %v7853_v16, %v7791_v40  ;;  %v7798_v16 = vmul.f32 %v22021_v37, %v22021_v37 }
 0x48b   :  { %v7855_v23 = vadd.f32 %v7854_v33, %v7792_v36  ;;  %v25329_v33 = vld [vmem:[#allocation5_spill] sm:$0xff] }
 0x48c   :  { %v7799_v59 = vmul.f32 %v25329_v33, %v25329_v33 }
 0x48d   :  { %v7856_v3 = vadd.f32 %v7855_v23, %v7793_v17  ;;  %v25330_v23 = vld [vmem:[#allocation7_spill] sm:$0xff] }
 0x48e   :  { %v7800_v60 = vmul.f32 %v25330_v23, %v25330_v23 }
 0x48f   :  { %v7857_v12 = vadd.f32 %v7856_v3, %v7794_v35  ;;  %v7801_v3 = vmul.f32 %v22033_v43, %v22033_v43 }
 0x491   :  { %v7858_v29 = vadd.f32 %v7857_v12, %v7795_v41  ;;  %v7802_v12 = vmul.f32 %v22037_v1, %v22037_v1 }
 0x493   :  { %v7859_v40 = vadd.f32 %v7858_v29, %v7796_v11  ;;  %v7803_v29 = vmul.f32 %v22041_v21, %v22041_v21 }
 0x495   :  { %v7860_v36 = vadd.f32 %v7859_v40, %v7797_v0  ;;  %v7804_v40 = vmul.f32 %v22045_v8, %v22045_v8 }
 0x497   :  { %v7861_v17 = vadd.f32 %v7860_v36, %v7798_v16  ;;  %v7805_v36 = vmul.f32 %v22049_v5, %v22049_v5 }
 0x499   :  { %v7862_v35 = vadd.f32 %v7861_v17, %v7799_v59  ;;  %v7806_v17 = vmul.f32 %v22053_v38, %v22053_v38 }
 0x49b   :  { %v7863_v41 = vadd.f32 %v7862_v35, %v7800_v60  ;;  %v7807_v35 = vmul.f32 %v22057_v24, %v22057_v24 }
 0x49d   :  { %v7864_v11 = vadd.f32 %v7863_v41, %v7801_v3  ;;  %v7808_v41 = vmul.f32 %v22061_v58, %v22061_v58 }
 0x49f   :  { %v7865_v0 = vadd.f32 %v7864_v11, %v7802_v12  ;;  %v7809_v11 = vmul.f32 %v22065_v52, %v22065_v52 }
 0x4a1   :  { %v7866_v16 = vadd.f32 %v7865_v0, %v7803_v29  ;;  %v7810_v0 = vmul.f32 %v22069_v34, %v22069_v34 }
 0x4a3   :  { %v7867_v59 = vadd.f32 %v7866_v16, %v7804_v40  ;;  %v7811_v16 = vmul.f32 %v22073_v19, %v22073_v19 }
 0x4a5   :  { %v7868_v60 = vadd.f32 %v7867_v59, %v7805_v36  ;;  %v7812_v59 = vmul.f32 %v22077_v48, %v22077_v48 }
 0x4a7   :  { %v7869_v3 = vadd.f32 %v7868_v60, %v7806_v17  ;;  %v7813_v60 = vmul.f32 %v22081_v42, %v22081_v42 }
 0x4a9   :  { %v7870_v12 = vadd.f32 %v7869_v3, %v7807_v35  ;;  %v7814_v3 = vmul.f32 %v22085_v14, %v22085_v14 }
 0x4ab   :  { %v7871_v29 = vadd.f32 %v7870_v12, %v7808_v41  ;;  %v7815_v12 = vmul.f32 %v22089_v54, %v22089_v54 }
 0x4ad   :  { %v7872_v40 = vadd.f32 %v7871_v29, %v7809_v11  ;;  %v7816_v29 = vmul.f32 %v22093_v44, %v22093_v44 }
 0x4af   :  { %v7873_v36 = vadd.f32 %v7872_v40, %v7810_v0  ;;  %v7817_v40 = vmul.f32 %v22097_v26, %v22097_v26 }
 0x4b1   :  { %v7874_v17 = vadd.f32 %v7873_v36, %v7811_v16  ;;  %v20212_v36 = vld [vmem:[%s25077_s4] sm:$0xff]  }
 0x4b2   :  { %18147 = vmatprep.subr.bf16.mxu0 %v20212_v36 }
 0x4b3   :  { %v7875_v35 = vadd.f32 %v7874_v17, %v7812_v59  ;;  %v7818_v59 = vmul.f32 %v22101_v13, %v22101_v13  ;;  %18148 = vmatpush3.bf16.msra.mxu0 %v20212_v36  ;;  %v20215_v36 = vld [vmem:[%s25077_s4 + $0x18] sm:$0xff]  }
 0x4b5   :  { %v7876_v41 = vadd.f32 %v7875_v35, %v7813_v60  ;;  %v20213_v60 = vld [vmem:[%s25077_s4 + $0x8] sm:$0xff]   ;;  %v20364_v35 = vld [vmem:[#allocation2] sm:$0xff] }
 0x4b6   :  { %18149 = vmatprep.subr.bf16.mxu0 %v20213_v60 }
 0x4b7   :  { %v7877_v11 = vadd.f32 %v7876_v41, %v7814_v3  ;;  %v8210_v3 = vpack.c.bf16 %v20364_v35, %v20364_v35  ;;  %v20217_v41 = vld [vmem:[%s25077_s4] sm:$0xff]   ;;  %18150 = vmatpush3.bf16.msra.mxu0 %v20213_v60  ;;  %v7822_v60 = vmul.f32 %v22117_v27, %v22117_v27 }
 0x4b8   :  { %18579 = vmatprep.subr.bf16.mxu1 %v20217_v41 }
 0x4b9   :  { %v7878_v0 = vadd.f32 %v7877_v11, %v7815_v12  ;;  %v20218_v12 = vld [vmem:[%s25077_s4 + $0x8] sm:$0xff]   ;;  %v7819_v11 = vmul.f32 %v22105_v47, %v22105_v47  ;;  %18163 = vmatprep.mubr.bf16.mxu0 %v8210_v3  ;;  %18595 = vmatprep.mubr.bf16.mxu1 %v8210_v3  ;;  %v20221_v3 = vld [vmem:[%s25077_s4 + $0x18] sm:$0xff]  }
 0x4ba   :  { %18580 = vmatpush3.bf16.msra.mxu1 %v20217_v41 }
 0x4bb   :  { %v7879_v16 = vadd.f32 %v7878_v0, %v7816_v29  ;;  %v20214_v0 = vld [vmem:[%s25077_s4 + $0x10] sm:$0xff]   ;;  %18581 = vmatprep.subr.bf16.mxu1 %v20218_v12 }
 0x4bc   :  { %18151 = vmatprep.subr.bf16.mxu0 %v20214_v0 }
 0x4bd   :  { %v7880_v17 = vadd.f32 %v7879_v16, %v7817_v40  ;;  %v7820_v40 = vmul.f32 %v22109_v32, %v22109_v32  ;;  %18152 = vmatpush3.bf16.msra.mxu0 %v20214_v0  ;;  %v25332_v0 = vld [vmem:[#allocation16_spill] sm:$0xff] }
 0x4be   :  { %18582 = vmatpush3.bf16.msra.mxu1 %v20218_v12  ;;  %18153 = vmatprep.subr.bf16.mxu0 %v20215_v36  ;;  %v20223_v12 = vld [vmem:[%s25077_s4 + $0x20] sm:$0xff]  }
 0x4bf   :  { %v7881_v29 = vadd.f32 %v7880_v17, %v7818_v59  ;;  %v20220_v59 = vld [vmem:[%s25077_s4 + $0x10] sm:$0xff]   ;;  %v7821_v17 = vmul.f32 %v22113_v57, %v22113_v57 }
 0x4c0   :  { %18583 = vmatprep.subr.bf16.mxu1 %v20220_v59 }
 0x4c1   :  { %v7882_v16 = vadd.f32 %v7881_v29, %v7819_v11  ;;  %v20216_v11 = vld [vmem:[%s25077_s4 + $0x20] sm:$0xff]   ;;  %v7823_v29 = vmul.f32 %v22121_v4, %v22121_v4  ;;  %18154 = vmatpush3.bf16.msra.mxu0 %v20215_v36  ;;  %v25334_v36 = vld [vmem:[#allocation15_spill] sm:$0xff] }
 0x4c2   :  { %18584 = vmatpush3.bf16.msra.mxu1 %v20220_v59  ;;  %18155 = vmatprep.subr.bf16.mxu0 %v20216_v11  ;;  %v20222_v59 = vld [vmem:[%s25077_s4 + $0x30] sm:$0xff]  }
 0x4c3   :  { %v7883_v35 = vadd.f32 %v7882_v16, %v7820_v40  ;;  %v25331_v16 = vld [vmem:[#allocation12_spill] sm:$0xff]  ;;  %18585 = vmatprep.subr.bf16.mxu1 %v20221_v3 }
 0x4c4   :  { %v7824_v57 = vmul.f32 %v25331_v16, %v25331_v16 }
 0x4c5   :  { %v7884_v41 = vadd.f32 %v7883_v35, %v7821_v17  ;;  %v20219_v17 = vld [vmem:[%s25077_s4 + $0x28] sm:$0xff]   ;;  %v7825_v35 = vmul.f32 %v25332_v0, %v25332_v0  ;;  %18156 = vmatpush3.bf16.msra.mxu0 %v20216_v11  ;;  %v7827_v0 = vmul.f32 %v25334_v36, %v25334_v36  ;;  %v7829_v11 = vmul.f32 %v22145_v25, %v22145_v25 }
 0x4c6   :  { %18586 = vmatpush3.bf16.msra.mxu1 %v20221_v3  ;;  %18157 = vmatprep.subr.bf16.mxu0 %v20219_v17  ;;  %v20225_v3 = vld [vmem:[%s25077_s4 + $0x38] sm:$0xff]  }
 0x4c7   :  { %v7885_v40 = vadd.f32 %v7884_v41, %v7822_v60  ;;  %v20224_v41 = vld [vmem:[%s25077_s4 + $0x28] sm:$0xff]   ;;  %18587 = vmatprep.subr.bf16.mxu1 %v20223_v12 }
 0x4c9   :  { %v7886_v32 = vadd.f32 %v7885_v40, %v7823_v29  ;;  %v25333_v29 = vld [vmem:[#allocation13_spill] sm:$0xff]  ;;  %18158 = vmatpush3.bf16.msra.mxu0 %v20219_v17 }
 0x4ca   :  { %v7826_v40 = vmul.f32 %v25333_v29, %v25333_v29  ;;  %18588 = vmatpush3.bf16.msra.mxu1 %v20223_v12  ;;  %18159 = vmatprep.subr.bf16.mxu0 %v20222_v59  ;;  %v7830_v12 = vmul.f32 %v22149_v22, %v22149_v22 }
 0x4cb   :  { %v7887_v60 = vadd.f32 %v7886_v32, %v7824_v57  ;;  %v7828_v57 = vmul.f32 %v22141_v28, %v22141_v28  ;;  %18589 = vmatprep.subr.bf16.mxu1 %v20224_v41 }
 0x4cd   :  { %v7888_v16 = vadd.f32 %v7887_v60, %v7825_v35  ;;  %v20226_v35 = vld [vmem:[%s25077_s4 + $0x30] sm:$0xff]   ;;  %18160 = vmatpush3.bf16.msra.mxu0 %v20222_v59  ;;  %v7834_v59 = vmul.f32 %v22165_v20, %v22165_v20  ;;  %v7840_v20 = vmul.f32 %v22189_v55, %v22189_v55 }
 0x4ce   :  { %18590 = vmatpush3.bf16.msra.mxu1 %v20224_v41  ;;  %18161 = vmatprep.subr.bf16.mxu0 %v20225_v3  ;;  %v7833_v41 = vmul.f32 %v22161_v30, %v22161_v30 }
 0x4cf   :  { %v7889_v32 = vadd.f32 %v7888_v16, %v7826_v40  ;;  %v22350_v40 = vld [vmem:[%s25077_s4 + $0x40] sm:$0xff]   ;;  %18591 = vmatprep.subr.bf16.mxu1 %v20226_v35 }
 0x4d0   :  { %25335 = vst [vmem:[#allocation5_spill] sm:$0xff] %v22350_v40 }
 0x4d1   :  { %v7890_v4 = vadd.f32 %v7889_v32, %v7827_v0  ;;  %v20227_v0 = vld [vmem:[%s25077_s4 + $0x38] sm:$0xff]   ;;  %v7832_v32 = vmul.f32 %v22157_v51, %v22157_v51  ;;  %18162 = vmatpush3.bf16.msra.mxu0 %v20225_v3  ;;  %v22366_v3 = vld [vmem:[%s25077_s4 + $0x40] sm:$0xff]  }
 0x4d2   :  { %18592 = vmatpush3.bf16.msra.mxu1 %v20226_v35  ;;  %18195 = vmatprep.subr.bf16.mxu0 %v22350_v40  ;;  %25336 = vst [vmem:[#allocation7_spill] sm:$0xff] %v22366_v3  ;;  %v25337_v35 = vld [vmem:[#allocation24_spill] sm:$0xff] }
 0x4d3   :  { %v7891_v16 = vadd.f32 %v7890_v4, %v7828_v57  ;;  %v7831_v4 = vmul.f32 %v22153_v18, %v22153_v18  ;;  %18593 = vmatprep.subr.bf16.mxu1 %v20227_v0 }
 0x4d5   :  { %v7892_v60 = vadd.f32 %v7891_v16, %v7829_v11 }
 0x4d6   :  { %18594 = vmatpush3.bf16.msra.mxu1 %v20227_v0  ;;  %v25339_v0 = vld [vmem:[#allocation26_spill] sm:$0xff] }
 0x4d7   :  { %v7893_v17 = vadd.f32 %v7892_v60, %v7830_v12  ;;  %v7835_v12 = vmul.f32 %v22169_v62, %v22169_v62  ;;  %18627 = vmatprep.subr.bf16.mxu1 %v22366_v3 }
 0x4d9   :  { %v7894_v57 = vadd.f32 %v7893_v17, %v7831_v4  ;;  %v7836_v4 = vmul.f32 %v25337_v35, %v25337_v35 }
 0x4db   :  { %v7895_v11 = vadd.f32 %v7894_v57, %v7832_v32  ;;  %v25338_v32 = vld [vmem:[#allocation25_spill] sm:$0xff] }
 0x4dc   :  { %v7837_v57 = vmul.f32 %v25338_v32, %v25338_v32  ;;  %v7914_v32 = vlaneseq }
 0x4dd   :  { %v7896_v16 = vadd.f32 %v7895_v11, %v7833_v41  ;;  %v7838_v11 = vmul.f32 %v25339_v0, %v25339_v0 }
 0x4de   :  { %v22379_v22 = vshrl.u32 %v7914_v32, 7  ;;  %v25343_v32 = vld [vmem:[#allocation20_spill] sm:$0xff] }
 0x4df   :  { %v7897_v60 = vadd.f32 %v7896_v16, %v7834_v59  ;;  %v25340_v59 = vld [vmem:[#allocation27_spill] sm:$0xff] }
 0x4e0   :  { %v7839_v16 = vmul.f32 %v25340_v59, %v25340_v59  ;;  %25341 = vst [vmem:[#allocation13_spill] sm:$0xff] %v22379_v22 }
 0x4e1   :  { %v7898_v17 = vadd.f32 %v7897_v60, %v7835_v12 }
 0x4e3   :  { %v7899_v41 = vadd.f32 %v7898_v17, %v7836_v4 }
 0x4e5   :  { %v7900_v40 = vadd.f32 %v7899_v41, %v7837_v57  ;;  %v25136_v41 = vsub.s32 0, %v22379_v22  ;;  %v25358_v22 = vld [vmem:[#allocation18_spill] sm:$0xff] }
 0x4e7   :  { %v7901_v62 = vadd.f32 %v7900_v40, %v7838_v11  ;;  %v7577_v40 = vld [vmem:[%s25078_s5] sm:$0x1] }
 0x4e9   :  { %v7902_v30 = vadd.f32 %v7901_v62, %v7839_v16  ;;  %v25344_v16 = vld [vmem:[#allocation21_spill] sm:$0xff] }
 0x4eb   :  { %v7903_v35 = vadd.f32 %v7902_v30, %v7840_v20 }
 0x4ed   :  { %v7904_v12 = vrot.slane %v7903_v35, 4 }
 0x4ef   :  { %v7905_v60 = vadd.f32 %v7904_v12, %v7903_v35 }
 0x4f1   :  { %v7906_v3 = vrot.slane %v7905_v60, 2 }
 0x4f3   :  { %v7907_v51 = vadd.f32 %v7906_v3, %v7905_v60  ;;  %v25342_v3 = vld [vmem:[#allocation19_spill] sm:$0xff] }
 0x4f5   :  { %v7908_v18 = vrot.slane %v7907_v51, 1 }
 0x4f7   :  { %v7909_v4 = vadd.f32 %v7908_v18, %v7907_v51  ;;  %v22392_v18 = vld [vmem:[%s25078_s5 + $0x1] ss:$0 sm:$0xff] }
 0x4f9   :  { %v7910_v17 = vmul.f32 0.001953125, %v7909_v4 }
 0x4fb   :  { %v7911_v57 = vadd.f32 1e-05, %v7910_v17 }
 0x4fd   :  { %20356 = vrsqrt.f32 %v7911_v57 }
 0x507   :  { %v20357_v62 = vpop.eup %20356 }
 0x508   :  { %v7913_v30 = vmul.f32 %v20357_v62, %v7577_v40 }
 0x50a   :  { %v22387_v20 = vrot.slane %v7913_v30, %v25136_v41  ;;  %v25345_v30 = vld [vmem:[#allocation22_spill] sm:$0xff]  ;;  %v25356_v41 = vld [vmem:[#allocation17_spill] sm:$0xff] }
 0x50c   :  { %v7979_v51 = vmul.f32 %v22387_v20, %v25339_v0  ;;  %v22398_v35 = vmul.f32 %v22387_v20, %v25342_v3  ;;  %v22402_v11 = vmul.f32 %v22387_v20, %v25343_v32  ;;  %v22406_v12 = vmul.f32 %v22387_v20, %v25344_v16  ;;  %v25347_v16 = vld [vmem:[#allocation10_spill] sm:$0xff] }
 0x50d   :  { %v22410_v60 = vmul.f32 %v22387_v20, %v21949_v53  ;;  %v22414_v4 = vmul.f32 %v22387_v20, %v21953_v49  ;;  %v22418_v0 = vmul.f32 %v22387_v20, %v21957_v7  ;;  %v22422_v17 = vmul.f32 %v22387_v20, %v21961_v9 }
 0x50e   :  { %v8047_v57 = vadd.f32 %v22392_v18, %v7979_v51  ;;  %v22427_v40 = vmul.f32 %v22387_v20, %v21965_v6  ;;  %v22431_v53 = vmul.f32 %v22387_v20, %v21969_v46  ;;  %v22435_v49 = vmul.f32 %v22387_v20, %v21973_v2  ;;  %v25346_v51 = vld [vmem:[#allocation23_spill] sm:$0xff] }
 0x50f   :  { %v22439_v7 = vmul.f32 %v22387_v20, %v21977_v31  ;;  %v22443_v9 = vmul.f32 %v22387_v20, %v21981_v15  ;;  %v22447_v6 = vmul.f32 %v22387_v20, %v21985_v61  ;;  %v22451_v46 = vmul.f32 %v22387_v20, %v21989_v50 }
 0x510   :  { %v8111_v62 = vmax.f32 %v8047_v57, 0.0  ;;  %v22455_v2 = vmul.f32 %v22387_v20, %v21993_v63  ;;  %v22459_v31 = vmul.f32 %v22387_v20, %v21997_v56  ;;  %v22463_v15 = vmul.f32 %v22387_v20, %v22001_v45  ;;  %v25348_v57 = vld [vmem:[#allocation4_spill] sm:$0xff] }
 0x511   :  { %v22467_v61 = vmul.f32 %v22387_v20, %v25345_v30  ;;  %v22471_v50 = vmul.f32 %v22387_v20, %v25346_v51  ;;  %v22475_v63 = vmul.f32 %v22387_v20, %v22013_v10  ;;  %v22479_v56 = vmul.f32 %v22387_v20, %v22017_v39  ;;  %v25350_v30 = vld [vmem:[#allocation12_spill] sm:$0xff] }
 0x512   :  { %v22483_v45 = vmul.f32 %v22387_v20, %v22021_v37  ;;  %v22487_v3 = vmul.f32 %v22387_v20, %v25329_v33  ;;  %v22491_v32 = vmul.f32 %v22387_v20, %v25330_v23  ;;  %v22495_v10 = vmul.f32 %v22387_v20, %v22033_v43  ;;  %8175 = vst [vmem:[#allocation2 + $0x321] sm:$0xff] %v8111_v62  ;;  %v25349_v62 = vld [vmem:[#allocation8_spill] sm:$0xff] }
 0x513   :  { %v22499_v39 = vmul.f32 %v22387_v20, %v22037_v1  ;;  %v22503_v37 = vmul.f32 %v22387_v20, %v22041_v21  ;;  %v22507_v33 = vmul.f32 %v22387_v20, %v22045_v8  ;;  %v22511_v23 = vmul.f32 %v22387_v20, %v22049_v5  ;;  %v25351_v51 = vld [vmem:[#allocation16_spill] sm:$0xff] }
 0x514   :  { %v22515_v43 = vmul.f32 %v22387_v20, %v22053_v38  ;;  %v22519_v1 = vmul.f32 %v22387_v20, %v22057_v24  ;;  %v22523_v21 = vmul.f32 %v22387_v20, %v22061_v58  ;;  %v22527_v8 = vmul.f32 %v22387_v20, %v22065_v52 }
 0x515   :  { %v22531_v5 = vmul.f32 %v22387_v20, %v22069_v34  ;;  %v22535_v38 = vmul.f32 %v22387_v20, %v22073_v19  ;;  %v22539_v24 = vmul.f32 %v22387_v20, %v22077_v48  ;;  %v22543_v58 = vmul.f32 %v22387_v20, %v22081_v42 }
 0x516   :  { %v22547_v52 = vmul.f32 %v22387_v20, %v22085_v14  ;;  %v22551_v34 = vmul.f32 %v22387_v20, %v22089_v54  ;;  %v22555_v19 = vmul.f32 %v22387_v20, %v22093_v44  ;;  %v22559_v48 = vmul.f32 %v22387_v20, %v22097_v26 }
 0x517   :  { %v22563_v42 = vmul.f32 %v22387_v20, %v22101_v13  ;;  %v22567_v14 = vmul.f32 %v22387_v20, %v22105_v47  ;;  %v22571_v54 = vmul.f32 %v22387_v20, %v25347_v16  ;;  %v22575_v44 = vmul.f32 %v22387_v20, %v25348_v57 }
 0x518   :  { %v22579_v26 = vmul.f32 %v22387_v20, %v22117_v27  ;;  %v22583_v13 = vmul.f32 %v22387_v20, %v25349_v62  ;;  %v22587_v47 = vmul.f32 %v22387_v20, %v25350_v30  ;;  %v22591_v16 = vmul.f32 %v22387_v20, %v25351_v51 }
 0x519   :  { %v22595_v57 = vmul.f32 %v22387_v20, %v25333_v29  ;;  %v22599_v27 = vmul.f32 %v22387_v20, %v25334_v36  ;;  %v22603_v62 = vmul.f32 %v22387_v20, %v22141_v28  ;;  %v22607_v30 = vmul.f32 %v22387_v20, %v22145_v25 }
 0x51a   :  { %v22611_v51 = vmul.f32 %v22387_v20, %v25356_v41  ;;  %v22615_v29 = vmul.f32 %v22387_v20, %v25358_v22 }
 0x51b   :  { %25352 = vst [vmem:[#allocation15_spill] sm:$0xff] %v22595_v57  ;;  %25353 = vst [vmem:[#allocation26_spill] sm:$0xff] %v22599_v27  ;;  %v25360_v57 = vld [vmem:[#allocation11_spill] sm:$0xff]  ;;  %v25361_v27 = vld [vmem:[#allocation6_spill] sm:$0xff] }
 0x51c   :  { %25354 = vst [vmem:[#allocation27_spill] sm:$0xff] %v22603_v62  ;;  %25355 = vst [vmem:[#allocation19_spill] sm:$0xff] %v22607_v30  ;;  %v22619_v36 = vmul.f32 %v22387_v20, %v25360_v57  ;;  %v22623_v28 = vmul.f32 %v22387_v20, %v25361_v27  ;;  %v25362_v62 = vld [vmem:[#allocation9_spill] sm:$0xff]  ;;  %v25363_v30 = vld [vmem:[#allocation14_spill] sm:$0xff]  ;;  %v22643_v27 = vmul.f32 %v22387_v20, %v25340_v59 }
 0x51d   :  { %25357 = vst [vmem:[#allocation20_spill] sm:$0xff] %v22611_v51  ;;  %25359 = vst [vmem:[#allocation21_spill] sm:$0xff] %v22615_v29  ;;  %v22627_v25 = vmul.f32 %v22387_v20, %v25362_v62  ;;  %v22631_v41 = vmul.f32 %v22387_v20, %v25363_v30  ;;  %v25364_v51 = vld [vmem:[#allocation24_spill] sm:$0xff]  ;;  %v25365_v29 = vld [vmem:[#allocation25_spill] sm:$0xff]  ;;  %v22647_v62 = vmul.f32 %v22387_v20, %v22189_v55 }
 0x51e   :  { %v22635_v22 = vmul.f32 %v22387_v20, %v25364_v51  ;;  %v22639_v57 = vmul.f32 %v22387_v20, %v25365_v29  ;;  %v22651_v30 = vadd.f32 %v22392_v18, %v22398_v35  ;;  %v22655_v51 = vadd.f32 %v22392_v18, %v22402_v11 }
 0x51f   :  { %v22659_v29 = vadd.f32 %v22392_v18, %v22406_v12  ;;  %v22663_v59 = vadd.f32 %v22392_v18, %v22410_v60  ;;  %v22667_v55 = vadd.f32 %v22392_v18, %v22414_v4  ;;  %v22671_v20 = vadd.f32 %v22392_v18, %v22418_v0 }
 0x520   :  { %v22675_v35 = vadd.f32 %v22392_v18, %v22422_v17  ;;  %v22679_v11 = vadd.f32 %v22392_v18, %v22427_v40  ;;  %v22683_v12 = vadd.f32 %v22392_v18, %v22431_v53  ;;  %v22687_v60 = vadd.f32 %v22392_v18, %v22435_v49 }
 0x521   :  { %v22691_v4 = vadd.f32 %v22392_v18, %v22439_v7  ;;  %v22695_v0 = vadd.f32 %v22392_v18, %v22443_v9  ;;  %v22699_v17 = vadd.f32 %v22392_v18, %v22447_v6  ;;  %v22703_v40 = vadd.f32 %v22392_v18, %v22451_v46 }
 0x522   :  { %v22707_v53 = vadd.f32 %v22392_v18, %v22455_v2  ;;  %v22711_v49 = vadd.f32 %v22392_v18, %v22459_v31  ;;  %v22715_v7 = vadd.f32 %v22392_v18, %v22463_v15  ;;  %v22719_v9 = vadd.f32 %v22392_v18, %v22467_v61 }
 0x523   :  { %v22723_v6 = vadd.f32 %v22392_v18, %v22471_v50  ;;  %v22727_v46 = vadd.f32 %v22392_v18, %v22475_v63  ;;  %v22731_v2 = vadd.f32 %v22392_v18, %v22479_v56  ;;  %v22735_v31 = vadd.f32 %v22392_v18, %v22483_v45 }
 0x524   :  { %v22739_v15 = vadd.f32 %v22392_v18, %v22487_v3  ;;  %v22743_v61 = vadd.f32 %v22392_v18, %v22491_v32  ;;  %v22747_v50 = vadd.f32 %v22392_v18, %v22495_v10  ;;  %v22751_v63 = vadd.f32 %v22392_v18, %v22499_v39 }
 0x525   :  { %25366 = vst [vmem:[#allocation22_spill] sm:$0xff] %v22731_v2  ;;  %25367 = vst [vmem:[#allocation23_spill] sm:$0xff] %v22735_v31  ;;  %v22755_v56 = vadd.f32 %v22392_v18, %v22503_v37  ;;  %v22759_v45 = vadd.f32 %v22392_v18, %v22507_v33  ;;  %v22763_v3 = vadd.f32 %v22392_v18, %v22511_v23 }
 0x526   :  { %25368 = vst [vmem:[#allocation10_spill] sm:$0xff] %v22739_v15  ;;  %25369 = vst [vmem:[#allocation4_spill] sm:$0xff] %v22743_v61  ;;  %v22767_v32 = vadd.f32 %v22392_v18, %v22515_v43  ;;  %v22771_v10 = vadd.f32 %v22392_v18, %v22519_v1  ;;  %v22775_v39 = vadd.f32 %v22392_v18, %v22523_v21 }
 0x527   :  { %25370 = vst [vmem:[#allocation8_spill] sm:$0xff] %v22747_v50  ;;  %25371 = vst [vmem:[#allocation12_spill] sm:$0xff] %v22751_v63  ;;  %v22779_v37 = vadd.f32 %v22392_v18, %v22527_v8  ;;  %v22783_v33 = vadd.f32 %v22392_v18, %v22531_v5  ;;  %v22787_v23 = vadd.f32 %v22392_v18, %v22535_v38 }
 0x528   :  { %25372 = vst [vmem:[#allocation16_spill] sm:$0xff] %v22755_v56  ;;  %25373 = vst [vmem:[#allocation17_spill] sm:$0xff] %v22759_v45  ;;  %v22791_v43 = vadd.f32 %v22392_v18, %v22539_v24  ;;  %v22795_v1 = vadd.f32 %v22392_v18, %v22543_v58  ;;  %v22799_v21 = vadd.f32 %v22392_v18, %v22547_v52 }
 0x529   :  { %25374 = vst [vmem:[#allocation18_spill] sm:$0xff] %v22763_v3  ;;  %25375 = vst [vmem:[#allocation11_spill] sm:$0xff] %v22767_v32  ;;  %v22803_v8 = vadd.f32 %v22392_v18, %v22551_v34  ;;  %v22807_v5 = vadd.f32 %v22392_v18, %v22555_v19  ;;  %v22811_v38 = vadd.f32 %v22392_v18, %v22559_v48 }
 0x52a   :  { %v22815_v24 = vadd.f32 %v22392_v18, %v22563_v42  ;;  %v22819_v58 = vadd.f32 %v22392_v18, %v22567_v14  ;;  %v22823_v52 = vadd.f32 %v22392_v18, %v22571_v54  ;;  %v22827_v34 = vadd.f32 %v22392_v18, %v22575_v44  ;;  %v25381_v54 = vld [vmem:[#allocation15_spill] sm:$0xff] }
 0x52b   :  { %v22831_v19 = vadd.f32 %v22392_v18, %v22579_v26  ;;  %v22835_v48 = vadd.f32 %v22392_v18, %v22583_v13  ;;  %v22839_v42 = vadd.f32 %v22392_v18, %v22587_v47  ;;  %v22843_v14 = vadd.f32 %v22392_v18, %v22591_v16 }
 0x52c   :  { %25376 = vst [vmem:[#allocation6_spill] sm:$0xff] %v22827_v34  ;;  %v22847_v44 = vadd.f32 %v22392_v18, %v25381_v54  ;;  %v25382_v34 = vld [vmem:[#allocation26_spill] sm:$0xff] }
 0x52d   :  { %25377 = vst [vmem:[#allocation9_spill] sm:$0xff] %v22831_v19  ;;  %25378 = vst [vmem:[#allocation14_spill] sm:$0xff] %v22835_v48  ;;  %v22851_v26 = vadd.f32 %v22392_v18, %v25382_v34  ;;  %v25383_v19 = vld [vmem:[#allocation27_spill] sm:$0xff]  ;;  %v22871_v34 = vadd.f32 %v22392_v18, %v22619_v36  ;;  %v22891_v36 = vadd.f32 %v22392_v18, %v22639_v57  ;;  %v25394_v57 = vmax.f32 %v22679_v11, 0.0 }
 0x52e   :  { %25379 = vst [vmem:[#allocation24_spill] sm:$0xff] %v22839_v42  ;;  %25380 = vst [vmem:[#allocation25_spill] sm:$0xff] %v22843_v14  ;;  %v22855_v13 = vadd.f32 %v22392_v18, %v25383_v19  ;;  %v25384_v48 = vld [vmem:[#allocation19_spill] sm:$0xff]  ;;  %v25385_v42 = vld [vmem:[#allocation20_spill] sm:$0xff]  ;;  %v22875_v19 = vadd.f32 %v22392_v18, %v22623_v28  ;;  %v22895_v28 = vadd.f32 %v22392_v18, %v22643_v27  ;;  %v25396_v27 = vmax.f32 %v22695_v0, 0.0 }
 0x52f   :  { %v22859_v47 = vadd.f32 %v22392_v18, %v25384_v48  ;;  %v22863_v16 = vadd.f32 %v22392_v18, %v25385_v42  ;;  %v25386_v14 = vld [vmem:[#allocation21_spill] sm:$0xff]  ;;  %v22879_v48 = vadd.f32 %v22392_v18, %v22627_v25  ;;  %v22883_v42 = vadd.f32 %v22392_v18, %v22631_v41  ;;  %25390 = vst [vmem:[#allocation19_spill] sm:$0xff] %v22891_v36 }
 0x530   :  { %v22867_v54 = vadd.f32 %v22392_v18, %v25386_v14  ;;  %v22887_v14 = vadd.f32 %v22392_v18, %v22635_v22  ;;  %25391 = vst [vmem:[#allocation20_spill] sm:$0xff] %v22895_v28  ;;  %v22899_v25 = vadd.f32 %v22392_v18, %v22647_v62  ;;  %v25148_v41 = vmax.f32 %v22655_v51, 0.0  ;;  %8121 = vst [vmem:[#allocation2 + $0x69] sm:$0xff] %v25394_v57 }
 0x531   :  { %25387 = vst [vmem:[#allocation15_spill] sm:$0xff] %v22879_v48  ;;  %25388 = vst [vmem:[#allocation26_spill] sm:$0xff] %v22883_v42  ;;  %v25147_v48 = vmax.f32 %v22651_v30, 0.0  ;;  %v25149_v42 = vmax.f32 %v22659_v29, 0.0  ;;  %v25150_v22 = vmax.f32 %v22663_v59, 0.0  ;;  %v25152_v18 = vmax.f32 %v22687_v60, 0.0 }
 0x532   :  { %25389 = vst [vmem:[#allocation27_spill] sm:$0xff] %v22887_v14  ;;  %v25151_v14 = vmax.f32 %v22667_v55, 0.0  ;;  %v25153_v62 = vmax.f32 %v22691_v4, 0.0  ;;  %8115 = vst [vmem:[#allocation2 + $0x21] sm:$0xff] %v25148_v41  ;;  %v25393_v41 = vmax.f32 %v22675_v35, 0.0  ;;  %v25155_v36 = vmax.f32 %v22715_v7, 0.0 }
 0x533   :  { %8114 = vst [vmem:[#allocation2 + $0x19] sm:$0xff] %v25147_v48  ;;  %8116 = vst [vmem:[#allocation2 + $0x31] sm:$0xff] %v25149_v42  ;;  %v25392_v48 = vmax.f32 %v22671_v20, 0.0  ;;  %v25154_v42 = vmax.f32 %v22711_v49, 0.0  ;;  %v25397_v57 = vmax.f32 %v22699_v17, 0.0  ;;  %v8080_v28 = vmax.f32 %v22771_v10, 0.0 }
 0x534   :  { %8117 = vst [vmem:[#allocation2 + $0x39] sm:$0xff] %v25150_v22  ;;  %8118 = vst [vmem:[#allocation2 + $0x49] sm:$0xff] %v25151_v14  ;;  %v25395_v22 = vmax.f32 %v22683_v12, 0.0  ;;  %v25161_v14 = vmax.f32 %v22783_v33, 0.0  ;;  %v25412_v10 = vld [vmem:[#allocation14_spill] sm:$0xff] }
 0x535   :  { %8119 = vst [vmem:[#allocation2 + $0x51] sm:$0xff] %v25392_v48  ;;  %8120 = vst [vmem:[#allocation2 + $0x61] sm:$0xff] %v25393_v41  ;;  %v25156_v48 = vmax.f32 %v22727_v46, 0.0  ;;  %v25158_v41 = vmax.f32 %v22747_v50, 0.0  ;;  %v8113_v50 = vmax.f32 %v22899_v25, 0.0 }
 0x536   :  { %8122 = vst [vmem:[#allocation2 + $0x79] sm:$0xff] %v25395_v22  ;;  %8123 = vst [vmem:[#allocation2 + $0x81] sm:$0xff] %v25152_v18  ;;  %v25398_v22 = vmax.f32 %v22703_v40, 0.0  ;;  %v25399_v18 = vmax.f32 %v22707_v53, 0.0 }
 0x537   :  { %8124 = vst [vmem:[#allocation2 + $0x91] sm:$0xff] %v25153_v62  ;;  %8125 = vst [vmem:[#allocation2 + $0x99] sm:$0xff] %v25396_v27  ;;  %v25157_v62 = vmax.f32 %v22743_v61, 0.0  ;;  %v25400_v27 = vmax.f32 %v22719_v9, 0.0 }
 0x538   :  { %8126 = vst [vmem:[#allocation2 + $0xa9] sm:$0xff] %v25397_v57  ;;  %8127 = vst [vmem:[#allocation2 + $0xb1] sm:$0xff] %v25398_v22  ;;  %v25401_v57 = vmax.f32 %v22723_v6, 0.0  ;;  %v25160_v22 = vmax.f32 %v22779_v37, 0.0 }
 0x539   :  { %8128 = vst [vmem:[#allocation2 + $0xc1] sm:$0xff] %v25399_v18  ;;  %8129 = vst [vmem:[#allocation2 + $0xc9] sm:$0xff] %v25154_v42  ;;  %v25159_v18 = vmax.f32 %v22759_v45, 0.0  ;;  %v25402_v42 = vmax.f32 %v22731_v2, 0.0  ;;  %v25432_v61 = vld [vmem:[#allocation27_spill] sm:$0xff]  ;;  %v25435_v2 = vmax.f32 %v22855_v13, 0.0 }
 0x53a   :  { %8130 = vst [vmem:[#allocation2 + $0xd9] sm:$0xff] %v25155_v36  ;;  %8131 = vst [vmem:[#allocation2 + $0xe1] sm:$0xff] %v25400_v27  ;;  %v25403_v36 = vmax.f32 %v22735_v31, 0.0  ;;  %v25404_v27 = vmax.f32 %v22739_v15, 0.0  ;;  %v8182_v45 = vld [vmem:[#allocation2 + $0x30] sm:$0xff]  ;;  %v25433_v15 = vld [vmem:[#allocation19_spill] sm:$0xff] }
 0x53b   :  { %8132 = vst [vmem:[#allocation2 + $0xf1] sm:$0xff] %v25401_v57  ;;  %8133 = vst [vmem:[#allocation2 + $0xf9] sm:$0xff] %v25156_v48  ;;  %v8081_v57 = vmax.f32 %v22775_v39, 0.0  ;;  %v25163_v39 = vmax.f32 %v22791_v43, 0.0  ;;  %v25417_v48 = vld [vmem:[#allocation25_spill] sm:$0xff]  ;;  %v25434_v31 = vld [vmem:[#allocation20_spill] sm:$0xff] }
 0x53c   :  { %8134 = vst [vmem:[#allocation2 + $0x109] sm:$0xff] %v25402_v42  ;;  %8135 = vst [vmem:[#allocation2 + $0x111] sm:$0xff] %v25403_v36  ;;  %v25405_v42 = vmax.f32 %v22751_v63, 0.0  ;;  %v25406_v36 = vmax.f32 %v22755_v56, 0.0  ;;  %v25426_v56 = vld [vmem:[#allocation15_spill] sm:$0xff]  ;;  %v25427_v63 = vld [vmem:[#allocation26_spill] sm:$0xff] }
 0x53d   :  { %8136 = vst [vmem:[#allocation2 + $0x121] sm:$0xff] %v25404_v27  ;;  %8137 = vst [vmem:[#allocation2 + $0x129] sm:$0xff] %v25157_v62  ;;  %v25407_v62 = vmax.f32 %v22763_v3, 0.0  ;;  %v8112_v3 = vmax.f32 %v25434_v31, 0.0  ;;  %v25440_v27 = vmax.f32 %v22875_v19, 0.0  ;;  %v25441_v31 = vmax.f32 %v25426_v56, 0.0 }
 0x53e   :  { %8138 = vst [vmem:[#allocation2 + $0x139] sm:$0xff] %v25158_v41  ;;  %8139 = vst [vmem:[#allocation2 + $0x141] sm:$0xff] %v25405_v42  ;;  %v25408_v41 = vmax.f32 %v22767_v32, 0.0  ;;  %v25411_v42 = vld [vmem:[#allocation9_spill] sm:$0xff]  ;;  %v25418_v32 = vmax.f32 %v22807_v5, 0.0 }
 0x53f   :  { %8140 = vst [vmem:[#allocation2 + $0x151] sm:$0xff] %v25406_v36  ;;  %8141 = vst [vmem:[#allocation2 + $0x159] sm:$0xff] %v25159_v18  ;;  %v8183_v18 = vld [vmem:[#allocation2 + $0x38] sm:$0xff]  ;;  %v25174_v36 = vmax.f32 %v25432_v61, 0.0 }
 0x540   :  { %8142 = vst [vmem:[#allocation2 + $0x169] sm:$0xff] %v25407_v62  ;;  %8143 = vst [vmem:[#allocation2 + $0x171] sm:$0xff] %v25408_v41  ;;  %v25409_v62 = vmax.f32 %v22787_v23, 0.0  ;;  %v25410_v41 = vld [vmem:[#allocation6_spill] sm:$0xff] }
 0x541   :  { %8144 = vst [vmem:[#allocation2 + $0x181] sm:$0xff] %v8080_v28  ;;  %8145 = vst [vmem:[#allocation2 + $0x189] sm:$0xff] %v8081_v57  ;;  %v25413_v57 = vmax.f32 %v22795_v1, 0.0  ;;  %v8181_v28 = vld [vmem:[#allocation2 + $0x20] sm:$0xff] }
 0x542   :  { %8146 = vst [vmem:[#allocation2 + $0x1c9] sm:$0xff] %v25160_v22  ;;  %8147 = vst [vmem:[#allocation2 + $0x1d1] sm:$0xff] %v25161_v14  ;;  %v25414_v22 = vmax.f32 %v22799_v21, 0.0  ;;  %v25415_v14 = vmax.f32 %v22803_v8, 0.0 }
 0x543   :  { %8148 = vst [vmem:[#allocation2 + $0x1e1] sm:$0xff] %v25409_v62  ;;  %8149 = vst [vmem:[#allocation2 + $0x1e9] sm:$0xff] %v25163_v39  ;;  %v25416_v62 = vld [vmem:[#allocation24_spill] sm:$0xff]  ;;  %v25419_v39 = vmax.f32 %v22811_v38, 0.0 }
 0x544   :  { %8150 = vst [vmem:[#allocation2 + $0x1f9] sm:$0xff] %v25413_v57  ;;  %8151 = vst [vmem:[#allocation2 + $0x201] sm:$0xff] %v25414_v22  ;;  %v25420_v57 = vmax.f32 %v22815_v24, 0.0  ;;  %v25421_v22 = vmax.f32 %v22819_v58, 0.0 }
 0x545   :  { %8152 = vst [vmem:[#allocation2 + $0x211] sm:$0xff] %v25415_v14  ;;  %8153 = vst [vmem:[#allocation2 + $0x219] sm:$0xff] %v25418_v32  ;;  %v8180_v14 = vld [vmem:[#allocation2 + $0x18] sm:$0xff]  ;;  %v25422_v32 = vmax.f32 %v22823_v52, 0.0 }
 0x546   :  { %8154 = vst [vmem:[#allocation2 + $0x229] sm:$0xff] %v25419_v39  ;;  %8155 = vst [vmem:[#allocation2 + $0x231] sm:$0xff] %v25420_v57  ;;  %v25423_v39 = vmax.f32 %v25410_v41, 0.0  ;;  %v25424_v57 = vmax.f32 %v25411_v42, 0.0  ;;  %v8211_v25 = vpack.c.bf16 %v8181_v28, %v8180_v14  ;;  %v25445_v28 = vmax.f32 %v22655_v51, 0.0 }
 0x547   :  { %8156 = vst [vmem:[#allocation2 + $0x241] sm:$0xff] %v25421_v22  ;;  %8157 = vst [vmem:[#allocation2 + $0x249] sm:$0xff] %v25422_v32  ;;  %v25425_v22 = vmax.f32 %v25412_v10, 0.0  ;;  %v25428_v32 = vmax.f32 %v25416_v62, 0.0  ;;  %v25451_v51 = vmax.f32 %v22787_v23, 0.0  ;;  %v25456_v23 = vmax.f32 %v22799_v21, 0.0 }
 0x548   :  { %8158 = vst [vmem:[#allocation2 + $0x259] sm:$0xff] %v25423_v39  ;;  %8159 = vst [vmem:[#allocation2 + $0x261] sm:$0xff] %v25424_v57  ;;  %v25429_v39 = vmax.f32 %v25417_v48, 0.0  ;;  %v25430_v57 = vmax.f32 %v22847_v44, 0.0  ;;  %18164 = vmatmul.mubr.bf16.vlgmr.msra.gmra.mrb[64].mxu0 %v8211_v25  ;;  %v25448_v25 = vmax.f32 %v22659_v29, 0.0  ;;  %v20230_v29 = vld [vmem:[%s25077_s4 + $0x50] sm:$0xff]  }
 0x549   :  { %8160 = vst [vmem:[#allocation2 + $0x271] sm:$0xff] %v25425_v22  ;;  %8161 = vst [vmem:[#allocation2 + $0x279] sm:$0xff] %v25428_v32  ;;  %v25431_v22 = vmax.f32 %v22851_v26, 0.0  ;;  %v25436_v32 = vmax.f32 %v22859_v47, 0.0  ;;  %v25460_v21 = vmax.f32 %v22803_v8, 0.0  ;;  %v25466_v8 = vmax.f32 %v22691_v4, 0.0 }
 0x54a   :  { %8162 = vst [vmem:[#allocation2 + $0x289] sm:$0xff] %v25429_v39  ;;  %8163 = vst [vmem:[#allocation2 + $0x291] sm:$0xff] %v25430_v57  ;;  %v25437_v39 = vmax.f32 %v22863_v16, 0.0  ;;  %v25438_v57 = vmax.f32 %v22867_v54, 0.0  ;;  %v25470_v4 = vmax.f32 %v22699_v17, 0.0  ;;  %v25476_v17 = vmax.f32 %v25412_v10, 0.0 }
 0x54b   :  { %8164 = vst [vmem:[#allocation2 + $0x2a1] sm:$0xff] %v25431_v22  ;;  %8165 = vst [vmem:[#allocation2 + $0x2a9] sm:$0xff] %v25435_v2  ;;  %v25439_v22 = vmax.f32 %v22871_v34, 0.0  ;;  %v25442_v2 = vmax.f32 %v25427_v63, 0.0  ;;  %v25481_v10 = vmax.f32 %v22847_v44, 0.0  ;;  %v20232_v44 = vld [vmem:[%s25077_s4 + $0x60] sm:$0xff]  }
 0x54c   :  { %8166 = vst [vmem:[#allocation2 + $0x2b9] sm:$0xff] %v25436_v32  ;;  %8167 = vst [vmem:[#allocation2 + $0x2c1] sm:$0xff] %v25437_v39  ;;  %v8212_v32 = vpack.c.bf16 %v8183_v18, %v8182_v45  ;;  %v20229_v39 = vld [vmem:[%s25077_s4 + $0x48] sm:$0xff]   ;;  %v25444_v18 = vmax.f32 %v22651_v30, 0.0 }
 0x54d   :  { %8168 = vst [vmem:[#allocation2 + $0x2d1] sm:$0xff] %v25438_v57  ;;  %8169 = vst [vmem:[#allocation2 + $0x2d9] sm:$0xff] %v25439_v22  ;;  %v25443_v57 = vmax.f32 %v25433_v15, 0.0  ;;  %v11446_v22 = vld [vmem:[#allocation2 + $0x1d0] sm:$0xff]  ;;  %v20234_v45 = vld [vmem:[%s25077_s4 + $0x48] sm:$0xff]  }
 0x54e   :  { %8170 = vst [vmem:[#allocation2 + $0x2e9] sm:$0xff] %v25440_v27  ;;  %8171 = vst [vmem:[#allocation2 + $0x2f1] sm:$0xff] %v25441_v31  ;;  %v11445_v27 = vld [vmem:[#allocation2 + $0x1c8] sm:$0xff]  ;;  %v11447_v31 = vld [vmem:[#allocation2 + $0x1e0] sm:$0xff]  ;;  %v23092_v14 = vpack.c.bf16 %v25445_v28, %v25444_v18  ;;  %18167 = vmatprep.mubr.bf16.mxu0 %v8212_v32  ;;  %v25452_v18 = vmax.f32 %v22791_v43, 0.0 }
 0x54f   :  { %8172 = vst [vmem:[#allocation2 + $0x301] sm:$0xff] %v25442_v2  ;;  %8173 = vst [vmem:[#allocation2 + $0x309] sm:$0xff] %v25174_v36  ;;  %v11476_v63 = vpack.c.bf16 %v11446_v22, %v11445_v27  ;;  %v11448_v2 = vld [vmem:[#allocation2 + $0x1e8] sm:$0xff]  ;;  %v25449_v27 = vmax.f32 %v22663_v59, 0.0  ;;  %v25453_v59 = vmax.f32 %v22667_v55, 0.0 }
 0x550   :  { %8174 = vst [vmem:[#allocation2 + $0x319] sm:$0xff] %v25443_v57  ;;  %8176 = vst [vmem:[#allocation2 + $0x331] sm:$0xff] %v8112_v3  ;;  %v25446_v57 = vmax.f32 %v22779_v37, 0.0  ;;  %v25450_v36 = vld [vmem:[#allocation5_spill] sm:$0xff]  ;;  %v11477_v30 = vpack.c.bf16 %v11448_v2, %v11447_v31  ;;  %v23111_v28 = vpack.c.bf16 %v25452_v18, %v25451_v51  ;;  %v25454_v37 = vmax.f32 %v22671_v20, 0.0  ;;  %v25457_v31 = vld [vmem:[#allocation7_spill] sm:$0xff] }
 0x551   :  { %8177 = vst [vmem:[#allocation2 + $0x339] sm:$0xff] %v8113_v50  ;;  %v25447_v50 = vmax.f32 %v22783_v33, 0.0  ;;  %v23104_v22 = vpack.c.bf16 %v25449_v27, %v25448_v25  ;;  %18196 = vmatpush3.bf16.msra.mxu0 %v25450_v36  ;;  %18596 = vmatmul.mubr.bf16.vlgmr.msra.gmra.mrb[64].mxu1 %v11476_v63  ;;  %v25455_v36 = vmax.f32 %v22795_v1, 0.0  ;;  %v8184_v43 = vld [vmem:[#allocation2 + $0x48] sm:$0xff]  ;;  %v8185_v63 = vld [vmem:[#allocation2 + $0x50] sm:$0xff]  ;;  %v25458_v2 = vmax.f32 %v22675_v35, 0.0 }
 0x552   :  { %18197 = vmatprep.subr.bf16.mxu0 %v20229_v39  ;;  %v23120_v33 = vpack.c.bf16 %v25454_v37, %v25453_v59  ;;  %18599 = vmatprep.mubr.bf16.mxu1 %v11477_v30  ;;  %v8186_v20 = vld [vmem:[#allocation2 + $0x60] sm:$0xff]  ;;  %v20236_v1 = vld [vmem:[%s25077_s4 + $0x50] sm:$0xff]   ;;  %v25461_v25 = vmax.f32 %v22807_v5, 0.0  ;;  %v25462_v30 = vmax.f32 %v22683_v12, 0.0  ;;  %v25463_v35 = vmax.f32 %v22687_v60, 0.0  ;;  %v11449_v37 = vld [vmem:[#allocation2 + $0x1f8] sm:$0xff] }
 0x553   :  { %v23098_v3 = vpack.c.bf16 %v25447_v50, %v25446_v57  ;;  %v23126_v32 = vpack.c.bf16 %v25456_v23, %v25455_v36  ;;  %18628 = vmatpush3.bf16.msra.mxu1 %v25457_v31  ;;  %v25459_v57 = vmax.f32 %v22679_v11, 0.0  ;;  %v8187_v50 = vld [vmem:[#allocation2 + $0x68] sm:$0xff]  ;;  %v25464_v51 = vmax.f32 %v22811_v38, 0.0  ;;  %v11450_v36 = vld [vmem:[#allocation2 + $0x200] sm:$0xff] }
 0x554   :  { %18629 = vmatprep.subr.bf16.mxu1 %v20234_v45  ;;  %v23142_v27 = vpack.c.bf16 %v25461_v25, %v25460_v21  ;;  %v23148_v11 = vpack.c.bf16 %v25463_v35, %v25462_v30  ;;  %v25465_v18 = vmax.f32 %v22815_v24, 0.0  ;;  %v25467_v5 = vmax.f32 %v22695_v0, 0.0  ;;  %v11452_v24 = vld [vmem:[#allocation2 + $0x218] sm:$0xff] }
 0x555   :  { %v23133_v55 = vpack.c.bf16 %v25459_v57, %v25458_v2  ;;  %18198 = vmatpush3.bf16.msra.mxu0 %v20229_v39  ;;  %v25468_v12 = vmax.f32 %v22819_v58, 0.0  ;;  %v25469_v60 = vmax.f32 %v22823_v52, 0.0  ;;  %v8213_v38 = vpack.c.bf16 %v8185_v63, %v8184_v43  ;;  %v11451_v2 = vld [vmem:[#allocation2 + $0x210] sm:$0xff]  ;;  %v20231_v39 = vld [vmem:[%s25077_s4 + $0x58] sm:$0xff]  }
 0x556   :  { %v23154_v59 = vpack.c.bf16 %v25465_v18, %v25464_v51  ;;  %v23160_v23 = vpack.c.bf16 %v25467_v5, %v25466_v8  ;;  %18199 = vmatprep.subr.bf16.mxu0 %v20230_v29  ;;  %v25471_v0 = vmax.f32 %v22703_v40, 0.0  ;;  %v25472_v58 = vmax.f32 %v25410_v41, 0.0  ;;  %v25488_v8 = vld [vmem:[#allocation23_spill] sm:$0xff] }
 0x557   :  { %v23166_v31 = vpack.c.bf16 %v25469_v60, %v25468_v12  ;;  %v25473_v52 = vmax.f32 %v25411_v42, 0.0  ;;  %v8214_v43 = vpack.c.bf16 %v8187_v50, %v8186_v20  ;;  %18630 = vmatpush3.bf16.msra.mxu1 %v20234_v45  ;;  %v25474_v63 = vmax.f32 %v22707_v53, 0.0  ;;  %18168 = vmatmul.mubr.bf16.gmra.mrb[68].mxu0 %v8213_v38  ;;  %v20237_v53 = vld [vmem:[%s25077_s4 + $0x58] sm:$0xff]   ;;  %v8189_v12 = vld [vmem:[#allocation2 + $0x80] sm:$0xff]  ;;  %v25492_v38 = vld [vmem:[#allocation10_spill] sm:$0xff] }
 0x558   :  { %v23175_v57 = vpack.c.bf16 %v25471_v0, %v25470_v4  ;;  %v25475_v25 = vmax.f32 %v22711_v49, 0.0  ;;  %v25477_v40 = vmax.f32 %v25416_v62, 0.0  ;;  %v25478_v41 = vmax.f32 %v22715_v7, 0.0  ;;  %18631 = vmatprep.subr.bf16.mxu1 %v20236_v1 }
 0x559   :  { %v23181_v21 = vpack.c.bf16 %v25473_v52, %v25472_v58  ;;  %v25479_v42 = vmax.f32 %v22719_v9, 0.0  ;;  %v11478_v45 = vpack.c.bf16 %v11450_v36, %v11449_v37  ;;  %v25480_v49 = vmax.f32 %v25417_v48, 0.0  ;;  %18171 = vmatprep.mubr.bf16.mxu0 %v8214_v43  ;;  %18200 = vmatpush3.bf16.msra.mxu0 %v20230_v29  ;;  %v25486_v48 = vld [vmem:[#allocation22_spill] sm:$0xff]  ;;  %v8191_v52 = vld [vmem:[#allocation2 + $0x98] sm:$0xff]  ;;  %v20239_v43 = vld [vmem:[%s25077_s4 + $0x60] sm:$0xff]  }
 0x55a   :  { %v23187_v30 = vpack.c.bf16 %v25475_v25, %v25474_v63  ;;  %v23193_v35 = vpack.c.bf16 %v25477_v40, %v25476_v17  ;;  %v11479_v20 = vpack.c.bf16 %v11452_v24, %v11451_v2  ;;  %v25482_v7 = vmax.f32 %v22723_v6, 0.0  ;;  %18201 = vmatprep.subr.bf16.mxu0 %v20231_v39  ;;  %v25494_v24 = vld [vmem:[#allocation4_spill] sm:$0xff]  ;;  %v8190_v58 = vld [vmem:[#allocation2 + $0x90] sm:$0xff] }
 0x55b   :  { %v23199_v51 = vpack.c.bf16 %v25479_v42, %v25478_v41  ;;  %v23208_v62 = vpack.c.bf16 %v25481_v10, %v25480_v49  ;;  %v25483_v9 = vmax.f32 %v22727_v46, 0.0  ;;  %v25484_v18 = vmax.f32 %v22851_v26, 0.0  ;;  %18600 = vmatmul.mubr.bf16.gmra.mrb[68].mxu1 %v11478_v45  ;;  %v8188_v46 = vld [vmem:[#allocation2 + $0x78] sm:$0xff]  ;;  %v25498_v63 = vld [vmem:[#allocation8_spill] sm:$0xff]  ;;  %v11453_v42 = vld [vmem:[#allocation2 + $0x228] sm:$0xff] }
 0x55c   :  { %v25485_v37 = vmax.f32 %v22855_v13, 0.0  ;;  %v25487_v29 = vmax.f32 %v25486_v48, 0.0  ;;  %v25489_v6 = vmax.f32 %v25488_v8, 0.0  ;;  %18603 = vmatprep.mubr.bf16.mxu1 %v11479_v20  ;;  %18632 = vmatpush3.bf16.msra.mxu1 %v20236_v1  ;;  %v25490_v26 = vmax.f32 %v22859_v47, 0.0  ;;  %v25500_v17 = vld [vmem:[#allocation12_spill] sm:$0xff]  ;;  %v11454_v45 = vld [vmem:[#allocation2 + $0x230] sm:$0xff] }
 0x55d   :  { %v23214_v50 = vpack.c.bf16 %v25483_v9, %v25482_v7  ;;  %v25491_v13 = vmax.f32 %v22863_v16, 0.0  ;;  %v25493_v2 = vmax.f32 %v25492_v38, 0.0  ;;  %v25495_v4 = vmax.f32 %v25494_v24, 0.0  ;;  %18633 = vmatprep.subr.bf16.mxu1 %v20237_v53  ;;  %18202 = vmatpush3.bf16.msra.mxu0 %v20231_v39  ;;  %v11455_v39 = vld [vmem:[#allocation2 + $0x240] sm:$0xff]  ;;  %v25513_v38 = vld [vmem:[#allocation11_spill] sm:$0xff] }
 0x55e   :  { %v23220_v36 = vpack.c.bf16 %v25485_v37, %v25484_v18  ;;  %v23229_v5 = vpack.c.bf16 %v25489_v6, %v25487_v29  ;;  %v25496_v1 = vmax.f32 %v22867_v54, 0.0  ;;  %v25497_v47 = vmax.f32 %v22871_v34, 0.0  ;;  %v25504_v54 = vld [vmem:[#allocation16_spill] sm:$0xff]  ;;  %v25506_v34 = vld [vmem:[#allocation17_spill] sm:$0xff]  ;;  %v25508_v37 = vld [vmem:[#allocation26_spill] sm:$0xff]  ;;  %18203 = vmatprep.subr.bf16.mxu0 %v20232_v44 }
 0x55f   :  { %v23235_v60 = vpack.c.bf16 %v25491_v13, %v25490_v26  ;;  %v23241_v0 = vpack.c.bf16 %v25495_v4, %v25493_v2  ;;  %v25499_v25 = vmax.f32 %v25498_v63, 0.0  ;;  %v25501_v40 = vmax.f32 %v25500_v17, 0.0  ;;  %v11456_v26 = vld [vmem:[#allocation2 + $0x248] sm:$0xff]  ;;  %v20242_v63 = vld [vmem:[%s25077_s4 + $0x70] sm:$0xff]   ;;  %v11458_v17 = vld [vmem:[#allocation2 + $0x260] sm:$0xff] }
 0x560   :  { %v23250_v16 = vpack.c.bf16 %v25497_v47, %v25496_v1  ;;  %v25502_v49 = vmax.f32 %v22875_v19, 0.0  ;;  %v25503_v10 = vmax.f32 %v25426_v56, 0.0  ;;  %v25505_v7 = vmax.f32 %v25504_v54, 0.0  ;;  %v20235_v56 = vld [vmem:[%s25077_s4 + $0x68] sm:$0xff]   ;;  %v25511_v19 = vld [vmem:[#allocation18_spill] sm:$0xff]  ;;  %18634 = vmatpush3.bf16.msra.mxu1 %v20237_v53  ;;  %v8194_v53 = vld [vmem:[#allocation2 + $0xc0] sm:$0xff] }
 0x561   :  { %v23256_v41 = vpack.c.bf16 %v25501_v40, %v25499_v25  ;;  %v25507_v9 = vmax.f32 %v25506_v34, 0.0  ;;  %v25509_v48 = vmax.f32 %v25508_v37, 0.0  ;;  %v25510_v29 = vmax.f32 %v25432_v61, 0.0  ;;  %18635 = vmatprep.subr.bf16.mxu1 %v20239_v43  ;;  %18204 = vmatpush3.bf16.msra.mxu0 %v20232_v44  ;;  %v20238_v1 = vld [vmem:[%s25077_s4 + $0x70] sm:$0xff]   ;;  %v8192_v47 = vld [vmem:[#allocation2 + $0xa8] sm:$0xff]  ;;  %v11457_v25 = vld [vmem:[#allocation2 + $0x258] sm:$0xff] }
 0x562   :  { %v23262_v20 = vpack.c.bf16 %v25503_v10, %v25502_v49  ;;  %v8215_v6 = vpack.c.bf16 %v8189_v12, %v8188_v46  ;;  %v25512_v13 = vmax.f32 %v25511_v19, 0.0  ;;  %v25514_v2 = vmax.f32 %v25513_v38, 0.0  ;;  %v20240_v46 = vld [vmem:[%s25077_s4 + $0x68] sm:$0xff]   ;;  %18205 = vmatprep.subr.bf16.mxu0 %v20235_v56  ;;  %v11459_v40 = vld [vmem:[#allocation2 + $0x270] sm:$0xff]  ;;  %v20243_v10 = vld [vmem:[%s25077_s4 + $0x78] sm:$0xff]  }
 0x563   :  { %v23268_v18 = vpack.c.bf16 %v25507_v9, %v25505_v7  ;;  %v23274_v8 = vpack.c.bf16 %v25510_v29, %v25509_v48  ;;  %v8216_v4 = vpack.c.bf16 %v8191_v52, %v8190_v58  ;;  %v11480_v61 = vpack.c.bf16 %v11454_v45, %v11453_v42  ;;  %v8193_v58 = vld [vmem:[#allocation2 + $0xb0] sm:$0xff]  ;;  %v8195_v52 = vld [vmem:[#allocation2 + $0xc8] sm:$0xff]  ;;  %v11460_v42 = vld [vmem:[#allocation2 + $0x278] sm:$0xff] }
 0x564   :  { %v23283_v24 = vpack.c.bf16 %v25514_v2, %v25512_v13  ;;  %18172 = vmatmul.mubr.bf16.gmra.mrb[72].mxu0 %v8215_v6  ;;  %v11481_v12 = vpack.c.bf16 %v11456_v26, %v11455_v39  ;;  %18636 = vmatpush3.bf16.msra.mxu1 %v20239_v43  ;;  %v8217_v44 = vpack.c.bf16 %v8193_v58, %v8192_v47  ;;  %v20241_v45 = vld [vmem:[%s25077_s4 + $0x78] sm:$0xff]   ;;  %v23303_v7 = vld [vmem:[%s25077_s4 + $0x80] sm:$0xff]   ;;  %v8198_v37 = vld [vmem:[#allocation2 + $0xf0] sm:$0xff] }
 0x565   :  { %18175 = vmatprep.mubr.bf16.mxu0 %v8216_v4  ;;  %18604 = vmatmul.mubr.bf16.gmra.mrb[72].mxu1 %v11480_v61  ;;  %v8218_v49 = vpack.c.bf16 %v8195_v52, %v8194_v53  ;;  %v11482_v43 = vpack.c.bf16 %v11458_v17, %v11457_v25  ;;  %v11483_v54 = vpack.c.bf16 %v11460_v42, %v11459_v40  ;;  %v8196_v34 = vld [vmem:[#allocation2 + $0xd8] sm:$0xff]  ;;  %v8197_v9 = vld [vmem:[#allocation2 + $0xe0] sm:$0xff]  ;;  %v11461_v6 = vld [vmem:[#allocation2 + $0x288] sm:$0xff] }
 0x566   :  { %18607 = vmatprep.mubr.bf16.mxu1 %v11481_v12  ;;  %18637 = vmatprep.subr.bf16.mxu1 %v20240_v46  ;;  %v8199_v48 = vld [vmem:[#allocation2 + $0xf8] sm:$0xff]  ;;  %v23308_v29 = vld [vmem:[%s25077_s4 + $0x80] sm:$0xff]   ;;  %v11462_v39 = vld [vmem:[#allocation2 + $0x290] sm:$0xff]  ;;  %v8219_v26 = vpack.c.bf16 %v8197_v9, %v8196_v34 }
 0x567   :  { %18206 = vmatpush3.bf16.msra.mxu0 %v20235_v56  ;;  %v11463_v56 = vld [vmem:[#allocation2 + $0x2a0] sm:$0xff]  ;;  %v11464_v19 = vld [vmem:[#allocation2 + $0x2a8] sm:$0xff]  ;;  %v8220_v13 = vpack.c.bf16 %v8199_v48, %v8198_v37  ;;  %v11484_v38 = vpack.c.bf16 %v11462_v39, %v11461_v6  ;;  %v8201_v61 = vld [vmem:[#allocation2 + $0x110] sm:$0xff] }
 0x568   :  { %18207 = vmatprep.subr.bf16.mxu0 %v20238_v1  ;;  %18638 = vmatpush3.bf16.msra.mxu1 %v20240_v46  ;;  %v11485_v2 = vpack.c.bf16 %v11464_v19, %v11463_v56  ;;  %v8200_v4 = vld [vmem:[#allocation2 + $0x108] sm:$0xff]  ;;  %v8202_v46 = vld [vmem:[#allocation2 + $0x120] sm:$0xff]  ;;  %v11467_v53 = vld [vmem:[#allocation2 + $0x2d0] sm:$0xff] }
 0x569   :  { %18639 = vmatprep.subr.bf16.mxu1 %v20242_v63  ;;  %v8203_v12 = vld [vmem:[#allocation2 + $0x128] sm:$0xff]  ;;  %v11466_v47 = vld [vmem:[#allocation2 + $0x2c0] sm:$0xff]  ;;  %v8221_v58 = vpack.c.bf16 %v8201_v61, %v8200_v4  ;;  %v11468_v52 = vld [vmem:[#allocation2 + $0x2d8] sm:$0xff] }
 0x56a   :  { %v11487_v17 = vpack.c.bf16 %v11468_v52, %v11467_v53  ;;  %v8205_v40 = vld [vmem:[#allocation2 + $0x140] sm:$0xff]  ;;  %v8206_v42 = vld [vmem:[#allocation2 + $0x150] sm:$0xff]  ;;  %v11472_v34 = vld [vmem:[#allocation2 + $0x308] sm:$0xff] }
 0x56b   :  { %18208 = vmatpush3.bf16.msra.mxu0 %v20238_v1  ;;  %v11465_v1 = vld [vmem:[#allocation2 + $0x2b8] sm:$0xff]  ;;  %v8483_v6 = vld [vmem:[#allocation2 + $0x1] sm:$0xff]  ;;  %v8484_v39 = vld [vmem:[#allocation2 + $0x9] sm:$0xff] }
 0x56c   :  { %18176 = vmatmul.mubr.bf16.gmra.mrb[76].mxu0 %v8217_v44  ;;  %18209 = vmatprep.subr.bf16.mxu0 %v20241_v45  ;;  %v11486_v25 = vpack.c.bf16 %v11466_v47, %v11465_v1  ;;  %v8204_v44 = vld [vmem:[#allocation2 + $0x138] sm:$0xff]  ;;  %v8209_v56 = vld [vmem:[#allocation2 + $0x170] sm:$0xff]  ;;  %v8515_v4 = vpack.c.bf16 %v8484_v39, %v8483_v6  ;;  %v20245_v1 = vld [vmem:[%s25077_s4 + $0x88] sm:$0xff]  }
 0x56d   :  { %18179 = vmatprep.mubr.bf16.mxu0 %v8218_v49  ;;  %18608 = vmatmul.mubr.bf16.gmra.mrb[76].mxu1 %v11482_v43  ;;  %v11469_v49 = vld [vmem:[#allocation2 + $0x2e8] sm:$0xff]  ;;  %v11470_v43 = vld [vmem:[#allocation2 + $0x2f0] sm:$0xff]  ;;  %v20269_v39 = vld [vmem:[%s25077_s4 + $0xd8] sm:$0xff]  }
 0x56e   :  { %18611 = vmatprep.mubr.bf16.mxu1 %v11483_v54  ;;  %18640 = vmatpush3.bf16.msra.mxu1 %v20242_v63  ;;  %v8222_v63 = vpack.c.bf16 %v8203_v12, %v8202_v46  ;;  %v11471_v54 = vld [vmem:[#allocation2 + $0x300] sm:$0xff]  ;;  %v11488_v37 = vpack.c.bf16 %v11470_v43, %v11469_v49  ;;  %v11748_v19 = vld [vmem:[#allocation2 + $0x1b1] sm:$0xff]  ;;  %v20250_v47 = vld [vmem:[%s25077_s4 + $0x88] sm:$0xff]  }
 0x56f   :  { %18641 = vmatprep.subr.bf16.mxu1 %v20243_v10  ;;  %18210 = vmatpush3.bf16.msra.mxu0 %v20241_v45  ;;  %v8207_v45 = vld [vmem:[#allocation2 + $0x158] sm:$0xff]  ;;  %v11489_v48 = vpack.c.bf16 %v11472_v34, %v11471_v54  ;;  %v12122_v53 = vld [vmem:[#allocation2 + $0x1ea] sm:$0xff] }
 0x570   :  { %18243 = vmatprep.subr.bf16.mxu0 %v23303_v7  ;;  %v8224_v9 = vpack.c.bf16 %v8207_v45, %v8206_v42  ;;  %v20261_v52 = vld [vmem:[%s25077_s4 + $0xc8] sm:$0xff]   ;;  %v20268_v49 = vld [vmem:[%s25077_s4 + $0xd0] sm:$0xff]   ;;  %v12123_v43 = vld [vmem:[#allocation2 + $0x1fa] sm:$0xff] }
 0x571   :  { %v8861_v42 = vld [vmem:[#allocation2 + $0x62] sm:$0xff]  ;;  %v8862_v45 = vld [vmem:[#allocation2 + $0x6a] sm:$0xff]  ;;  %v12125_v34 = vld [vmem:[#allocation2 + $0x212] sm:$0xff] }
 0x572   :  { %18642 = vmatpush3.bf16.msra.mxu1 %v20243_v10  ;;  %v8223_v10 = vpack.c.bf16 %v8205_v40, %v8204_v44  ;;  %v8859_v44 = vld [vmem:[#allocation2 + $0x4a] sm:$0xff]  ;;  %v8860_v40 = vld [vmem:[#allocation2 + $0x52] sm:$0xff] }
 0x573   :  { %18675 = vmatprep.subr.bf16.mxu1 %v23308_v29  ;;  %v8888_v54 = vpack.c.bf16 %v8860_v40, %v8859_v44  ;;  %v8878_v44 = vld [vmem:[#allocation2 + $0x12a] sm:$0xff]  ;;  %v12139_v40 = vld [vmem:[#allocation2 + $0x2ba] sm:$0xff] }
 0x574   :  { %18180 = vmatmul.mubr.bf16.gmra.mrb[80].mxu0 %v8219_v26  ;;  %v8208_v26 = vld [vmem:[#allocation2 + $0x168] sm:$0xff] }
 0x575   :  { %18183 = vmatprep.mubr.bf16.mxu0 %v8220_v13  ;;  %18612 = vmatmul.mubr.bf16.gmra.mrb[80].mxu1 %v11484_v38  ;;  %v11749_v13 = vld [vmem:[#allocation2 + $0x1b9] sm:$0xff]  ;;  %v8225_v61 = vpack.c.bf16 %v8209_v56, %v8208_v26 }
 0x576   :  { %18615 = vmatprep.mubr.bf16.mxu1 %v11485_v2  ;;  %v11473_v38 = vld [vmem:[#allocation2 + $0x318] sm:$0xff]  ;;  %v11474_v2 = vld [vmem:[#allocation2 + $0x320] sm:$0xff]  ;;  %v11780_v46 = vpack.c.bf16 %v11749_v13, %v11748_v19 }
 0x577   :  { %v11490_v12 = vpack.c.bf16 %v11474_v2, %v11473_v38  ;;  %v20264_v56 = vld [vmem:[%s25077_s4 + $0xe0] sm:$0xff]   ;;  %v8865_v38 = vld [vmem:[#allocation2 + $0x92] sm:$0xff] }
 0x578   :  { %v8863_v19 = vld [vmem:[#allocation2 + $0x7a] sm:$0xff]  ;;  %v8864_v13 = vld [vmem:[#allocation2 + $0x82] sm:$0xff] }
 0x579   :  { %v8866_v2 = vld [vmem:[#allocation2 + $0x9a] sm:$0xff] }
 0x57c   :  { %18184 = vmatmul.mubr.bf16.gmra.mrb[84].mxu0 %v8221_v58  ;;  %v20246_v58 = vld [vmem:[%s25077_s4 + $0x90] sm:$0xff]  }
 0x57d   :  { %18187 = vmatprep.mubr.bf16.mxu0 %v8222_v63  ;;  %18616 = vmatmul.mubr.bf16.gmra.mrb[84].mxu1 %v11486_v25  ;;  %v20266_v63 = vld [vmem:[%s25077_s4 + $0xc8] sm:$0xff]  }
 0x57e   :  { %18619 = vmatprep.mubr.bf16.mxu1 %v11487_v17  ;;  %v20262_v17 = vld [vmem:[%s25077_s4 + $0xd0] sm:$0xff]  }
 0x584   :  { %18188 = vmatmul.mubr.bf16.gmra.mrb[88].mxu0 %v8223_v10  ;;  %v12124_v10 = vld [vmem:[#allocation2 + $0x202] sm:$0xff] }
 0x585   :  { %18191 = vmatprep.mubr.bf16.mxu0 %v8224_v9  ;;  %18620 = vmatmul.mubr.bf16.gmra.mrb[88].mxu1 %v11488_v37  ;;  %v12126_v9 = vld [vmem:[#allocation2 + $0x21a] sm:$0xff]  ;;  %v12152_v6 = vpack.c.bf16 %v12124_v10, %v12123_v43 }
 0x586   :  { %18623 = vmatprep.mubr.bf16.mxu1 %v11489_v48  ;;  %v20263_v37 = vld [vmem:[%s25077_s4 + $0xd8] sm:$0xff]   ;;  %v8889_v48 = vpack.c.bf16 %v8862_v45, %v8861_v42  ;;  %v12153_v26 = vpack.c.bf16 %v12126_v9, %v12125_v34  ;;  %v12140_v42 = vld [vmem:[#allocation2 + $0x2c2] sm:$0xff] }
 0x587   :  { %v12142_v43 = vld [vmem:[#allocation2 + $0x2da] sm:$0xff] }
 0x588   :  { %v8879_v9 = vld [vmem:[#allocation2 + $0x13a] sm:$0xff] }
 0x58c   :  { %18192 = vmatmul.mubr.bf16.gmra.mrb[92].mxu0 %v8225_v61  ;;  %v12127_v61 = vld [vmem:[#allocation2 + $0x22a] sm:$0xff] }
 0x58d   :  { %18211 = vmatprep.mubr.bf16.mxu0 %v8515_v4  ;;  %18624 = vmatmul.mubr.bf16.gmra.mrb[92].mxu1 %v11490_v12  ;;  %v20271_v4 = vld [vmem:[%s25077_s4 + $0xe0] sm:$0xff]   ;;  %v8890_v12 = vpack.c.bf16 %v8864_v13, %v8863_v19  ;;  %v12146_v13 = vld [vmem:[#allocation2 + $0x30a] sm:$0xff] }
 0x58e   :  { %18643 = vmatprep.mubr.bf16.mxu1 %v11780_v46  ;;  %v12128_v46 = vld [vmem:[#allocation2 + $0x232] sm:$0xff]  ;;  %v12145_v19 = vld [vmem:[#allocation2 + $0x302] sm:$0xff] }
 0x594   :  { %18212 = vmatmul.mubr.bf16.vlgmr.msra.gmra.mrb[64].mxu0 %v23092_v14  ;;  %v20252_v14 = vld [vmem:[%s25077_s4 + $0x90] sm:$0xff]  }
 0x595   :  { %18244 = vmatpush3.bf16.msra.mxu0 %v23303_v7  ;;  %18215 = vmatprep.mubr.bf16.mxu0 %v23104_v22  ;;  %v20253_v22 = vld [vmem:[%s25077_s4 + $0x98] sm:$0xff]  }
 0x596   :  { %18644 = vmatmul.mubr.bf16.vlgmr.msra.gmra.mrb[64].mxu1 %v23098_v3  ;;  %18245 = vmatprep.subr.bf16.mxu0 %v20245_v1  ;;  %v20247_v3 = vld [vmem:[%s25077_s4 + $0x98] sm:$0xff]  }
 0x597   :  { %18647 = vmatprep.mubr.bf16.mxu1 %v23111_v28  ;;  %18676 = vmatpush3.bf16.msra.mxu1 %v23308_v29  ;;  %v20248_v28 = vld [vmem:[%s25077_s4 + $0xa0] sm:$0xff]   ;;  %v12120_v7 = vld [vmem:[#allocation2 + $0x1d2] sm:$0xff] }
 0x598   :  { %18677 = vmatprep.subr.bf16.mxu1 %v20250_v47  ;;  %v12121_v29 = vld [vmem:[#allocation2 + $0x1e2] sm:$0xff] }
 0x599   :  { %18246 = vmatpush3.bf16.msra.mxu0 %v20245_v1  ;;  %v12151_v25 = vpack.c.bf16 %v12122_v53, %v12121_v29  ;;  %v12129_v1 = vld [vmem:[#allocation2 + $0x242] sm:$0xff]  ;;  %v12138_v53 = vld [vmem:[#allocation2 + $0x2aa] sm:$0xff] }
 0x59a   :  { %18247 = vmatprep.subr.bf16.mxu0 %v20246_v58  ;;  %v12137_v29 = vld [vmem:[#allocation2 + $0x2a2] sm:$0xff] }
 0x59b   :  { %18678 = vmatpush3.bf16.msra.mxu1 %v20250_v47  ;;  %v12130_v47 = vld [vmem:[#allocation2 + $0x24a] sm:$0xff] }
 0x59c   :  { %18216 = vmatmul.mubr.bf16.gmra.mrb[68].mxu0 %v23120_v33  ;;  %18679 = vmatprep.subr.bf16.mxu1 %v20252_v14  ;;  %v20255_v33 = vld [vmem:[%s25077_s4 + $0xa0] sm:$0xff]  }
 0x59d   :  { %18219 = vmatprep.mubr.bf16.mxu0 %v23133_v55  ;;  %18248 = vmatpush3.bf16.msra.mxu0 %v20246_v58  ;;  %v20251_v55 = vld [vmem:[%s25077_s4 + $0xa8] sm:$0xff]  }
 0x59e   :  { %18648 = vmatmul.mubr.bf16.gmra.mrb[68].mxu1 %v23126_v32  ;;  %18249 = vmatprep.subr.bf16.mxu0 %v20247_v3  ;;  %v20256_v32 = vld [vmem:[%s25077_s4 + $0xa8] sm:$0xff]  }
 0x59f   :  { %18651 = vmatprep.mubr.bf16.mxu1 %v23142_v27  ;;  %18680 = vmatpush3.bf16.msra.mxu1 %v20252_v14  ;;  %v20254_v27 = vld [vmem:[%s25077_s4 + $0xb0] sm:$0xff]   ;;  %v20267_v58 = vld [vmem:[%s25077_s4 + $0xe8] sm:$0xff]   ;;  %v8891_v14 = vpack.c.bf16 %v8866_v2, %v8865_v38 }
 0x5a0   :  { %18681 = vmatprep.subr.bf16.mxu1 %v20253_v22 }
 0x5a1   :  { %18250 = vmatpush3.bf16.msra.mxu0 %v20247_v3  ;;  %v12154_v3 = vpack.c.bf16 %v12128_v46, %v12127_v61  ;;  %v8883_v61 = vld [vmem:[#allocation2 + $0x16a] sm:$0xff]  ;;  %v8884_v46 = vld [vmem:[#allocation2 + $0x172] sm:$0xff] }
 0x5a2   :  { %18251 = vmatprep.subr.bf16.mxu0 %v20248_v28 }
 0x5a3   :  { %18682 = vmatpush3.bf16.msra.mxu1 %v20253_v22  ;;  %v20272_v22 = vld [vmem:[%s25077_s4 + $0xe8] sm:$0xff]  }
 0x5a4   :  { %18220 = vmatmul.mubr.bf16.gmra.mrb[72].mxu0 %v23148_v11  ;;  %18683 = vmatprep.subr.bf16.mxu1 %v20255_v33  ;;  %v20258_v11 = vld [vmem:[%s25077_s4 + $0xb0] sm:$0xff]  }
 0x5a5   :  { %18223 = vmatprep.mubr.bf16.mxu0 %v23160_v23  ;;  %18252 = vmatpush3.bf16.msra.mxu0 %v20248_v28  ;;  %v20257_v23 = vld [vmem:[%s25077_s4 + $0xb8] sm:$0xff]   ;;  %v12155_v28 = vpack.c.bf16 %v12130_v47, %v12129_v1  ;;  %v9224_v1 = vld [vmem:[#allocation2 + $0x20] sm:$0xff] }
 0x5a6   :  { %18652 = vmatmul.mubr.bf16.gmra.mrb[72].mxu1 %v23154_v59  ;;  %18253 = vmatprep.subr.bf16.mxu0 %v20251_v55  ;;  %v20259_v59 = vld [vmem:[%s25077_s4 + $0xb8] sm:$0xff]  }
 0x5a7   :  { %18655 = vmatprep.mubr.bf16.mxu1 %v23166_v31  ;;  %18684 = vmatpush3.bf16.msra.mxu1 %v20255_v33  ;;  %v20260_v31 = vld [vmem:[%s25077_s4 + $0xc0] sm:$0xff]   ;;  %v20270_v33 = vld [vmem:[%s25077_s4 + $0xf0] sm:$0xff]  }
 0x5a8   :  { %18685 = vmatprep.subr.bf16.mxu1 %v20256_v32  ;;  %v12147_v47 = vld [vmem:[#allocation2 + $0x31a] sm:$0xff] }
 0x5a9   :  { %18254 = vmatpush3.bf16.msra.mxu0 %v20251_v55  ;;  %v8867_v55 = vld [vmem:[#allocation2 + $0xaa] sm:$0xff] }
 0x5aa   :  { %18255 = vmatprep.subr.bf16.mxu0 %v20254_v27 }
 0x5ab   :  { %18686 = vmatpush3.bf16.msra.mxu1 %v20256_v32  ;;  %v8868_v32 = vld [vmem:[#allocation2 + $0xb2] sm:$0xff] }
 0x5ac   :  { %18224 = vmatmul.mubr.bf16.gmra.mrb[76].mxu0 %v23175_v57  ;;  %18687 = vmatprep.subr.bf16.mxu1 %v20258_v11  ;;  %v20265_v57 = vld [vmem:[%s25077_s4 + $0xc0] sm:$0xff]  }
 0x5ad   :  { %18227 = vmatprep.mubr.bf16.mxu0 %v23187_v30  ;;  %18256 = vmatpush3.bf16.msra.mxu0 %v20254_v27  ;;  %v8854_v30 = vld [vmem:[#allocation2 + $0xa] sm:$0xff]  ;;  %v8869_v27 = vld [vmem:[#allocation2 + $0xc2] sm:$0xff] }
 0x5ae   :  { %18656 = vmatmul.mubr.bf16.gmra.mrb[76].mxu1 %v23181_v21  ;;  %18257 = vmatprep.subr.bf16.mxu0 %v20257_v23  ;;  %v8853_v21 = vld [vmem:[#allocation2 + $0x2] sm:$0xff] }
 0x5af   :  { %18659 = vmatprep.mubr.bf16.mxu1 %v23193_v35  ;;  %18688 = vmatpush3.bf16.msra.mxu1 %v20258_v11  ;;  %v12117_v35 = vld [vmem:[#allocation2 + $0x1b2] sm:$0xff]  ;;  %v8870_v11 = vld [vmem:[#allocation2 + $0xca] sm:$0xff] }
 0x5b0   :  { %18689 = vmatprep.subr.bf16.mxu1 %v20259_v59 }
 0x5b1   :  { %18258 = vmatpush3.bf16.msra.mxu0 %v20257_v23  ;;  %v20274_v23 = vld [vmem:[%s25077_s4 + $0xf0] sm:$0xff]  }
 0x5b2   :  { %18291 = vmatprep.subr.bf16.mxu0 %v20260_v31 }
 0x5b3   :  { %18690 = vmatpush3.bf16.msra.mxu1 %v20259_v59  ;;  %v12131_v59 = vld [vmem:[#allocation2 + $0x25a] sm:$0xff] }
 0x5b4   :  { %18228 = vmatmul.mubr.bf16.gmra.mrb[80].mxu0 %v23199_v51  ;;  %18723 = vmatprep.subr.bf16.mxu1 %v20265_v57  ;;  %v12118_v51 = vld [vmem:[#allocation2 + $0x1ba] sm:$0xff] }
 0x5b5   :  { %18231 = vmatprep.mubr.bf16.mxu0 %v23214_v50  ;;  %v8885_v50 = vpack.c.bf16 %v8854_v30, %v8853_v21  ;;  %v12133_v21 = vld [vmem:[#allocation2 + $0x272] sm:$0xff]  ;;  %v12134_v30 = vld [vmem:[#allocation2 + $0x27a] sm:$0xff] }
 0x5b6   :  { %18660 = vmatmul.mubr.bf16.gmra.mrb[80].mxu1 %v23208_v62  ;;  %v11779_v62 = vld [vmem:[#allocation2 + $0x321] sm:$0xff] }
 0x5b7   :  { %18663 = vmatprep.mubr.bf16.mxu1 %v23220_v36  ;;  %v12149_v36 = vpack.c.bf16 %v12118_v51, %v12117_v35  ;;  %v20273_v35 = vld [vmem:[%s25077_s4 + $0xf8] sm:$0xff]   ;;  %v8893_v51 = vpack.c.bf16 %v8870_v11, %v8869_v27  ;;  %v9227_v11 = vld [vmem:[#allocation2 + $0x48] sm:$0xff] }
 0x5b8   :  { %v9226_v27 = vld [vmem:[#allocation2 + $0x38] sm:$0xff] }
 0x5bc   :  { %18232 = vmatmul.mubr.bf16.gmra.mrb[84].mxu0 %v23229_v5  ;;  %v25515_v5 = vmax.f32 %v25433_v15, 0.0 }
 0x5bd   :  { %18235 = vmatprep.mubr.bf16.mxu0 %v23241_v0  ;;  %v8855_v0 = vld [vmem:[#allocation2 + $0x1a] sm:$0xff] }
 0x5be   :  { %18664 = vmatmul.mubr.bf16.gmra.mrb[84].mxu1 %v23235_v60  ;;  %v11795_v60 = vpack.c.bf16 %v11779_v62, %v25515_v5  ;;  %v23438_v5 = vld [vmem:[%s25077_s4 + $0x100] sm:$0xff]  }
 0x5bf   :  { %18667 = vmatprep.mubr.bf16.mxu1 %v23250_v16  ;;  %v8856_v16 = vld [vmem:[#allocation2 + $0x22] sm:$0xff] }
 0x5c4   :  { %18236 = vmatmul.mubr.bf16.gmra.mrb[88].mxu0 %v23256_v41  ;;  %v8857_v41 = vld [vmem:[#allocation2 + $0x32] sm:$0xff] }
 0x5c5   :  { %18239 = vmatprep.mubr.bf16.mxu0 %v23268_v18  ;;  %v12119_v18 = vld [vmem:[#allocation2 + $0x1ca] sm:$0xff] }
 0x5c6   :  { %18668 = vmatmul.mubr.bf16.gmra.mrb[88].mxu1 %v23262_v20  ;;  %v8858_v20 = vld [vmem:[#allocation2 + $0x3a] sm:$0xff]  ;;  %v12150_v15 = vpack.c.bf16 %v12120_v7, %v12119_v18  ;;  %v12135_v18 = vld [vmem:[#allocation2 + $0x28a] sm:$0xff]  ;;  %v12136_v7 = vld [vmem:[#allocation2 + $0x292] sm:$0xff] }
 0x5c7   :  { %18671 = vmatprep.mubr.bf16.mxu1 %v23274_v8  ;;  %v8886_v8 = vpack.c.bf16 %v8856_v16, %v8855_v0  ;;  %v8872_v0 = vld [vmem:[#allocation2 + $0xe2] sm:$0xff]  ;;  %v8873_v16 = vld [vmem:[#allocation2 + $0xf2] sm:$0xff] }
 0x5cc   :  { %18240 = vmatmul.mubr.bf16.gmra.mrb[92].mxu0 %v23283_v24  ;;  %v8887_v24 = vpack.c.bf16 %v8858_v20, %v8857_v41  ;;  %v8874_v41 = vld [vmem:[#allocation2 + $0xfa] sm:$0xff] }
 0x5cd   :  { %18259 = vmatprep.mubr.bf16.mxu0 %v8885_v50  ;;  %v20275_v50 = vld [vmem:[%s25077_s4 + $0xf8] sm:$0xff]   ;;  %v23443_v20 = vld [vmem:[%s25077_s4 + $0x100] sm:$0xff]  }
 0x5ce   :  { %18672 = vmatmul.mubr.bf16.gmra.mrb[92].mxu1 %v11795_v60  ;;  %v8871_v60 = vld [vmem:[#allocation2 + $0xda] sm:$0xff] }
 0x5cf   :  { %18691 = vmatprep.mubr.bf16.mxu1 %v12149_v36  ;;  %v12157_v36 = vpack.c.bf16 %v12134_v30, %v12133_v21  ;;  %v12490_v21 = vld [vmem:[#allocation2 + $0x1f8] sm:$0xff]  ;;  %v12491_v30 = vld [vmem:[#allocation2 + $0x200] sm:$0xff] }
 0x5d4   :  { %18260 = vmatmul.mubr.bf16.vlgmr.msra.gmra.mrb[64].mxu0 %v8886_v8  ;;  %v8894_v8 = vpack.c.bf16 %v8872_v0, %v8871_v60  ;;  %v20278_v60 = vld [vmem:[%s25077_s4 + $0x110] sm:$0xff]   ;;  %v9229_v0 = vld [vmem:[#allocation2 + $0x60] sm:$0xff] }
 0x5d5   :  { %18292 = vmatpush3.bf16.msra.mxu0 %v20260_v31  ;;  %18263 = vmatprep.mubr.bf16.mxu0 %v8887_v24  ;;  %v12132_v31 = vld [vmem:[#allocation2 + $0x262] sm:$0xff]  ;;  %v12158_v24 = vpack.c.bf16 %v12136_v7, %v12135_v18  ;;  %v12492_v7 = vld [vmem:[#allocation2 + $0x210] sm:$0xff] }
 0x5d6   :  { %18692 = vmatmul.mubr.bf16.vlgmr.msra.gmra.mrb[64].mxu1 %v12150_v15  ;;  %18293 = vmatprep.subr.bf16.mxu0 %v20261_v52  ;;  %v12156_v62 = vpack.c.bf16 %v12132_v31, %v12131_v59  ;;  %v12159_v15 = vpack.c.bf16 %v12138_v53, %v12137_v29  ;;  %v12488_v59 = vld [vmem:[#allocation2 + $0x1e0] sm:$0xff]  ;;  %v12489_v31 = vld [vmem:[#allocation2 + $0x1e8] sm:$0xff] }
 0x5d7   :  { %18695 = vmatprep.mubr.bf16.mxu1 %v12151_v25  ;;  %18724 = vmatpush3.bf16.msra.mxu1 %v20265_v57  ;;  %v8892_v57 = vpack.c.bf16 %v8868_v32, %v8867_v55  ;;  %v8876_v25 = vld [vmem:[#allocation2 + $0x112] sm:$0xff]  ;;  %v9232_v18 = vld [vmem:[#allocation2 + $0x80] sm:$0xff]  ;;  %v12494_v53 = vld [vmem:[#allocation2 + $0x228] sm:$0xff] }
 0x5d8   :  { %18725 = vmatprep.subr.bf16.mxu1 %v20266_v63  ;;  %v9225_v32 = vld [vmem:[#allocation2 + $0x30] sm:$0xff] }
 0x5d9   :  { %18294 = vmatpush3.bf16.msra.mxu0 %v20261_v52  ;;  %v8895_v52 = vpack.c.bf16 %v8874_v41, %v8873_v16  ;;  %v9230_v16 = vld [vmem:[#allocation2 + $0x68] sm:$0xff]  ;;  %v9231_v41 = vld [vmem:[#allocation2 + $0x78] sm:$0xff] }
 0x5da   :  { %18295 = vmatprep.subr.bf16.mxu0 %v20262_v17  ;;  %v9258_v29 = vpack.c.bf16 %v9230_v16, %v9229_v0  ;;  %v9248_v0 = vld [vmem:[#allocation2 + $0x140] sm:$0xff]  ;;  %v12508_v16 = vld [vmem:[#allocation2 + $0x2d0] sm:$0xff] }
 0x5db   :  { %18726 = vmatpush3.bf16.msra.mxu1 %v20266_v63  ;;  %v8875_v63 = vld [vmem:[#allocation2 + $0x10a] sm:$0xff] }
 0x5dc   :  { %18264 = vmatmul.mubr.bf16.gmra.mrb[68].mxu0 %v8888_v54  ;;  %18727 = vmatprep.subr.bf16.mxu1 %v20268_v49  ;;  %v8896_v45 = vpack.c.bf16 %v8876_v25, %v8875_v63  ;;  %v12160_v54 = vpack.c.bf16 %v12140_v42, %v12139_v40  ;;  %v20285_v63 = vld [vmem:[%s25077_s4 + $0x118] sm:$0xff]   ;;  %v9235_v42 = vld [vmem:[#allocation2 + $0xa8] sm:$0xff] }
 0x5dd   :  { %18267 = vmatprep.mubr.bf16.mxu0 %v8889_v48  ;;  %18296 = vmatpush3.bf16.msra.mxu0 %v20262_v17  ;;  %v8877_v17 = vld [vmem:[#allocation2 + $0x122] sm:$0xff]  ;;  %v8881_v48 = vld [vmem:[#allocation2 + $0x152] sm:$0xff] }
 0x5de   :  { %18696 = vmatmul.mubr.bf16.gmra.mrb[68].mxu1 %v12152_v6  ;;  %18297 = vmatprep.subr.bf16.mxu0 %v20263_v37  ;;  %v8897_v10 = vpack.c.bf16 %v8878_v44, %v8877_v17  ;;  %v8882_v6 = vld [vmem:[#allocation2 + $0x15a] sm:$0xff]  ;;  %v9233_v44 = vld [vmem:[#allocation2 + $0x90] sm:$0xff] }
 0x5df   :  { %18699 = vmatprep.mubr.bf16.mxu1 %v12153_v26  ;;  %18728 = vmatpush3.bf16.msra.mxu1 %v20268_v49  ;;  %v12141_v49 = vld [vmem:[#allocation2 + $0x2d2] sm:$0xff]  ;;  %v8899_v38 = vpack.c.bf16 %v8882_v6, %v8881_v48  ;;  %v20280_v17 = vld [vmem:[%s25077_s4 + $0x120] sm:$0xff]  }
 0x5e0   :  { %18729 = vmatprep.subr.bf16.mxu1 %v20269_v39  ;;  %v12161_v34 = vpack.c.bf16 %v12142_v43, %v12141_v49  ;;  %v12144_v26 = vld [vmem:[#allocation2 + $0x2f2] sm:$0xff]  ;;  %v20287_v49 = vld [vmem:[%s25077_s4 + $0x120] sm:$0xff]  }
 0x5e1   :  { %18298 = vmatpush3.bf16.msra.mxu0 %v20263_v37  ;;  %v8880_v37 = vld [vmem:[#allocation2 + $0x142] sm:$0xff]  ;;  %v9234_v40 = vld [vmem:[#allocation2 + $0x98] sm:$0xff] }
 0x5e2   :  { %18299 = vmatprep.subr.bf16.mxu0 %v20264_v56  ;;  %v12496_v43 = vld [vmem:[#allocation2 + $0x240] sm:$0xff] }
 0x5e3   :  { %18730 = vmatpush3.bf16.msra.mxu1 %v20269_v39  ;;  %v12143_v39 = vld [vmem:[#allocation2 + $0x2ea] sm:$0xff] }
 0x5e4   :  { %18268 = vmatmul.mubr.bf16.gmra.mrb[72].mxu0 %v8890_v12  ;;  %18731 = vmatprep.subr.bf16.mxu1 %v20271_v4  ;;  %v12162_v2 = vpack.c.bf16 %v12144_v26, %v12143_v39  ;;  %v9223_v12 = vld [vmem:[#allocation2 + $0x18] sm:$0xff]  ;;  %v20288_v39 = vld [vmem:[%s25077_s4 + $0x128] sm:$0xff]  }
 0x5e5   :  { %18271 = vmatprep.mubr.bf16.mxu0 %v8891_v14  ;;  %18300 = vmatpush3.bf16.msra.mxu0 %v20264_v56  ;;  %v8898_v56 = vpack.c.bf16 %v8880_v37, %v8879_v9  ;;  %v8900_v14 = vpack.c.bf16 %v8884_v46, %v8883_v61  ;;  %v12499_v9 = vld [vmem:[#allocation2 + $0x260] sm:$0xff]  ;;  %v20283_v37 = vld [vmem:[%s25077_s4 + $0x128] sm:$0xff]   ;;  %v12500_v61 = vld [vmem:[#allocation2 + $0x270] sm:$0xff] }
 0x5e6   :  { %18700 = vmatmul.mubr.bf16.gmra.mrb[72].mxu1 %v12154_v3  ;;  %18301 = vmatprep.subr.bf16.mxu0 %v20267_v58  ;;  %v12486_v3 = vld [vmem:[#allocation2 + $0x1c8] sm:$0xff]  ;;  %v12501_v46 = vld [vmem:[#allocation2 + $0x278] sm:$0xff] }
 0x5e7   :  { %18703 = vmatprep.mubr.bf16.mxu1 %v12155_v28  ;;  %18732 = vmatpush3.bf16.msra.mxu1 %v20271_v4  ;;  %v12163_v4 = vpack.c.bf16 %v12146_v13, %v12145_v19  ;;  %v9255_v28 = vpack.c.bf16 %v9224_v1, %v9223_v12  ;;  %v9237_v19 = vld [vmem:[#allocation2 + $0xc0] sm:$0xff]  ;;  %v9238_v13 = vld [vmem:[#allocation2 + $0xc8] sm:$0xff] }
 0x5e8   :  { %18733 = vmatprep.subr.bf16.mxu1 %v20272_v22  ;;  %v9262_v12 = vpack.c.bf16 %v9238_v13, %v9237_v19  ;;  %v12502_v1 = vld [vmem:[#allocation2 + $0x288] sm:$0xff]  ;;  %v9595_v13 = vld [vmem:[#allocation2 + $0x31] sm:$0xff] }
 0x5e9   :  { %18302 = vmatpush3.bf16.msra.mxu0 %v20267_v58  ;;  %v12148_v58 = vld [vmem:[#allocation2 + $0x322] sm:$0xff] }
 0x5ea   :  { %18303 = vmatprep.subr.bf16.mxu0 %v20270_v33 }
 0x5eb   :  { %18734 = vmatpush3.bf16.msra.mxu1 %v20272_v22  ;;  %v12487_v22 = vld [vmem:[#allocation2 + $0x1d0] sm:$0xff] }
 0x5ec   :  { %18272 = vmatmul.mubr.bf16.gmra.mrb[76].mxu0 %v8892_v57  ;;  %18735 = vmatprep.subr.bf16.mxu1 %v20274_v23  ;;  %v12518_v55 = vpack.c.bf16 %v12487_v22, %v12486_v3  ;;  %v9256_v57 = vpack.c.bf16 %v9226_v27, %v9225_v32  ;;  %v12525_v3 = vpack.c.bf16 %v12501_v46, %v12500_v61  ;;  %v20291_v22 = vld [vmem:[%s25077_s4 + $0x138] sm:$0xff]   ;;  %v9243_v27 = vld [vmem:[#allocation2 + $0x108] sm:$0xff] }
 0x5ed   :  { %18275 = vmatprep.mubr.bf16.mxu0 %v8893_v51  ;;  %18304 = vmatpush3.bf16.msra.mxu0 %v20270_v33  ;;  %v12164_v33 = vpack.c.bf16 %v12148_v58, %v12147_v47  ;;  %v12503_v47 = vld [vmem:[#allocation2 + $0x290] sm:$0xff]  ;;  %v20289_v58 = vld [vmem:[%s25077_s4 + $0x138] sm:$0xff]   ;;  %v12857_v61 = vld [vmem:[#allocation2 + $0x1e1] sm:$0xff] }
 0x5ee   :  { %18704 = vmatmul.mubr.bf16.gmra.mrb[76].mxu1 %v12156_v62  ;;  %18305 = vmatprep.subr.bf16.mxu0 %v20273_v35  ;;  %v12519_v62 = vpack.c.bf16 %v12489_v31, %v12488_v59  ;;  %v9242_v32 = vld [vmem:[#allocation2 + $0xf8] sm:$0xff]  ;;  %v12504_v59 = vld [vmem:[#allocation2 + $0x2a0] sm:$0xff]  ;;  %v12505_v31 = vld [vmem:[#allocation2 + $0x2a8] sm:$0xff] }
 0x5ef   :  { %18707 = vmatprep.mubr.bf16.mxu1 %v12157_v36  ;;  %18736 = vmatpush3.bf16.msra.mxu1 %v20274_v23  ;;  %v9228_v23 = vld [vmem:[#allocation2 + $0x50] sm:$0xff]  ;;  %v12520_v36 = vpack.c.bf16 %v12491_v30, %v12490_v21  ;;  %v12506_v21 = vld [vmem:[#allocation2 + $0x2b8] sm:$0xff]  ;;  %v12507_v30 = vld [vmem:[#allocation2 + $0x2c0] sm:$0xff] }
 0x5f0   :  { %18737 = vmatprep.subr.bf16.mxu1 %v20275_v50  ;;  %v9257_v51 = vpack.c.bf16 %v9228_v23, %v9227_v11  ;;  %v9244_v11 = vld [vmem:[#allocation2 + $0x110] sm:$0xff]  ;;  %v23499_v23 = vld [vmem:[%s25077_s4 + $0x140] sm:$0xff]  }
 0x5f1   :  { %18306 = vmatpush3.bf16.msra.mxu0 %v20273_v35  ;;  %v20277_v35 = vld [vmem:[%s25077_s4 + $0x108] sm:$0xff]  }
 0x5f2   :  { %18339 = vmatprep.subr.bf16.mxu0 %v23438_v5  ;;  %v12858_v46 = vld [vmem:[#allocation2 + $0x1e9] sm:$0xff] }
 0x5f3   :  { %18738 = vmatpush3.bf16.msra.mxu1 %v20275_v50  ;;  %v20282_v50 = vld [vmem:[%s25077_s4 + $0x108] sm:$0xff]  }
 0x5f4   :  { %18276 = vmatmul.mubr.bf16.gmra.mrb[80].mxu0 %v8894_v8  ;;  %18771 = vmatprep.subr.bf16.mxu1 %v23443_v20  ;;  %v12493_v8 = vld [vmem:[#allocation2 + $0x218] sm:$0xff] }
 0x5f5   :  { %18279 = vmatprep.mubr.bf16.mxu0 %v8895_v52  ;;  %v12495_v52 = vld [vmem:[#allocation2 + $0x230] sm:$0xff] }
 0x5f6   :  { %18708 = vmatmul.mubr.bf16.gmra.mrb[80].mxu1 %v12158_v24  ;;  %v20279_v24 = vld [vmem:[%s25077_s4 + $0x118] sm:$0xff]   ;;  %v12522_v25 = vpack.c.bf16 %v12495_v52, %v12494_v53  ;;  %v9249_v52 = vld [vmem:[#allocation2 + $0x150] sm:$0xff] }
 0x5f7   :  { %18711 = vmatprep.mubr.bf16.mxu1 %v12159_v15  ;;  %v9259_v15 = vpack.c.bf16 %v9232_v18, %v9231_v41  ;;  %v12509_v41 = vld [vmem:[#allocation2 + $0x2d8] sm:$0xff] }
 0x5fc   :  { %18280 = vmatmul.mubr.bf16.gmra.mrb[84].mxu0 %v8896_v45  ;;  %v9236_v45 = vld [vmem:[#allocation2 + $0xb0] sm:$0xff] }
 0x5fd   :  { %18283 = vmatprep.mubr.bf16.mxu0 %v8897_v10  ;;  %v12497_v10 = vld [vmem:[#allocation2 + $0x248] sm:$0xff]  ;;  %v9261_v48 = vpack.c.bf16 %v9236_v45, %v9235_v42 }
 0x5fe   :  { %18712 = vmatmul.mubr.bf16.gmra.mrb[84].mxu1 %v12160_v54  ;;  %v9260_v54 = vpack.c.bf16 %v9234_v40, %v9233_v44  ;;  %v12523_v6 = vpack.c.bf16 %v12497_v10, %v12496_v43  ;;  %v12514_v44 = vld [vmem:[#allocation2 + $0x318] sm:$0xff]  ;;  %v12515_v40 = vld [vmem:[#allocation2 + $0x320] sm:$0xff]  ;;  %v9254_v10 = vld [vmem:[#allocation2 + $0x188] sm:$0xff] }
 0x5ff   :  { %18715 = vmatprep.mubr.bf16.mxu1 %v12161_v34  ;;  %v12498_v34 = vld [vmem:[#allocation2 + $0x258] sm:$0xff]  ;;  %v9253_v43 = vld [vmem:[#allocation2 + $0x180] sm:$0xff] }
 0x600   :  { %v12524_v26 = vpack.c.bf16 %v12499_v9, %v12498_v34  ;;  %v9594_v34 = vld [vmem:[#allocation2 + $0x21] sm:$0xff]  ;;  %v12516_v9 = vld [vmem:[#allocation2 + $0x330] sm:$0xff] }
 0x604   :  { %18284 = vmatmul.mubr.bf16.gmra.mrb[88].mxu0 %v8898_v56  ;;  %v20286_v56 = vld [vmem:[%s25077_s4 + $0x130] sm:$0xff]  }
 0x605   :  { %18287 = vmatprep.mubr.bf16.mxu0 %v8899_v38  ;;  %v9239_v38 = vld [vmem:[#allocation2 + $0xd8] sm:$0xff] }
 0x606   :  { %18716 = vmatmul.mubr.bf16.gmra.mrb[88].mxu1 %v12162_v2  ;;  %v9240_v2 = vld [vmem:[#allocation2 + $0xe0] sm:$0xff] }
 0x607   :  { %18719 = vmatprep.mubr.bf16.mxu1 %v12163_v4  ;;  %v20290_v4 = vld [vmem:[%s25077_s4 + $0x130] sm:$0xff]  }
 0x60c   :  { %18288 = vmatmul.mubr.bf16.gmra.mrb[92].mxu0 %v8900_v14  ;;  %v9263_v14 = vpack.c.bf16 %v9240_v2, %v9239_v38  ;;  %v9596_v38 = vld [vmem:[#allocation2 + $0x39] sm:$0xff]  ;;  %v9597_v2 = vld [vmem:[#allocation2 + $0x49] sm:$0xff] }
 0x60d   :  { %18307 = vmatprep.mubr.bf16.mxu0 %v9255_v28  ;;  %v12526_v28 = vpack.c.bf16 %v12503_v47, %v12502_v1  ;;  %v12859_v1 = vld [vmem:[#allocation2 + $0x1f9] sm:$0xff]  ;;  %v12860_v47 = vld [vmem:[#allocation2 + $0x201] sm:$0xff] }
 0x60e   :  { %18720 = vmatmul.mubr.bf16.gmra.mrb[92].mxu1 %v12164_v33  ;;  %v23494_v33 = vld [vmem:[%s25077_s4 + $0x140] sm:$0xff]  }
 0x60f   :  { %18739 = vmatprep.mubr.bf16.mxu1 %v12518_v55  ;;  %v9241_v55 = vld [vmem:[#allocation2 + $0xf0] sm:$0xff] }
 0x614   :  { %18308 = vmatmul.mubr.bf16.vlgmr.msra.gmra.mrb[64].mxu0 %v9256_v57  ;;  %v9264_v57 = vpack.c.bf16 %v9242_v32, %v9241_v55  ;;  %v20294_v55 = vld [vmem:[%s25077_s4 + $0x150] sm:$0xff]   ;;  %v9599_v32 = vld [vmem:[#allocation2 + $0x61] sm:$0xff] }
 0x615   :  { %18340 = vmatpush3.bf16.msra.mxu0 %v23438_v5  ;;  %18311 = vmatprep.mubr.bf16.mxu0 %v9257_v51  ;;  %v20284_v5 = vld [vmem:[%s25077_s4 + $0x110] sm:$0xff]   ;;  %v12527_v51 = vpack.c.bf16 %v12505_v31, %v12504_v59  ;;  %v9602_v59 = vld [vmem:[#allocation2 + $0x81] sm:$0xff] }
 0x616   :  { %18740 = vmatmul.mubr.bf16.vlgmr.msra.gmra.mrb[64].mxu1 %v12519_v62  ;;  %18341 = vmatprep.subr.bf16.mxu0 %v20277_v35  ;;  %v12528_v62 = vpack.c.bf16 %v12507_v30, %v12506_v21  ;;  %v12861_v31 = vld [vmem:[#allocation2 + $0x211] sm:$0xff]  ;;  %v12863_v30 = vld [vmem:[#allocation2 + $0x229] sm:$0xff] }
 0x617   :  { %18743 = vmatprep.mubr.bf16.mxu1 %v12520_v36  ;;  %18772 = vmatpush3.bf16.msra.mxu1 %v23443_v20  ;;  %v12521_v20 = vpack.c.bf16 %v12493_v8, %v12492_v7  ;;  %v9246_v36 = vld [vmem:[#allocation2 + $0x128] sm:$0xff]  ;;  %v12511_v7 = vld [vmem:[#allocation2 + $0x2f0] sm:$0xff] }
 0x618   :  { %18773 = vmatprep.subr.bf16.mxu1 %v20282_v50 }
 0x619   :  { %18342 = vmatpush3.bf16.msra.mxu0 %v20277_v35  ;;  %v9265_v35 = vpack.c.bf16 %v9244_v11, %v9243_v27  ;;  %v9600_v27 = vld [vmem:[#allocation2 + $0x69] sm:$0xff]  ;;  %v9601_v11 = vld [vmem:[#allocation2 + $0x79] sm:$0xff] }
 0x61a   :  { %18343 = vmatprep.subr.bf16.mxu0 %v20278_v60  ;;  %v9628_v21 = vpack.c.bf16 %v9600_v27, %v9599_v32  ;;  %v9618_v32 = vld [vmem:[#allocation2 + $0x141] sm:$0xff]  ;;  %v12877_v27 = vld [vmem:[#allocation2 + $0x2d1] sm:$0xff] }
 0x61b   :  { %18774 = vmatpush3.bf16.msra.mxu1 %v20282_v50  ;;  %v9245_v50 = vld [vmem:[#allocation2 + $0x120] sm:$0xff] }
 0x61c   :  { %18312 = vmatmul.mubr.bf16.gmra.mrb[68].mxu0 %v9258_v29  ;;  %18775 = vmatprep.subr.bf16.mxu1 %v20284_v5  ;;  %v9266_v18 = vpack.c.bf16 %v9246_v36, %v9245_v50  ;;  %v12529_v29 = vpack.c.bf16 %v12509_v41, %v12508_v16  ;;  %v20301_v50 = vld [vmem:[%s25077_s4 + $0x158] sm:$0xff]   ;;  %v9605_v41 = vld [vmem:[#allocation2 + $0xa9] sm:$0xff] }
 0x61d   :  { %18315 = vmatprep.mubr.bf16.mxu0 %v9259_v15  ;;  %18344 = vmatpush3.bf16.msra.mxu0 %v20278_v60  ;;  %v9247_v60 = vld [vmem:[#allocation2 + $0x138] sm:$0xff]  ;;  %v9251_v15 = vld [vmem:[#allocation2 + $0x168] sm:$0xff] }
 0x61e   :  { %18744 = vmatmul.mubr.bf16.gmra.mrb[68].mxu1 %v12521_v20  ;;  %18345 = vmatprep.subr.bf16.mxu0 %v20279_v24  ;;  %v9267_v8 = vpack.c.bf16 %v9248_v0, %v9247_v60  ;;  %v9252_v20 = vld [vmem:[#allocation2 + $0x170] sm:$0xff]  ;;  %v20296_v60 = vld [vmem:[%s25077_s4 + $0x160] sm:$0xff]  }
 0x61f   :  { %18747 = vmatprep.mubr.bf16.mxu1 %v12522_v25  ;;  %18776 = vmatpush3.bf16.msra.mxu1 %v20284_v5  ;;  %v12510_v5 = vld [vmem:[#allocation2 + $0x2e8] sm:$0xff]  ;;  %v9269_v42 = vpack.c.bf16 %v9252_v20, %v9251_v15  ;;  %v9603_v0 = vld [vmem:[#allocation2 + $0x91] sm:$0xff]  ;;  %v9604_v16 = vld [vmem:[#allocation2 + $0x99] sm:$0xff] }
 0x620   :  { %18777 = vmatprep.subr.bf16.mxu1 %v20285_v63  ;;  %v12530_v53 = vpack.c.bf16 %v12511_v7, %v12510_v5  ;;  %v12513_v25 = vld [vmem:[#allocation2 + $0x308] sm:$0xff]  ;;  %v20303_v5 = vld [vmem:[%s25077_s4 + $0x160] sm:$0xff]  }
 0x621   :  { %18346 = vmatpush3.bf16.msra.mxu0 %v20279_v24  ;;  %v9250_v24 = vld [vmem:[#allocation2 + $0x158] sm:$0xff]  ;;  %v12865_v7 = vld [vmem:[#allocation2 + $0x241] sm:$0xff] }
 0x622   :  { %18347 = vmatprep.subr.bf16.mxu0 %v20280_v17 }
 0x623   :  { %18778 = vmatpush3.bf16.msra.mxu1 %v20285_v63  ;;  %v12512_v63 = vld [vmem:[#allocation2 + $0x300] sm:$0xff] }
 0x624   :  { %18316 = vmatmul.mubr.bf16.gmra.mrb[72].mxu0 %v9260_v54  ;;  %18779 = vmatprep.subr.bf16.mxu1 %v20287_v49  ;;  %v12531_v45 = vpack.c.bf16 %v12513_v25, %v12512_v63  ;;  %v9593_v54 = vld [vmem:[#allocation2 + $0x19] sm:$0xff]  ;;  %v20304_v63 = vld [vmem:[%s25077_s4 + $0x168] sm:$0xff]  }
 0x625   :  { %18319 = vmatprep.mubr.bf16.mxu0 %v9261_v48  ;;  %18348 = vmatpush3.bf16.msra.mxu0 %v20280_v17  ;;  %v9268_v17 = vpack.c.bf16 %v9250_v24, %v9249_v52  ;;  %v9270_v48 = vpack.c.bf16 %v9254_v10, %v9253_v43  ;;  %v12868_v52 = vld [vmem:[#allocation2 + $0x261] sm:$0xff]  ;;  %v12869_v43 = vld [vmem:[#allocation2 + $0x271] sm:$0xff]  ;;  %v12870_v10 = vld [vmem:[#allocation2 + $0x279] sm:$0xff] }
 0x626   :  { %18748 = vmatmul.mubr.bf16.gmra.mrb[72].mxu1 %v12523_v6  ;;  %18349 = vmatprep.subr.bf16.mxu0 %v20283_v37  ;;  %v12855_v6 = vld [vmem:[#allocation2 + $0x1c9] sm:$0xff] }
 0x627   :  { %18751 = vmatprep.mubr.bf16.mxu1 %v12524_v26  ;;  %18780 = vmatpush3.bf16.msra.mxu1 %v20287_v49  ;;  %v12532_v49 = vpack.c.bf16 %v12515_v40, %v12514_v44  ;;  %v9625_v26 = vpack.c.bf16 %v9594_v34, %v9593_v54  ;;  %v20299_v24 = vld [vmem:[%s25077_s4 + $0x168] sm:$0xff]  }
 0x628   :  { %18781 = vmatprep.subr.bf16.mxu1 %v20288_v39  ;;  %v9607_v44 = vld [vmem:[#allocation2 + $0xc1] sm:$0xff]  ;;  %v9608_v40 = vld [vmem:[#allocation2 + $0xc9] sm:$0xff] }
 0x629   :  { %18350 = vmatpush3.bf16.msra.mxu0 %v20283_v37  ;;  %v12517_v37 = vld [vmem:[#allocation2 + $0x338] sm:$0xff]  ;;  %v9632_v54 = vpack.c.bf16 %v9608_v40, %v9607_v44  ;;  %v12871_v34 = vld [vmem:[#allocation2 + $0x289] sm:$0xff] }
 0x62a   :  { %18351 = vmatprep.subr.bf16.mxu0 %v20286_v56  ;;  %v9965_v40 = vld [vmem:[#allocation2 + $0x32] sm:$0xff] }
 0x62b   :  { %18782 = vmatpush3.bf16.msra.mxu1 %v20288_v39  ;;  %v12856_v39 = vld [vmem:[#allocation2 + $0x1d1] sm:$0xff] }
 0x62c   :  { %18320 = vmatmul.mubr.bf16.gmra.mrb[76].mxu0 %v9262_v12  ;;  %18783 = vmatprep.subr.bf16.mxu1 %v20290_v4  ;;  %v12887_v19 = vpack.c.bf16 %v12856_v39, %v12855_v6  ;;  %v9626_v12 = vpack.c.bf16 %v9596_v38, %v9595_v13  ;;  %v12894_v6 = vpack.c.bf16 %v12870_v10, %v12869_v43  ;;  %v20307_v39 = vld [vmem:[%s25077_s4 + $0x178] sm:$0xff]   ;;  %v9613_v38 = vld [vmem:[#allocation2 + $0x109] sm:$0xff] }
 0x62d   :  { %18323 = vmatprep.mubr.bf16.mxu0 %v9263_v14  ;;  %18352 = vmatpush3.bf16.msra.mxu0 %v20286_v56  ;;  %v12533_v56 = vpack.c.bf16 %v12517_v37, %v12516_v9  ;;  %v12872_v9 = vld [vmem:[#allocation2 + $0x291] sm:$0xff]  ;;  %v9612_v13 = vld [vmem:[#allocation2 + $0xf9] sm:$0xff]  ;;  %v13226_v43 = vld [vmem:[#allocation2 + $0x1e2] sm:$0xff] }
 0x62e   :  { %18752 = vmatmul.mubr.bf16.gmra.mrb[76].mxu1 %v12525_v3  ;;  %18353 = vmatprep.subr.bf16.mxu0 %v20289_v58  ;;  %v12888_v3 = vpack.c.bf16 %v12858_v46, %v12857_v61  ;;  %v20305_v37 = vld [vmem:[%s25077_s4 + $0x178] sm:$0xff]   ;;  %v12873_v61 = vld [vmem:[#allocation2 + $0x2a1] sm:$0xff]  ;;  %v12874_v46 = vld [vmem:[#allocation2 + $0x2a9] sm:$0xff] }
 0x62f   :  { %18755 = vmatprep.mubr.bf16.mxu1 %v12526_v28  ;;  %18784 = vmatpush3.bf16.msra.mxu1 %v20290_v4  ;;  %v9598_v4 = vld [vmem:[#allocation2 + $0x51] sm:$0xff]  ;;  %v12889_v28 = vpack.c.bf16 %v12860_v47, %v12859_v1  ;;  %v12875_v1 = vld [vmem:[#allocation2 + $0x2b9] sm:$0xff]  ;;  %v12876_v47 = vld [vmem:[#allocation2 + $0x2c1] sm:$0xff] }
 0x630   :  { %18785 = vmatprep.subr.bf16.mxu1 %v20291_v22  ;;  %v9627_v14 = vpack.c.bf16 %v9598_v4, %v9597_v2  ;;  %v9614_v2 = vld [vmem:[#allocation2 + $0x111] sm:$0xff]  ;;  %v23555_v4 = vld [vmem:[%s25077_s4 + $0x180] sm:$0xff]  }
 0x631   :  { %18354 = vmatpush3.bf16.msra.mxu0 %v20289_v58  ;;  %v20293_v58 = vld [vmem:[%s25077_s4 + $0x148] sm:$0xff]  }
 0x632   :  { %18387 = vmatprep.subr.bf16.mxu0 %v23494_v33  ;;  %v13227_v10 = vld [vmem:[#allocation2 + $0x1ea] sm:$0xff] }
 0x633   :  { %18786 = vmatpush3.bf16.msra.mxu1 %v20291_v22  ;;  %v20298_v22 = vld [vmem:[%s25077_s4 + $0x148] sm:$0xff]  }
 0x634   :  { %18324 = vmatmul.mubr.bf16.gmra.mrb[80].mxu0 %v9264_v57  ;;  %18819 = vmatprep.subr.bf16.mxu1 %v23499_v23  ;;  %v12862_v57 = vld [vmem:[#allocation2 + $0x219] sm:$0xff] }
 0x635   :  { %18327 = vmatprep.mubr.bf16.mxu0 %v9265_v35  ;;  %v12864_v35 = vld [vmem:[#allocation2 + $0x231] sm:$0xff] }
 0x636   :  { %18756 = vmatmul.mubr.bf16.gmra.mrb[80].mxu1 %v12527_v51  ;;  %v20295_v51 = vld [vmem:[%s25077_s4 + $0x158] sm:$0xff]   ;;  %v12891_v36 = vpack.c.bf16 %v12864_v35, %v12863_v30 }
 0x637   :  { %18759 = vmatprep.mubr.bf16.mxu1 %v12528_v62  ;;  %v9629_v62 = vpack.c.bf16 %v9602_v59, %v9601_v11  ;;  %v12878_v11 = vld [vmem:[#allocation2 + $0x2d9] sm:$0xff]  ;;  %v9619_v35 = vld [vmem:[#allocation2 + $0x151] sm:$0xff] }
 0x63c   :  { %18328 = vmatmul.mubr.bf16.gmra.mrb[84].mxu0 %v9266_v18  ;;  %v9606_v18 = vld [vmem:[#allocation2 + $0xb1] sm:$0xff] }
 0x63d   :  { %18331 = vmatprep.mubr.bf16.mxu0 %v9267_v8  ;;  %v12866_v8 = vld [vmem:[#allocation2 + $0x249] sm:$0xff]  ;;  %v9631_v15 = vpack.c.bf16 %v9606_v18, %v9605_v41 }
 0x63e   :  { %18760 = vmatmul.mubr.bf16.gmra.mrb[84].mxu1 %v12529_v29  ;;  %v9630_v29 = vpack.c.bf16 %v9604_v16, %v9603_v0  ;;  %v12892_v20 = vpack.c.bf16 %v12866_v8, %v12865_v7  ;;  %v12883_v0 = vld [vmem:[#allocation2 + $0x319] sm:$0xff]  ;;  %v12884_v16 = vld [vmem:[#allocation2 + $0x321] sm:$0xff]  ;;  %v9624_v8 = vld [vmem:[#allocation2 + $0x189] sm:$0xff] }
 0x63f   :  { %18763 = vmatprep.mubr.bf16.mxu1 %v12530_v53  ;;  %v12867_v53 = vld [vmem:[#allocation2 + $0x259] sm:$0xff]  ;;  %v9623_v7 = vld [vmem:[#allocation2 + $0x181] sm:$0xff] }
 0x640   :  { %v12893_v25 = vpack.c.bf16 %v12868_v52, %v12867_v53  ;;  %v9964_v53 = vld [vmem:[#allocation2 + $0x22] sm:$0xff]  ;;  %v12885_v52 = vld [vmem:[#allocation2 + $0x331] sm:$0xff] }
 0x644   :  { %18332 = vmatmul.mubr.bf16.gmra.mrb[88].mxu0 %v9268_v17  ;;  %v20302_v17 = vld [vmem:[%s25077_s4 + $0x170] sm:$0xff]  }
 0x645   :  { %18335 = vmatprep.mubr.bf16.mxu0 %v9269_v42  ;;  %v9609_v42 = vld [vmem:[#allocation2 + $0xd9] sm:$0xff] }
 0x646   :  { %18764 = vmatmul.mubr.bf16.gmra.mrb[88].mxu1 %v12531_v45  ;;  %v9610_v45 = vld [vmem:[#allocation2 + $0xe1] sm:$0xff] }
 0x647   :  { %18767 = vmatprep.mubr.bf16.mxu1 %v12532_v49  ;;  %v20306_v49 = vld [vmem:[%s25077_s4 + $0x170] sm:$0xff]  }
 0x64c   :  { %18336 = vmatmul.mubr.bf16.gmra.mrb[92].mxu0 %v9270_v48  ;;  %v9633_v48 = vpack.c.bf16 %v9610_v45, %v9609_v42  ;;  %v9966_v42 = vld [vmem:[#allocation2 + $0x3a] sm:$0xff]  ;;  %v9967_v45 = vld [vmem:[#allocation2 + $0x4a] sm:$0xff] }
 0x64d   :  { %18355 = vmatprep.mubr.bf16.mxu0 %v9625_v26  ;;  %v12895_v26 = vpack.c.bf16 %v12872_v9, %v12871_v34  ;;  %v13228_v34 = vld [vmem:[#allocation2 + $0x1fa] sm:$0xff]  ;;  %v13229_v9 = vld [vmem:[#allocation2 + $0x202] sm:$0xff] }
 0x64e   :  { %18768 = vmatmul.mubr.bf16.gmra.mrb[92].mxu1 %v12533_v56  ;;  %v23550_v56 = vld [vmem:[%s25077_s4 + $0x180] sm:$0xff]  }
 0x64f   :  { %18787 = vmatprep.mubr.bf16.mxu1 %v12887_v19  ;;  %v9611_v19 = vld [vmem:[#allocation2 + $0xf1] sm:$0xff] }
 0x654   :  { %18356 = vmatmul.mubr.bf16.vlgmr.msra.gmra.mrb[64].mxu0 %v9626_v12  ;;  %v9634_v12 = vpack.c.bf16 %v9612_v13, %v9611_v19  ;;  %v20310_v19 = vld [vmem:[%s25077_s4 + $0x190] sm:$0xff]   ;;  %v9969_v13 = vld [vmem:[#allocation2 + $0x62] sm:$0xff] }
 0x655   :  { %18388 = vmatpush3.bf16.msra.mxu0 %v23494_v33  ;;  %18359 = vmatprep.mubr.bf16.mxu0 %v9627_v14  ;;  %v20300_v33 = vld [vmem:[%s25077_s4 + $0x150] sm:$0xff]   ;;  %v12896_v14 = vpack.c.bf16 %v12874_v46, %v12873_v61  ;;  %v9972_v61 = vld [vmem:[#allocation2 + $0x82] sm:$0xff] }
 0x656   :  { %18788 = vmatmul.mubr.bf16.vlgmr.msra.gmra.mrb[64].mxu1 %v12888_v3  ;;  %18389 = vmatprep.subr.bf16.mxu0 %v20293_v58  ;;  %v12897_v3 = vpack.c.bf16 %v12876_v47, %v12875_v1  ;;  %v13230_v46 = vld [vmem:[#allocation2 + $0x212] sm:$0xff]  ;;  %v13232_v47 = vld [vmem:[#allocation2 + $0x22a] sm:$0xff] }
 0x657   :  { %18791 = vmatprep.mubr.bf16.mxu1 %v12889_v28  ;;  %18820 = vmatpush3.bf16.msra.mxu1 %v23499_v23  ;;  %v12890_v23 = vpack.c.bf16 %v12862_v57, %v12861_v31  ;;  %v9616_v28 = vld [vmem:[#allocation2 + $0x129] sm:$0xff]  ;;  %v12880_v31 = vld [vmem:[#allocation2 + $0x2f1] sm:$0xff] }
 0x658   :  { %18821 = vmatprep.subr.bf16.mxu1 %v20298_v22 }
 0x659   :  { %18390 = vmatpush3.bf16.msra.mxu0 %v20293_v58  ;;  %v9635_v58 = vpack.c.bf16 %v9614_v2, %v9613_v38  ;;  %v9970_v38 = vld [vmem:[#allocation2 + $0x6a] sm:$0xff]  ;;  %v9971_v2 = vld [vmem:[#allocation2 + $0x7a] sm:$0xff] }
 0x65a   :  { %18391 = vmatprep.subr.bf16.mxu0 %v20294_v55  ;;  %v9998_v1 = vpack.c.bf16 %v9970_v38, %v9969_v13  ;;  %v9988_v13 = vld [vmem:[#allocation2 + $0x142] sm:$0xff]  ;;  %v13246_v38 = vld [vmem:[#allocation2 + $0x2d2] sm:$0xff] }
 0x65b   :  { %18822 = vmatpush3.bf16.msra.mxu1 %v20298_v22  ;;  %v9615_v22 = vld [vmem:[#allocation2 + $0x121] sm:$0xff] }
 0x65c   :  { %18360 = vmatmul.mubr.bf16.gmra.mrb[68].mxu0 %v9628_v21  ;;  %18823 = vmatprep.subr.bf16.mxu1 %v20300_v33  ;;  %v9636_v59 = vpack.c.bf16 %v9616_v28, %v9615_v22  ;;  %v12898_v21 = vpack.c.bf16 %v12878_v11, %v12877_v27  ;;  %v20317_v22 = vld [vmem:[%s25077_s4 + $0x198] sm:$0xff]   ;;  %v9975_v11 = vld [vmem:[#allocation2 + $0xaa] sm:$0xff] }
 0x65d   :  { %18363 = vmatprep.mubr.bf16.mxu0 %v9629_v62  ;;  %18392 = vmatpush3.bf16.msra.mxu0 %v20294_v55  ;;  %v9617_v55 = vld [vmem:[#allocation2 + $0x139] sm:$0xff]  ;;  %v9621_v62 = vld [vmem:[#allocation2 + $0x169] sm:$0xff] }
 0x65e   :  { %18792 = vmatmul.mubr.bf16.gmra.mrb[68].mxu1 %v12890_v23  ;;  %18393 = vmatprep.subr.bf16.mxu0 %v20295_v51  ;;  %v9637_v57 = vpack.c.bf16 %v9618_v32, %v9617_v55  ;;  %v9622_v23 = vld [vmem:[#allocation2 + $0x171] sm:$0xff]  ;;  %v20312_v55 = vld [vmem:[%s25077_s4 + $0x1a0] sm:$0xff]  }
 0x65f   :  { %18795 = vmatprep.mubr.bf16.mxu1 %v12891_v36  ;;  %18824 = vmatpush3.bf16.msra.mxu1 %v20300_v33  ;;  %v12879_v33 = vld [vmem:[#allocation2 + $0x2e9] sm:$0xff]  ;;  %v9639_v41 = vpack.c.bf16 %v9622_v23, %v9621_v62  ;;  %v9973_v32 = vld [vmem:[#allocation2 + $0x92] sm:$0xff]  ;;  %v9974_v27 = vld [vmem:[#allocation2 + $0x9a] sm:$0xff] }
 0x660   :  { %18825 = vmatprep.subr.bf16.mxu1 %v20301_v50  ;;  %v12899_v30 = vpack.c.bf16 %v12880_v31, %v12879_v33  ;;  %v12882_v36 = vld [vmem:[#allocation2 + $0x309] sm:$0xff]  ;;  %v20319_v33 = vld [vmem:[%s25077_s4 + $0x1a0] sm:$0xff]  }
 0x661   :  { %18394 = vmatpush3.bf16.msra.mxu0 %v20295_v51  ;;  %v9620_v51 = vld [vmem:[#allocation2 + $0x159] sm:$0xff]  ;;  %v13234_v31 = vld [vmem:[#allocation2 + $0x242] sm:$0xff] }
 0x662   :  { %18395 = vmatprep.subr.bf16.mxu0 %v20296_v60 }
 0x663   :  { %18826 = vmatpush3.bf16.msra.mxu1 %v20301_v50  ;;  %v12881_v50 = vld [vmem:[#allocation2 + $0x301] sm:$0xff] }
 0x664   :  { %18364 = vmatmul.mubr.bf16.gmra.mrb[72].mxu0 %v9630_v29  ;;  %18827 = vmatprep.subr.bf16.mxu1 %v20303_v5  ;;  %v12900_v18 = vpack.c.bf16 %v12882_v36, %v12881_v50  ;;  %v9963_v29 = vld [vmem:[#allocation2 + $0x1a] sm:$0xff]  ;;  %v20320_v50 = vld [vmem:[%s25077_s4 + $0x1a8] sm:$0xff]  }
 0x665   :  { %18367 = vmatprep.mubr.bf16.mxu0 %v9631_v15  ;;  %18396 = vmatpush3.bf16.msra.mxu0 %v20296_v60  ;;  %v9638_v60 = vpack.c.bf16 %v9620_v51, %v9619_v35  ;;  %v9640_v15 = vpack.c.bf16 %v9624_v8, %v9623_v7  ;;  %v13237_v35 = vld [vmem:[#allocation2 + $0x262] sm:$0xff]  ;;  %v13238_v7 = vld [vmem:[#allocation2 + $0x272] sm:$0xff]  ;;  %v13239_v8 = vld [vmem:[#allocation2 + $0x27a] sm:$0xff] }
 0x666   :  { %18796 = vmatmul.mubr.bf16.gmra.mrb[72].mxu1 %v12892_v20  ;;  %18397 = vmatprep.subr.bf16.mxu0 %v20299_v24  ;;  %v13224_v20 = vld [vmem:[#allocation2 + $0x1ca] sm:$0xff] }
 0x667   :  { %18799 = vmatprep.mubr.bf16.mxu1 %v12893_v25  ;;  %18828 = vmatpush3.bf16.msra.mxu1 %v20303_v5  ;;  %v12901_v5 = vpack.c.bf16 %v12884_v16, %v12883_v0  ;;  %v9995_v25 = vpack.c.bf16 %v9964_v53, %v9963_v29  ;;  %v20315_v51 = vld [vmem:[%s25077_s4 + $0x1a8] sm:$0xff]  }
 0x668   :  { %18829 = vmatprep.subr.bf16.mxu1 %v20304_v63  ;;  %v9977_v0 = vld [vmem:[#allocation2 + $0xc2] sm:$0xff]  ;;  %v9978_v16 = vld [vmem:[#allocation2 + $0xca] sm:$0xff] }
 0x669   :  { %18398 = vmatpush3.bf16.msra.mxu0 %v20299_v24  ;;  %v12886_v24 = vld [vmem:[#allocation2 + $0x339] sm:$0xff]  ;;  %v10002_v29 = vpack.c.bf16 %v9978_v16, %v9977_v0  ;;  %v13240_v53 = vld [vmem:[#allocation2 + $0x28a] sm:$0xff] }
 0x66a   :  { %18399 = vmatprep.subr.bf16.mxu0 %v20302_v17  ;;  %v10335_v16 = vld [vmem:[#allocation2 + $0x48] sm:$0xff] }
 0x66b   :  { %18830 = vmatpush3.bf16.msra.mxu1 %v20304_v63  ;;  %v13225_v63 = vld [vmem:[#allocation2 + $0x1d2] sm:$0xff] }
 0x66c   :  { %18368 = vmatmul.mubr.bf16.gmra.mrb[76].mxu0 %v9632_v54  ;;  %18831 = vmatprep.subr.bf16.mxu1 %v20306_v49  ;;  %v13256_v44 = vpack.c.bf16 %v13225_v63, %v13224_v20  ;;  %v9996_v54 = vpack.c.bf16 %v9966_v42, %v9965_v40  ;;  %v13263_v20 = vpack.c.bf16 %v13239_v8, %v13238_v7  ;;  %v20323_v63 = vld [vmem:[%s25077_s4 + $0x1b8] sm:$0xff]   ;;  %v9983_v42 = vld [vmem:[#allocation2 + $0x10a] sm:$0xff]  ;;  %v13596_v8 = vld [vmem:[#allocation2 + $0x200] sm:$0xff] }
 0x66d   :  { %18371 = vmatprep.mubr.bf16.mxu0 %v9633_v48  ;;  %18400 = vmatpush3.bf16.msra.mxu0 %v20302_v17  ;;  %v12902_v17 = vpack.c.bf16 %v12886_v24, %v12885_v52  ;;  %v13241_v52 = vld [vmem:[#allocation2 + $0x292] sm:$0xff]  ;;  %v9982_v40 = vld [vmem:[#allocation2 + $0xfa] sm:$0xff] }
 0x66e   :  { %18800 = vmatmul.mubr.bf16.gmra.mrb[76].mxu1 %v12894_v6  ;;  %18401 = vmatprep.subr.bf16.mxu0 %v20305_v37  ;;  %v13257_v6 = vpack.c.bf16 %v13227_v10, %v13226_v43  ;;  %v20321_v24 = vld [vmem:[%s25077_s4 + $0x1b8] sm:$0xff]   ;;  %v13242_v43 = vld [vmem:[#allocation2 + $0x2a2] sm:$0xff]  ;;  %v13243_v10 = vld [vmem:[#allocation2 + $0x2aa] sm:$0xff] }
 0x66f   :  { %18803 = vmatprep.mubr.bf16.mxu1 %v12895_v26  ;;  %18832 = vmatpush3.bf16.msra.mxu1 %v20306_v49  ;;  %v9968_v49 = vld [vmem:[#allocation2 + $0x52] sm:$0xff]  ;;  %v13258_v26 = vpack.c.bf16 %v13229_v9, %v13228_v34  ;;  %v13244_v34 = vld [vmem:[#allocation2 + $0x2ba] sm:$0xff]  ;;  %v13245_v9 = vld [vmem:[#allocation2 + $0x2c2] sm:$0xff] }
 0x670   :  { %18833 = vmatprep.subr.bf16.mxu1 %v20307_v39  ;;  %v9997_v48 = vpack.c.bf16 %v9968_v49, %v9967_v45  ;;  %v9984_v45 = vld [vmem:[#allocation2 + $0x112] sm:$0xff]  ;;  %v23611_v49 = vld [vmem:[%s25077_s4 + $0x1c0] sm:$0xff]  }
 0x671   :  { %18402 = vmatpush3.bf16.msra.mxu0 %v20305_v37  ;;  %v20309_v37 = vld [vmem:[%s25077_s4 + $0x188] sm:$0xff]   ;;  %v13595_v7 = vld [vmem:[#allocation2 + $0x1f8] sm:$0xff] }
 0x672   :  { %18435 = vmatprep.subr.bf16.mxu0 %v23550_v56 }
 0x673   :  { %18834 = vmatpush3.bf16.msra.mxu1 %v20307_v39  ;;  %v20314_v39 = vld [vmem:[%s25077_s4 + $0x188] sm:$0xff]  }
 0x674   :  { %18372 = vmatmul.mubr.bf16.gmra.mrb[80].mxu0 %v9634_v12  ;;  %18867 = vmatprep.subr.bf16.mxu1 %v23555_v4  ;;  %v13231_v12 = vld [vmem:[#allocation2 + $0x21a] sm:$0xff] }
 0x675   :  { %18375 = vmatprep.mubr.bf16.mxu0 %v9635_v58  ;;  %v13233_v58 = vld [vmem:[#allocation2 + $0x232] sm:$0xff] }
 0x676   :  { %18804 = vmatmul.mubr.bf16.gmra.mrb[80].mxu1 %v12896_v14  ;;  %v20311_v14 = vld [vmem:[%s25077_s4 + $0x198] sm:$0xff]   ;;  %v13260_v28 = vpack.c.bf16 %v13233_v58, %v13232_v47 }
 0x677   :  { %18807 = vmatprep.mubr.bf16.mxu1 %v12897_v3  ;;  %v9999_v3 = vpack.c.bf16 %v9972_v61, %v9971_v2  ;;  %v13247_v2 = vld [vmem:[#allocation2 + $0x2da] sm:$0xff]  ;;  %v9989_v58 = vld [vmem:[#allocation2 + $0x152] sm:$0xff] }
 0x67c   :  { %18376 = vmatmul.mubr.bf16.gmra.mrb[84].mxu0 %v9636_v59  ;;  %v9976_v59 = vld [vmem:[#allocation2 + $0xb2] sm:$0xff] }
 0x67d   :  { %18379 = vmatprep.mubr.bf16.mxu0 %v9637_v57  ;;  %v13235_v57 = vld [vmem:[#allocation2 + $0x24a] sm:$0xff]  ;;  %v10001_v62 = vpack.c.bf16 %v9976_v59, %v9975_v11 }
 0x67e   :  { %18808 = vmatmul.mubr.bf16.gmra.mrb[84].mxu1 %v12898_v21  ;;  %v10000_v21 = vpack.c.bf16 %v9974_v27, %v9973_v32  ;;  %v13261_v23 = vpack.c.bf16 %v13235_v57, %v13234_v31  ;;  %v13252_v32 = vld [vmem:[#allocation2 + $0x31a] sm:$0xff]  ;;  %v13253_v27 = vld [vmem:[#allocation2 + $0x322] sm:$0xff]  ;;  %v9994_v57 = vld [vmem:[#allocation2 + $0x18a] sm:$0xff] }
 0x67f   :  { %18811 = vmatprep.mubr.bf16.mxu1 %v12899_v30  ;;  %v13236_v30 = vld [vmem:[#allocation2 + $0x25a] sm:$0xff]  ;;  %v9993_v31 = vld [vmem:[#allocation2 + $0x182] sm:$0xff] }
 0x680   :  { %v13262_v36 = vpack.c.bf16 %v13237_v35, %v13236_v30  ;;  %v10334_v30 = vld [vmem:[#allocation2 + $0x38] sm:$0xff] }
 0x681   :  { %v13254_v35 = vld [vmem:[#allocation2 + $0x332] sm:$0xff] }
 0x684   :  { %18380 = vmatmul.mubr.bf16.gmra.mrb[88].mxu0 %v9638_v60  ;;  %v20318_v60 = vld [vmem:[%s25077_s4 + $0x1b0] sm:$0xff]  }
 0x685   :  { %18383 = vmatprep.mubr.bf16.mxu0 %v9639_v41  ;;  %v9979_v41 = vld [vmem:[#allocation2 + $0xda] sm:$0xff] }
 0x686   :  { %18812 = vmatmul.mubr.bf16.gmra.mrb[88].mxu1 %v12900_v18  ;;  %v9980_v18 = vld [vmem:[#allocation2 + $0xe2] sm:$0xff] }
 0x687   :  { %18815 = vmatprep.mubr.bf16.mxu1 %v12901_v5  ;;  %v20322_v5 = vld [vmem:[%s25077_s4 + $0x1b0] sm:$0xff]  }
 0x68c   :  { %18384 = vmatmul.mubr.bf16.gmra.mrb[92].mxu0 %v9640_v15  ;;  %v10003_v15 = vpack.c.bf16 %v9980_v18, %v9979_v41  ;;  %v10336_v41 = vld [vmem:[#allocation2 + $0x50] sm:$0xff]  ;;  %v10337_v18 = vld [vmem:[#allocation2 + $0x60] sm:$0xff] }
 0x68d   :  { %18403 = vmatprep.mubr.bf16.mxu0 %v9995_v25  ;;  %v13264_v25 = vpack.c.bf16 %v13241_v52, %v13240_v53  ;;  %v13597_v53 = vld [vmem:[#allocation2 + $0x210] sm:$0xff]  ;;  %v13598_v52 = vld [vmem:[#allocation2 + $0x218] sm:$0xff] }
 0x68e   :  { %18816 = vmatmul.mubr.bf16.gmra.mrb[92].mxu1 %v12902_v17  ;;  %v23606_v17 = vld [vmem:[%s25077_s4 + $0x1c0] sm:$0xff]  }
 0x68f   :  { %18835 = vmatprep.mubr.bf16.mxu1 %v13256_v44  ;;  %v9981_v44 = vld [vmem:[#allocation2 + $0xf2] sm:$0xff] }
 0x694   :  { %18404 = vmatmul.mubr.bf16.vlgmr.msra.gmra.mrb[64].mxu0 %v9996_v54  ;;  %v10004_v54 = vpack.c.bf16 %v9982_v40, %v9981_v44  ;;  %v20326_v44 = vld [vmem:[%s25077_s4 + $0x1d0] sm:$0xff]   ;;  %v10339_v40 = vld [vmem:[#allocation2 + $0x78] sm:$0xff] }
 0x695   :  { %18436 = vmatpush3.bf16.msra.mxu0 %v23550_v56  ;;  %18407 = vmatprep.mubr.bf16.mxu0 %v9997_v48  ;;  %v20316_v56 = vld [vmem:[%s25077_s4 + $0x190] sm:$0xff]   ;;  %v13265_v48 = vpack.c.bf16 %v13243_v10, %v13242_v43  ;;  %v10342_v43 = vld [vmem:[#allocation2 + $0x98] sm:$0xff]  ;;  %v13599_v10 = vld [vmem:[#allocation2 + $0x228] sm:$0xff] }
 0x696   :  { %18836 = vmatmul.mubr.bf16.vlgmr.msra.gmra.mrb[64].mxu1 %v13257_v6  ;;  %18437 = vmatprep.subr.bf16.mxu0 %v20309_v37  ;;  %v13266_v6 = vpack.c.bf16 %v13245_v9, %v13244_v34  ;;  %v13601_v9 = vld [vmem:[#allocation2 + $0x240] sm:$0xff] }
 0x697   :  { %18839 = vmatprep.mubr.bf16.mxu1 %v13258_v26  ;;  %18868 = vmatpush3.bf16.msra.mxu1 %v23555_v4  ;;  %v13259_v4 = vpack.c.bf16 %v13231_v12, %v13230_v46  ;;  %v9986_v26 = vld [vmem:[#allocation2 + $0x12a] sm:$0xff]  ;;  %v13249_v46 = vld [vmem:[#allocation2 + $0x2f2] sm:$0xff] }
 0x698   :  { %18869 = vmatprep.subr.bf16.mxu1 %v20314_v39 }
 0x699   :  { %18438 = vmatpush3.bf16.msra.mxu0 %v20309_v37  ;;  %v10005_v37 = vpack.c.bf16 %v9984_v45, %v9983_v42  ;;  %v10340_v42 = vld [vmem:[#allocation2 + $0x80] sm:$0xff]  ;;  %v10341_v45 = vld [vmem:[#allocation2 + $0x90] sm:$0xff] }
 0x69a   :  { %18439 = vmatprep.subr.bf16.mxu0 %v20310_v19  ;;  %v10368_v34 = vpack.c.bf16 %v10340_v42, %v10339_v40  ;;  %v10358_v40 = vld [vmem:[#allocation2 + $0x158] sm:$0xff]  ;;  %v13615_v42 = vld [vmem:[#allocation2 + $0x2e8] sm:$0xff] }
 0x69b   :  { %18870 = vmatpush3.bf16.msra.mxu1 %v20314_v39  ;;  %v9985_v39 = vld [vmem:[#allocation2 + $0x122] sm:$0xff] }
 0x69c   :  { %18408 = vmatmul.mubr.bf16.gmra.mrb[68].mxu0 %v9998_v1  ;;  %18871 = vmatprep.subr.bf16.mxu1 %v20316_v56  ;;  %v10006_v61 = vpack.c.bf16 %v9986_v26, %v9985_v39  ;;  %v13267_v1 = vpack.c.bf16 %v13247_v2, %v13246_v38  ;;  %v20333_v39 = vld [vmem:[%s25077_s4 + $0x1d8] sm:$0xff]   ;;  %v10344_v38 = vld [vmem:[#allocation2 + $0xb0] sm:$0xff]  ;;  %v10345_v2 = vld [vmem:[#allocation2 + $0xc0] sm:$0xff] }
 0x69d   :  { %18411 = vmatprep.mubr.bf16.mxu0 %v9999_v3  ;;  %18440 = vmatpush3.bf16.msra.mxu0 %v20310_v19  ;;  %v9987_v19 = vld [vmem:[#allocation2 + $0x13a] sm:$0xff]  ;;  %v9991_v3 = vld [vmem:[#allocation2 + $0x16a] sm:$0xff] }
 0x69e   :  { %18840 = vmatmul.mubr.bf16.gmra.mrb[68].mxu1 %v13259_v4  ;;  %18441 = vmatprep.subr.bf16.mxu0 %v20311_v14  ;;  %v10007_v12 = vpack.c.bf16 %v9988_v13, %v9987_v19  ;;  %v9992_v4 = vld [vmem:[#allocation2 + $0x172] sm:$0xff]  ;;  %v20328_v19 = vld [vmem:[%s25077_s4 + $0x1e0] sm:$0xff]   ;;  %v10343_v13 = vld [vmem:[#allocation2 + $0xa8] sm:$0xff] }
 0x69f   :  { %18843 = vmatprep.mubr.bf16.mxu1 %v13260_v28  ;;  %18872 = vmatpush3.bf16.msra.mxu1 %v20316_v56  ;;  %v13248_v56 = vld [vmem:[#allocation2 + $0x2ea] sm:$0xff]  ;;  %v10009_v11 = vpack.c.bf16 %v9992_v4, %v9991_v3 }
 0x6a0   :  { %18873 = vmatprep.subr.bf16.mxu1 %v20317_v22  ;;  %v13268_v47 = vpack.c.bf16 %v13249_v46, %v13248_v56  ;;  %v13251_v28 = vld [vmem:[#allocation2 + $0x30a] sm:$0xff]  ;;  %v20335_v56 = vld [vmem:[%s25077_s4 + $0x1e0] sm:$0xff]   ;;  %v13603_v46 = vld [vmem:[#allocation2 + $0x258] sm:$0xff] }
 0x6a1   :  { %18442 = vmatpush3.bf16.msra.mxu0 %v20311_v14  ;;  %v9990_v14 = vld [vmem:[#allocation2 + $0x15a] sm:$0xff] }
 0x6a2   :  { %18443 = vmatprep.subr.bf16.mxu0 %v20312_v55 }
 0x6a3   :  { %18874 = vmatpush3.bf16.msra.mxu1 %v20317_v22  ;;  %v13250_v22 = vld [vmem:[#allocation2 + $0x302] sm:$0xff] }
 0x6a4   :  { %18412 = vmatmul.mubr.bf16.gmra.mrb[72].mxu0 %v10000_v21  ;;  %18875 = vmatprep.subr.bf16.mxu1 %v20319_v33  ;;  %v13269_v59 = vpack.c.bf16 %v13251_v28, %v13250_v22  ;;  %v10333_v21 = vld [vmem:[#allocation2 + $0x30] sm:$0xff]  ;;  %v20336_v22 = vld [vmem:[%s25077_s4 + $0x1e8] sm:$0xff]  }
 0x6a5   :  { %18415 = vmatprep.mubr.bf16.mxu0 %v10001_v62  ;;  %18444 = vmatpush3.bf16.msra.mxu0 %v20312_v55  ;;  %v10008_v55 = vpack.c.bf16 %v9990_v14, %v9989_v58  ;;  %v10010_v62 = vpack.c.bf16 %v9994_v57, %v9993_v31  ;;  %v13606_v58 = vld [vmem:[#allocation2 + $0x278] sm:$0xff]  ;;  %v20331_v14 = vld [vmem:[%s25077_s4 + $0x1e8] sm:$0xff]   ;;  %v13608_v57 = vld [vmem:[#allocation2 + $0x290] sm:$0xff] }
 0x6a6   :  { %18844 = vmatmul.mubr.bf16.gmra.mrb[72].mxu1 %v13261_v23  ;;  %18445 = vmatprep.subr.bf16.mxu0 %v20315_v51  ;;  %v13593_v23 = vld [vmem:[#allocation2 + $0x1e0] sm:$0xff]  ;;  %v13607_v31 = vld [vmem:[#allocation2 + $0x288] sm:$0xff] }
 0x6a7   :  { %18847 = vmatprep.mubr.bf16.mxu1 %v13262_v36  ;;  %18876 = vmatpush3.bf16.msra.mxu1 %v20319_v33  ;;  %v13270_v33 = vpack.c.bf16 %v13253_v27, %v13252_v32  ;;  %v10365_v36 = vpack.c.bf16 %v10334_v30, %v10333_v21  ;;  %v10347_v32 = vld [vmem:[#allocation2 + $0xd8] sm:$0xff]  ;;  %v10348_v27 = vld [vmem:[#allocation2 + $0xe0] sm:$0xff] }
 0x6a8   :  { %18877 = vmatprep.subr.bf16.mxu1 %v20320_v50  ;;  %v10372_v21 = vpack.c.bf16 %v10348_v27, %v10347_v32  ;;  %v13609_v30 = vld [vmem:[#allocation2 + $0x2a0] sm:$0xff]  ;;  %v10708_v32 = vld [vmem:[#allocation2 + $0x69] sm:$0xff] }
 0x6a9   :  { %18446 = vmatpush3.bf16.msra.mxu0 %v20315_v51  ;;  %v13255_v51 = vld [vmem:[#allocation2 + $0x33a] sm:$0xff] }
 0x6aa   :  { %18447 = vmatprep.subr.bf16.mxu0 %v20318_v60  ;;  %v13964_v27 = vld [vmem:[#allocation2 + $0x1f9] sm:$0xff] }
 0x6ab   :  { %18878 = vmatpush3.bf16.msra.mxu1 %v20320_v50  ;;  %v13594_v50 = vld [vmem:[#allocation2 + $0x1e8] sm:$0xff] }
 0x6ac   :  { %18416 = vmatmul.mubr.bf16.gmra.mrb[76].mxu0 %v10002_v29  ;;  %18879 = vmatprep.subr.bf16.mxu1 %v20322_v5  ;;  %v13625_v0 = vpack.c.bf16 %v13594_v50, %v13593_v23  ;;  %v10366_v29 = vpack.c.bf16 %v10336_v41, %v10335_v16  ;;  %v13632_v23 = vpack.c.bf16 %v13608_v57, %v13607_v31  ;;  %v20339_v50 = vld [vmem:[%s25077_s4 + $0x1f8] sm:$0xff]   ;;  %v10352_v16 = vld [vmem:[#allocation2 + $0x110] sm:$0xff]  ;;  %v10353_v41 = vld [vmem:[#allocation2 + $0x120] sm:$0xff] }
 0x6ad   :  { %18419 = vmatprep.mubr.bf16.mxu0 %v10003_v15  ;;  %18448 = vmatpush3.bf16.msra.mxu0 %v20318_v60  ;;  %v13271_v60 = vpack.c.bf16 %v13255_v51, %v13254_v35  ;;  %v13610_v35 = vld [vmem:[#allocation2 + $0x2a8] sm:$0xff]  ;;  %v20337_v51 = vld [vmem:[%s25077_s4 + $0x1f8] sm:$0xff]  }
 0x6ae   :  { %18848 = vmatmul.mubr.bf16.gmra.mrb[76].mxu1 %v13263_v20  ;;  %18449 = vmatprep.subr.bf16.mxu0 %v20321_v24  ;;  %v13626_v20 = vpack.c.bf16 %v13596_v8, %v13595_v7  ;;  %v13611_v7 = vld [vmem:[#allocation2 + $0x2b8] sm:$0xff]  ;;  %v13612_v8 = vld [vmem:[#allocation2 + $0x2c0] sm:$0xff]  ;;  %v20341_v57 = vld [vmem:[%s25077_s4 + $0x208] sm:$0xff]  }
 0x6af   :  { %18851 = vmatprep.mubr.bf16.mxu1 %v13264_v25  ;;  %18880 = vmatpush3.bf16.msra.mxu1 %v20322_v5  ;;  %v10338_v5 = vld [vmem:[#allocation2 + $0x68] sm:$0xff]  ;;  %v13627_v25 = vpack.c.bf16 %v13598_v52, %v13597_v53  ;;  %v13613_v53 = vld [vmem:[#allocation2 + $0x2d0] sm:$0xff]  ;;  %v13614_v52 = vld [vmem:[#allocation2 + $0x2d8] sm:$0xff] }
 0x6b0   :  { %18881 = vmatprep.subr.bf16.mxu1 %v20323_v63  ;;  %v10367_v15 = vpack.c.bf16 %v10338_v5, %v10337_v18  ;;  %v10354_v18 = vld [vmem:[#allocation2 + $0x128] sm:$0xff]  ;;  %v23667_v5 = vld [vmem:[%s25077_s4 + $0x200] sm:$0xff]  }
 0x6b1   :  { %18450 = vmatpush3.bf16.msra.mxu0 %v20321_v24  ;;  %v20325_v24 = vld [vmem:[%s25077_s4 + $0x1c8] sm:$0xff]   ;;  %v13967_v31 = vld [vmem:[#allocation2 + $0x219] sm:$0xff] }
 0x6b2   :  { %18483 = vmatprep.subr.bf16.mxu0 %v23606_v17 }
 0x6b3   :  { %18882 = vmatpush3.bf16.msra.mxu1 %v20323_v63  ;;  %v20330_v63 = vld [vmem:[%s25077_s4 + $0x1c8] sm:$0xff]  }
 0x6b4   :  { %18420 = vmatmul.mubr.bf16.gmra.mrb[80].mxu0 %v10004_v54  ;;  %18915 = vmatprep.subr.bf16.mxu1 %v23611_v49  ;;  %v13600_v54 = vld [vmem:[#allocation2 + $0x230] sm:$0xff] }
 0x6b5   :  { %18423 = vmatprep.mubr.bf16.mxu0 %v10005_v37  ;;  %v13602_v37 = vld [vmem:[#allocation2 + $0x248] sm:$0xff] }
 0x6b6   :  { %18852 = vmatmul.mubr.bf16.gmra.mrb[80].mxu1 %v13265_v48  ;;  %v20327_v48 = vld [vmem:[%s25077_s4 + $0x1d8] sm:$0xff]   ;;  %v13629_v26 = vpack.c.bf16 %v13602_v37, %v13601_v9  ;;  %v10359_v37 = vld [vmem:[#allocation2 + $0x168] sm:$0xff] }
 0x6b7   :  { %18855 = vmatprep.mubr.bf16.mxu1 %v13266_v6  ;;  %v10369_v6 = vpack.c.bf16 %v10342_v43, %v10341_v45  ;;  %v13616_v45 = vld [vmem:[#allocation2 + $0x2f0] sm:$0xff] }
 0x6bc   :  { %18424 = vmatmul.mubr.bf16.gmra.mrb[84].mxu0 %v10006_v61  ;;  %v10346_v61 = vld [vmem:[#allocation2 + $0xc8] sm:$0xff] }
 0x6bd   :  { %18427 = vmatprep.mubr.bf16.mxu0 %v10007_v12  ;;  %v13604_v12 = vld [vmem:[#allocation2 + $0x260] sm:$0xff]  ;;  %v10371_v3 = vpack.c.bf16 %v10346_v61, %v10345_v2 }
 0x6be   :  { %18856 = vmatmul.mubr.bf16.gmra.mrb[84].mxu1 %v13267_v1  ;;  %v10370_v1 = vpack.c.bf16 %v10344_v38, %v10343_v13  ;;  %v13630_v4 = vpack.c.bf16 %v13604_v12, %v13603_v46  ;;  %v13621_v13 = vld [vmem:[#allocation2 + $0x330] sm:$0xff]  ;;  %v13622_v38 = vld [vmem:[#allocation2 + $0x338] sm:$0xff]  ;;  %v20365_v46 = vld [vmem:[#allocation2] sm:$0xff] }
 0x6bf   :  { %18859 = vmatprep.mubr.bf16.mxu1 %v13268_v47  ;;  %v13605_v47 = vld [vmem:[#allocation2 + $0x270] sm:$0xff]  ;;  %v10380_v12 = vpack.c.bf16 %v20365_v46, %v20365_v46 }
 0x6c0   :  { %v13631_v28 = vpack.c.bf16 %v13606_v58, %v13605_v47  ;;  %v10704_v47 = vld [vmem:[#allocation2 + $0x39] sm:$0xff]  ;;  %v13962_v58 = vld [vmem:[#allocation2 + $0x1e1] sm:$0xff]  ;;  %v13979_v46 = vld [vmem:[#allocation2 + $0x2a9] sm:$0xff] }
 0x6c4   :  { %18428 = vmatmul.mubr.bf16.gmra.mrb[88].mxu0 %v10008_v55  ;;  %v20334_v55 = vld [vmem:[%s25077_s4 + $0x1f0] sm:$0xff]  }
 0x6c5   :  { %18431 = vmatprep.mubr.bf16.mxu0 %v10009_v11  ;;  %v10349_v11 = vld [vmem:[#allocation2 + $0xf0] sm:$0xff] }
 0x6c6   :  { %18860 = vmatmul.mubr.bf16.gmra.mrb[88].mxu1 %v13269_v59  ;;  %v10350_v59 = vld [vmem:[#allocation2 + $0xf8] sm:$0xff] }
 0x6c7   :  { %18863 = vmatprep.mubr.bf16.mxu1 %v13270_v33  ;;  %v20338_v33 = vld [vmem:[%s25077_s4 + $0x1f0] sm:$0xff]  }
 0x6cc   :  { %18432 = vmatmul.mubr.bf16.gmra.mrb[92].mxu0 %v10010_v62  ;;  %v10373_v62 = vpack.c.bf16 %v10350_v59, %v10349_v11  ;;  %v13965_v11 = vld [vmem:[#allocation2 + $0x201] sm:$0xff] }
 0x6cd   :  { %18451 = vmatprep.mubr.bf16.mxu0 %v10365_v36  ;;  %v13633_v36 = vpack.c.bf16 %v13610_v35, %v13609_v30  ;;  %v13995_v30 = vpack.c.bf16 %v13965_v11, %v13964_v27  ;;  %v20346_v35 = vld [vmem:[%s25077_s4 + $0x208] sm:$0xff]   ;;  %v13982_v11 = vld [vmem:[#allocation2 + $0x2d1] sm:$0xff] }
 0x6ce   :  { %18864 = vmatmul.mubr.bf16.gmra.mrb[92].mxu1 %v13271_v60  ;;  %v23662_v60 = vld [vmem:[%s25077_s4 + $0x200] sm:$0xff]  }
 0x6cf   :  { %18883 = vmatprep.mubr.bf16.mxu1 %v13625_v0  ;;  %v10351_v0 = vld [vmem:[#allocation2 + $0x108] sm:$0xff] }
 0x6d4   :  { %18452 = vmatmul.mubr.bf16.vlgmr.msra.gmra.mrb[64].mxu0 %v10366_v29  ;;  %v10374_v29 = vpack.c.bf16 %v10352_v16, %v10351_v0  ;;  %v10712_v0 = vld [vmem:[#allocation2 + $0x99] sm:$0xff]  ;;  %v13968_v16 = vld [vmem:[#allocation2 + $0x229] sm:$0xff] }
 0x6d5   :  { %18484 = vmatpush3.bf16.msra.mxu0 %v23606_v17  ;;  %18455 = vmatprep.mubr.bf16.mxu0 %v10367_v15  ;;  %v20332_v17 = vld [vmem:[%s25077_s4 + $0x1d0] sm:$0xff]   ;;  %v13634_v15 = vpack.c.bf16 %v13612_v8, %v13611_v7  ;;  %v13970_v7 = vld [vmem:[#allocation2 + $0x241] sm:$0xff] }
 0x6d6   :  { %18884 = vmatmul.mubr.bf16.vlgmr.msra.gmra.mrb[64].mxu1 %v13626_v20  ;;  %18485 = vmatprep.subr.bf16.mxu0 %v20325_v24  ;;  %v13635_v20 = vpack.c.bf16 %v13614_v52, %v13613_v53  ;;  %v13971_v8 = vld [vmem:[#allocation2 + $0x249] sm:$0xff]  ;;  %v20349_v52 = vld [vmem:[%s25077_s4 + $0x218] sm:$0xff]  }
 0x6d7   :  { %18887 = vmatprep.mubr.bf16.mxu1 %v13627_v25  ;;  %18916 = vmatpush3.bf16.msra.mxu1 %v23611_v49  ;;  %v13628_v49 = vpack.c.bf16 %v13600_v54, %v13599_v10  ;;  %v10356_v25 = vld [vmem:[#allocation2 + $0x140] sm:$0xff]  ;;  %v13618_v10 = vld [vmem:[#allocation2 + $0x308] sm:$0xff] }
 0x6d8   :  { %18917 = vmatprep.subr.bf16.mxu1 %v20330_v63 }
 0x6d9   :  { %18486 = vmatpush3.bf16.msra.mxu0 %v20325_v24  ;;  %v10375_v24 = vpack.c.bf16 %v10354_v18, %v10353_v41  ;;  %v13969_v41 = vld [vmem:[#allocation2 + $0x231] sm:$0xff] }
 0x6da   :  { %18487 = vmatprep.subr.bf16.mxu0 %v20326_v44 }
 0x6db   :  { %18918 = vmatpush3.bf16.msra.mxu1 %v20330_v63  ;;  %v10355_v63 = vld [vmem:[#allocation2 + $0x138] sm:$0xff] }
 0x6dc   :  { %18456 = vmatmul.mubr.bf16.gmra.mrb[68].mxu0 %v10368_v34  ;;  %18919 = vmatprep.subr.bf16.mxu1 %v20332_v17  ;;  %v10376_v43 = vpack.c.bf16 %v10356_v25, %v10355_v63  ;;  %v13636_v34 = vpack.c.bf16 %v13616_v45, %v13615_v42  ;;  %v10714_v63 = vld [vmem:[#allocation2 + $0xb1] sm:$0xff]  ;;  %v10715_v25 = vld [vmem:[#allocation2 + $0xc1] sm:$0xff]  ;;  %v13972_v42 = vld [vmem:[#allocation2 + $0x259] sm:$0xff] }
 0x6dd   :  { %18459 = vmatprep.mubr.bf16.mxu0 %v10369_v6  ;;  %18488 = vmatpush3.bf16.msra.mxu0 %v20326_v44  ;;  %v10357_v44 = vld [vmem:[#allocation2 + $0x150] sm:$0xff]  ;;  %v10361_v6 = vld [vmem:[#allocation2 + $0x180] sm:$0xff] }
 0x6de   :  { %18888 = vmatmul.mubr.bf16.gmra.mrb[68].mxu1 %v13628_v49  ;;  %18489 = vmatprep.subr.bf16.mxu0 %v20327_v48  ;;  %v10377_v54 = vpack.c.bf16 %v10358_v40, %v10357_v44  ;;  %v10362_v49 = vld [vmem:[#allocation2 + $0x188] sm:$0xff]  ;;  %v20351_v40 = vld [vmem:[%s25077_s4 + $0x220] sm:$0xff]  }
 0x6df   :  { %18891 = vmatprep.mubr.bf16.mxu1 %v13629_v26  ;;  %18920 = vmatpush3.bf16.msra.mxu1 %v20332_v17  ;;  %v13617_v17 = vld [vmem:[#allocation2 + $0x300] sm:$0xff]  ;;  %v10379_v2 = vpack.c.bf16 %v10362_v49, %v10361_v6  ;;  %v10716_v44 = vld [vmem:[#allocation2 + $0xc9] sm:$0xff] }
 0x6e0   :  { %18921 = vmatprep.subr.bf16.mxu1 %v20333_v39  ;;  %v13637_v9 = vpack.c.bf16 %v13618_v10, %v13617_v17  ;;  %v13620_v26 = vld [vmem:[#allocation2 + $0x320] sm:$0xff]  ;;  %v13974_v17 = vld [vmem:[#allocation2 + $0x271] sm:$0xff] }
 0x6e1   :  { %18490 = vmatpush3.bf16.msra.mxu0 %v20327_v48  ;;  %v10360_v48 = vld [vmem:[#allocation2 + $0x170] sm:$0xff]  ;;  %v13973_v45 = vld [vmem:[#allocation2 + $0x261] sm:$0xff]  ;;  %v13975_v10 = vld [vmem:[#allocation2 + $0x279] sm:$0xff] }
 0x6e2   :  { %18491 = vmatprep.subr.bf16.mxu0 %v20328_v19  ;;  %v20350_v6 = vld [vmem:[%s25077_s4 + $0x230] sm:$0xff]   ;;  %v10717_v49 = vld [vmem:[#allocation2 + $0xd9] sm:$0xff] }
 0x6e3   :  { %18922 = vmatpush3.bf16.msra.mxu1 %v20333_v39  ;;  %v13619_v39 = vld [vmem:[#allocation2 + $0x318] sm:$0xff] }
 0x6e4   :  { %18460 = vmatmul.mubr.bf16.gmra.mrb[72].mxu0 %v10370_v1  ;;  %18923 = vmatprep.subr.bf16.mxu1 %v20335_v56  ;;  %v13638_v61 = vpack.c.bf16 %v13620_v26, %v13619_v39  ;;  %v10703_v1 = vld [vmem:[#allocation2 + $0x31] sm:$0xff]  ;;  %v10718_v39 = vld [vmem:[#allocation2 + $0xe1] sm:$0xff] }
 0x6e5   :  { %18463 = vmatprep.mubr.bf16.mxu0 %v10371_v3  ;;  %18492 = vmatpush3.bf16.msra.mxu0 %v20328_v19  ;;  %v10378_v19 = vpack.c.bf16 %v10360_v48, %v10359_v37  ;;  %v10735_v3 = vpack.c.bf16 %v10704_v47, %v10703_v1  ;;  %v20352_v37 = vld [vmem:[%s25077_s4 + $0x228] sm:$0xff]   ;;  %v14000_v48 = vpack.c.bf16 %v13975_v10, %v13974_v17  ;;  %v10719_v26 = vld [vmem:[#allocation2 + $0xf1] sm:$0xff]  ;;  %v11074_v10 = vld [vmem:[#allocation2 + $0x3a] sm:$0xff] }
 0x6e6   :  { %18892 = vmatmul.mubr.bf16.gmra.mrb[72].mxu1 %v13630_v4  ;;  %18493 = vmatprep.subr.bf16.mxu0 %v20331_v14  ;;  %v11073_v17 = vld [vmem:[#allocation2 + $0x32] sm:$0xff] }
 0x6e7   :  { %18895 = vmatprep.mubr.bf16.mxu1 %v13631_v28  ;;  %18924 = vmatpush3.bf16.msra.mxu1 %v20335_v56  ;;  %v13639_v56 = vpack.c.bf16 %v13622_v38, %v13621_v13  ;;  %v10706_v28 = vld [vmem:[#allocation2 + $0x51] sm:$0xff]  ;;  %v13976_v38 = vld [vmem:[#allocation2 + $0x289] sm:$0xff] }
 0x6e8   :  { %18925 = vmatprep.subr.bf16.mxu1 %v20336_v22  ;;  %v20354_v13 = vld [vmem:[%s25077_s4 + $0x230] sm:$0xff]  }
 0x6e9   :  { %18494 = vmatpush3.bf16.msra.mxu0 %v20331_v14  ;;  %v13963_v14 = vld [vmem:[#allocation2 + $0x1e9] sm:$0xff] }
 0x6ea   :  { %18495 = vmatprep.subr.bf16.mxu0 %v20334_v55  ;;  %v13994_v4 = vpack.c.bf16 %v13963_v14, %v13962_v58  ;;  %v20355_v58 = vld [vmem:[%s25077_s4 + $0x238] sm:$0xff]  }
 0x6eb   :  { %18926 = vmatpush3.bf16.msra.mxu1 %v20336_v22  ;;  %v10705_v22 = vld [vmem:[#allocation2 + $0x49] sm:$0xff] }
 0x6ec   :  { %18464 = vmatmul.mubr.bf16.gmra.mrb[76].mxu0 %v10372_v21  ;;  %18927 = vmatprep.subr.bf16.mxu1 %v20338_v33  ;;  %v10736_v59 = vpack.c.bf16 %v10706_v28, %v10705_v22  ;;  %v10723_v22 = vld [vmem:[#allocation2 + $0x121] sm:$0xff]  ;;  %v10724_v28 = vld [vmem:[#allocation2 + $0x129] sm:$0xff] }
 0x6ed   :  { %18467 = vmatprep.mubr.bf16.mxu0 %v10373_v62  ;;  %18496 = vmatpush3.bf16.msra.mxu0 %v20334_v55  ;;  %v10707_v55 = vld [vmem:[#allocation2 + $0x61] sm:$0xff]  ;;  %v20342_v62 = vld [vmem:[%s25077_s4 + $0x210] sm:$0xff]  }
 0x6ee   :  { %18896 = vmatmul.mubr.bf16.gmra.mrb[76].mxu1 %v13632_v23  ;;  %18497 = vmatprep.subr.bf16.mxu0 %v20337_v51  ;;  %v10737_v21 = vpack.c.bf16 %v10708_v32, %v10707_v55  ;;  %v10709_v23 = vld [vmem:[#allocation2 + $0x79] sm:$0xff]  ;;  %v13981_v32 = vld [vmem:[#allocation2 + $0x2c1] sm:$0xff] }
 0x6ef   :  { %18899 = vmatprep.mubr.bf16.mxu1 %v13633_v36  ;;  %18928 = vmatpush3.bf16.msra.mxu1 %v20338_v33  ;;  %v13966_v33 = vld [vmem:[#allocation2 + $0x211] sm:$0xff]  ;;  %v13980_v55 = vld [vmem:[#allocation2 + $0x2b9] sm:$0xff] }
 0x6f0   :  { %18929 = vmatprep.subr.bf16.mxu1 %v20339_v50  ;;  %v10711_v36 = vld [vmem:[#allocation2 + $0x91] sm:$0xff] }
 0x6f1   :  { %18498 = vmatpush3.bf16.msra.mxu0 %v20337_v51  ;;  %v13996_v51 = vpack.c.bf16 %v13967_v31, %v13966_v33  ;;  %v10739_v53 = vpack.c.bf16 %v10712_v0, %v10711_v36  ;;  %v10745_v33 = vpack.c.bf16 %v10724_v28, %v10723_v22  ;;  %v14003_v31 = vpack.c.bf16 %v13981_v32, %v13980_v55  ;;  %v13986_v36 = vld [vmem:[#allocation2 + $0x301] sm:$0xff]  ;;  %v13987_v0 = vld [vmem:[#allocation2 + $0x309] sm:$0xff] }
 0x6f2   :  { %18531 = vmatprep.subr.bf16.mxu0 %v23662_v60  ;;  %v14339_v28 = vld [vmem:[#allocation2 + $0x242] sm:$0xff]  ;;  %v14340_v55 = vld [vmem:[#allocation2 + $0x24a] sm:$0xff] }
 0x6f3   :  { %18930 = vmatpush3.bf16.msra.mxu1 %v20339_v50  ;;  %v10710_v50 = vld [vmem:[#allocation2 + $0x81] sm:$0xff] }
 0x6f4   :  { %18468 = vmatmul.mubr.bf16.gmra.mrb[80].mxu0 %v10374_v29  ;;  %18963 = vmatprep.subr.bf16.mxu1 %v23667_v5  ;;  %v10738_v18 = vpack.c.bf16 %v10710_v50, %v10709_v23  ;;  %v20343_v29 = vld [vmem:[%s25077_s4 + $0x218] sm:$0xff]  }
 0x6f5   :  { %18471 = vmatprep.mubr.bf16.mxu0 %v10375_v24  ;;  %v13998_v24 = vpack.c.bf16 %v13971_v8, %v13970_v7  ;;  %v13985_v23 = vld [vmem:[#allocation2 + $0x2f1] sm:$0xff]  ;;  %v10731_v8 = vld [vmem:[#allocation2 + $0x181] sm:$0xff] }
 0x6f6   :  { %18900 = vmatmul.mubr.bf16.gmra.mrb[80].mxu1 %v13634_v15  ;;  %v20344_v15 = vld [vmem:[%s25077_s4 + $0x220] sm:$0xff]   ;;  %v10730_v7 = vld [vmem:[#allocation2 + $0x171] sm:$0xff] }
 0x6f7   :  { %18903 = vmatprep.mubr.bf16.mxu1 %v13635_v20  ;;  %v10713_v20 = vld [vmem:[#allocation2 + $0xa9] sm:$0xff] }
 0x6fc   :  { %18472 = vmatmul.mubr.bf16.gmra.mrb[84].mxu0 %v10376_v43  ;;  %v10740_v43 = vpack.c.bf16 %v10714_v63, %v10713_v20 }
 0x6fd   :  { %18475 = vmatprep.mubr.bf16.mxu0 %v10377_v54  ;;  %v20347_v54 = vld [vmem:[%s25077_s4 + $0x228] sm:$0xff]  }
 0x6fe   :  { %18904 = vmatmul.mubr.bf16.gmra.mrb[84].mxu1 %v13636_v34  ;;  %v10741_v34 = vpack.c.bf16 %v10716_v44, %v10715_v25  ;;  %v10733_v44 = vld [vmem:[#allocation2 + $0x199] sm:$0xff] }
 0x6ff   :  { %18907 = vmatprep.mubr.bf16.mxu1 %v13637_v9  ;;  %v13999_v9 = vpack.c.bf16 %v13973_v45, %v13972_v42  ;;  %v13992_v42 = vld [vmem:[#allocation2 + $0x349] sm:$0xff]  ;;  %v13993_v45 = vld [vmem:[#allocation2 + $0x351] sm:$0xff] }
 0x704   :  { %18476 = vmatmul.mubr.bf16.gmra.mrb[88].mxu0 %v10378_v19  ;;  %v10720_v19 = vld [vmem:[#allocation2 + $0xf9] sm:$0xff] }
 0x705   :  { %18479 = vmatprep.mubr.bf16.mxu0 %v10379_v2  ;;  %v13977_v2 = vld [vmem:[#allocation2 + $0x291] sm:$0xff]  ;;  %v10743_v1 = vpack.c.bf16 %v10720_v19, %v10719_v26  ;;  %v14333_v19 = vld [vmem:[#allocation2 + $0x1fa] sm:$0xff] }
 0x706   :  { %18908 = vmatmul.mubr.bf16.gmra.mrb[88].mxu1 %v13638_v61  ;;  %v10742_v61 = vpack.c.bf16 %v10718_v39, %v10717_v49  ;;  %v14001_v47 = vpack.c.bf16 %v13977_v2, %v13976_v38  ;;  %v11076_v49 = vld [vmem:[#allocation2 + $0x52] sm:$0xff]  ;;  %v11077_v39 = vld [vmem:[#allocation2 + $0x62] sm:$0xff]  ;;  %v11078_v26 = vld [vmem:[#allocation2 + $0x6a] sm:$0xff] }
 0x707   :  { %18911 = vmatprep.mubr.bf16.mxu1 %v13639_v56  ;;  %v13978_v56 = vld [vmem:[#allocation2 + $0x2a1] sm:$0xff]  ;;  %v14335_v2 = vld [vmem:[#allocation2 + $0x212] sm:$0xff] }
 0x708   :  { %v14002_v14 = vpack.c.bf16 %v13979_v46, %v13978_v56  ;;  %v11107_v56 = vpack.c.bf16 %v11078_v26, %v11077_v39  ;;  %v14355_v26 = vld [vmem:[#allocation2 + $0x302] sm:$0xff] }
 0x70c   :  { %18480 = vmatmul.mubr.bf16.gmra.mrb[92].mxu0 %v10380_v12 }
 0x70d   :  { %18499 = vmatprep.mubr.bf16.mxu0 %v10735_v3  ;;  %v10721_v3 = vld [vmem:[#allocation2 + $0x109] sm:$0xff] }
 0x70e   :  { %18912 = vmatmul.mubr.bf16.gmra.mrb[92].mxu1 %v10380_v12  ;;  %v20353_v12 = vld [vmem:[%s25077_s4 + $0x238] sm:$0xff]  }
 0x70f   :  { %18931 = vmatprep.mubr.bf16.mxu1 %v13994_v4  ;;  %v10722_v4 = vld [vmem:[#allocation2 + $0x111] sm:$0xff] }
 0x710   :  { %v10744_v27 = vpack.c.bf16 %v10722_v4, %v10721_v3  ;;  %v14337_v3 = vld [vmem:[#allocation2 + $0x22a] sm:$0xff]  ;;  %v14338_v4 = vld [vmem:[#allocation2 + $0x232] sm:$0xff] }
 0x714   :  { %18500 = vmatmul.mubr.bf16.vlgmr.msra.gmra.mrb[64].mxu0 %v10736_v59  ;;  %v13983_v59 = vld [vmem:[#allocation2 + $0x2d9] sm:$0xff] }
 0x715   :  { %18532 = vmatpush3.bf16.msra.mxu0 %v23662_v60  ;;  %18503 = vmatprep.mubr.bf16.mxu0 %v10737_v21  ;;  %v20348_v60 = vld [vmem:[%s25077_s4 + $0x210] sm:$0xff]   ;;  %v10725_v21 = vld [vmem:[#allocation2 + $0x139] sm:$0xff] }
 0x716   :  { %18932 = vmatmul.mubr.bf16.vlgmr.msra.gmra.mrb[64].mxu1 %v13995_v30  ;;  %18533 = vmatprep.subr.bf16.mxu0 %v20341_v57  ;;  %v10726_v30 = vld [vmem:[#allocation2 + $0x141] sm:$0xff] }
 0x717   :  { %18935 = vmatprep.mubr.bf16.mxu1 %v13996_v51  ;;  %18964 = vmatpush3.bf16.msra.mxu1 %v23667_v5  ;;  %v13997_v5 = vpack.c.bf16 %v13969_v41, %v13968_v16  ;;  %v10728_v51 = vld [vmem:[#allocation2 + $0x159] sm:$0xff]  ;;  %v10746_v50 = vpack.c.bf16 %v10726_v30, %v10725_v21  ;;  %v14006_v41 = vpack.c.bf16 %v13987_v0, %v13986_v36  ;;  %v14342_v30 = vld [vmem:[#allocation2 + $0x262] sm:$0xff] }
 0x718   :  { %18965 = vmatprep.subr.bf16.mxu1 %v20346_v35  ;;  %v14341_v21 = vld [vmem:[#allocation2 + $0x25a] sm:$0xff] }
 0x719   :  { %18534 = vmatpush3.bf16.msra.mxu0 %v20341_v57  ;;  %v14004_v57 = vpack.c.bf16 %v13983_v59, %v13982_v11  ;;  %v14367_v11 = vpack.c.bf16 %v14340_v55, %v14339_v28  ;;  %v11083_v59 = vld [vmem:[#allocation2 + $0xaa] sm:$0xff]  ;;  %v11087_v0 = vld [vmem:[#allocation2 + $0xda] sm:$0xff] }
 0x71a   :  { %18535 = vmatprep.subr.bf16.mxu0 %v20342_v62  ;;  %v11103_v55 = vld [vmem:[#allocation2 + $0x19a] sm:$0xff] }
 0x71b   :  { %18966 = vmatpush3.bf16.msra.mxu1 %v20346_v35  ;;  %v10727_v35 = vld [vmem:[#allocation2 + $0x151] sm:$0xff] }
 0x71c   :  { %18504 = vmatmul.mubr.bf16.gmra.mrb[68].mxu0 %v10738_v18  ;;  %18967 = vmatprep.subr.bf16.mxu1 %v20348_v60  ;;  %v10729_v18 = vld [vmem:[#allocation2 + $0x169] sm:$0xff] }
 0x71d   :  { %18507 = vmatprep.mubr.bf16.mxu0 %v10739_v53  ;;  %18536 = vmatpush3.bf16.msra.mxu0 %v20342_v62  ;;  %v13984_v62 = vld [vmem:[#allocation2 + $0x2e9] sm:$0xff]  ;;  %v13988_v53 = vld [vmem:[#allocation2 + $0x319] sm:$0xff] }
 0x71e   :  { %18936 = vmatmul.mubr.bf16.gmra.mrb[68].mxu1 %v13997_v5  ;;  %18537 = vmatprep.subr.bf16.mxu0 %v20343_v29  ;;  %v14005_v16 = vpack.c.bf16 %v13985_v23, %v13984_v62  ;;  %v13989_v5 = vld [vmem:[#allocation2 + $0x321] sm:$0xff] }
 0x71f   :  { %18939 = vmatprep.mubr.bf16.mxu1 %v13998_v24  ;;  %18968 = vmatpush3.bf16.msra.mxu1 %v20348_v60  ;;  %v10747_v60 = vpack.c.bf16 %v10728_v51, %v10727_v35  ;;  %v13990_v24 = vld [vmem:[#allocation2 + $0x331] sm:$0xff]  ;;  %v14007_v63 = vpack.c.bf16 %v13989_v5, %v13988_v53  ;;  %v14344_v62 = vld [vmem:[#allocation2 + $0x27a] sm:$0xff] }
 0x720   :  { %18969 = vmatprep.subr.bf16.mxu1 %v20349_v52  ;;  %v14343_v51 = vld [vmem:[#allocation2 + $0x272] sm:$0xff]  ;;  %v14348_v53 = vld [vmem:[#allocation2 + $0x2aa] sm:$0xff] }
 0x721   :  { %18538 = vmatpush3.bf16.msra.mxu0 %v20343_v29  ;;  %v10732_v29 = vld [vmem:[#allocation2 + $0x189] sm:$0xff]  ;;  %v14369_v36 = vpack.c.bf16 %v14344_v62, %v14343_v51 }
 0x722   :  { %18539 = vmatprep.subr.bf16.mxu0 %v20344_v15  ;;  %v10749_v20 = vpack.c.bf16 %v10732_v29, %v10731_v8  ;;  %v14347_v29 = vld [vmem:[#allocation2 + $0x2a2] sm:$0xff] }
 0x723   :  { %18970 = vmatpush3.bf16.msra.mxu1 %v20349_v52  ;;  %v10748_v52 = vpack.c.bf16 %v10730_v7, %v10729_v18  ;;  %v14345_v18 = vld [vmem:[#allocation2 + $0x28a] sm:$0xff]  ;;  %v14346_v7 = vld [vmem:[#allocation2 + $0x292] sm:$0xff] }
 0x724   :  { %18508 = vmatmul.mubr.bf16.gmra.mrb[72].mxu0 %v10740_v43  ;;  %18971 = vmatprep.subr.bf16.mxu1 %v20351_v40 }
 0x725   :  { %18511 = vmatprep.mubr.bf16.mxu0 %v10741_v34  ;;  %18540 = vmatpush3.bf16.msra.mxu0 %v20344_v15  ;;  %v13991_v15 = vld [vmem:[#allocation2 + $0x339] sm:$0xff]  ;;  %v14331_v34 = vld [vmem:[#allocation2 + $0x1e2] sm:$0xff] }
 0x726   :  { %18940 = vmatmul.mubr.bf16.gmra.mrb[72].mxu1 %v13999_v9  ;;  %18541 = vmatprep.subr.bf16.mxu0 %v20347_v54  ;;  %v14008_v25 = vpack.c.bf16 %v13991_v15, %v13990_v24  ;;  %v14332_v9 = vld [vmem:[#allocation2 + $0x1ea] sm:$0xff]  ;;  %v14371_v24 = vpack.c.bf16 %v14348_v53, %v14347_v29 }
 0x727   :  { %18943 = vmatprep.mubr.bf16.mxu1 %v14000_v48  ;;  %18972 = vmatpush3.bf16.msra.mxu1 %v20351_v40  ;;  %v10734_v40 = vld [vmem:[#allocation2 + $0x1a1] sm:$0xff]  ;;  %v14363_v48 = vpack.c.bf16 %v14332_v9, %v14331_v34  ;;  %v11091_v15 = vld [vmem:[#allocation2 + $0x10a] sm:$0xff] }
 0x728   :  { %18973 = vmatprep.subr.bf16.mxu1 %v20352_v37  ;;  %v10750_v43 = vpack.c.bf16 %v10734_v40, %v10733_v44  ;;  %v14349_v44 = vld [vmem:[#allocation2 + $0x2ba] sm:$0xff]  ;;  %v14350_v40 = vld [vmem:[#allocation2 + $0x2c2] sm:$0xff] }
 0x729   :  { %18542 = vmatpush3.bf16.msra.mxu0 %v20347_v54  ;;  %v14009_v54 = vpack.c.bf16 %v13993_v45, %v13992_v42  ;;  %v14351_v45 = vld [vmem:[#allocation2 + $0x2d2] sm:$0xff]  ;;  %v11095_v34 = vld [vmem:[#allocation2 + $0x13a] sm:$0xff]  ;;  %v11096_v9 = vld [vmem:[#allocation2 + $0x142] sm:$0xff] }
 0x72a   :  { %18543 = vmatprep.subr.bf16.mxu0 %v20350_v6  ;;  %v11116_v39 = vpack.c.bf16 %v11096_v9, %v11095_v34 }
 0x72b   :  { %18974 = vmatpush3.bf16.msra.mxu1 %v20352_v37  ;;  %v11105_v37 = vpack.c.bf16 %v11074_v10, %v11073_v17  ;;  %v14372_v10 = vpack.c.bf16 %v14350_v40, %v14349_v44 }
 0x72c   :  { %18512 = vmatmul.mubr.bf16.gmra.mrb[76].mxu0 %v10742_v61  ;;  %18975 = vmatprep.subr.bf16.mxu1 %v20354_v13  ;;  %v14336_v61 = vld [vmem:[#allocation2 + $0x21a] sm:$0xff] }
 0x72d   :  { %18515 = vmatprep.mubr.bf16.mxu0 %v10743_v1  ;;  %18544 = vmatpush3.bf16.msra.mxu0 %v20350_v6  ;;  %v11075_v6 = vld [vmem:[#allocation2 + $0x4a] sm:$0xff]  ;;  %v11079_v1 = vld [vmem:[#allocation2 + $0x7a] sm:$0xff] }
 0x72e   :  { %18944 = vmatmul.mubr.bf16.gmra.mrb[76].mxu1 %v14001_v47  ;;  %18545 = vmatprep.subr.bf16.mxu0 %v20353_v12  ;;  %v11106_v38 = vpack.c.bf16 %v11076_v49, %v11075_v6  ;;  %v11080_v47 = vld [vmem:[#allocation2 + $0x82] sm:$0xff]  ;;  %v14353_v6 = vld [vmem:[#allocation2 + $0x2ea] sm:$0xff]  ;;  %v14354_v49 = vld [vmem:[#allocation2 + $0x2f2] sm:$0xff] }
 0x72f   :  { %18947 = vmatprep.mubr.bf16.mxu1 %v14002_v14  ;;  %18976 = vmatpush3.bf16.msra.mxu1 %v20354_v13  ;;  %v14334_v13 = vld [vmem:[#allocation2 + $0x202] sm:$0xff]  ;;  %v11082_v14 = vld [vmem:[#allocation2 + $0x9a] sm:$0xff]  ;;  %v11108_v22 = vpack.c.bf16 %v11080_v47, %v11079_v1 }
 0x730   :  { %18977 = vmatprep.subr.bf16.mxu1 %v20355_v58  ;;  %v14364_v46 = vpack.c.bf16 %v14334_v13, %v14333_v19  ;;  %v14356_v19 = vld [vmem:[#allocation2 + $0x30a] sm:$0xff]  ;;  %v14357_v1 = vld [vmem:[#allocation2 + $0x31a] sm:$0xff]  ;;  %v14358_v47 = vld [vmem:[#allocation2 + $0x322] sm:$0xff] }
 0x731   :  { %18546 = vmatpush3.bf16.msra.mxu0 %v20353_v12  ;;  %v14365_v12 = vpack.c.bf16 %v14336_v61, %v14335_v2  ;;  %v14375_v2 = vpack.c.bf16 %v14356_v19, %v14355_v26  ;;  %v11099_v61 = vld [vmem:[#allocation2 + $0x16a] sm:$0xff] }
 0x733   :  { %18978 = vmatpush3.bf16.msra.mxu1 %v20355_v58  ;;  %v11081_v58 = vld [vmem:[#allocation2 + $0x92] sm:$0xff] }
 0x734   :  { %18516 = vmatmul.mubr.bf16.gmra.mrb[80].mxu0 %v10744_v27  ;;  %v11109_v32 = vpack.c.bf16 %v11082_v14, %v11081_v58  ;;  %v14366_v27 = vpack.c.bf16 %v14338_v4, %v14337_v3  ;;  %v14359_v14 = vld [vmem:[#allocation2 + $0x332] sm:$0xff]  ;;  %v14360_v3 = vld [vmem:[#allocation2 + $0x33a] sm:$0xff] }
 0x735   :  { %18519 = vmatprep.mubr.bf16.mxu0 %v10745_v33  ;;  %v11084_v33 = vld [vmem:[#allocation2 + $0xb2] sm:$0xff]  ;;  %v14377_v28 = vpack.c.bf16 %v14360_v3, %v14359_v14 }
 0x736   :  { %18948 = vmatmul.mubr.bf16.gmra.mrb[80].mxu1 %v14003_v31  ;;  %v11085_v31 = vld [vmem:[#allocation2 + $0xc2] sm:$0xff]  ;;  %v11110_v35 = vpack.c.bf16 %v11084_v33, %v11083_v59 }
 0x737   :  { %18951 = vmatprep.mubr.bf16.mxu1 %v14004_v57  ;;  %v11086_v57 = vld [vmem:[#allocation2 + $0xca] sm:$0xff] }
 0x738   :  { %v11111_v23 = vpack.c.bf16 %v11086_v57, %v11085_v31 }
 0x73c   :  { %18520 = vmatmul.mubr.bf16.gmra.mrb[84].mxu0 %v10746_v50  ;;  %v14368_v50 = vpack.c.bf16 %v14342_v30, %v14341_v21 }
 0x73d   :  { %18523 = vmatprep.mubr.bf16.mxu0 %v10747_v60  ;;  %v11088_v60 = vld [vmem:[#allocation2 + $0xe2] sm:$0xff] }
 0x73e   :  { %18952 = vmatmul.mubr.bf16.gmra.mrb[84].mxu1 %v14005_v16  ;;  %v11089_v16 = vld [vmem:[#allocation2 + $0xf2] sm:$0xff]  ;;  %v11112_v8 = vpack.c.bf16 %v11088_v60, %v11087_v0 }
 0x73f   :  { %18955 = vmatprep.mubr.bf16.mxu1 %v14006_v41  ;;  %v11090_v41 = vld [vmem:[#allocation2 + $0xfa] sm:$0xff] }
 0x740   :  { %v11113_v5 = vpack.c.bf16 %v11090_v41, %v11089_v16 }
 0x744   :  { %18524 = vmatmul.mubr.bf16.gmra.mrb[88].mxu0 %v10748_v52  ;;  %v14370_v52 = vpack.c.bf16 %v14346_v7, %v14345_v18 }
 0x745   :  { %18527 = vmatprep.mubr.bf16.mxu0 %v10749_v20  ;;  %v11092_v20 = vld [vmem:[#allocation2 + $0x112] sm:$0xff] }
 0x746   :  { %18956 = vmatmul.mubr.bf16.gmra.mrb[88].mxu1 %v14007_v63  ;;  %v11093_v63 = vld [vmem:[#allocation2 + $0x122] sm:$0xff]  ;;  %v11114_v42 = vpack.c.bf16 %v11092_v20, %v11091_v15 }
 0x747   :  { %18959 = vmatprep.mubr.bf16.mxu1 %v14008_v25  ;;  %v11094_v25 = vld [vmem:[#allocation2 + $0x12a] sm:$0xff] }
 0x748   :  { %v11115_v17 = vpack.c.bf16 %v11094_v25, %v11093_v63 }
 0x74c   :  { %18528 = vmatmul.mubr.bf16.gmra.mrb[92].mxu0 %v10750_v43  ;;  %v14352_v43 = vld [vmem:[#allocation2 + $0x2da] sm:$0xff] }
 0x74d   :  { %18547 = vmatprep.mubr.bf16.mxu0 %v11105_v37  ;;  %v11097_v37 = vld [vmem:[#allocation2 + $0x152] sm:$0xff] }
 0x74e   :  { %18960 = vmatmul.mubr.bf16.gmra.mrb[92].mxu1 %v14009_v54  ;;  %v14373_v54 = vpack.c.bf16 %v14352_v43, %v14351_v45 }
 0x74f   :  { %18979 = vmatprep.mubr.bf16.mxu1 %v14363_v48  ;;  %v11098_v48 = vld [vmem:[#allocation2 + $0x15a] sm:$0xff] }
 0x750   :  { %v11117_v13 = vpack.c.bf16 %v11098_v48, %v11097_v37 }
 0x754   :  { %18548 = vmatmul.mubr.bf16.vlgmr.msra.gmra.mrb[64].mxu0 %v11106_v38  ;;  %v14374_v38 = vpack.c.bf16 %v14354_v49, %v14353_v6 }
 0x755   :  { %18551 = vmatprep.mubr.bf16.mxu0 %v11107_v56  ;;  %v11100_v56 = vld [vmem:[#allocation2 + $0x172] sm:$0xff] }
 0x756   :  { %18980 = vmatmul.mubr.bf16.vlgmr.msra.gmra.mrb[64].mxu1 %v14364_v46  ;;  %v11101_v46 = vld [vmem:[#allocation2 + $0x182] sm:$0xff]  ;;  %v11118_v58 = vpack.c.bf16 %v11100_v56, %v11099_v61 }
 0x757   :  { %18983 = vmatprep.mubr.bf16.mxu1 %v14365_v12  ;;  %v11102_v12 = vld [vmem:[#allocation2 + $0x18a] sm:$0xff] }
 0x758   :  { %v11119_v4 = vpack.c.bf16 %v11102_v12, %v11101_v46 }
 0x75c   :  { %18552 = vmatmul.mubr.bf16.gmra.mrb[68].mxu0 %v11108_v22  ;;  %v14376_v22 = vpack.c.bf16 %v14358_v47, %v14357_v1 }
 0x75d   :  { %18555 = vmatprep.mubr.bf16.mxu0 %v11109_v32  ;;  %v11104_v32 = vld [vmem:[#allocation2 + $0x1a2] sm:$0xff] }
 0x75e   :  { %18984 = vmatmul.mubr.bf16.gmra.mrb[68].mxu1 %v14366_v27  ;;  %v14361_v27 = vld [vmem:[#allocation2 + $0x34a] sm:$0xff]  ;;  %v11120_v59 = vpack.c.bf16 %v11104_v32, %v11103_v55 }
 0x75f   :  { %18987 = vmatprep.mubr.bf16.mxu1 %v14367_v11  ;;  %v14362_v11 = vld [vmem:[#allocation2 + $0x352] sm:$0xff] }
 0x760   :  { %v14378_v33 = vpack.c.bf16 %v14362_v11, %v14361_v27 }
 0x764   :  { %18556 = vmatmul.mubr.bf16.gmra.mrb[72].mxu0 %v11110_v35 }
 0x765   :  { %18559 = vmatprep.mubr.bf16.mxu0 %v11111_v23 }
 0x766   :  { %18988 = vmatmul.mubr.bf16.gmra.mrb[72].mxu1 %v14368_v50 }
 0x767   :  { %18991 = vmatprep.mubr.bf16.mxu1 %v14369_v36 }
 0x76c   :  { %18560 = vmatmul.mubr.bf16.gmra.mrb[76].mxu0 %v11112_v8 }
 0x76d   :  { %18563 = vmatprep.mubr.bf16.mxu0 %v11113_v5 }
 0x76e   :  { %18992 = vmatmul.mubr.bf16.gmra.mrb[76].mxu1 %v14370_v52 }
 0x76f   :  { %18995 = vmatprep.mubr.bf16.mxu1 %v14371_v24 }
 0x774   :  { %18564 = vmatmul.mubr.bf16.gmra.mrb[80].mxu0 %v11114_v42 }
 0x775   :  { %18567 = vmatprep.mubr.bf16.mxu0 %v11115_v17 }
 0x776   :  { %18996 = vmatmul.mubr.bf16.gmra.mrb[80].mxu1 %v14372_v10 }
 0x777   :  { %18999 = vmatprep.mubr.bf16.mxu1 %v14373_v54 }
 0x77c   :  { %18568 = vmatmul.mubr.bf16.gmra.mrb[84].mxu0 %v11116_v39 }
 0x77d   :  { %18571 = vmatprep.mubr.bf16.mxu0 %v11117_v13 }
 0x77e   :  { %19000 = vmatmul.mubr.bf16.gmra.mrb[84].mxu1 %v14374_v38 }
 0x77f   :  { %19003 = vmatprep.mubr.bf16.mxu1 %v14375_v2 }
 0x784   :  { %18572 = vmatmul.mubr.bf16.gmra.mrb[88].mxu0 %v11118_v58 }
 0x785   :  { %18575 = vmatprep.mubr.bf16.mxu0 %v11119_v4 }
 0x786   :  { %19004 = vmatmul.mubr.bf16.gmra.mrb[88].mxu1 %v14376_v22 }
 0x787   :  { %19007 = vmatprep.mubr.bf16.mxu1 %v14377_v28 }
 0x78c   :  { %18576 = vmatmul.mubr.bf16.gmra.mrb[92].mxu0 %v11120_v59 }
 0x78e   :  { %19008 = vmatmul.mubr.bf16.gmra.mrb[92].mxu1 %v14378_v33 }
 0x827   :  { %v23715_v31 = vpop.f32.mrb[64].mxu0 }
 0x828   :  { %v23717_v57 = vpop.f32.mrb[65].mxu0 }
 0x829   :  { %v23719_v21 = vpop.f32.mrb[64].mxu1  ;;  %v23721_v30 = vpop.f32.mrb[66].mxu0 }
 0x82a   :  { %v23723_v35 = vpop.f32.mrb[65].mxu1  ;;  %v23725_v51 = vpop.f32.mrb[67].mxu0 }
 0x82b   :  { %v23727_v62 = vpop.f32.mrb[66].mxu1  ;;  %v14766_v23 = vadd.f32 %v23725_v51, %v23717_v57 }
 0x82c   :  { %v23731_v50 = vpop.f32.mrb[67].mxu1 }
 0x82d   :  { %v14767_v36 = vadd.f32 %v23715_v31, %v14766_v23 }
 0x82f   :  { %v23734_v0 = vpop.f32.mrb[68].mxu0  ;;  %v14768_v60 = vadd.f32 %v23721_v30, %v14767_v36 }
 0x830   :  { %v23737_v16 = vpop.f32.mrb[69].mxu0 }
 0x831   :  { %v23739_v41 = vpop.f32.mrb[68].mxu1  ;;  %v14769_v18 = vadd.f32 %v14768_v60, %v23737_v16  ;;  %v23742_v7 = vpop.f32.mrb[70].mxu0 }
 0x832   :  { %v23744_v8 = vpop.f32.mrb[69].mxu1  ;;  %v23746_v29 = vpop.f32.mrb[71].mxu0 }
 0x833   :  { %v23748_v53 = vpop.f32.mrb[70].mxu1  ;;  %v14770_v5 = vadd.f32 %v14769_v18, %v23746_v29 }
 0x834   :  { %v23751_v52 = vpop.f32.mrb[71].mxu1 }
 0x835   :  { %v14771_v24 = vadd.f32 %v23734_v0, %v14770_v5 }
 0x837   :  { %v23754_v15 = vpop.f32.mrb[72].mxu0  ;;  %v14772_v20 = vadd.f32 %v23742_v7, %v14771_v24 }
 0x838   :  { %v23757_v63 = vpop.f32.mrb[73].mxu0 }
 0x839   :  { %v23759_v25 = vpop.f32.mrb[72].mxu1  ;;  %v14773_v44 = vadd.f32 %v14772_v20, %v23757_v63  ;;  %v23762_v40 = vpop.f32.mrb[74].mxu0 }
 0x83a   :  { %v23764_v42 = vpop.f32.mrb[73].mxu1  ;;  %v23766_v45 = vpop.f32.mrb[75].mxu0 }
 0x83b   :  { %v23768_v43 = vpop.f32.mrb[74].mxu1  ;;  %v14774_v17 = vadd.f32 %v14773_v44, %v23766_v45 }
 0x83c   :  { %v23771_v10 = vpop.f32.mrb[75].mxu1 }
 0x83d   :  { %v14775_v54 = vadd.f32 %v23754_v15, %v14774_v17 }
 0x83f   :  { %v23774_v34 = vpop.f32.mrb[76].mxu0  ;;  %v14776_v9 = vadd.f32 %v23762_v40, %v14775_v54 }
 0x840   :  { %v23777_v37 = vpop.f32.mrb[77].mxu0 }
 0x841   :  { %v23779_v48 = vpop.f32.mrb[76].mxu1  ;;  %v14777_v6 = vadd.f32 %v14776_v9, %v23777_v37  ;;  %v23782_v49 = vpop.f32.mrb[78].mxu0 }
 0x842   :  { %v23784_v39 = vpop.f32.mrb[77].mxu1  ;;  %v23786_v26 = vpop.f32.mrb[79].mxu0 }
 0x843   :  { %v23788_v19 = vpop.f32.mrb[78].mxu1  ;;  %v14778_v13 = vadd.f32 %v14777_v6, %v23786_v26 }
 0x844   :  { %v23791_v38 = vpop.f32.mrb[79].mxu1 }
 0x845   :  { %v14779_v2 = vadd.f32 %v23774_v34, %v14778_v13 }
 0x847   :  { %v23794_v61 = vpop.f32.mrb[80].mxu0  ;;  %v14780_v56 = vadd.f32 %v23782_v49, %v14779_v2 }
 0x848   :  { %v23797_v46 = vpop.f32.mrb[81].mxu0 }
 0x849   :  { %v23799_v12 = vpop.f32.mrb[80].mxu1  ;;  %v14781_v1 = vadd.f32 %v14780_v56, %v23797_v46  ;;  %v23802_v47 = vpop.f32.mrb[82].mxu0 }
 0x84a   :  { %25516 = vst [vmem:[#allocation21_spill] sm:$0xff] %v23802_v47  ;;  %v23804_v58 = vpop.f32.mrb[81].mxu1  ;;  %v23806_v14 = vpop.f32.mrb[83].mxu0 }
 0x84b   :  { %v23808_v3 = vpop.f32.mrb[82].mxu1  ;;  %v14782_v4 = vadd.f32 %v14781_v1, %v23806_v14 }
 0x84c   :  { %v23811_v22 = vpop.f32.mrb[83].mxu1 }
 0x84d   :  { %v14783_v28 = vadd.f32 %v23794_v61, %v14782_v4 }
 0x84f   :  { %v23814_v55 = vpop.f32.mrb[84].mxu0  ;;  %v14784_v32 = vadd.f32 %v23802_v47, %v14783_v28 }
 0x850   :  { %25517 = vst [vmem:[#allocation6_spill] sm:$0xff] %v23814_v55  ;;  %v23817_v27 = vpop.f32.mrb[85].mxu0 }
 0x851   :  { %25518 = vst [vmem:[#allocation9_spill] sm:$0xff] %v23817_v27  ;;  %v23819_v11 = vpop.f32.mrb[84].mxu1  ;;  %v14785_v59 = vadd.f32 %v14784_v32, %v23817_v27  ;;  %v23822_v33 = vpop.f32.mrb[86].mxu0 }
 0x852   :  { %25519 = vst [vmem:[#allocation14_spill] sm:$0xff] %v23819_v11  ;;  %25520 = vst [vmem:[#allocation24_spill] sm:$0xff] %v23822_v33  ;;  %v23824_v23 = vpop.f32.mrb[85].mxu1  ;;  %v23826_v36 = vpop.f32.mrb[87].mxu0 }
 0x853   :  { %25521 = vst [vmem:[#allocation25_spill] sm:$0xff] %v23826_v36  ;;  %v23828_v60 = vpop.f32.mrb[86].mxu1  ;;  %v14786_v18 = vadd.f32 %v14785_v59, %v23826_v36 }
 0x854   :  { %25522 = vst [vmem:[#allocation15_spill] sm:$0xff] %v23828_v60  ;;  %v23831_v5 = vpop.f32.mrb[87].mxu1 }
 0x855   :  { %25523 = vst [vmem:[#allocation27_spill] sm:$0xff] %v23831_v5  ;;  %v14787_v24 = vadd.f32 %v23814_v55, %v14786_v18 }
 0x857   :  { %v23834_v20 = vpop.f32.mrb[88].mxu0  ;;  %v14788_v44 = vadd.f32 %v23822_v33, %v14787_v24 }
 0x858   :  { %25524 = vst [vmem:[#allocation19_spill] sm:$0xff] %v23834_v20  ;;  %v23837_v17 = vpop.f32.mrb[89].mxu0 }
 0x859   :  { %25525 = vst [vmem:[#allocation20_spill] sm:$0xff] %v23837_v17  ;;  %v23839_v54 = vpop.f32.mrb[88].mxu1  ;;  %v14789_v9 = vadd.f32 %v14788_v44, %v23837_v17  ;;  %v23842_v6 = vpop.f32.mrb[90].mxu0 }
 0x85a   :  { %25526 = vst [vmem:[#allocation5_spill] sm:$0xff] %v23842_v6  ;;  %v23844_v13 = vpop.f32.mrb[89].mxu1  ;;  %v23846_v2 = vpop.f32.mrb[91].mxu0 }
 0x85b   :  { %25527 = vst [vmem:[#allocation7_spill] sm:$0xff] %v23844_v13  ;;  %25528 = vst [vmem:[#allocation22_spill] sm:$0xff] %v23846_v2  ;;  %v23848_v56 = vpop.f32.mrb[90].mxu1  ;;  %v14790_v1 = vadd.f32 %v14789_v9, %v23846_v2 }
 0x85c   :  { %v23851_v4 = vpop.f32.mrb[91].mxu1 }
 0x85d   :  { %v14791_v28 = vadd.f32 %v23834_v20, %v14790_v1 }
 0x85f   :  { %v23854_v32 = vpop.f32.mrb[92].mxu0  ;;  %v14792_v59 = vadd.f32 %v23842_v6, %v14791_v28 }
 0x860   :  { %v23857_v18 = vpop.f32.mrb[93].mxu0 }
 0x861   :  { %25529 = vst [vmem:[#allocation23_spill] sm:$0xff] %v23857_v18  ;;  %v23859_v24 = vpop.f32.mrb[92].mxu1  ;;  %v14793_v44 = vadd.f32 %v14792_v59, %v23857_v18  ;;  %v23862_v17 = vpop.f32.mrb[94].mxu0 }
 0x862   :  { %v23864_v33 = vpop.f32.mrb[93].mxu1  ;;  %v23866_v55 = vpop.f32.mrb[95].mxu0 }
 0x863   :  { %25530 = vst [vmem:[#allocation10_spill] sm:$0xff] %v23866_v55  ;;  %v23868_v9 = vpop.f32.mrb[94].mxu1  ;;  %v14794_v1 = vadd.f32 %v14793_v44, %v23866_v55 }
 0x864   :  { %v23871_v20 = vpop.f32.mrb[95].mxu1 }
 0x865   :  { %v14795_v28 = vadd.f32 %v23854_v32, %v14794_v1 }
 0x867   :  { %v14796_v6 = vadd.f32 %v23862_v17, %v14795_v28 }
 0x869   :  { %v14797_v2 = vadd.f32 %v14796_v6, %v23723_v35 }
 0x86b   :  { %v14798_v59 = vadd.f32 %v14797_v2, %v23731_v50 }
 0x86d   :  { %v14799_v18 = vadd.f32 %v23719_v21, %v14798_v59 }
 0x86f   :  { %v14800_v36 = vadd.f32 %v23727_v62, %v14799_v18 }
 0x871   :  { %v14801_v27 = vadd.f32 %v14800_v36, %v23744_v8 }
 0x873   :  { %v14802_v47 = vadd.f32 %v14801_v27, %v23751_v52 }
 0x875   :  { %v14803_v44 = vadd.f32 %v23739_v41, %v14802_v47 }
 0x877   :  { %v14804_v55 = vadd.f32 %v23748_v53, %v14803_v44 }
 0x879   :  { %v14805_v1 = vadd.f32 %v14804_v55, %v23764_v42 }
 0x87b   :  { %v14806_v28 = vadd.f32 %v14805_v1, %v23771_v10 }
 0x87d   :  { %v14807_v6 = vadd.f32 %v23759_v25, %v14806_v28 }
 0x87f   :  { %v14808_v2 = vadd.f32 %v23768_v43, %v14807_v6 }
 0x881   :  { %v14809_v59 = vadd.f32 %v14808_v2, %v23784_v39 }
 0x883   :  { %v14810_v18 = vadd.f32 %v14809_v59, %v23791_v38 }
 0x885   :  { %v14811_v36 = vadd.f32 %v23779_v48, %v14810_v18 }
 0x887   :  { %v14812_v27 = vadd.f32 %v23788_v19, %v14811_v36 }
 0x889   :  { %v14813_v47 = vadd.f32 %v14812_v27, %v23804_v58 }
 0x88b   :  { %v14814_v44 = vadd.f32 %v14813_v47, %v23811_v22 }
 0x88d   :  { %v14815_v55 = vadd.f32 %v23799_v12, %v14814_v44 }
 0x88f   :  { %v14816_v1 = vadd.f32 %v23808_v3, %v14815_v55 }
 0x891   :  { %v14817_v28 = vadd.f32 %v14816_v1, %v23824_v23 }
 0x893   :  { %v14818_v6 = vadd.f32 %v14817_v28, %v23831_v5 }
 0x895   :  { %v14819_v2 = vadd.f32 %v23819_v11, %v14818_v6 }
 0x897   :  { %v14820_v59 = vadd.f32 %v23828_v60, %v14819_v2 }
 0x899   :  { %v14821_v18 = vadd.f32 %v14820_v59, %v23844_v13 }
 0x89b   :  { %v14822_v36 = vadd.f32 %v14821_v18, %v23851_v4 }
 0x89d   :  { %v14823_v27 = vadd.f32 %v23839_v54, %v14822_v36 }
 0x89f   :  { %v14824_v47 = vadd.f32 %v23848_v56, %v14823_v27 }
 0x8a1   :  { %v14825_v44 = vadd.f32 %v14824_v47, %v23864_v33  ;;  %v25537_v47 = vld [vmem:[#allocation9_spill] sm:$0xff] }
 0x8a3   :  { %v14826_v55 = vadd.f32 %v14825_v44, %v23871_v20  ;;  %v25538_v44 = vld [vmem:[#allocation25_spill] sm:$0xff] }
 0x8a5   :  { %v14827_v1 = vadd.f32 %v23859_v24, %v14826_v55  ;;  %v25539_v55 = vld [vmem:[#allocation6_spill] sm:$0xff] }
 0x8a7   :  { %v14828_v28 = vadd.f32 %v23868_v9, %v14827_v1  ;;  %v25541_v1 = vld [vmem:[#allocation24_spill] sm:$0xff] }
 0x8a9   :  { %v14829_v5 = vrot.slane %v14828_v28, 4 }
 0x8ab   :  { %v14830_v6 = vadd.f32 %v14829_v5, %v14828_v28  ;;  %v25543_v28 = vld [vmem:[#allocation20_spill] sm:$0xff] }
 0x8ad   :  { %v14831_v11 = vrot.slane %v14830_v6, 2 }
 0x8af   :  { %v14832_v2 = vadd.f32 %v14831_v11, %v14830_v6 }
 0x8b1   :  { %v14833_v60 = vrot.slane %v14832_v2, 1 }
 0x8b3   :  { %v14834_v59 = vadd.f32 %v14833_v60, %v14832_v2  ;;  %v25536_v60 = vld [vmem:[#allocation21_spill] sm:$0xff]  ;;  %v25544_v2 = vld [vmem:[#allocation22_spill] sm:$0xff] }
 0x8b5   :  { %v23907_v13 = vmul.f32 0.001953125, %v14834_v59 }
 0x8b7   :  { %v23911_v18 = vsub.f32 %v23717_v57, %v23907_v13  ;;  %v23915_v36 = vsub.f32 %v23725_v51, %v23907_v13  ;;  %v23919_v27 = vsub.f32 %v23715_v31, %v23907_v13  ;;  %v23923_v5 = vsub.f32 %v23721_v30, %v23907_v13 }
 0x8b8   :  { %v23927_v11 = vsub.f32 %v23737_v16, %v23907_v13  ;;  %v23931_v57 = vsub.f32 %v23746_v29, %v23907_v13  ;;  %v23935_v51 = vsub.f32 %v23734_v0, %v23907_v13  ;;  %v23939_v31 = vsub.f32 %v23742_v7, %v23907_v13 }
 0x8b9   :  { %25531 = vst [vmem:[#allocation4_spill] sm:$0xff] %v23911_v18  ;;  %25532 = vst [vmem:[#allocation8_spill] sm:$0xff] %v23915_v36  ;;  %v23943_v30 = vsub.f32 %v23757_v63, %v23907_v13  ;;  %v23947_v16 = vsub.f32 %v23766_v45, %v23907_v13  ;;  %v23951_v29 = vsub.f32 %v23754_v15, %v23907_v13 }
 0x8ba   :  { %25533 = vst [vmem:[#allocation12_spill] sm:$0xff] %v23919_v27  ;;  %v23955_v0 = vsub.f32 %v23762_v40, %v23907_v13  ;;  %v23959_v7 = vsub.f32 %v23777_v37, %v23907_v13  ;;  %v23963_v63 = vsub.f32 %v23786_v26, %v23907_v13  ;;  %v23967_v45 = vsub.f32 %v23774_v34, %v23907_v13 }
 0x8bb   :  { %v23971_v15 = vsub.f32 %v23782_v49, %v23907_v13  ;;  %v23975_v40 = vsub.f32 %v23797_v46, %v23907_v13  ;;  %v23979_v37 = vsub.f32 %v23806_v14, %v23907_v13  ;;  %v23983_v26 = vsub.f32 %v23794_v61, %v23907_v13 }
 0x8bc   :  { %v23987_v34 = vsub.f32 %v25536_v60, %v23907_v13  ;;  %v23991_v49 = vsub.f32 %v25537_v47, %v23907_v13  ;;  %v23995_v46 = vsub.f32 %v25538_v44, %v23907_v13  ;;  %v23999_v14 = vsub.f32 %v25539_v55, %v23907_v13  ;;  %v25545_v60 = vld [vmem:[#allocation19_spill] sm:$0xff]  ;;  %v25546_v44 = vld [vmem:[#allocation5_spill] sm:$0xff] }
 0x8bd   :  { %25534 = vst [vmem:[#allocation16_spill] sm:$0xff] %v23979_v37  ;;  %25535 = vst [vmem:[#allocation17_spill] sm:$0xff] %v23983_v26  ;;  %v24003_v61 = vsub.f32 %v25541_v1, %v23907_v13  ;;  %v24007_v6 = vsub.f32 %v25543_v28, %v23907_v13  ;;  %v24011_v59 = vsub.f32 %v25544_v2, %v23907_v13 }
 0x8be   :  { %25540 = vst [vmem:[#allocation26_spill] sm:$0xff] %v23999_v14  ;;  %v24015_v47 = vsub.f32 %v25545_v60, %v23907_v13  ;;  %v24019_v55 = vsub.f32 %v25546_v44, %v23907_v13  ;;  %v25547_v14 = vld [vmem:[#allocation23_spill] sm:$0xff]  ;;  %v24031_v2 = vsub.f32 %v23854_v32, %v23907_v13  ;;  %v24035_v60 = vsub.f32 %v23862_v17, %v23907_v13 }
 0x8bf   :  { %25542 = vst [vmem:[#allocation18_spill] sm:$0xff] %v24003_v61  ;;  %v24023_v1 = vsub.f32 %v25547_v14, %v23907_v13  ;;  %v25548_v61 = vld [vmem:[#allocation10_spill] sm:$0xff]  ;;  %v24039_v44 = vsub.f32 %v23723_v35, %v23907_v13  ;;  %v24043_v14 = vsub.f32 %v23731_v50, %v23907_v13  ;;  %v24051_v32 = vsub.f32 %v23727_v62, %v23907_v13 }
 0x8c0   :  { %v24027_v28 = vsub.f32 %v25548_v61, %v23907_v13  ;;  %v24047_v61 = vsub.f32 %v23719_v21, %v23907_v13  ;;  %v24055_v17 = vsub.f32 %v23744_v8, %v23907_v13  ;;  %v24059_v35 = vsub.f32 %v23751_v52, %v23907_v13 }
 0x8c1   :  { %v24063_v50 = vsub.f32 %v23739_v41, %v23907_v13  ;;  %v24067_v21 = vsub.f32 %v23748_v53, %v23907_v13  ;;  %v24071_v62 = vsub.f32 %v23764_v42, %v23907_v13  ;;  %v24075_v8 = vsub.f32 %v23771_v10, %v23907_v13 }
 0x8c2   :  { %v24079_v52 = vsub.f32 %v23759_v25, %v23907_v13  ;;  %v24083_v41 = vsub.f32 %v23768_v43, %v23907_v13  ;;  %v24087_v53 = vsub.f32 %v23784_v39, %v23907_v13  ;;  %v24091_v42 = vsub.f32 %v23791_v38, %v23907_v13 }
 0x8c3   :  { %v24095_v10 = vsub.f32 %v23779_v48, %v23907_v13  ;;  %v24099_v25 = vsub.f32 %v23788_v19, %v23907_v13  ;;  %v24103_v43 = vsub.f32 %v23804_v58, %v23907_v13  ;;  %v24107_v39 = vsub.f32 %v23811_v22, %v23907_v13 }
 0x8c4   :  { %25549 = vst [vmem:[#allocation11_spill] sm:$0xff] %v24079_v52  ;;  %25550 = vst [vmem:[#allocation21_spill] sm:$0xff] %v24083_v41  ;;  %v24111_v38 = vsub.f32 %v23799_v12, %v23907_v13  ;;  %v24115_v48 = vsub.f32 %v23808_v3, %v23907_v13  ;;  %v24119_v19 = vsub.f32 %v23824_v23, %v23907_v13 }
 0x8c5   :  { %25551 = vst [vmem:[#allocation9_spill] sm:$0xff] %v24087_v53  ;;  %25552 = vst [vmem:[#allocation25_spill] sm:$0xff] %v24091_v42  ;;  %v24139_v23 = vsub.f32 %v23851_v4, %v23907_v13  ;;  %v24159_v4 = vsub.f32 %v23859_v24, %v23907_v13  ;;  %v14904_v24 = vmul.f32 %v23927_v11, %v23927_v11 }
 0x8c6   :  { %25553 = vst [vmem:[#allocation6_spill] sm:$0xff] %v24099_v25  ;;  %25554 = vst [vmem:[#allocation24_spill] sm:$0xff] %v24103_v43  ;;  %v25557_v25 = vld [vmem:[#allocation27_spill] sm:$0xff]  ;;  %v25559_v43 = vld [vmem:[#allocation14_spill] sm:$0xff] }
 0x8c7   :  { %25555 = vst [vmem:[#allocation20_spill] sm:$0xff] %v24107_v39  ;;  %25556 = vst [vmem:[#allocation22_spill] sm:$0xff] %v24111_v38  ;;  %v24123_v58 = vsub.f32 %v25557_v25, %v23907_v13  ;;  %v24127_v22 = vsub.f32 %v25559_v43, %v23907_v13  ;;  %v25561_v39 = vld [vmem:[#allocation15_spill] sm:$0xff]  ;;  %v24143_v25 = vsub.f32 %v23839_v54, %v23907_v13 }
 0x8c8   :  { %v24131_v12 = vsub.f32 %v25561_v39, %v23907_v13  ;;  %v25563_v38 = vld [vmem:[#allocation7_spill] sm:$0xff]  ;;  %25565 = vst [vmem:[#allocation27_spill] sm:$0xff] %v24139_v23  ;;  %v24147_v43 = vsub.f32 %v23848_v56, %v23907_v13  ;;  %v24151_v39 = vsub.f32 %v23864_v33, %v23907_v13  ;;  %25570 = vst [vmem:[#allocation29_spill] sm:$0xff] %v24159_v4 }
 0x8c9   :  { %25558 = vst [vmem:[#allocation19_spill] sm:$0xff] %v24123_v58  ;;  %25560 = vst [vmem:[#allocation5_spill] sm:$0xff] %v24127_v22  ;;  %v24135_v3 = vsub.f32 %v25563_v38, %v23907_v13  ;;  %v24155_v38 = vsub.f32 %v23871_v20, %v23907_v13  ;;  %v24163_v54 = vsub.f32 %v23868_v9, %v23907_v13 }
 0x8ca   :  { %25562 = vst [vmem:[#allocation23_spill] sm:$0xff] %v24131_v12  ;;  %25566 = vst [vmem:[#allocation14_spill] sm:$0xff] %v24143_v25  ;;  %v14900_v56 = vmul.f32 %v23911_v18, %v23911_v18  ;;  %v14902_v33 = vmul.f32 %v23919_v27, %v23919_v27  ;;  %v14903_v20 = vmul.f32 %v23923_v5, %v23923_v5 }
 0x8cb   :  { %25564 = vst [vmem:[#allocation10_spill] sm:$0xff] %v24135_v3  ;;  %25567 = vst [vmem:[#allocation15_spill] sm:$0xff] %v24147_v43  ;;  %v14901_v43 = vmul.f32 %v23915_v36, %v23915_v36  ;;  %v14905_v13 = vmul.f32 %v23931_v57, %v23931_v57  ;;  %v14906_v18 = vmul.f32 %v23935_v51, %v23935_v51 }
 0x8cc   :  { %25568 = vst [vmem:[#allocation7_spill] sm:$0xff] %v24151_v39  ;;  %25569 = vst [vmem:[#allocation28_spill] sm:$0xff] %v24155_v38  ;;  %v14907_v27 = vmul.f32 %v23939_v31, %v23939_v31 }
 0x8cd   :  { %25571 = vst [vmem:[#allocation30_spill] sm:$0xff] %v24163_v54  ;;  %v14964_v39 = vadd.f32 %v14901_v43, %v14900_v56  ;;  %v14908_v56 = vmul.f32 %v23943_v30, %v23943_v30 }
 0x8cf   :  { %v14965_v38 = vadd.f32 %v14964_v39, %v14902_v33  ;;  %v14909_v33 = vmul.f32 %v23947_v16, %v23947_v16 }
 0x8d1   :  { %v14966_v4 = vadd.f32 %v14965_v38, %v14903_v20  ;;  %v14910_v20 = vmul.f32 %v23951_v29, %v23951_v29 }
 0x8d3   :  { %v14967_v9 = vadd.f32 %v14966_v4, %v14904_v24  ;;  %v14911_v24 = vmul.f32 %v23955_v0, %v23955_v0 }
 0x8d5   :  { %v14968_v36 = vadd.f32 %v14967_v9, %v14905_v13  ;;  %v14912_v9 = vmul.f32 %v23959_v7, %v23959_v7 }
 0x8d7   :  { %v14969_v43 = vadd.f32 %v14968_v36, %v14906_v18  ;;  %v14913_v36 = vmul.f32 %v23963_v63, %v23963_v63 }
 0x8d9   :  { %v14970_v39 = vadd.f32 %v14969_v43, %v14907_v27  ;;  %v14914_v43 = vmul.f32 %v23967_v45, %v23967_v45 }
 0x8db   :  { %v14971_v38 = vadd.f32 %v14970_v39, %v14908_v56  ;;  %v14915_v39 = vmul.f32 %v23971_v15, %v23971_v15 }
 0x8dd   :  { %v14972_v4 = vadd.f32 %v14971_v38, %v14909_v33  ;;  %v14916_v38 = vmul.f32 %v23975_v40, %v23975_v40 }
 0x8df   :  { %v14973_v13 = vadd.f32 %v14972_v4, %v14910_v20  ;;  %v14917_v4 = vmul.f32 %v23979_v37, %v23979_v37 }
 0x8e1   :  { %v14974_v18 = vadd.f32 %v14973_v13, %v14911_v24  ;;  %v14918_v13 = vmul.f32 %v23983_v26, %v23983_v26 }
 0x8e3   :  { %v14975_v27 = vadd.f32 %v14974_v18, %v14912_v9  ;;  %v14919_v18 = vmul.f32 %v23987_v34, %v23987_v34 }
 0x8e5   :  { %v14976_v56 = vadd.f32 %v14975_v27, %v14913_v36  ;;  %v14920_v27 = vmul.f32 %v23991_v49, %v23991_v49 }
 0x8e7   :  { %v14977_v33 = vadd.f32 %v14976_v56, %v14914_v43  ;;  %v14921_v56 = vmul.f32 %v23995_v46, %v23995_v46 }
 0x8e9   :  { %v14978_v20 = vadd.f32 %v14977_v33, %v14915_v39  ;;  %v25572_v33 = vld [vmem:[#allocation26_spill] sm:$0xff] }
 0x8ea   :  { %v14922_v37 = vmul.f32 %v25572_v33, %v25572_v33 }
 0x8eb   :  { %v14979_v24 = vadd.f32 %v14978_v20, %v14916_v38  ;;  %v25573_v20 = vld [vmem:[#allocation18_spill] sm:$0xff] }
 0x8ec   :  { %v14923_v26 = vmul.f32 %v25573_v20, %v25573_v20 }
 0x8ed   :  { %v14980_v9 = vadd.f32 %v14979_v24, %v14917_v4  ;;  %v14924_v24 = vmul.f32 %v24007_v6, %v24007_v6 }
 0x8ef   :  { %v14981_v36 = vadd.f32 %v14980_v9, %v14918_v13  ;;  %v14925_v9 = vmul.f32 %v24011_v59, %v24011_v59 }
 0x8f1   :  { %v14982_v43 = vadd.f32 %v14981_v36, %v14919_v18  ;;  %v14926_v36 = vmul.f32 %v24015_v47, %v24015_v47 }
 0x8f3   :  { %v14983_v39 = vadd.f32 %v14982_v43, %v14920_v27  ;;  %v14927_v43 = vmul.f32 %v24019_v55, %v24019_v55 }
 0x8f5   :  { %v14984_v38 = vadd.f32 %v14983_v39, %v14921_v56  ;;  %v14928_v39 = vmul.f32 %v24023_v1, %v24023_v1 }
 0x8f7   :  { %v14985_v4 = vadd.f32 %v14984_v38, %v14922_v37  ;;  %v14929_v38 = vmul.f32 %v24027_v28, %v24027_v28 }
 0x8f9   :  { %v14986_v13 = vadd.f32 %v14985_v4, %v14923_v26  ;;  %v14930_v4 = vmul.f32 %v24031_v2, %v24031_v2 }
 0x8fb   :  { %v14987_v18 = vadd.f32 %v14986_v13, %v14924_v24  ;;  %v14931_v13 = vmul.f32 %v24035_v60, %v24035_v60 }
 0x8fd   :  { %v14988_v27 = vadd.f32 %v14987_v18, %v14925_v9  ;;  %v14932_v18 = vmul.f32 %v24039_v44, %v24039_v44 }
 0x8ff   :  { %v14989_v56 = vadd.f32 %v14988_v27, %v14926_v36  ;;  %v14933_v27 = vmul.f32 %v24043_v14, %v24043_v14 }
 0x901   :  { %v14990_v37 = vadd.f32 %v14989_v56, %v14927_v43  ;;  %v14934_v56 = vmul.f32 %v24047_v61, %v24047_v61 }
 0x903   :  { %v14991_v26 = vadd.f32 %v14990_v37, %v14928_v39  ;;  %v14935_v37 = vmul.f32 %v24051_v32, %v24051_v32 }
 0x905   :  { %v14992_v24 = vadd.f32 %v14991_v26, %v14929_v38  ;;  %v14936_v26 = vmul.f32 %v24055_v17, %v24055_v17 }
 0x907   :  { %v14993_v9 = vadd.f32 %v14992_v24, %v14930_v4  ;;  %v14937_v24 = vmul.f32 %v24059_v35, %v24059_v35 }
 0x909   :  { %v14994_v36 = vadd.f32 %v14993_v9, %v14931_v13  ;;  %v14938_v9 = vmul.f32 %v24063_v50, %v24063_v50 }
 0x90b   :  { %v14995_v43 = vadd.f32 %v14994_v36, %v14932_v18  ;;  %v14939_v36 = vmul.f32 %v24067_v21, %v24067_v21 }
 0x90d   :  { %v14996_v39 = vadd.f32 %v14995_v43, %v14933_v27  ;;  %v14940_v43 = vmul.f32 %v24071_v62, %v24071_v62 }
 0x90f   :  { %v14997_v38 = vadd.f32 %v14996_v39, %v14934_v56  ;;  %v14941_v39 = vmul.f32 %v24075_v8, %v24075_v8 }
 0x911   :  { %v14998_v4 = vadd.f32 %v14997_v38, %v14935_v37  ;;  %v14942_v38 = vmul.f32 %v24079_v52, %v24079_v52 }
 0x913   :  { %v14999_v13 = vadd.f32 %v14998_v4, %v14936_v26  ;;  %v14943_v4 = vmul.f32 %v24083_v41, %v24083_v41 }
 0x915   :  { %v15000_v18 = vadd.f32 %v14999_v13, %v14937_v24  ;;  %v14944_v13 = vmul.f32 %v24087_v53, %v24087_v53 }
 0x917   :  { %v15001_v27 = vadd.f32 %v15000_v18, %v14938_v9  ;;  %v14945_v18 = vmul.f32 %v24091_v42, %v24091_v42 }
 0x919   :  { %v15002_v56 = vadd.f32 %v15001_v27, %v14939_v36  ;;  %v14946_v27 = vmul.f32 %v24095_v10, %v24095_v10 }
 0x91b   :  { %v15003_v37 = vadd.f32 %v15002_v56, %v14940_v43  ;;  %v25574_v56 = vld [vmem:[#allocation6_spill] sm:$0xff] }
 0x91c   :  { %v14947_v52 = vmul.f32 %v25574_v56, %v25574_v56 }
 0x91d   :  { %v15004_v26 = vadd.f32 %v15003_v37, %v14941_v39  ;;  %v25575_v37 = vld [vmem:[#allocation24_spill] sm:$0xff] }
 0x91e   :  { %v14948_v41 = vmul.f32 %v25575_v37, %v25575_v37 }
 0x91f   :  { %v15005_v24 = vadd.f32 %v15004_v26, %v14942_v38  ;;  %v25576_v26 = vld [vmem:[#allocation20_spill] sm:$0xff] }
 0x920   :  { %v14949_v53 = vmul.f32 %v25576_v26, %v25576_v26 }
 0x921   :  { %v15006_v9 = vadd.f32 %v15005_v24, %v14943_v4  ;;  %v25577_v24 = vld [vmem:[#allocation22_spill] sm:$0xff] }
 0x922   :  { %v14950_v42 = vmul.f32 %v25577_v24, %v25577_v24 }
 0x923   :  { %v15007_v36 = vadd.f32 %v15006_v9, %v14944_v13  ;;  %v14951_v9 = vmul.f32 %v24115_v48, %v24115_v48 }
 0x925   :  { %v15008_v43 = vadd.f32 %v15007_v36, %v14945_v18  ;;  %v14952_v36 = vmul.f32 %v24119_v19, %v24119_v19 }
 0x927   :  { %v15009_v39 = vadd.f32 %v15008_v43, %v14946_v27  ;;  %v14953_v43 = vmul.f32 %v24123_v58, %v24123_v58 }
 0x929   :  { %v15010_v38 = vadd.f32 %v15009_v39, %v14947_v52  ;;  %v14954_v39 = vmul.f32 %v24127_v22, %v24127_v22 }
 0x92b   :  { %v15011_v4 = vadd.f32 %v15010_v38, %v14948_v41  ;;  %v14955_v38 = vmul.f32 %v24131_v12, %v24131_v12 }
 0x92d   :  { %v15012_v13 = vadd.f32 %v15011_v4, %v14949_v53  ;;  %v14956_v4 = vmul.f32 %v24135_v3, %v24135_v3 }
 0x92f   :  { %v15013_v18 = vadd.f32 %v15012_v13, %v14950_v42  ;;  %v14957_v13 = vmul.f32 %v24139_v23, %v24139_v23 }
 0x931   :  { %v15014_v27 = vadd.f32 %v15013_v18, %v14951_v9  ;;  %v14958_v18 = vmul.f32 %v24143_v25, %v24143_v25 }
 0x933   :  { %v15015_v52 = vadd.f32 %v15014_v27, %v14952_v36  ;;  %v25578_v27 = vld [vmem:[#allocation15_spill] sm:$0xff] }
 0x934   :  { %v14959_v22 = vmul.f32 %v25578_v27, %v25578_v27 }
 0x935   :  { %v15016_v41 = vadd.f32 %v15015_v52, %v14953_v43  ;;  %v25579_v52 = vld [vmem:[#allocation7_spill] sm:$0xff] }
 0x936   :  { %v14960_v12 = vmul.f32 %v25579_v52, %v25579_v52 }
 0x937   :  { %v15017_v53 = vadd.f32 %v15016_v41, %v14954_v39  ;;  %v25580_v41 = vld [vmem:[#allocation28_spill] sm:$0xff] }
 0x938   :  { %v14961_v3 = vmul.f32 %v25580_v41, %v25580_v41 }
 0x939   :  { %v15018_v42 = vadd.f32 %v15017_v53, %v14955_v38  ;;  %v25581_v53 = vld [vmem:[#allocation29_spill] sm:$0xff] }
 0x93a   :  { %v14962_v23 = vmul.f32 %v25581_v53, %v25581_v53 }
 0x93b   :  { %v15019_v9 = vadd.f32 %v15018_v42, %v14956_v4  ;;  %v14963_v42 = vmul.f32 %v24163_v54, %v24163_v54 }
 0x93d   :  { %v15020_v36 = vadd.f32 %v15019_v9, %v14957_v13 }
 0x93f   :  { %v15021_v43 = vadd.f32 %v15020_v36, %v14958_v18 }
 0x941   :  { %v15022_v39 = vadd.f32 %v15021_v43, %v14959_v22 }
 0x943   :  { %v15023_v38 = vadd.f32 %v15022_v39, %v14960_v12  ;;  %v14700_v12 = vld [vmem:[%s25078_s5 + $0x2] sm:$0x1] }
 0x945   :  { %v15024_v4 = vadd.f32 %v15023_v38, %v14961_v3  ;;  %v25582_v38 = vld [vmem:[#allocation13_spill] sm:$0xff] }
 0x946   :  { %v25583_v53 = vsub.s32 0, %v25582_v38  ;;  %v25591_v38 = vld [vmem:[#allocation9_spill] sm:$0xff] }
 0x947   :  { %v15025_v13 = vadd.f32 %v15024_v4, %v14962_v23  ;;  %v25584_v23 = vld [vmem:[#allocation4_spill] sm:$0xff] }
 0x949   :  { %v15026_v9 = vadd.f32 %v15025_v13, %v14963_v42 }
 0x94b   :  { %v15027_v25 = vrot.slane %v15026_v9, 4 }
 0x94d   :  { %v15028_v27 = vadd.f32 %v15027_v25, %v15026_v9 }
 0x94f   :  { %v15029_v18 = vrot.slane %v15028_v27, 2 }
 0x951   :  { %v15030_v36 = vadd.f32 %v15029_v18, %v15028_v27  ;;  %v25585_v27 = vld [vmem:[#allocation8_spill] sm:$0xff] }
 0x953   :  { %v15031_v58 = vrot.slane %v15030_v36, 1 }
 0x955   :  { %v15032_v52 = vadd.f32 %v15031_v58, %v15030_v36  ;;  %v25587_v36 = vld [vmem:[#allocation16_spill] sm:$0xff] }
 0x957   :  { %v15033_v22 = vmul.f32 0.001953125, %v15032_v52  ;;  %v25586_v52 = vld [vmem:[#allocation12_spill] sm:$0xff] }
 0x959   :  { %v15034_v43 = vadd.f32 1e-05, %v15033_v22  ;;  %v25588_v22 = vld [vmem:[#allocation17_spill] sm:$0xff] }
 0x95b   :  { %20358 = vrsqrt.f32 %v15034_v43 }
 0x965   :  { %v20359_v39 = vpop.eup %20358 }
 0x966   :  { %v15036_v3 = vmul.f32 %v20359_v39, %v14700_v12  ;;  %v25589_v39 = vld [vmem:[#allocation11_spill] sm:$0xff] }
 0x968   :  { %v24298_v54 = vrot.slane %v15036_v3, %v25583_v53  ;;  %v25590_v3 = vld [vmem:[#allocation21_spill] sm:$0xff] }
 0x96a   :  { %v24302_v25 = vmul.f32 %v24298_v54, %v25584_v23  ;;  %v24306_v58 = vmul.f32 %v24298_v54, %v25585_v27  ;;  %v24310_v4 = vmul.f32 %v24298_v54, %v25586_v52  ;;  %v24314_v42 = vmul.f32 %v24298_v54, %v23923_v5  ;;  %v25592_v23 = vld [vmem:[#allocation25_spill] sm:$0xff] }
 0x96b   :  { %v24318_v53 = vmul.f32 %v24298_v54, %v23927_v11  ;;  %v24322_v13 = vmul.f32 %v24298_v54, %v23931_v57  ;;  %v24326_v9 = vmul.f32 %v24298_v54, %v23935_v51  ;;  %v24330_v18 = vmul.f32 %v24298_v54, %v23939_v31 }
 0x96c   :  { %v24334_v5 = vmul.f32 %v24298_v54, %v23943_v30  ;;  %v24338_v11 = vmul.f32 %v24298_v54, %v23947_v16  ;;  %v24342_v57 = vmul.f32 %v24298_v54, %v23951_v29  ;;  %v24346_v51 = vmul.f32 %v24298_v54, %v23955_v0 }
 0x96d   :  { %v24350_v31 = vmul.f32 %v24298_v54, %v23959_v7  ;;  %v24354_v30 = vmul.f32 %v24298_v54, %v23963_v63  ;;  %v24358_v16 = vmul.f32 %v24298_v54, %v23967_v45  ;;  %v24362_v29 = vmul.f32 %v24298_v54, %v23971_v15 }
 0x96e   :  { %v24366_v0 = vmul.f32 %v24298_v54, %v23975_v40  ;;  %v24370_v7 = vmul.f32 %v24298_v54, %v25587_v36  ;;  %v24374_v63 = vmul.f32 %v24298_v54, %v25588_v22  ;;  %v24378_v45 = vmul.f32 %v24298_v54, %v23987_v34 }
 0x96f   :  { %v24382_v15 = vmul.f32 %v24298_v54, %v23991_v49  ;;  %v24386_v40 = vmul.f32 %v24298_v54, %v23995_v46  ;;  %v24390_v43 = vmul.f32 %v24298_v54, %v25572_v33  ;;  %v24394_v12 = vmul.f32 %v24298_v54, %v25573_v20 }
 0x970   :  { %v24398_v34 = vmul.f32 %v24298_v54, %v24007_v6  ;;  %v24402_v49 = vmul.f32 %v24298_v54, %v24011_v59  ;;  %v24406_v46 = vmul.f32 %v24298_v54, %v24015_v47  ;;  %v24410_v33 = vmul.f32 %v24298_v54, %v24019_v55 }
 0x971   :  { %v24414_v20 = vmul.f32 %v24298_v54, %v24023_v1  ;;  %v24418_v6 = vmul.f32 %v24298_v54, %v24027_v28  ;;  %v24422_v59 = vmul.f32 %v24298_v54, %v24031_v2  ;;  %v24426_v47 = vmul.f32 %v24298_v54, %v24035_v60 }
 0x972   :  { %v24430_v55 = vmul.f32 %v24298_v54, %v24039_v44  ;;  %v24434_v1 = vmul.f32 %v24298_v54, %v24043_v14  ;;  %v24438_v28 = vmul.f32 %v24298_v54, %v24047_v61  ;;  %v24442_v2 = vmul.f32 %v24298_v54, %v24051_v32 }
 0x973   :  { %v24446_v60 = vmul.f32 %v24298_v54, %v24055_v17  ;;  %v24450_v44 = vmul.f32 %v24298_v54, %v24059_v35  ;;  %v24454_v14 = vmul.f32 %v24298_v54, %v24063_v50  ;;  %v24458_v61 = vmul.f32 %v24298_v54, %v24067_v21 }
 0x974   :  { %v24462_v32 = vmul.f32 %v24298_v54, %v24071_v62  ;;  %v24466_v17 = vmul.f32 %v24298_v54, %v24075_v8  ;;  %v24470_v35 = vmul.f32 %v24298_v54, %v25589_v39  ;;  %v24474_v50 = vmul.f32 %v24298_v54, %v25590_v3  ;;  %v25596_v39 = vld [vmem:[#allocation19_spill] sm:$0xff]  ;;  %v25598_v3 = vld [vmem:[#allocation5_spill] sm:$0xff] }
 0x975   :  { %v24478_v21 = vmul.f32 %v24298_v54, %v25591_v38  ;;  %v24482_v62 = vmul.f32 %v24298_v54, %v25592_v23  ;;  %v24486_v8 = vmul.f32 %v24298_v54, %v24095_v10  ;;  %v24490_v27 = vmul.f32 %v24298_v54, %v25574_v56  ;;  %v24511_v56 = vld [vmem:[%s25078_s5 + $0x3] ss:$0 sm:$0xff]  ;;  %v25600_v38 = vld [vmem:[#allocation23_spill] sm:$0xff]  ;;  %v25601_v23 = vld [vmem:[#allocation10_spill] sm:$0xff] }
 0x976   :  { %v24494_v52 = vmul.f32 %v24298_v54, %v25575_v37  ;;  %v24498_v36 = vmul.f32 %v24298_v54, %v25576_v26  ;;  %v24502_v22 = vmul.f32 %v24298_v54, %v25577_v24  ;;  %v24506_v10 = vmul.f32 %v24298_v54, %v24115_v48 }
 0x977   :  { %v24515_v37 = vmul.f32 %v24298_v54, %v24119_v19  ;;  %v24519_v26 = vmul.f32 %v24298_v54, %v25596_v39  ;;  %v24523_v24 = vmul.f32 %v24298_v54, %v25598_v3  ;;  %v24527_v48 = vmul.f32 %v24298_v54, %v25600_v38 }
 0x978   :  { %25593 = vst [vmem:[#allocation26_spill] sm:$0xff] %v24502_v22  ;;  %25594 = vst [vmem:[#allocation18_spill] sm:$0xff] %v24506_v10  ;;  %v24531_v10 = vmul.f32 %v24298_v54, %v25601_v23  ;;  %v25603_v22 = vld [vmem:[#allocation27_spill] sm:$0xff]  ;;  %v24551_v23 = vmul.f32 %v24298_v54, %v25580_v41  ;;  %v24571_v41 = vadd.f32 %v24511_v56, %v24310_v4 }
 0x979   :  { %25595 = vst [vmem:[#allocation6_spill] sm:$0xff] %v24515_v37  ;;  %25597 = vst [vmem:[#allocation24_spill] sm:$0xff] %v24519_v26  ;;  %v24535_v19 = vmul.f32 %v24298_v54, %v25603_v22  ;;  %v25605_v37 = vld [vmem:[#allocation14_spill] sm:$0xff]  ;;  %v25606_v26 = vld [vmem:[#allocation15_spill] sm:$0xff]  ;;  %v24591_v4 = vadd.f32 %v24511_v56, %v24330_v18  ;;  %v24611_v18 = vadd.f32 %v24511_v56, %v24350_v31 }
 0x97a   :  { %25599 = vst [vmem:[#allocation20_spill] sm:$0xff] %v24523_v24  ;;  %25602 = vst [vmem:[#allocation22_spill] sm:$0xff] %v24531_v10  ;;  %v24539_v39 = vmul.f32 %v24298_v54, %v25605_v37  ;;  %v24543_v3 = vmul.f32 %v24298_v54, %v25606_v26  ;;  %v25607_v24 = vld [vmem:[#allocation7_spill] sm:$0xff]  ;;  %v25608_v10 = vld [vmem:[#allocation29_spill] sm:$0xff]  ;;  %v24563_v26 = vadd.f32 %v24511_v56, %v24302_v25 }
 0x97b   :  { %25604 = vst [vmem:[#allocation28_spill] sm:$0xff] %v24535_v19  ;;  %v24547_v38 = vmul.f32 %v24298_v54, %v25607_v24  ;;  %v24555_v22 = vmul.f32 %v24298_v54, %v25608_v10  ;;  %v25609_v19 = vld [vmem:[#allocation30_spill] sm:$0xff]  ;;  %v24567_v24 = vadd.f32 %v24511_v56, %v24306_v58  ;;  %v24575_v10 = vadd.f32 %v24511_v56, %v24314_v42 }
 0x97c   :  { %v24559_v37 = vmul.f32 %v24298_v54, %v25609_v19  ;;  %v24579_v54 = vadd.f32 %v24511_v56, %v24318_v53  ;;  %v24583_v25 = vadd.f32 %v24511_v56, %v24322_v13  ;;  %v24587_v58 = vadd.f32 %v24511_v56, %v24326_v9 }
 0x97d   :  { %v24595_v42 = vadd.f32 %v24511_v56, %v24334_v5  ;;  %v24599_v53 = vadd.f32 %v24511_v56, %v24338_v11  ;;  %v24603_v13 = vadd.f32 %v24511_v56, %v24342_v57  ;;  %v24607_v9 = vadd.f32 %v24511_v56, %v24346_v51 }
 0x97e   :  { %v24615_v5 = vadd.f32 %v24511_v56, %v24354_v30  ;;  %v24619_v11 = vadd.f32 %v24511_v56, %v24358_v16  ;;  %v24623_v57 = vadd.f32 %v24511_v56, %v24362_v29  ;;  %v24627_v51 = vadd.f32 %v24511_v56, %v24366_v0 }
 0x97f   :  { %v24631_v31 = vadd.f32 %v24511_v56, %v24370_v7  ;;  %v24635_v30 = vadd.f32 %v24511_v56, %v24374_v63  ;;  %v24639_v16 = vadd.f32 %v24511_v56, %v24378_v45  ;;  %v24643_v29 = vadd.f32 %v24511_v56, %v24382_v15  ;;  %v25614_v19 = vld [vmem:[#allocation26_spill] sm:$0xff] }
 0x980   :  { %v24647_v0 = vadd.f32 %v24511_v56, %v24386_v40  ;;  %v24651_v7 = vadd.f32 %v24511_v56, %v24390_v43  ;;  %v24655_v63 = vadd.f32 %v24511_v56, %v24394_v12  ;;  %v24659_v45 = vadd.f32 %v24511_v56, %v24398_v34 }
 0x981   :  { %v24663_v15 = vadd.f32 %v24511_v56, %v24402_v49  ;;  %v24667_v40 = vadd.f32 %v24511_v56, %v24406_v46  ;;  %v24671_v43 = vadd.f32 %v24511_v56, %v24410_v33  ;;  %v24675_v12 = vadd.f32 %v24511_v56, %v24414_v20 }
 0x982   :  { %v24679_v34 = vadd.f32 %v24511_v56, %v24418_v6  ;;  %v24683_v49 = vadd.f32 %v24511_v56, %v24422_v59  ;;  %v24687_v46 = vadd.f32 %v24511_v56, %v24426_v47  ;;  %v24691_v33 = vadd.f32 %v24511_v56, %v24430_v55 }
 0x983   :  { %v24695_v20 = vadd.f32 %v24511_v56, %v24434_v1  ;;  %v24699_v6 = vadd.f32 %v24511_v56, %v24438_v28  ;;  %v24703_v59 = vadd.f32 %v24511_v56, %v24442_v2  ;;  %v24707_v47 = vadd.f32 %v24511_v56, %v24446_v60 }
 0x984   :  { %v24711_v55 = vadd.f32 %v24511_v56, %v24450_v44  ;;  %v24715_v1 = vadd.f32 %v24511_v56, %v24454_v14  ;;  %v24719_v28 = vadd.f32 %v24511_v56, %v24458_v61  ;;  %v24723_v2 = vadd.f32 %v24511_v56, %v24462_v32 }
 0x985   :  { %v24727_v60 = vadd.f32 %v24511_v56, %v24466_v17  ;;  %v24731_v44 = vadd.f32 %v24511_v56, %v24470_v35  ;;  %v24735_v14 = vadd.f32 %v24511_v56, %v24474_v50  ;;  %v24739_v61 = vadd.f32 %v24511_v56, %v24478_v21 }
 0x986   :  { %v24743_v32 = vadd.f32 %v24511_v56, %v24482_v62  ;;  %v24747_v17 = vadd.f32 %v24511_v56, %v24486_v8  ;;  %v24751_v35 = vadd.f32 %v24511_v56, %v24490_v27  ;;  %v24755_v50 = vadd.f32 %v24511_v56, %v24494_v52 }
 0x987   :  { %v24759_v21 = vadd.f32 %v24511_v56, %v24498_v36  ;;  %v24763_v62 = vadd.f32 %v24511_v56, %v25614_v19  ;;  %v24783_v19 = vadd.f32 %v24511_v56, %v24527_v48  ;;  %v24803_v48 = vadd.f32 %v24511_v56, %v24547_v38 }
 0x988   :  { %25610 = vst [vmem:[#allocation13_spill] sm:$0xff] %v24743_v32  ;;  %25611 = vst [vmem:[#allocation4_spill] sm:$0xff] %v24747_v17  ;;  %v25616_v32 = vld [vmem:[#allocation18_spill] sm:$0xff]  ;;  %v15176_v38 = vmax.f32 %v24575_v10, 0.0  ;;  %v15187_v10 = vmax.f32 %v24619_v11, 0.0  ;;  %v15198_v11 = vmax.f32 %v24663_v15, 0.0 }
 0x989   :  { %25612 = vst [vmem:[#allocation8_spill] sm:$0xff] %v24751_v35  ;;  %25613 = vst [vmem:[#allocation12_spill] sm:$0xff] %v24755_v50  ;;  %v24767_v8 = vadd.f32 %v24511_v56, %v25616_v32  ;;  %v25618_v17 = vld [vmem:[#allocation6_spill] sm:$0xff]  ;;  %v25619_v35 = vld [vmem:[#allocation24_spill] sm:$0xff]  ;;  %v15209_v15 = vmax.f32 %v24707_v47, 0.0 }
 0x98a   :  { %25615 = vst [vmem:[#allocation16_spill] sm:$0xff] %v24763_v62  ;;  %v24771_v27 = vadd.f32 %v24511_v56, %v25618_v17  ;;  %v24775_v52 = vadd.f32 %v24511_v56, %v25619_v35  ;;  %v25620_v50 = vld [vmem:[#allocation20_spill] sm:$0xff]  ;;  %v25621_v62 = vld [vmem:[#allocation22_spill] sm:$0xff]  ;;  %v24795_v35 = vadd.f32 %v24511_v56, %v24539_v39  ;;  %25625 = vst [vmem:[#allocation9_spill] sm:$0xff] %v24803_v48  ;;  %v15177_v48 = vmax.f32 %v24579_v54, 0.0 }
 0x98b   :  { %25617 = vst [vmem:[#allocation17_spill] sm:$0xff] %v24767_v8  ;;  %v24779_v36 = vadd.f32 %v24511_v56, %v25620_v50  ;;  %v24787_v32 = vadd.f32 %v24511_v56, %v25621_v62  ;;  %v25622_v8 = vld [vmem:[#allocation28_spill] sm:$0xff]  ;;  %v24799_v50 = vadd.f32 %v24511_v56, %v24543_v3  ;;  %v24807_v62 = vadd.f32 %v24511_v56, %v24551_v23 }
 0x98c   :  { %v24791_v17 = vadd.f32 %v24511_v56, %v25622_v8  ;;  %25623 = vst [vmem:[#allocation11_spill] sm:$0xff] %v24795_v35  ;;  %v24811_v8 = vadd.f32 %v24511_v56, %v24555_v22  ;;  %v24815_v39 = vadd.f32 %v24511_v56, %v24559_v37  ;;  %v15173_v35 = vmax.f32 %v24563_v26, 0.0  ;;  %15240 = vst [vmem:[%s25079_s6 + $0x18] sm:$0xff] %v15176_v38 }
 0x98d   :  { %25624 = vst [vmem:[#allocation21_spill] sm:$0xff] %v24799_v50  ;;  %25626 = vst [vmem:[#allocation25_spill] sm:$0xff] %v24807_v62  ;;  %v15174_v3 = vmax.f32 %v24567_v24, 0.0  ;;  %v15175_v50 = vmax.f32 %v24571_v41, 0.0  ;;  %v15178_v23 = vmax.f32 %v24583_v25, 0.0  ;;  %v15179_v62 = vmax.f32 %v24587_v58, 0.0 }
 0x98e   :  { %25627 = vst [vmem:[#allocation19_spill] sm:$0xff] %v24811_v8  ;;  %v15180_v22 = vmax.f32 %v24591_v4, 0.0  ;;  %v15181_v8 = vmax.f32 %v24595_v42, 0.0  ;;  %v15182_v56 = vmax.f32 %v24599_v53, 0.0  ;;  %v15183_v37 = vmax.f32 %v24603_v13, 0.0  ;;  %15237 = vst [vmem:[%s25079_s6] sm:$0xff] %v15173_v35 }
 0x98f   :  { %v15184_v26 = vmax.f32 %v24607_v9, 0.0  ;;  %15238 = vst [vmem:[%s25079_s6 + $0x8] sm:$0xff] %v15174_v3  ;;  %15239 = vst [vmem:[%s25079_s6 + $0x10] sm:$0xff] %v15175_v50  ;;  %v15185_v24 = vmax.f32 %v24611_v18, 0.0  ;;  %v15186_v41 = vmax.f32 %v24615_v5, 0.0  ;;  %v15188_v54 = vmax.f32 %v24623_v57, 0.0 }
 0x990   :  { %15241 = vst [vmem:[%s25079_s6 + $0x20] sm:$0xff] %v15177_v48  ;;  %15242 = vst [vmem:[%s25079_s6 + $0x28] sm:$0xff] %v15178_v23  ;;  %v15189_v25 = vmax.f32 %v24627_v51, 0.0  ;;  %v15190_v58 = vmax.f32 %v24631_v31, 0.0  ;;  %v15191_v4 = vmax.f32 %v24635_v30, 0.0  ;;  %v15192_v42 = vmax.f32 %v24639_v16, 0.0 }
 0x991   :  { %15243 = vst [vmem:[%s25079_s6 + $0x30] sm:$0xff] %v15179_v62  ;;  %15244 = vst [vmem:[%s25079_s6 + $0x38] sm:$0xff] %v15180_v22  ;;  %v15193_v53 = vmax.f32 %v24643_v29, 0.0  ;;  %v15194_v13 = vmax.f32 %v24647_v0, 0.0  ;;  %v15195_v9 = vmax.f32 %v24651_v7, 0.0  ;;  %v15196_v18 = vmax.f32 %v24655_v63, 0.0 }
 0x992   :  { %15245 = vst [vmem:[%s25079_s6 + $0x40] sm:$0xff] %v15181_v8  ;;  %15246 = vst [vmem:[%s25079_s6 + $0x48] sm:$0xff] %v15182_v56  ;;  %v15197_v5 = vmax.f32 %v24659_v45, 0.0  ;;  %v15199_v57 = vmax.f32 %v24667_v40, 0.0  ;;  %v15200_v51 = vmax.f32 %v24671_v43, 0.0  ;;  %v15201_v31 = vmax.f32 %v24675_v12, 0.0 }
 0x993   :  { %15247 = vst [vmem:[%s25079_s6 + $0x50] sm:$0xff] %v15183_v37  ;;  %15248 = vst [vmem:[%s25079_s6 + $0x58] sm:$0xff] %v15184_v26  ;;  %v15202_v30 = vmax.f32 %v24679_v34, 0.0  ;;  %v15203_v16 = vmax.f32 %v24683_v49, 0.0  ;;  %v15204_v29 = vmax.f32 %v24687_v46, 0.0  ;;  %v15205_v0 = vmax.f32 %v24691_v33, 0.0 }
 0x994   :  { %15249 = vst [vmem:[%s25079_s6 + $0x60] sm:$0xff] %v15185_v24  ;;  %15250 = vst [vmem:[%s25079_s6 + $0x68] sm:$0xff] %v15186_v41  ;;  %v15206_v7 = vmax.f32 %v24695_v20, 0.0  ;;  %v15207_v63 = vmax.f32 %v24699_v6, 0.0  ;;  %v15208_v45 = vmax.f32 %v24703_v59, 0.0  ;;  %v15210_v40 = vmax.f32 %v24711_v55, 0.0 }
 0x995   :  { %15251 = vst [vmem:[%s25079_s6 + $0x70] sm:$0xff] %v15187_v10  ;;  %15252 = vst [vmem:[%s25079_s6 + $0x78] sm:$0xff] %v15188_v54  ;;  %v15211_v43 = vmax.f32 %v24715_v1, 0.0  ;;  %v15212_v12 = vmax.f32 %v24719_v28, 0.0  ;;  %v15213_v34 = vmax.f32 %v24723_v2, 0.0  ;;  %v15214_v49 = vmax.f32 %v24727_v60, 0.0 }
 0x996   :  { %15253 = vst [vmem:[%s25079_s6 + $0x80] sm:$0xff] %v15189_v25  ;;  %15254 = vst [vmem:[%s25079_s6 + $0x88] sm:$0xff] %v15190_v58  ;;  %v15215_v46 = vmax.f32 %v24731_v44, 0.0  ;;  %v15216_v33 = vmax.f32 %v24735_v14, 0.0  ;;  %v15217_v20 = vmax.f32 %v24739_v61, 0.0  ;;  %v25628_v6 = vld [vmem:[#allocation13_spill] sm:$0xff] }
 0x997   :  { %15255 = vst [vmem:[%s25079_s6 + $0x90] sm:$0xff] %v15191_v4  ;;  %15256 = vst [vmem:[%s25079_s6 + $0x98] sm:$0xff] %v15192_v42  ;;  %v15218_v59 = vmax.f32 %v25628_v6, 0.0  ;;  %v25629_v47 = vld [vmem:[#allocation4_spill] sm:$0xff]  ;;  %v15222_v44 = vmax.f32 %v24759_v21, 0.0  ;;  %v25633_v35 = vld [vmem:[#allocation17_spill] sm:$0xff] }
 0x998   :  { %15257 = vst [vmem:[%s25079_s6 + $0xa0] sm:$0xff] %v15193_v53  ;;  %15258 = vst [vmem:[%s25079_s6 + $0xa8] sm:$0xff] %v15194_v13  ;;  %v15219_v55 = vmax.f32 %v25629_v47, 0.0  ;;  %v25630_v1 = vld [vmem:[#allocation8_spill] sm:$0xff]  ;;  %v15224_v50 = vmax.f32 %v25633_v35, 0.0  ;;  %v15225_v21 = vmax.f32 %v24771_v27, 0.0 }
 0x999   :  { %15259 = vst [vmem:[%s25079_s6 + $0xb0] sm:$0xff] %v15195_v9  ;;  %15260 = vst [vmem:[%s25079_s6 + $0xb8] sm:$0xff] %v15196_v18  ;;  %v15220_v28 = vmax.f32 %v25630_v1, 0.0  ;;  %v25631_v2 = vld [vmem:[#allocation12_spill] sm:$0xff]  ;;  %v15226_v48 = vmax.f32 %v24775_v52, 0.0  ;;  %v15227_v62 = vmax.f32 %v24779_v36, 0.0 }
 0x99a   :  { %15261 = vst [vmem:[%s25079_s6 + $0xc0] sm:$0xff] %v15197_v5  ;;  %15262 = vst [vmem:[%s25079_s6 + $0xc8] sm:$0xff] %v15198_v11  ;;  %v15221_v60 = vmax.f32 %v25631_v2, 0.0  ;;  %v25632_v14 = vld [vmem:[#allocation16_spill] sm:$0xff]  ;;  %v15228_v8 = vmax.f32 %v24783_v19, 0.0  ;;  %v15229_v27 = vmax.f32 %v24787_v32, 0.0 }
 0x99b   :  { %15263 = vst [vmem:[%s25079_s6 + $0xd0] sm:$0xff] %v15199_v57  ;;  %15264 = vst [vmem:[%s25079_s6 + $0xd8] sm:$0xff] %v15200_v51  ;;  %v15223_v61 = vmax.f32 %v25632_v14, 0.0  ;;  %v15230_v52 = vmax.f32 %v24791_v17, 0.0  ;;  %v25634_v36 = vld [vmem:[#allocation11_spill] sm:$0xff]  ;;  %v25635_v3 = vld [vmem:[#allocation21_spill] sm:$0xff] }
 0x99c   :  { %15265 = vst [vmem:[%s25079_s6 + $0xe0] sm:$0xff] %v15201_v31  ;;  %15266 = vst [vmem:[%s25079_s6 + $0xe8] sm:$0xff] %v15202_v30  ;;  %v15231_v19 = vmax.f32 %v25634_v36, 0.0  ;;  %v15232_v38 = vmax.f32 %v25635_v3, 0.0  ;;  %v25636_v32 = vld [vmem:[#allocation9_spill] sm:$0xff]  ;;  %v25638_v56 = vld [vmem:[#allocation19_spill] sm:$0xff] }
 0x99d   :  { %15267 = vst [vmem:[%s25079_s6 + $0xf0] sm:$0xff] %v15203_v16  ;;  %15268 = vst [vmem:[%s25079_s6 + $0xf8] sm:$0xff] %v15204_v29  ;;  %v15233_v17 = vmax.f32 %v25636_v32, 0.0  ;;  %v25637_v23 = vld [vmem:[#allocation25_spill] sm:$0xff]  ;;  %v15235_v37 = vmax.f32 %v25638_v56, 0.0  ;;  %v15236_v26 = vmax.f32 %v24815_v39, 0.0 }
 0x99e   :  { %15269 = vst [vmem:[%s25079_s6 + $0x100] sm:$0xff] %v15205_v0  ;;  %15270 = vst [vmem:[%s25079_s6 + $0x108] sm:$0xff] %v15206_v7  ;;  %v15234_v22 = vmax.f32 %v25637_v23, 0.0 }
 0x99f   :  { %15271 = vst [vmem:[%s25079_s6 + $0x110] sm:$0xff] %v15207_v63  ;;  %15272 = vst [vmem:[%s25079_s6 + $0x118] sm:$0xff] %v15208_v45 }
 0x9a0   :  { %15273 = vst [vmem:[%s25079_s6 + $0x120] sm:$0xff] %v15209_v15  ;;  %15274 = vst [vmem:[%s25079_s6 + $0x128] sm:$0xff] %v15210_v40 }
 0x9a1   :  { %15275 = vst [vmem:[%s25079_s6 + $0x130] sm:$0xff] %v15211_v43  ;;  %15276 = vst [vmem:[%s25079_s6 + $0x138] sm:$0xff] %v15212_v12 }
 0x9a2   :  { %15277 = vst [vmem:[%s25079_s6 + $0x140] sm:$0xff] %v15213_v34  ;;  %15278 = vst [vmem:[%s25079_s6 + $0x148] sm:$0xff] %v15214_v49 }
 0x9a3   :  { %15279 = vst [vmem:[%s25079_s6 + $0x150] sm:$0xff] %v15215_v46  ;;  %15280 = vst [vmem:[%s25079_s6 + $0x158] sm:$0xff] %v15216_v33 }
 0x9a4   :  { %15281 = vst [vmem:[%s25079_s6 + $0x160] sm:$0xff] %v15217_v20  ;;  %15282 = vst [vmem:[%s25079_s6 + $0x168] sm:$0xff] %v15218_v59 }
 0x9a5   :  { %15283 = vst [vmem:[%s25079_s6 + $0x170] sm:$0xff] %v15219_v55  ;;  %15284 = vst [vmem:[%s25079_s6 + $0x178] sm:$0xff] %v15220_v28 }
 0x9a6   :  { %15285 = vst [vmem:[%s25079_s6 + $0x180] sm:$0xff] %v15221_v60  ;;  %15286 = vst [vmem:[%s25079_s6 + $0x188] sm:$0xff] %v15222_v44 }
 0x9a7   :  { %15287 = vst [vmem:[%s25079_s6 + $0x190] sm:$0xff] %v15223_v61  ;;  %15288 = vst [vmem:[%s25079_s6 + $0x198] sm:$0xff] %v15224_v50 }
 0x9a8   :  { %15289 = vst [vmem:[%s25079_s6 + $0x1a0] sm:$0xff] %v15225_v21  ;;  %15290 = vst [vmem:[%s25079_s6 + $0x1a8] sm:$0xff] %v15226_v48 }
 0x9a9   :  { %15291 = vst [vmem:[%s25079_s6 + $0x1b0] sm:$0xff] %v15227_v62  ;;  %15292 = vst [vmem:[%s25079_s6 + $0x1b8] sm:$0xff] %v15228_v8 }
 0x9aa   :  { %15293 = vst [vmem:[%s25079_s6 + $0x1c0] sm:$0xff] %v15229_v27  ;;  %15294 = vst [vmem:[%s25079_s6 + $0x1c8] sm:$0xff] %v15230_v52 }
 0x9ab   :  { %15295 = vst [vmem:[%s25079_s6 + $0x1d0] sm:$0xff] %v15231_v19  ;;  %15296 = vst [vmem:[%s25079_s6 + $0x1d8] sm:$0xff] %v15232_v38 }
 0x9ac   :  { %15297 = vst [vmem:[%s25079_s6 + $0x1e0] sm:$0xff] %v15233_v17  ;;  %15298 = vst [vmem:[%s25079_s6 + $0x1e8] sm:$0xff] %v15234_v22 }
 0x9ad   :  { %15299 = vst [vmem:[%s25079_s6 + $0x1f0] sm:$0xff] %v15235_v37  ;;  %15300 = vst [vmem:[%s25079_s6 + $0x1f8] sm:$0xff] %v15236_v26 }

</bundles_post_ra>
